<compile_context>
chip_gen: v7x
topology: tpu7x:2x2x1
jax: 0.10.0
libtpu: 0.0.40
codegen_flags: <defaults>
</compile_context>

<pallas_src>
import functools
import math

import jax
import jax.numpy as jnp
from jax.experimental import pallas as pl
from jax.experimental.pallas import tpu as pltpu

# ----------------- deterministic "network.yaml" parameters -----------------
THETA = 10.0        # neuron['theta']
TAU_SR = 1.0        # neuron['tauSr']
TAU_REF = 1.0       # neuron['tauRef']
SCALE_REF = 2.0     # neuron['scaleRef']
T_SAMPLE = 8        # simulation['tSample']
TS = 1              # simulation['Ts']
N_TIME_BINS = T_SAMPLE // TS  # nTimeBins = 8

F_IN = 3 * 32 * 32      # fc1 input features (32, 32, 3) flattened
H1, H1_PAD = 410, 512   # fc1 output, lane-padded to multiple of 128
H2, H2_PAD = 10, 128    # fc2 output, lane-padded to multiple of 128

# Batch tile: MXU M-dimension = B_TILE * T.  16 -> M=128 (saturates v5e's
# 128-wide MXU rows, good default on all generations); use 32 on v6e/v7x for
# M=256.  Total VMEM ~8 MiB at B_TILE=16, well under the 32 MiB scoped default.
B_TILE = 16


def _alpha_kernel(tau, mult, length, ts):
    """SLAYER alpha kernel mult*(t/tau)*exp(1-t/tau) as Python floats (t=i*Ts)."""
    return tuple(
        mult * ((i * ts) / tau) * math.exp(1.0 - (i * ts) / tau)
        for i in range(length))


# ------------------------------ Pallas kernel -------------------------------
def snn_fused_kernel(x_ref, w1_ref, w2_ref, o_ref, z1_scr, s1_scr, z2_scr,
                     *, theta, inv_ts, srm_k, ref_k):
    """Fused fc1 -> psp -> spike -> fc2 -> psp -> spike for one batch tile.

    x_ref:  (T, B, Fin)   bf16 input spikes (time-major)
    w1_ref: (Fin, H1p)    bf16 dense weights, lane-padded
    w2_ref: (H1p, H2p)    bf16 dense weights, lane-padded
    o_ref:  (T, B, H2p)   bf16 output spikes
    z1_scr: (T, B, H1p)   f32  fc1 dense output
    s1_scr: (T, B, H1p)   bf16 layer-1 spikes (fc2 matmul input)
    z2_scr: (T, B, H2p)   f32  fc2 dense output
    """
    T, B, Fin = x_ref.shape
    H1p = w1_ref.shape[1]
    H2p = w2_ref.shape[1]

    # ---- fc1 dense on the MXU with M = T*B ----
    z1 = jnp.dot(x_ref[...].reshape(T * B, Fin), w1_ref[...],
                 preferred_element_type=jnp.float32)
    z1_scr[...] = z1.reshape(T, B, H1p)

    # ---- layer 1: causal SRM psp + spike with refractory feedback (VPU) ----
    # u[t] = sum_{s<t} srm_k[t-s]*z1[s] + ref_k[t-s]*spk1[s]   (srm_k[0]=0,
    # ref_k[0]=0, so only strictly-past time bins contribute).
    for t in range(T):
        u_t = jnp.zeros((B, H1p), jnp.float32)
        for s in range(t):
            u_t = (u_t
                   + srm_k[t - s] * z1_scr[s]
                   + ref_k[t - s] * s1_scr[s].astype(jnp.float32))
        spk = jnp.where(u_t >= theta, inv_ts, 0.0)
        s1_scr[t] = spk.astype(s1_scr.dtype)            # full-tile (B,H1p) store

    # ---- fc2 dense on the MXU (W2 already resident; hidden spikes never
    # ---- leave VMEM) ----
    z2 = jnp.dot(s1_scr[...].reshape(T * B, H1p), w2_ref[...],
                 preferred_element_type=jnp.float32)
    z2_scr[...] = z2.reshape(T, B, H2p)

    # ---- layer 2: psp + spike ----
    for t in range(T):
        u_t = jnp.zeros((B, H2p), jnp.float32)
        for s in range(t):
            u_t = (u_t
                   + srm_k[t - s] * z2_scr[s]
                   + ref_k[t - s] * o_ref[s].astype(jnp.float32))
        spk = jnp.where(u_t >= theta, inv_ts, 0.0)
        o_ref[t] = spk.astype(o_ref.dtype)              # full-tile (B,H2p) store


def snn_forward_fused(x_tmajor, w1, w2, *, b_tile=B_TILE,
                      theta=THETA, ts=float(TS)):
    """x_tmajor: (T, Np, Fin) bf16 spikes, Np a multiple of b_tile.
    Returns (T, Np, H2_PAD) bf16 output spikes of layer 2."""
    T, Np, Fin = x_tmajor.shape
    H1p = w1.shape[1]
    H2p = w2.shape[1]
    srm_k = _alpha_kernel(TAU_SR, 1.0, T, ts)                   # psp kernel
    ref_k = _alpha_kernel(TAU_REF, -SCALE_REF * THETA, T, ts)   # refractory
    kernel = functools.partial(snn_fused_kernel, theta=theta, inv_ts=1.0 / ts,
                               srm_k=srm_k, ref_k=ref_k)
    return pl.pallas_call(
        kernel,
        out_shape=jax.ShapeDtypeStruct((T, Np, H2p), jnp.bfloat16),
        grid=(Np // b_tile,),
        in_specs=[
            pl.BlockSpec((T, b_tile, Fin), lambda b: (0, b, 0)),  # x slab
            pl.BlockSpec((Fin, H1p), lambda b: (0, 0)),           # W1 resident
            pl.BlockSpec((H1p, H2p), lambda b: (0, 0)),           # W2 resident
        ],
        out_specs=pl.BlockSpec((T, b_tile, H2p), lambda b: (0, b, 0)),
        scratch_shapes=[
            pltpu.VMEM((T, b_tile, H1p), jnp.float32),    # z1  (fc1 output)
            pltpu.VMEM((T, b_tile, H1p), jnp.bfloat16),   # s1  (layer-1 spikes)
            pltpu.VMEM((T, b_tile, H2p), jnp.float32),    # z2  (fc2 output)
        ],
        compiler_params=pltpu.CompilerParams(
            dimension_semantics=("parallel",)),
    )(x_tmajor, w1, w2)


# ------------------------------ Network glue --------------------------------
def init_params(key):
    k1, k2 = jax.random.split(key)
    # Conv3d-style dense weights, weightScale=1 (deterministic synthetic init).
    w1 = jax.random.normal(k1, (F_IN, H1), jnp.float32) * 0.05
    w2 = jax.random.normal(k2, (H1, H2), jnp.float32) * 0.05
    # lane-pad outputs to multiples of 128 (padded units never spike and the
    # padded W2 rows are zero, so they never contribute); cast to bf16 for the
    # native MXU path and halved HBM/VMEM traffic.
    w1p = jnp.zeros((F_IN, H1_PAD), jnp.float32).at[:, :H1].set(w1)
    w2p = jnp.zeros((H1_PAD, H2_PAD), jnp.float32).at[:H1, :H2].set(w2)
    return dict(w1=w1p.astype(jnp.bfloat16), w2=w2p.astype(jnp.bfloat16))


def network_forward(x_img, params, key, b_tile=B_TILE):
    """x_img: (N, 3, 32, 32) intensities in [0, 1].  Returns (N, 10, 1, 1, T)."""
    N, C, H, W = x_img.shape
    T = N_TIME_BINS
    # rateEncoding: Bernoulli rate coding of pixel intensities (plain-JAX glue).
    # TODO(synk): move rate encoding into the kernel with pltpu.prng_random_bits
    # to avoid this HBM round trip + transpose for large batches.
    u = jax.random.uniform(key, (N, C, H, W, T), dtype=jnp.float32)
    spikes = (u < x_img[..., None])                       # (N, C, H, W, T) bool
    # time-major (T, N, C*H*W) bf16 for the batch-blocked, lane-dense matmul
    x = jnp.transpose(spikes, (4, 0, 1, 2, 3)).reshape(T, N, C * H * W)
    x = x.astype(jnp.bfloat16)
    # pad batch to a multiple of b_tile (padded samples get zero input -> no
    # spikes -> dropped below)
    n_pad = pl.cdiv(N, b_tile) * b_tile
    if n_pad != N:
        x = jnp.pad(x, ((0, 0), (0, n_pad - N), (0, 0)))

    out = snn_forward_fused(x, params['w1'], params['w2'], b_tile=b_tile)

    out = out[:, :N, :H2].astype(jnp.float32)             # (T, N, 10)
    # match PyTorch slayer output layout (N, C_out, 1, 1, T)
    return jnp.transpose(out, (1, 2, 0)).reshape(N, H2, 1, 1, T)


if __name__ == "__main__":
    key = jax.random.PRNGKey(0)
    k_param, k_input, k_enc = jax.random.split(key, 3)
    params = init_params(k_param)
    # small deterministic input consistent with fc1's (32, 32, 3) feature spec
    x_img = jax.random.uniform(k_input, (2, 3, 32, 32), dtype=jnp.float32)
    out = network_forward(x_img, params, k_enc)
    jax.block_until_ready(out)
    assert out.shape == (2, 10, 1, 1, N_TIME_BINS)
    print("KERNEL_OK")
</pallas_src>

<mosaic_0001>
module attributes {stable_mosaic.version = 11 : i64} {
  func.func @snn_fused_kernel(%arg0: i32, %arg1: memref<8x16x3072xbf16, #tpu.memory_space<vmem>>, %arg2: memref<3072x512xbf16, #tpu.memory_space<vmem>>, %arg3: memref<512x128xbf16, #tpu.memory_space<vmem>>, %arg4: memref<8x16x128xbf16, #tpu.memory_space<vmem>>, %arg5: memref<8x16x512xf32, #tpu.memory_space<vmem>>, %arg6: memref<8x16x512xbf16, #tpu.memory_space<vmem>>, %arg7: memref<8x16x128xf32, #tpu.memory_space<vmem>>) attributes {dimension_semantics = [#tpu.dimension_semantics<parallel>], iteration_bounds = array<i64: 1>, scalar_prefetch = 0 : i64, scratch_operands = 3 : i64, tpu.core_type = #tpu.core_type<tc>, window_params = [{transform_indices = @transform_0, window_bounds = array<i64: 8, 16, 3072>}, {pipeline_mode = #tpu.pipeline_mode<synchronous>, transform_indices = @transform_1, window_bounds = array<i64: 3072, 512>}, {pipeline_mode = #tpu.pipeline_mode<synchronous>, transform_indices = @transform_2, window_bounds = array<i64: 512, 128>}, {transform_indices = @transform_3, window_bounds = array<i64: 8, 16, 128>}]} {
    %c0 = arith.constant 0 : index
    %c0_0 = arith.constant 0 : index
    %c0_1 = arith.constant 0 : index
    %0 = vector.load %arg1[%c0, %c0_0, %c0_1] : memref<8x16x3072xbf16, #tpu.memory_space<vmem>>, vector<8x16x3072xbf16>
    %1 = vector.shape_cast %0 : vector<8x16x3072xbf16> to vector<128x3072xbf16>
    %c0_2 = arith.constant 0 : index
    %c0_3 = arith.constant 0 : index
    %2 = vector.load %arg2[%c0_2, %c0_3] : memref<3072x512xbf16, #tpu.memory_space<vmem>>, vector<3072x512xbf16>
    %cst = arith.constant dense<0.000000e+00> : vector<128x512xf32>
    %3 = tpu.matmul %1, %2, %cst {dimension_numbers = #tpu.dot_dimension_numbers<[1], [0], [0], [1], [0, 0, 1, 1], [], []>} : vector<128x3072xbf16>, vector<3072x512xbf16>, vector<128x512xf32> -> vector<128x512xf32>
    %4 = vector.shape_cast %3 : vector<128x512xf32> to vector<8x16x512xf32>
    %c0_4 = arith.constant 0 : index
    %c0_5 = arith.constant 0 : index
    %c0_6 = arith.constant 0 : index
    %5 = vector.load %arg5[%c0_4, %c0_5, %c0_6] : memref<8x16x512xf32, #tpu.memory_space<vmem>>, vector<8x16x512xf32>
    tpu.vector_store %arg5[%c0_4, %c0_5, %c0_6], %4 {strides = array<i32>} : memref<8x16x512xf32, #tpu.memory_space<vmem>>, vector<8x16x512xf32>,
    %cst_7 = arith.constant 0.000000e+00 : f32
    %6 = vector.broadcast %cst_7 : f32 to vector<16x512xf32>
    %cst_8 = arith.constant 1.000000e+01 : f32
    %7 = vector.broadcast %cst_8 : f32 to vector<16x512xf32>
    %8 = arith.cmpf oge, %6, %7 : vector<16x512xf32>
    %cst_9 = arith.constant 1.000000e+00 : f32
    %cst_10 = arith.constant 0.000000e+00 : f32
    %9 = vector.broadcast %cst_9 : f32 to vector<16x512xf32>
    %10 = vector.broadcast %cst_10 : f32 to vector<16x512xf32>
    %11 = arith.select %8, %9, %10 : vector<16x512xi1>, vector<16x512xf32>
    %12 = arith.truncf %11 : vector<16x512xf32> to vector<16x512xbf16>
    %c0_11 = arith.constant 0 : index
    %c0_12 = arith.constant 0 : index
    %c0_13 = arith.constant 0 : index
    %13 = vector.load %arg6[%c0_11, %c0_12, %c0_13] : memref<8x16x512xbf16, #tpu.memory_space<vmem>>, vector<1x16x512xbf16>
    %14 = vector.shape_cast %13 : vector<1x16x512xbf16> to vector<16x512xbf16>
    %15 = vector.shape_cast %12 : vector<16x512xbf16> to vector<1x16x512xbf16>
    tpu.vector_store %arg6[%c0_11, %c0_12, %c0_13], %15 {strides = array<i32>} : memref<8x16x512xbf16, #tpu.memory_space<vmem>>, vector<1x16x512xbf16>,
    %cst_14 = arith.constant 0.000000e+00 : f32
    %16 = vector.broadcast %cst_14 : f32 to vector<16x512xf32>
    %c0_15 = arith.constant 0 : index
    %c0_16 = arith.constant 0 : index
    %c0_17 = arith.constant 0 : index
    %17 = vector.load %arg5[%c0_15, %c0_16, %c0_17] : memref<8x16x512xf32, #tpu.memory_space<vmem>>, vector<1x16x512xf32>
    %18 = vector.shape_cast %17 : vector<1x16x512xf32> to vector<16x512xf32>
    %cst_18 = arith.constant 1.000000e+00 : f32
    %19 = vector.broadcast %cst_18 : f32 to vector<16x512xf32>
    %20 = arith.mulf %19, %18 : vector<16x512xf32>
    %21 = arith.addf %16, %20 : vector<16x512xf32>
    %c0_19 = arith.constant 0 : index
    %c0_20 = arith.constant 0 : index
    %c0_21 = arith.constant 0 : index
    %22 = vector.load %arg6[%c0_19, %c0_20, %c0_21] : memref<8x16x512xbf16, #tpu.memory_space<vmem>>, vector<1x16x512xbf16>
    %23 = vector.shape_cast %22 : vector<1x16x512xbf16> to vector<16x512xbf16>
    %24 = arith.extf %23 : vector<16x512xbf16> to vector<16x512xf32>
    %cst_22 = arith.constant -2.000000e+01 : f32
    %25 = vector.broadcast %cst_22 : f32 to vector<16x512xf32>
    %26 = arith.mulf %25, %24 : vector<16x512xf32>
    %27 = arith.addf %21, %26 : vector<16x512xf32>
    %cst_23 = arith.constant 1.000000e+01 : f32
    %28 = vector.broadcast %cst_23 : f32 to vector<16x512xf32>
    %29 = arith.cmpf oge, %27, %28 : vector<16x512xf32>
    %cst_24 = arith.constant 1.000000e+00 : f32
    %cst_25 = arith.constant 0.000000e+00 : f32
    %30 = vector.broadcast %cst_24 : f32 to vector<16x512xf32>
    %31 = vector.broadcast %cst_25 : f32 to vector<16x512xf32>
    %32 = arith.select %29, %30, %31 : vector<16x512xi1>, vector<16x512xf32>
    %33 = arith.truncf %32 : vector<16x512xf32> to vector<16x512xbf16>
    %c1 = arith.constant 1 : index
    %c0_26 = arith.constant 0 : index
    %c0_27 = arith.constant 0 : index
    %34 = vector.load %arg6[%c1, %c0_26, %c0_27] : memref<8x16x512xbf16, #tpu.memory_space<vmem>>, vector<1x16x512xbf16>
    %35 = vector.shape_cast %34 : vector<1x16x512xbf16> to vector<16x512xbf16>
    %36 = vector.shape_cast %33 : vector<16x512xbf16> to vector<1x16x512xbf16>
    tpu.vector_store %arg6[%c1, %c0_26, %c0_27], %36 {strides = array<i32>} : memref<8x16x512xbf16, #tpu.memory_space<vmem>>, vector<1x16x512xbf16>,
    %cst_28 = arith.constant 0.000000e+00 : f32
    %37 = vector.broadcast %cst_28 : f32 to vector<16x512xf32>
    %c0_29 = arith.constant 0 : index
    %c0_30 = arith.constant 0 : index
    %c0_31 = arith.constant 0 : index
    %38 = vector.load %arg5[%c0_29, %c0_30, %c0_31] : memref<8x16x512xf32, #tpu.memory_space<vmem>>, vector<1x16x512xf32>
    %39 = vector.shape_cast %38 : vector<1x16x512xf32> to vector<16x512xf32>
    %cst_32 = arith.constant 0.735758901 : f32
    %40 = vector.broadcast %cst_32 : f32 to vector<16x512xf32>
    %41 = arith.mulf %40, %39 : vector<16x512xf32>
    %42 = arith.addf %37, %41 : vector<16x512xf32>
    %c0_33 = arith.constant 0 : index
    %c0_34 = arith.constant 0 : index
    %c0_35 = arith.constant 0 : index
    %43 = vector.load %arg6[%c0_33, %c0_34, %c0_35] : memref<8x16x512xbf16, #tpu.memory_space<vmem>>, vector<1x16x512xbf16>
    %44 = vector.shape_cast %43 : vector<1x16x512xbf16> to vector<16x512xbf16>
    %45 = arith.extf %44 : vector<16x512xbf16> to vector<16x512xf32>
    %cst_36 = arith.constant -14.7151775 : f32
    %46 = vector.broadcast %cst_36 : f32 to vector<16x512xf32>
    %47 = arith.mulf %46, %45 : vector<16x512xf32>
    %48 = arith.addf %42, %47 : vector<16x512xf32>
    %c1_37 = arith.constant 1 : index
    %c0_38 = arith.constant 0 : index
    %c0_39 = arith.constant 0 : index
    %49 = vector.load %arg5[%c1_37, %c0_38, %c0_39] : memref<8x16x512xf32, #tpu.memory_space<vmem>>, vector<1x16x512xf32>
    %50 = vector.shape_cast %49 : vector<1x16x512xf32> to vector<16x512xf32>
    %cst_40 = arith.constant 1.000000e+00 : f32
    %51 = vector.broadcast %cst_40 : f32 to vector<16x512xf32>
    %52 = arith.mulf %51, %50 : vector<16x512xf32>
    %53 = arith.addf %48, %52 : vector<16x512xf32>
    %c1_41 = arith.constant 1 : index
    %c0_42 = arith.constant 0 : index
    %c0_43 = arith.constant 0 : index
    %54 = vector.load %arg6[%c1_41, %c0_42, %c0_43] : memref<8x16x512xbf16, #tpu.memory_space<vmem>>, vector<1x16x512xbf16>
    %55 = vector.shape_cast %54 : vector<1x16x512xbf16> to vector<16x512xbf16>
    %56 = arith.extf %55 : vector<16x512xbf16> to vector<16x512xf32>
    %cst_44 = arith.constant -2.000000e+01 : f32
    %57 = vector.broadcast %cst_44 : f32 to vector<16x512xf32>
    %58 = arith.mulf %57, %56 : vector<16x512xf32>
    %59 = arith.addf %53, %58 : vector<16x512xf32>
    %cst_45 = arith.constant 1.000000e+01 : f32
    %60 = vector.broadcast %cst_45 : f32 to vector<16x512xf32>
    %61 = arith.cmpf oge, %59, %60 : vector<16x512xf32>
    %cst_46 = arith.constant 1.000000e+00 : f32
    %cst_47 = arith.constant 0.000000e+00 : f32
    %62 = vector.broadcast %cst_46 : f32 to vector<16x512xf32>
    %63 = vector.broadcast %cst_47 : f32 to vector<16x512xf32>
    %64 = arith.select %61, %62, %63 : vector<16x512xi1>, vector<16x512xf32>
    %65 = arith.truncf %64 : vector<16x512xf32> to vector<16x512xbf16>
    %c2 = arith.constant 2 : index
    %c0_48 = arith.constant 0 : index
    %c0_49 = arith.constant 0 : index
    %66 = vector.load %arg6[%c2, %c0_48, %c0_49] : memref<8x16x512xbf16, #tpu.memory_space<vmem>>, vector<1x16x512xbf16>
    %67 = vector.shape_cast %66 : vector<1x16x512xbf16> to vector<16x512xbf16>
    %68 = vector.shape_cast %65 : vector<16x512xbf16> to vector<1x16x512xbf16>
    tpu.vector_store %arg6[%c2, %c0_48, %c0_49], %68 {strides = array<i32>} : memref<8x16x512xbf16, #tpu.memory_space<vmem>>, vector<1x16x512xbf16>,
    %cst_50 = arith.constant 0.000000e+00 : f32
    %69 = vector.broadcast %cst_50 : f32 to vector<16x512xf32>
    %c0_51 = arith.constant 0 : index
    %c0_52 = arith.constant 0 : index
    %c0_53 = arith.constant 0 : index
    %70 = vector.load %arg5[%c0_51, %c0_52, %c0_53] : memref<8x16x512xf32, #tpu.memory_space<vmem>>, vector<1x16x512xf32>
    %71 = vector.shape_cast %70 : vector<1x16x512xf32> to vector<16x512xf32>
    %cst_54 = arith.constant 0.406005859 : f32
    %72 = vector.broadcast %cst_54 : f32 to vector<16x512xf32>
    %73 = arith.mulf %72, %71 : vector<16x512xf32>
    %74 = arith.addf %69, %73 : vector<16x512xf32>
    %c0_55 = arith.constant 0 : index
    %c0_56 = arith.constant 0 : index
    %c0_57 = arith.constant 0 : index
    %75 = vector.load %arg6[%c0_55, %c0_56, %c0_57] : memref<8x16x512xbf16, #tpu.memory_space<vmem>>, vector<1x16x512xbf16>
    %76 = vector.shape_cast %75 : vector<1x16x512xbf16> to vector<16x512xbf16>
    %77 = arith.extf %76 : vector<16x512xbf16> to vector<16x512xf32>
    %cst_58 = arith.constant -8.12011718 : f32
    %78 = vector.broadcast %cst_58 : f32 to vector<16x512xf32>
    %79 = arith.mulf %78, %77 : vector<16x512xf32>
    %80 = arith.addf %74, %79 : vector<16x512xf32>
    %c1_59 = arith.constant 1 : index
    %c0_60 = arith.constant 0 : index
    %c0_61 = arith.constant 0 : index
    %81 = vector.load %arg5[%c1_59, %c0_60, %c0_61] : memref<8x16x512xf32, #tpu.memory_space<vmem>>, vector<1x16x512xf32>
    %82 = vector.shape_cast %81 : vector<1x16x512xf32> to vector<16x512xf32>
    %cst_62 = arith.constant 0.735758901 : f32
    %83 = vector.broadcast %cst_62 : f32 to vector<16x512xf32>
    %84 = arith.mulf %83, %82 : vector<16x512xf32>
    %85 = arith.addf %80, %84 : vector<16x512xf32>
    %c1_63 = arith.constant 1 : index
    %c0_64 = arith.constant 0 : index
    %c0_65 = arith.constant 0 : index
    %86 = vector.load %arg6[%c1_63, %c0_64, %c0_65] : memref<8x16x512xbf16, #tpu.memory_space<vmem>>, vector<1x16x512xbf16>
    %87 = vector.shape_cast %86 : vector<1x16x512xbf16> to vector<16x512xbf16>
    %88 = arith.extf %87 : vector<16x512xbf16> to vector<16x512xf32>
    %cst_66 = arith.constant -14.7151775 : f32
    %89 = vector.broadcast %cst_66 : f32 to vector<16x512xf32>
    %90 = arith.mulf %89, %88 : vector<16x512xf32>
    %91 = arith.addf %85, %90 : vector<16x512xf32>
    %c2_67 = arith.constant 2 : index
    %c0_68 = arith.constant 0 : index
    %c0_69 = arith.constant 0 : index
    %92 = vector.load %arg5[%c2_67, %c0_68, %c0_69] : memref<8x16x512xf32, #tpu.memory_space<vmem>>, vector<1x16x512xf32>
    %93 = vector.shape_cast %92 : vector<1x16x512xf32> to vector<16x512xf32>
    %cst_70 = arith.constant 1.000000e+00 : f32
    %94 = vector.broadcast %cst_70 : f32 to vector<16x512xf32>
    %95 = arith.mulf %94, %93 : vector<16x512xf32>
    %96 = arith.addf %91, %95 : vector<16x512xf32>
    %c2_71 = arith.constant 2 : index
    %c0_72 = arith.constant 0 : index
    %c0_73 = arith.constant 0 : index
    %97 = vector.load %arg6[%c2_71, %c0_72, %c0_73] : memref<8x16x512xbf16, #tpu.memory_space<vmem>>, vector<1x16x512xbf16>
    %98 = vector.shape_cast %97 : vector<1x16x512xbf16> to vector<16x512xbf16>
    %99 = arith.extf %98 : vector<16x512xbf16> to vector<16x512xf32>
    %cst_74 = arith.constant -2.000000e+01 : f32
    %100 = vector.broadcast %cst_74 : f32 to vector<16x512xf32>
    %101 = arith.mulf %100, %99 : vector<16x512xf32>
    %102 = arith.addf %96, %101 : vector<16x512xf32>
    %cst_75 = arith.constant 1.000000e+01 : f32
    %103 = vector.broadcast %cst_75 : f32 to vector<16x512xf32>
    %104 = arith.cmpf oge, %102, %103 : vector<16x512xf32>
    %cst_76 = arith.constant 1.000000e+00 : f32
    %cst_77 = arith.constant 0.000000e+00 : f32
    %105 = vector.broadcast %cst_76 : f32 to vector<16x512xf32>
    %106 = vector.broadcast %cst_77 : f32 to vector<16x512xf32>
    %107 = arith.select %104, %105, %106 : vector<16x512xi1>, vector<16x512xf32>
    %108 = arith.truncf %107 : vector<16x512xf32> to vector<16x512xbf16>
    %c3 = arith.constant 3 : index
    %c0_78 = arith.constant 0 : index
    %c0_79 = arith.constant 0 : index
    %109 = vector.load %arg6[%c3, %c0_78, %c0_79] : memref<8x16x512xbf16, #tpu.memory_space<vmem>>, vector<1x16x512xbf16>
    %110 = vector.shape_cast %109 : vector<1x16x512xbf16> to vector<16x512xbf16>
    %111 = vector.shape_cast %108 : vector<16x512xbf16> to vector<1x16x512xbf16>
    tpu.vector_store %arg6[%c3, %c0_78, %c0_79], %111 {strides = array<i32>} : memref<8x16x512xbf16, #tpu.memory_space<vmem>>, vector<1x16x512xbf16>,
    %cst_80 = arith.constant 0.000000e+00 : f32
    %112 = vector.broadcast %cst_80 : f32 to vector<16x512xf32>
    %c0_81 = arith.constant 0 : index
    %c0_82 = arith.constant 0 : index
    %c0_83 = arith.constant 0 : index
    %113 = vector.load %arg5[%c0_81, %c0_82, %c0_83] : memref<8x16x512xf32, #tpu.memory_space<vmem>>, vector<1x16x512xf32>
    %114 = vector.shape_cast %113 : vector<1x16x512xf32> to vector<16x512xf32>
    %cst_84 = arith.constant 0.199148268 : f32
    %115 = vector.broadcast %cst_84 : f32 to vector<16x512xf32>
    %116 = arith.mulf %115, %114 : vector<16x512xf32>
    %117 = arith.addf %112, %116 : vector<16x512xf32>
    %c0_85 = arith.constant 0 : index
    %c0_86 = arith.constant 0 : index
    %c0_87 = arith.constant 0 : index
    %118 = vector.load %arg6[%c0_85, %c0_86, %c0_87] : memref<8x16x512xbf16, #tpu.memory_space<vmem>>, vector<1x16x512xbf16>
    %119 = vector.shape_cast %118 : vector<1x16x512xbf16> to vector<16x512xbf16>
    %120 = arith.extf %119 : vector<16x512xbf16> to vector<16x512xf32>
    %cst_88 = arith.constant -3.98296547 : f32
    %121 = vector.broadcast %cst_88 : f32 to vector<16x512xf32>
    %122 = arith.mulf %121, %120 : vector<16x512xf32>
    %123 = arith.addf %117, %122 : vector<16x512xf32>
    %c1_89 = arith.constant 1 : index
    %c0_90 = arith.constant 0 : index
    %c0_91 = arith.constant 0 : index
    %124 = vector.load %arg5[%c1_89, %c0_90, %c0_91] : memref<8x16x512xf32, #tpu.memory_space<vmem>>, vector<1x16x512xf32>
    %125 = vector.shape_cast %124 : vector<1x16x512xf32> to vector<16x512xf32>
    %cst_92 = arith.constant 0.406005859 : f32
    %126 = vector.broadcast %cst_92 : f32 to vector<16x512xf32>
    %127 = arith.mulf %126, %125 : vector<16x512xf32>
    %128 = arith.addf %123, %127 : vector<16x512xf32>
    %c1_93 = arith.constant 1 : index
    %c0_94 = arith.constant 0 : index
    %c0_95 = arith.constant 0 : index
    %129 = vector.load %arg6[%c1_93, %c0_94, %c0_95] : memref<8x16x512xbf16, #tpu.memory_space<vmem>>, vector<1x16x512xbf16>
    %130 = vector.shape_cast %129 : vector<1x16x512xbf16> to vector<16x512xbf16>
    %131 = arith.extf %130 : vector<16x512xbf16> to vector<16x512xf32>
    %cst_96 = arith.constant -8.12011718 : f32
    %132 = vector.broadcast %cst_96 : f32 to vector<16x512xf32>
    %133 = arith.mulf %132, %131 : vector<16x512xf32>
    %134 = arith.addf %128, %133 : vector<16x512xf32>
    %c2_97 = arith.constant 2 : index
    %c0_98 = arith.constant 0 : index
    %c0_99 = arith.constant 0 : index
    %135 = vector.load %arg5[%c2_97, %c0_98, %c0_99] : memref<8x16x512xf32, #tpu.memory_space<vmem>>, vector<1x16x512xf32>
    %136 = vector.shape_cast %135 : vector<1x16x512xf32> to vector<16x512xf32>
    %cst_100 = arith.constant 0.735758901 : f32
    %137 = vector.broadcast %cst_100 : f32 to vector<16x512xf32>
    %138 = arith.mulf %137, %136 : vector<16x512xf32>
    %139 = arith.addf %134, %138 : vector<16x512xf32>
    %c2_101 = arith.constant 2 : index
    %c0_102 = arith.constant 0 : index
    %c0_103 = arith.constant 0 : index
    %140 = vector.load %arg6[%c2_101, %c0_102, %c0_103] : memref<8x16x512xbf16, #tpu.memory_space<vmem>>, vector<1x16x512xbf16>
    %141 = vector.shape_cast %140 : vector<1x16x512xbf16> to vector<16x512xbf16>
    %142 = arith.extf %141 : vector<16x512xbf16> to vector<16x512xf32>
    %cst_104 = arith.constant -14.7151775 : f32
    %143 = vector.broadcast %cst_104 : f32 to vector<16x512xf32>
    %144 = arith.mulf %143, %142 : vector<16x512xf32>
    %145 = arith.addf %139, %144 : vector<16x512xf32>
    %c3_105 = arith.constant 3 : index
    %c0_106 = arith.constant 0 : index
    %c0_107 = arith.constant 0 : index
    %146 = vector.load %arg5[%c3_105, %c0_106, %c0_107] : memref<8x16x512xf32, #tpu.memory_space<vmem>>, vector<1x16x512xf32>
    %147 = vector.shape_cast %146 : vector<1x16x512xf32> to vector<16x512xf32>
    %cst_108 = arith.constant 1.000000e+00 : f32
    %148 = vector.broadcast %cst_108 : f32 to vector<16x512xf32>
    %149 = arith.mulf %148, %147 : vector<16x512xf32>
    %150 = arith.addf %145, %149 : vector<16x512xf32>
    %c3_109 = arith.constant 3 : index
    %c0_110 = arith.constant 0 : index
    %c0_111 = arith.constant 0 : index
    %151 = vector.load %arg6[%c3_109, %c0_110, %c0_111] : memref<8x16x512xbf16, #tpu.memory_space<vmem>>, vector<1x16x512xbf16>
    %152 = vector.shape_cast %151 : vector<1x16x512xbf16> to vector<16x512xbf16>
    %153 = arith.extf %152 : vector<16x512xbf16> to vector<16x512xf32>
    %cst_112 = arith.constant -2.000000e+01 : f32
    %154 = vector.broadcast %cst_112 : f32 to vector<16x512xf32>
    %155 = arith.mulf %154, %153 : vector<16x512xf32>
    %156 = arith.addf %150, %155 : vector<16x512xf32>
    %cst_113 = arith.constant 1.000000e+01 : f32
    %157 = vector.broadcast %cst_113 : f32 to vector<16x512xf32>
    %158 = arith.cmpf oge, %156, %157 : vector<16x512xf32>
    %cst_114 = arith.constant 1.000000e+00 : f32
    %cst_115 = arith.constant 0.000000e+00 : f32
    %159 = vector.broadcast %cst_114 : f32 to vector<16x512xf32>
    %160 = vector.broadcast %cst_115 : f32 to vector<16x512xf32>
    %161 = arith.select %158, %159, %160 : vector<16x512xi1>, vector<16x512xf32>
    %162 = arith.truncf %161 : vector<16x512xf32> to vector<16x512xbf16>
    %c4 = arith.constant 4 : index
    %c0_116 = arith.constant 0 : index
    %c0_117 = arith.constant 0 : index
    %163 = vector.load %arg6[%c4, %c0_116, %c0_117] : memref<8x16x512xbf16, #tpu.memory_space<vmem>>, vector<1x16x512xbf16>
    %164 = vector.shape_cast %163 : vector<1x16x512xbf16> to vector<16x512xbf16>
    %165 = vector.shape_cast %162 : vector<16x512xbf16> to vector<1x16x512xbf16>
    tpu.vector_store %arg6[%c4, %c0_116, %c0_117], %165 {strides = array<i32>} : memref<8x16x512xbf16, #tpu.memory_space<vmem>>, vector<1x16x512xbf16>,
    %cst_118 = arith.constant 0.000000e+00 : f32
    %166 = vector.broadcast %cst_118 : f32 to vector<16x512xf32>
    %c0_119 = arith.constant 0 : index
    %c0_120 = arith.constant 0 : index
    %c0_121 = arith.constant 0 : index
    %167 = vector.load %arg5[%c0_119, %c0_120, %c0_121] : memref<8x16x512xf32, #tpu.memory_space<vmem>>, vector<1x16x512xf32>
    %168 = vector.shape_cast %167 : vector<1x16x512xf32> to vector<16x512xf32>
    %cst_122 = arith.constant 0.091578193 : f32
    %169 = vector.broadcast %cst_122 : f32 to vector<16x512xf32>
    %170 = arith.mulf %169, %168 : vector<16x512xf32>
    %171 = arith.addf %166, %170 : vector<16x512xf32>
    %c0_123 = arith.constant 0 : index
    %c0_124 = arith.constant 0 : index
    %c0_125 = arith.constant 0 : index
    %172 = vector.load %arg6[%c0_123, %c0_124, %c0_125] : memref<8x16x512xbf16, #tpu.memory_space<vmem>>, vector<1x16x512xbf16>
    %173 = vector.shape_cast %172 : vector<1x16x512xbf16> to vector<16x512xbf16>
    %174 = arith.extf %173 : vector<16x512xbf16> to vector<16x512xf32>
    %cst_126 = arith.constant -1.83156383 : f32
    %175 = vector.broadcast %cst_126 : f32 to vector<16x512xf32>
    %176 = arith.mulf %175, %174 : vector<16x512xf32>
    %177 = arith.addf %171, %176 : vector<16x512xf32>
    %c1_127 = arith.constant 1 : index
    %c0_128 = arith.constant 0 : index
    %c0_129 = arith.constant 0 : index
    %178 = vector.load %arg5[%c1_127, %c0_128, %c0_129] : memref<8x16x512xf32, #tpu.memory_space<vmem>>, vector<1x16x512xf32>
    %179 = vector.shape_cast %178 : vector<1x16x512xf32> to vector<16x512xf32>
    %cst_130 = arith.constant 0.199148268 : f32
    %180 = vector.broadcast %cst_130 : f32 to vector<16x512xf32>
    %181 = arith.mulf %180, %179 : vector<16x512xf32>
    %182 = arith.addf %177, %181 : vector<16x512xf32>
    %c1_131 = arith.constant 1 : index
    %c0_132 = arith.constant 0 : index
    %c0_133 = arith.constant 0 : index
    %183 = vector.load %arg6[%c1_131, %c0_132, %c0_133] : memref<8x16x512xbf16, #tpu.memory_space<vmem>>, vector<1x16x512xbf16>
    %184 = vector.shape_cast %183 : vector<1x16x512xbf16> to vector<16x512xbf16>
    %185 = arith.extf %184 : vector<16x512xbf16> to vector<16x512xf32>
    %cst_134 = arith.constant -3.98296547 : f32
    %186 = vector.broadcast %cst_134 : f32 to vector<16x512xf32>
    %187 = arith.mulf %186, %185 : vector<16x512xf32>
    %188 = arith.addf %182, %187 : vector<16x512xf32>
    %c2_135 = arith.constant 2 : index
    %c0_136 = arith.constant 0 : index
    %c0_137 = arith.constant 0 : index
    %189 = vector.load %arg5[%c2_135, %c0_136, %c0_137] : memref<8x16x512xf32, #tpu.memory_space<vmem>>, vector<1x16x512xf32>
    %190 = vector.shape_cast %189 : vector<1x16x512xf32> to vector<16x512xf32>
    %cst_138 = arith.constant 0.406005859 : f32
    %191 = vector.broadcast %cst_138 : f32 to vector<16x512xf32>
    %192 = arith.mulf %191, %190 : vector<16x512xf32>
    %193 = arith.addf %188, %192 : vector<16x512xf32>
    %c2_139 = arith.constant 2 : index
    %c0_140 = arith.constant 0 : index
    %c0_141 = arith.constant 0 : index
    %194 = vector.load %arg6[%c2_139, %c0_140, %c0_141] : memref<8x16x512xbf16, #tpu.memory_space<vmem>>, vector<1x16x512xbf16>
    %195 = vector.shape_cast %194 : vector<1x16x512xbf16> to vector<16x512xbf16>
    %196 = arith.extf %195 : vector<16x512xbf16> to vector<16x512xf32>
    %cst_142 = arith.constant -8.12011718 : f32
    %197 = vector.broadcast %cst_142 : f32 to vector<16x512xf32>
    %198 = arith.mulf %197, %196 : vector<16x512xf32>
    %199 = arith.addf %193, %198 : vector<16x512xf32>
    %c3_143 = arith.constant 3 : index
    %c0_144 = arith.constant 0 : index
    %c0_145 = arith.constant 0 : index
    %200 = vector.load %arg5[%c3_143, %c0_144, %c0_145] : memref<8x16x512xf32, #tpu.memory_space<vmem>>, vector<1x16x512xf32>
    %201 = vector.shape_cast %200 : vector<1x16x512xf32> to vector<16x512xf32>
    %cst_146 = arith.constant 0.735758901 : f32
    %202 = vector.broadcast %cst_146 : f32 to vector<16x512xf32>
    %203 = arith.mulf %202, %201 : vector<16x512xf32>
    %204 = arith.addf %199, %203 : vector<16x512xf32>
    %c3_147 = arith.constant 3 : index
    %c0_148 = arith.constant 0 : index
    %c0_149 = arith.constant 0 : index
    %205 = vector.load %arg6[%c3_147, %c0_148, %c0_149] : memref<8x16x512xbf16, #tpu.memory_space<vmem>>, vector<1x16x512xbf16>
    %206 = vector.shape_cast %205 : vector<1x16x512xbf16> to vector<16x512xbf16>
    %207 = arith.extf %206 : vector<16x512xbf16> to vector<16x512xf32>
    %cst_150 = arith.constant -14.7151775 : f32
    %208 = vector.broadcast %cst_150 : f32 to vector<16x512xf32>
    %209 = arith.mulf %208, %207 : vector<16x512xf32>
    %210 = arith.addf %204, %209 : vector<16x512xf32>
    %c4_151 = arith.constant 4 : index
    %c0_152 = arith.constant 0 : index
    %c0_153 = arith.constant 0 : index
    %211 = vector.load %arg5[%c4_151, %c0_152, %c0_153] : memref<8x16x512xf32, #tpu.memory_space<vmem>>, vector<1x16x512xf32>
    %212 = vector.shape_cast %211 : vector<1x16x512xf32> to vector<16x512xf32>
    %cst_154 = arith.constant 1.000000e+00 : f32
    %213 = vector.broadcast %cst_154 : f32 to vector<16x512xf32>
    %214 = arith.mulf %213, %212 : vector<16x512xf32>
    %215 = arith.addf %210, %214 : vector<16x512xf32>
    %c4_155 = arith.constant 4 : index
    %c0_156 = arith.constant 0 : index
    %c0_157 = arith.constant 0 : index
    %216 = vector.load %arg6[%c4_155, %c0_156, %c0_157] : memref<8x16x512xbf16, #tpu.memory_space<vmem>>, vector<1x16x512xbf16>
    %217 = vector.shape_cast %216 : vector<1x16x512xbf16> to vector<16x512xbf16>
    %218 = arith.extf %217 : vector<16x512xbf16> to vector<16x512xf32>
    %cst_158 = arith.constant -2.000000e+01 : f32
    %219 = vector.broadcast %cst_158 : f32 to vector<16x512xf32>
    %220 = arith.mulf %219, %218 : vector<16x512xf32>
    %221 = arith.addf %215, %220 : vector<16x512xf32>
    %cst_159 = arith.constant 1.000000e+01 : f32
    %222 = vector.broadcast %cst_159 : f32 to vector<16x512xf32>
    %223 = arith.cmpf oge, %221, %222 : vector<16x512xf32>
    %cst_160 = arith.constant 1.000000e+00 : f32
    %cst_161 = arith.constant 0.000000e+00 : f32
    %224 = vector.broadcast %cst_160 : f32 to vector<16x512xf32>
    %225 = vector.broadcast %cst_161 : f32 to vector<16x512xf32>
    %226 = arith.select %223, %224, %225 : vector<16x512xi1>, vector<16x512xf32>
    %227 = arith.truncf %226 : vector<16x512xf32> to vector<16x512xbf16>
    %c5 = arith.constant 5 : index
    %c0_162 = arith.constant 0 : index
    %c0_163 = arith.constant 0 : index
    %228 = vector.load %arg6[%c5, %c0_162, %c0_163] : memref<8x16x512xbf16, #tpu.memory_space<vmem>>, vector<1x16x512xbf16>
    %229 = vector.shape_cast %228 : vector<1x16x512xbf16> to vector<16x512xbf16>
    %230 = vector.shape_cast %227 : vector<16x512xbf16> to vector<1x16x512xbf16>
    tpu.vector_store %arg6[%c5, %c0_162, %c0_163], %230 {strides = array<i32>} : memref<8x16x512xbf16, #tpu.memory_space<vmem>>, vector<1x16x512xbf16>,
    %cst_164 = arith.constant 0.000000e+00 : f32
    %231 = vector.broadcast %cst_164 : f32 to vector<16x512xf32>
    %c0_165 = arith.constant 0 : index
    %c0_166 = arith.constant 0 : index
    %c0_167 = arith.constant 0 : index
    %232 = vector.load %arg5[%c0_165, %c0_166, %c0_167] : memref<8x16x512xf32, #tpu.memory_space<vmem>>, vector<1x16x512xf32>
    %233 = vector.shape_cast %232 : vector<1x16x512xf32> to vector<16x512xf32>
    %cst_168 = arith.constant 0.0404276811 : f32
    %234 = vector.broadcast %cst_168 : f32 to vector<16x512xf32>
    %235 = arith.mulf %234, %233 : vector<16x512xf32>
    %236 = arith.addf %231, %235 : vector<16x512xf32>
    %c0_169 = arith.constant 0 : index
    %c0_170 = arith.constant 0 : index
    %c0_171 = arith.constant 0 : index
    %237 = vector.load %arg6[%c0_169, %c0_170, %c0_171] : memref<8x16x512xbf16, #tpu.memory_space<vmem>>, vector<1x16x512xbf16>
    %238 = vector.shape_cast %237 : vector<1x16x512xbf16> to vector<16x512xbf16>
    %239 = arith.extf %238 : vector<16x512xbf16> to vector<16x512xf32>
    %cst_172 = arith.constant -0.808553636 : f32
    %240 = vector.broadcast %cst_172 : f32 to vector<16x512xf32>
    %241 = arith.mulf %240, %239 : vector<16x512xf32>
    %242 = arith.addf %236, %241 : vector<16x512xf32>
    %c1_173 = arith.constant 1 : index
    %c0_174 = arith.constant 0 : index
    %c0_175 = arith.constant 0 : index
    %243 = vector.load %arg5[%c1_173, %c0_174, %c0_175] : memref<8x16x512xf32, #tpu.memory_space<vmem>>, vector<1x16x512xf32>
    %244 = vector.shape_cast %243 : vector<1x16x512xf32> to vector<16x512xf32>
    %cst_176 = arith.constant 0.091578193 : f32
    %245 = vector.broadcast %cst_176 : f32 to vector<16x512xf32>
    %246 = arith.mulf %245, %244 : vector<16x512xf32>
    %247 = arith.addf %242, %246 : vector<16x512xf32>
    %c1_177 = arith.constant 1 : index
    %c0_178 = arith.constant 0 : index
    %c0_179 = arith.constant 0 : index
    %248 = vector.load %arg6[%c1_177, %c0_178, %c0_179] : memref<8x16x512xbf16, #tpu.memory_space<vmem>>, vector<1x16x512xbf16>
    %249 = vector.shape_cast %248 : vector<1x16x512xbf16> to vector<16x512xbf16>
    %250 = arith.extf %249 : vector<16x512xbf16> to vector<16x512xf32>
    %cst_180 = arith.constant -1.83156383 : f32
    %251 = vector.broadcast %cst_180 : f32 to vector<16x512xf32>
    %252 = arith.mulf %251, %250 : vector<16x512xf32>
    %253 = arith.addf %247, %252 : vector<16x512xf32>
    %c2_181 = arith.constant 2 : index
    %c0_182 = arith.constant 0 : index
    %c0_183 = arith.constant 0 : index
    %254 = vector.load %arg5[%c2_181, %c0_182, %c0_183] : memref<8x16x512xf32, #tpu.memory_space<vmem>>, vector<1x16x512xf32>
    %255 = vector.shape_cast %254 : vector<1x16x512xf32> to vector<16x512xf32>
    %cst_184 = arith.constant 0.199148268 : f32
    %256 = vector.broadcast %cst_184 : f32 to vector<16x512xf32>
    %257 = arith.mulf %256, %255 : vector<16x512xf32>
    %258 = arith.addf %253, %257 : vector<16x512xf32>
    %c2_185 = arith.constant 2 : index
    %c0_186 = arith.constant 0 : index
    %c0_187 = arith.constant 0 : index
    %259 = vector.load %arg6[%c2_185, %c0_186, %c0_187] : memref<8x16x512xbf16, #tpu.memory_space<vmem>>, vector<1x16x512xbf16>
    %260 = vector.shape_cast %259 : vector<1x16x512xbf16> to vector<16x512xbf16>
    %261 = arith.extf %260 : vector<16x512xbf16> to vector<16x512xf32>
    %cst_188 = arith.constant -3.98296547 : f32
    %262 = vector.broadcast %cst_188 : f32 to vector<16x512xf32>
    %263 = arith.mulf %262, %261 : vector<16x512xf32>
    %264 = arith.addf %258, %263 : vector<16x512xf32>
    %c3_189 = arith.constant 3 : index
    %c0_190 = arith.constant 0 : index
    %c0_191 = arith.constant 0 : index
    %265 = vector.load %arg5[%c3_189, %c0_190, %c0_191] : memref<8x16x512xf32, #tpu.memory_space<vmem>>, vector<1x16x512xf32>
    %266 = vector.shape_cast %265 : vector<1x16x512xf32> to vector<16x512xf32>
    %cst_192 = arith.constant 0.406005859 : f32
    %267 = vector.broadcast %cst_192 : f32 to vector<16x512xf32>
    %268 = arith.mulf %267, %266 : vector<16x512xf32>
    %269 = arith.addf %264, %268 : vector<16x512xf32>
    %c3_193 = arith.constant 3 : index
    %c0_194 = arith.constant 0 : index
    %c0_195 = arith.constant 0 : index
    %270 = vector.load %arg6[%c3_193, %c0_194, %c0_195] : memref<8x16x512xbf16, #tpu.memory_space<vmem>>, vector<1x16x512xbf16>
    %271 = vector.shape_cast %270 : vector<1x16x512xbf16> to vector<16x512xbf16>
    %272 = arith.extf %271 : vector<16x512xbf16> to vector<16x512xf32>
    %cst_196 = arith.constant -8.12011718 : f32
    %273 = vector.broadcast %cst_196 : f32 to vector<16x512xf32>
    %274 = arith.mulf %273, %272 : vector<16x512xf32>
    %275 = arith.addf %269, %274 : vector<16x512xf32>
    %c4_197 = arith.constant 4 : index
    %c0_198 = arith.constant 0 : index
    %c0_199 = arith.constant 0 : index
    %276 = vector.load %arg5[%c4_197, %c0_198, %c0_199] : memref<8x16x512xf32, #tpu.memory_space<vmem>>, vector<1x16x512xf32>
    %277 = vector.shape_cast %276 : vector<1x16x512xf32> to vector<16x512xf32>
    %cst_200 = arith.constant 0.735758901 : f32
    %278 = vector.broadcast %cst_200 : f32 to vector<16x512xf32>
    %279 = arith.mulf %278, %277 : vector<16x512xf32>
    %280 = arith.addf %275, %279 : vector<16x512xf32>
    %c4_201 = arith.constant 4 : index
    %c0_202 = arith.constant 0 : index
    %c0_203 = arith.constant 0 : index
    %281 = vector.load %arg6[%c4_201, %c0_202, %c0_203] : memref<8x16x512xbf16, #tpu.memory_space<vmem>>, vector<1x16x512xbf16>
    %282 = vector.shape_cast %281 : vector<1x16x512xbf16> to vector<16x512xbf16>
    %283 = arith.extf %282 : vector<16x512xbf16> to vector<16x512xf32>
    %cst_204 = arith.constant -14.7151775 : f32
    %284 = vector.broadcast %cst_204 : f32 to vector<16x512xf32>
    %285 = arith.mulf %284, %283 : vector<16x512xf32>
    %286 = arith.addf %280, %285 : vector<16x512xf32>
    %c5_205 = arith.constant 5 : index
    %c0_206 = arith.constant 0 : index
    %c0_207 = arith.constant 0 : index
    %287 = vector.load %arg5[%c5_205, %c0_206, %c0_207] : memref<8x16x512xf32, #tpu.memory_space<vmem>>, vector<1x16x512xf32>
    %288 = vector.shape_cast %287 : vector<1x16x512xf32> to vector<16x512xf32>
    %cst_208 = arith.constant 1.000000e+00 : f32
    %289 = vector.broadcast %cst_208 : f32 to vector<16x512xf32>
    %290 = arith.mulf %289, %288 : vector<16x512xf32>
    %291 = arith.addf %286, %290 : vector<16x512xf32>
    %c5_209 = arith.constant 5 : index
    %c0_210 = arith.constant 0 : index
    %c0_211 = arith.constant 0 : index
    %292 = vector.load %arg6[%c5_209, %c0_210, %c0_211] : memref<8x16x512xbf16, #tpu.memory_space<vmem>>, vector<1x16x512xbf16>
    %293 = vector.shape_cast %292 : vector<1x16x512xbf16> to vector<16x512xbf16>
    %294 = arith.extf %293 : vector<16x512xbf16> to vector<16x512xf32>
    %cst_212 = arith.constant -2.000000e+01 : f32
    %295 = vector.broadcast %cst_212 : f32 to vector<16x512xf32>
    %296 = arith.mulf %295, %294 : vector<16x512xf32>
    %297 = arith.addf %291, %296 : vector<16x512xf32>
    %cst_213 = arith.constant 1.000000e+01 : f32
    %298 = vector.broadcast %cst_213 : f32 to vector<16x512xf32>
    %299 = arith.cmpf oge, %297, %298 : vector<16x512xf32>
    %cst_214 = arith.constant 1.000000e+00 : f32
    %cst_215 = arith.constant 0.000000e+00 : f32
    %300 = vector.broadcast %cst_214 : f32 to vector<16x512xf32>
    %301 = vector.broadcast %cst_215 : f32 to vector<16x512xf32>
    %302 = arith.select %299, %300, %301 : vector<16x512xi1>, vector<16x512xf32>
    %303 = arith.truncf %302 : vector<16x512xf32> to vector<16x512xbf16>
    %c6 = arith.constant 6 : index
    %c0_216 = arith.constant 0 : index
    %c0_217 = arith.constant 0 : index
    %304 = vector.load %arg6[%c6, %c0_216, %c0_217] : memref<8x16x512xbf16, #tpu.memory_space<vmem>>, vector<1x16x512xbf16>
    %305 = vector.shape_cast %304 : vector<1x16x512xbf16> to vector<16x512xbf16>
    %306 = vector.shape_cast %303 : vector<16x512xbf16> to vector<1x16x512xbf16>
    tpu.vector_store %arg6[%c6, %c0_216, %c0_217], %306 {strides = array<i32>} : memref<8x16x512xbf16, #tpu.memory_space<vmem>>, vector<1x16x512xbf16>,
    %cst_218 = arith.constant 0.000000e+00 : f32
    %307 = vector.broadcast %cst_218 : f32 to vector<16x512xf32>
    %c0_219 = arith.constant 0 : index
    %c0_220 = arith.constant 0 : index
    %c0_221 = arith.constant 0 : index
    %308 = vector.load %arg5[%c0_219, %c0_220, %c0_221] : memref<8x16x512xf32, #tpu.memory_space<vmem>>, vector<1x16x512xf32>
    %309 = vector.shape_cast %308 : vector<1x16x512xf32> to vector<16x512xf32>
    %cst_222 = arith.constant 0.017351266 : f32
    %310 = vector.broadcast %cst_222 : f32 to vector<16x512xf32>
    %311 = arith.mulf %310, %309 : vector<16x512xf32>
    %312 = arith.addf %307, %311 : vector<16x512xf32>
    %c0_223 = arith.constant 0 : index
    %c0_224 = arith.constant 0 : index
    %c0_225 = arith.constant 0 : index
    %313 = vector.load %arg6[%c0_223, %c0_224, %c0_225] : memref<8x16x512xbf16, #tpu.memory_space<vmem>>, vector<1x16x512xbf16>
    %314 = vector.shape_cast %313 : vector<1x16x512xbf16> to vector<16x512xbf16>
    %315 = arith.extf %314 : vector<16x512xbf16> to vector<16x512xf32>
    %cst_226 = arith.constant -0.347025305 : f32
    %316 = vector.broadcast %cst_226 : f32 to vector<16x512xf32>
    %317 = arith.mulf %316, %315 : vector<16x512xf32>
    %318 = arith.addf %312, %317 : vector<16x512xf32>
    %c1_227 = arith.constant 1 : index
    %c0_228 = arith.constant 0 : index
    %c0_229 = arith.constant 0 : index
    %319 = vector.load %arg5[%c1_227, %c0_228, %c0_229] : memref<8x16x512xf32, #tpu.memory_space<vmem>>, vector<1x16x512xf32>
    %320 = vector.shape_cast %319 : vector<1x16x512xf32> to vector<16x512xf32>
    %cst_230 = arith.constant 0.0404276811 : f32
    %321 = vector.broadcast %cst_230 : f32 to vector<16x512xf32>
    %322 = arith.mulf %321, %320 : vector<16x512xf32>
    %323 = arith.addf %318, %322 : vector<16x512xf32>
    %c1_231 = arith.constant 1 : index
    %c0_232 = arith.constant 0 : index
    %c0_233 = arith.constant 0 : index
    %324 = vector.load %arg6[%c1_231, %c0_232, %c0_233] : memref<8x16x512xbf16, #tpu.memory_space<vmem>>, vector<1x16x512xbf16>
    %325 = vector.shape_cast %324 : vector<1x16x512xbf16> to vector<16x512xbf16>
    %326 = arith.extf %325 : vector<16x512xbf16> to vector<16x512xf32>
    %cst_234 = arith.constant -0.808553636 : f32
    %327 = vector.broadcast %cst_234 : f32 to vector<16x512xf32>
    %328 = arith.mulf %327, %326 : vector<16x512xf32>
    %329 = arith.addf %323, %328 : vector<16x512xf32>
    %c2_235 = arith.constant 2 : index
    %c0_236 = arith.constant 0 : index
    %c0_237 = arith.constant 0 : index
    %330 = vector.load %arg5[%c2_235, %c0_236, %c0_237] : memref<8x16x512xf32, #tpu.memory_space<vmem>>, vector<1x16x512xf32>
    %331 = vector.shape_cast %330 : vector<1x16x512xf32> to vector<16x512xf32>
    %cst_238 = arith.constant 0.091578193 : f32
    %332 = vector.broadcast %cst_238 : f32 to vector<16x512xf32>
    %333 = arith.mulf %332, %331 : vector<16x512xf32>
    %334 = arith.addf %329, %333 : vector<16x512xf32>
    %c2_239 = arith.constant 2 : index
    %c0_240 = arith.constant 0 : index
    %c0_241 = arith.constant 0 : index
    %335 = vector.load %arg6[%c2_239, %c0_240, %c0_241] : memref<8x16x512xbf16, #tpu.memory_space<vmem>>, vector<1x16x512xbf16>
    %336 = vector.shape_cast %335 : vector<1x16x512xbf16> to vector<16x512xbf16>
    %337 = arith.extf %336 : vector<16x512xbf16> to vector<16x512xf32>
    %cst_242 = arith.constant -1.83156383 : f32
    %338 = vector.broadcast %cst_242 : f32 to vector<16x512xf32>
    %339 = arith.mulf %338, %337 : vector<16x512xf32>
    %340 = arith.addf %334, %339 : vector<16x512xf32>
    %c3_243 = arith.constant 3 : index
    %c0_244 = arith.constant 0 : index
    %c0_245 = arith.constant 0 : index
    %341 = vector.load %arg5[%c3_243, %c0_244, %c0_245] : memref<8x16x512xf32, #tpu.memory_space<vmem>>, vector<1x16x512xf32>
    %342 = vector.shape_cast %341 : vector<1x16x512xf32> to vector<16x512xf32>
    %cst_246 = arith.constant 0.199148268 : f32
    %343 = vector.broadcast %cst_246 : f32 to vector<16x512xf32>
    %344 = arith.mulf %343, %342 : vector<16x512xf32>
    %345 = arith.addf %340, %344 : vector<16x512xf32>
    %c3_247 = arith.constant 3 : index
    %c0_248 = arith.constant 0 : index
    %c0_249 = arith.constant 0 : index
    %346 = vector.load %arg6[%c3_247, %c0_248, %c0_249] : memref<8x16x512xbf16, #tpu.memory_space<vmem>>, vector<1x16x512xbf16>
    %347 = vector.shape_cast %346 : vector<1x16x512xbf16> to vector<16x512xbf16>
    %348 = arith.extf %347 : vector<16x512xbf16> to vector<16x512xf32>
    %cst_250 = arith.constant -3.98296547 : f32
    %349 = vector.broadcast %cst_250 : f32 to vector<16x512xf32>
    %350 = arith.mulf %349, %348 : vector<16x512xf32>
    %351 = arith.addf %345, %350 : vector<16x512xf32>
    %c4_251 = arith.constant 4 : index
    %c0_252 = arith.constant 0 : index
    %c0_253 = arith.constant 0 : index
    %352 = vector.load %arg5[%c4_251, %c0_252, %c0_253] : memref<8x16x512xf32, #tpu.memory_space<vmem>>, vector<1x16x512xf32>
    %353 = vector.shape_cast %352 : vector<1x16x512xf32> to vector<16x512xf32>
    %cst_254 = arith.constant 0.406005859 : f32
    %354 = vector.broadcast %cst_254 : f32 to vector<16x512xf32>
    %355 = arith.mulf %354, %353 : vector<16x512xf32>
    %356 = arith.addf %351, %355 : vector<16x512xf32>
    %c4_255 = arith.constant 4 : index
    %c0_256 = arith.constant 0 : index
    %c0_257 = arith.constant 0 : index
    %357 = vector.load %arg6[%c4_255, %c0_256, %c0_257] : memref<8x16x512xbf16, #tpu.memory_space<vmem>>, vector<1x16x512xbf16>
    %358 = vector.shape_cast %357 : vector<1x16x512xbf16> to vector<16x512xbf16>
    %359 = arith.extf %358 : vector<16x512xbf16> to vector<16x512xf32>
    %cst_258 = arith.constant -8.12011718 : f32
    %360 = vector.broadcast %cst_258 : f32 to vector<16x512xf32>
    %361 = arith.mulf %360, %359 : vector<16x512xf32>
    %362 = arith.addf %356, %361 : vector<16x512xf32>
    %c5_259 = arith.constant 5 : index
    %c0_260 = arith.constant 0 : index
    %c0_261 = arith.constant 0 : index
    %363 = vector.load %arg5[%c5_259, %c0_260, %c0_261] : memref<8x16x512xf32, #tpu.memory_space<vmem>>, vector<1x16x512xf32>
    %364 = vector.shape_cast %363 : vector<1x16x512xf32> to vector<16x512xf32>
    %cst_262 = arith.constant 0.735758901 : f32
    %365 = vector.broadcast %cst_262 : f32 to vector<16x512xf32>
    %366 = arith.mulf %365, %364 : vector<16x512xf32>
    %367 = arith.addf %362, %366 : vector<16x512xf32>
    %c5_263 = arith.constant 5 : index
    %c0_264 = arith.constant 0 : index
    %c0_265 = arith.constant 0 : index
    %368 = vector.load %arg6[%c5_263, %c0_264, %c0_265] : memref<8x16x512xbf16, #tpu.memory_space<vmem>>, vector<1x16x512xbf16>
    %369 = vector.shape_cast %368 : vector<1x16x512xbf16> to vector<16x512xbf16>
    %370 = arith.extf %369 : vector<16x512xbf16> to vector<16x512xf32>
    %cst_266 = arith.constant -14.7151775 : f32
    %371 = vector.broadcast %cst_266 : f32 to vector<16x512xf32>
    %372 = arith.mulf %371, %370 : vector<16x512xf32>
    %373 = arith.addf %367, %372 : vector<16x512xf32>
    %c6_267 = arith.constant 6 : index
    %c0_268 = arith.constant 0 : index
    %c0_269 = arith.constant 0 : index
    %374 = vector.load %arg5[%c6_267, %c0_268, %c0_269] : memref<8x16x512xf32, #tpu.memory_space<vmem>>, vector<1x16x512xf32>
    %375 = vector.shape_cast %374 : vector<1x16x512xf32> to vector<16x512xf32>
    %cst_270 = arith.constant 1.000000e+00 : f32
    %376 = vector.broadcast %cst_270 : f32 to vector<16x512xf32>
    %377 = arith.mulf %376, %375 : vector<16x512xf32>
    %378 = arith.addf %373, %377 : vector<16x512xf32>
    %c6_271 = arith.constant 6 : index
    %c0_272 = arith.constant 0 : index
    %c0_273 = arith.constant 0 : index
    %379 = vector.load %arg6[%c6_271, %c0_272, %c0_273] : memref<8x16x512xbf16, #tpu.memory_space<vmem>>, vector<1x16x512xbf16>
    %380 = vector.shape_cast %379 : vector<1x16x512xbf16> to vector<16x512xbf16>
    %381 = arith.extf %380 : vector<16x512xbf16> to vector<16x512xf32>
    %cst_274 = arith.constant -2.000000e+01 : f32
    %382 = vector.broadcast %cst_274 : f32 to vector<16x512xf32>
    %383 = arith.mulf %382, %381 : vector<16x512xf32>
    %384 = arith.addf %378, %383 : vector<16x512xf32>
    %cst_275 = arith.constant 1.000000e+01 : f32
    %385 = vector.broadcast %cst_275 : f32 to vector<16x512xf32>
    %386 = arith.cmpf oge, %384, %385 : vector<16x512xf32>
    %cst_276 = arith.constant 1.000000e+00 : f32
    %cst_277 = arith.constant 0.000000e+00 : f32
    %387 = vector.broadcast %cst_276 : f32 to vector<16x512xf32>
    %388 = vector.broadcast %cst_277 : f32 to vector<16x512xf32>
    %389 = arith.select %386, %387, %388 : vector<16x512xi1>, vector<16x512xf32>
    %390 = arith.truncf %389 : vector<16x512xf32> to vector<16x512xbf16>
    %c7 = arith.constant 7 : index
    %c0_278 = arith.constant 0 : index
    %c0_279 = arith.constant 0 : index
    %391 = vector.load %arg6[%c7, %c0_278, %c0_279] : memref<8x16x512xbf16, #tpu.memory_space<vmem>>, vector<1x16x512xbf16>
    %392 = vector.shape_cast %391 : vector<1x16x512xbf16> to vector<16x512xbf16>
    %393 = vector.shape_cast %390 : vector<16x512xbf16> to vector<1x16x512xbf16>
    tpu.vector_store %arg6[%c7, %c0_278, %c0_279], %393 {strides = array<i32>} : memref<8x16x512xbf16, #tpu.memory_space<vmem>>, vector<1x16x512xbf16>,
    %c0_280 = arith.constant 0 : index
    %c0_281 = arith.constant 0 : index
    %c0_282 = arith.constant 0 : index
    %394 = vector.load %arg6[%c0_280, %c0_281, %c0_282] : memref<8x16x512xbf16, #tpu.memory_space<vmem>>, vector<8x16x512xbf16>
    %395 = vector.shape_cast %394 : vector<8x16x512xbf16> to vector<128x512xbf16>
    %c0_283 = arith.constant 0 : index
    %c0_284 = arith.constant 0 : index
    %396 = vector.load %arg3[%c0_283, %c0_284] : memref<512x128xbf16, #tpu.memory_space<vmem>>, vector<512x128xbf16>
    %cst_285 = arith.constant dense<0.000000e+00> : vector<128x128xf32>
    %397 = tpu.matmul %395, %396, %cst_285 {dimension_numbers = #tpu.dot_dimension_numbers<[1], [0], [0], [1], [0, 0, 1, 1], [], []>} : vector<128x512xbf16>, vector<512x128xbf16>, vector<128x128xf32> -> vector<128x128xf32>
    %398 = vector.shape_cast %397 : vector<128x128xf32> to vector<8x16x128xf32>
    %c0_286 = arith.constant 0 : index
    %c0_287 = arith.constant 0 : index
    %c0_288 = arith.constant 0 : index
    %399 = vector.load %arg7[%c0_286, %c0_287, %c0_288] : memref<8x16x128xf32, #tpu.memory_space<vmem>>, vector<8x16x128xf32>
    tpu.vector_store %arg7[%c0_286, %c0_287, %c0_288], %398 {strides = array<i32>} : memref<8x16x128xf32, #tpu.memory_space<vmem>>, vector<8x16x128xf32>,
    %cst_289 = arith.constant 0.000000e+00 : f32
    %400 = vector.broadcast %cst_289 : f32 to vector<16x128xf32>
    %cst_290 = arith.constant 1.000000e+01 : f32
    %401 = vector.broadcast %cst_290 : f32 to vector<16x128xf32>
    %402 = arith.cmpf oge, %400, %401 : vector<16x128xf32>
    %cst_291 = arith.constant 1.000000e+00 : f32
    %cst_292 = arith.constant 0.000000e+00 : f32
    %403 = vector.broadcast %cst_291 : f32 to vector<16x128xf32>
    %404 = vector.broadcast %cst_292 : f32 to vector<16x128xf32>
    %405 = arith.select %402, %403, %404 : vector<16x128xi1>, vector<16x128xf32>
    %406 = arith.truncf %405 : vector<16x128xf32> to vector<16x128xbf16>
    %c0_293 = arith.constant 0 : index
    %c0_294 = arith.constant 0 : index
    %c0_295 = arith.constant 0 : index
    %407 = vector.load %arg4[%c0_293, %c0_294, %c0_295] : memref<8x16x128xbf16, #tpu.memory_space<vmem>>, vector<1x16x128xbf16>
    %408 = vector.shape_cast %407 : vector<1x16x128xbf16> to vector<16x128xbf16>
    %409 = vector.shape_cast %406 : vector<16x128xbf16> to vector<1x16x128xbf16>
    tpu.vector_store %arg4[%c0_293, %c0_294, %c0_295], %409 {strides = array<i32>} : memref<8x16x128xbf16, #tpu.memory_space<vmem>>, vector<1x16x128xbf16>,
    %cst_296 = arith.constant 0.000000e+00 : f32
    %410 = vector.broadcast %cst_296 : f32 to vector<16x128xf32>
    %c0_297 = arith.constant 0 : index
    %c0_298 = arith.constant 0 : index
    %c0_299 = arith.constant 0 : index
    %411 = vector.load %arg7[%c0_297, %c0_298, %c0_299] : memref<8x16x128xf32, #tpu.memory_space<vmem>>, vector<1x16x128xf32>
    %412 = vector.shape_cast %411 : vector<1x16x128xf32> to vector<16x128xf32>
    %cst_300 = arith.constant 1.000000e+00 : f32
    %413 = vector.broadcast %cst_300 : f32 to vector<16x128xf32>
    %414 = arith.mulf %413, %412 : vector<16x128xf32>
    %415 = arith.addf %410, %414 : vector<16x128xf32>
    %c0_301 = arith.constant 0 : index
    %c0_302 = arith.constant 0 : index
    %c0_303 = arith.constant 0 : index
    %416 = vector.load %arg4[%c0_301, %c0_302, %c0_303] : memref<8x16x128xbf16, #tpu.memory_space<vmem>>, vector<1x16x128xbf16>
    %417 = vector.shape_cast %416 : vector<1x16x128xbf16> to vector<16x128xbf16>
    %418 = arith.extf %417 : vector<16x128xbf16> to vector<16x128xf32>
    %cst_304 = arith.constant -2.000000e+01 : f32
    %419 = vector.broadcast %cst_304 : f32 to vector<16x128xf32>
    %420 = arith.mulf %419, %418 : vector<16x128xf32>
    %421 = arith.addf %415, %420 : vector<16x128xf32>
    %cst_305 = arith.constant 1.000000e+01 : f32
    %422 = vector.broadcast %cst_305 : f32 to vector<16x128xf32>
    %423 = arith.cmpf oge, %421, %422 : vector<16x128xf32>
    %cst_306 = arith.constant 1.000000e+00 : f32
    %cst_307 = arith.constant 0.000000e+00 : f32
    %424 = vector.broadcast %cst_306 : f32 to vector<16x128xf32>
    %425 = vector.broadcast %cst_307 : f32 to vector<16x128xf32>
    %426 = arith.select %423, %424, %425 : vector<16x128xi1>, vector<16x128xf32>
    %427 = arith.truncf %426 : vector<16x128xf32> to vector<16x128xbf16>
    %c1_308 = arith.constant 1 : index
    %c0_309 = arith.constant 0 : index
    %c0_310 = arith.constant 0 : index
    %428 = vector.load %arg4[%c1_308, %c0_309, %c0_310] : memref<8x16x128xbf16, #tpu.memory_space<vmem>>, vector<1x16x128xbf16>
    %429 = vector.shape_cast %428 : vector<1x16x128xbf16> to vector<16x128xbf16>
    %430 = vector.shape_cast %427 : vector<16x128xbf16> to vector<1x16x128xbf16>
    tpu.vector_store %arg4[%c1_308, %c0_309, %c0_310], %430 {strides = array<i32>} : memref<8x16x128xbf16, #tpu.memory_space<vmem>>, vector<1x16x128xbf16>,
    %cst_311 = arith.constant 0.000000e+00 : f32
    %431 = vector.broadcast %cst_311 : f32 to vector<16x128xf32>
    %c0_312 = arith.constant 0 : index
    %c0_313 = arith.constant 0 : index
    %c0_314 = arith.constant 0 : index
    %432 = vector.load %arg7[%c0_312, %c0_313, %c0_314] : memref<8x16x128xf32, #tpu.memory_space<vmem>>, vector<1x16x128xf32>
    %433 = vector.shape_cast %432 : vector<1x16x128xf32> to vector<16x128xf32>
    %cst_315 = arith.constant 0.735758901 : f32
    %434 = vector.broadcast %cst_315 : f32 to vector<16x128xf32>
    %435 = arith.mulf %434, %433 : vector<16x128xf32>
    %436 = arith.addf %431, %435 : vector<16x128xf32>
    %c0_316 = arith.constant 0 : index
    %c0_317 = arith.constant 0 : index
    %c0_318 = arith.constant 0 : index
    %437 = vector.load %arg4[%c0_316, %c0_317, %c0_318] : memref<8x16x128xbf16, #tpu.memory_space<vmem>>, vector<1x16x128xbf16>
    %438 = vector.shape_cast %437 : vector<1x16x128xbf16> to vector<16x128xbf16>
    %439 = arith.extf %438 : vector<16x128xbf16> to vector<16x128xf32>
    %cst_319 = arith.constant -14.7151775 : f32
    %440 = vector.broadcast %cst_319 : f32 to vector<16x128xf32>
    %441 = arith.mulf %440, %439 : vector<16x128xf32>
    %442 = arith.addf %436, %441 : vector<16x128xf32>
    %c1_320 = arith.constant 1 : index
    %c0_321 = arith.constant 0 : index
    %c0_322 = arith.constant 0 : index
    %443 = vector.load %arg7[%c1_320, %c0_321, %c0_322] : memref<8x16x128xf32, #tpu.memory_space<vmem>>, vector<1x16x128xf32>
    %444 = vector.shape_cast %443 : vector<1x16x128xf32> to vector<16x128xf32>
    %cst_323 = arith.constant 1.000000e+00 : f32
    %445 = vector.broadcast %cst_323 : f32 to vector<16x128xf32>
    %446 = arith.mulf %445, %444 : vector<16x128xf32>
    %447 = arith.addf %442, %446 : vector<16x128xf32>
    %c1_324 = arith.constant 1 : index
    %c0_325 = arith.constant 0 : index
    %c0_326 = arith.constant 0 : index
    %448 = vector.load %arg4[%c1_324, %c0_325, %c0_326] : memref<8x16x128xbf16, #tpu.memory_space<vmem>>, vector<1x16x128xbf16>
    %449 = vector.shape_cast %448 : vector<1x16x128xbf16> to vector<16x128xbf16>
    %450 = arith.extf %449 : vector<16x128xbf16> to vector<16x128xf32>
    %cst_327 = arith.constant -2.000000e+01 : f32
    %451 = vector.broadcast %cst_327 : f32 to vector<16x128xf32>
    %452 = arith.mulf %451, %450 : vector<16x128xf32>
    %453 = arith.addf %447, %452 : vector<16x128xf32>
    %cst_328 = arith.constant 1.000000e+01 : f32
    %454 = vector.broadcast %cst_328 : f32 to vector<16x128xf32>
    %455 = arith.cmpf oge, %453, %454 : vector<16x128xf32>
    %cst_329 = arith.constant 1.000000e+00 : f32
    %cst_330 = arith.constant 0.000000e+00 : f32
    %456 = vector.broadcast %cst_329 : f32 to vector<16x128xf32>
    %457 = vector.broadcast %cst_330 : f32 to vector<16x128xf32>
    %458 = arith.select %455, %456, %457 : vector<16x128xi1>, vector<16x128xf32>
    %459 = arith.truncf %458 : vector<16x128xf32> to vector<16x128xbf16>
    %c2_331 = arith.constant 2 : index
    %c0_332 = arith.constant 0 : index
    %c0_333 = arith.constant 0 : index
    %460 = vector.load %arg4[%c2_331, %c0_332, %c0_333] : memref<8x16x128xbf16, #tpu.memory_space<vmem>>, vector<1x16x128xbf16>
    %461 = vector.shape_cast %460 : vector<1x16x128xbf16> to vector<16x128xbf16>
    %462 = vector.shape_cast %459 : vector<16x128xbf16> to vector<1x16x128xbf16>
    tpu.vector_store %arg4[%c2_331, %c0_332, %c0_333], %462 {strides = array<i32>} : memref<8x16x128xbf16, #tpu.memory_space<vmem>>, vector<1x16x128xbf16>,
    %cst_334 = arith.constant 0.000000e+00 : f32
    %463 = vector.broadcast %cst_334 : f32 to vector<16x128xf32>
    %c0_335 = arith.constant 0 : index
    %c0_336 = arith.constant 0 : index
    %c0_337 = arith.constant 0 : index
    %464 = vector.load %arg7[%c0_335, %c0_336, %c0_337] : memref<8x16x128xf32, #tpu.memory_space<vmem>>, vector<1x16x128xf32>
    %465 = vector.shape_cast %464 : vector<1x16x128xf32> to vector<16x128xf32>
    %cst_338 = arith.constant 0.406005859 : f32
    %466 = vector.broadcast %cst_338 : f32 to vector<16x128xf32>
    %467 = arith.mulf %466, %465 : vector<16x128xf32>
    %468 = arith.addf %463, %467 : vector<16x128xf32>
    %c0_339 = arith.constant 0 : index
    %c0_340 = arith.constant 0 : index
    %c0_341 = arith.constant 0 : index
    %469 = vector.load %arg4[%c0_339, %c0_340, %c0_341] : memref<8x16x128xbf16, #tpu.memory_space<vmem>>, vector<1x16x128xbf16>
    %470 = vector.shape_cast %469 : vector<1x16x128xbf16> to vector<16x128xbf16>
    %471 = arith.extf %470 : vector<16x128xbf16> to vector<16x128xf32>
    %cst_342 = arith.constant -8.12011718 : f32
    %472 = vector.broadcast %cst_342 : f32 to vector<16x128xf32>
    %473 = arith.mulf %472, %471 : vector<16x128xf32>
    %474 = arith.addf %468, %473 : vector<16x128xf32>
    %c1_343 = arith.constant 1 : index
    %c0_344 = arith.constant 0 : index
    %c0_345 = arith.constant 0 : index
    %475 = vector.load %arg7[%c1_343, %c0_344, %c0_345] : memref<8x16x128xf32, #tpu.memory_space<vmem>>, vector<1x16x128xf32>
    %476 = vector.shape_cast %475 : vector<1x16x128xf32> to vector<16x128xf32>
    %cst_346 = arith.constant 0.735758901 : f32
    %477 = vector.broadcast %cst_346 : f32 to vector<16x128xf32>
    %478 = arith.mulf %477, %476 : vector<16x128xf32>
    %479 = arith.addf %474, %478 : vector<16x128xf32>
    %c1_347 = arith.constant 1 : index
    %c0_348 = arith.constant 0 : index
    %c0_349 = arith.constant 0 : index
    %480 = vector.load %arg4[%c1_347, %c0_348, %c0_349] : memref<8x16x128xbf16, #tpu.memory_space<vmem>>, vector<1x16x128xbf16>
    %481 = vector.shape_cast %480 : vector<1x16x128xbf16> to vector<16x128xbf16>
    %482 = arith.extf %481 : vector<16x128xbf16> to vector<16x128xf32>
    %cst_350 = arith.constant -14.7151775 : f32
    %483 = vector.broadcast %cst_350 : f32 to vector<16x128xf32>
    %484 = arith.mulf %483, %482 : vector<16x128xf32>
    %485 = arith.addf %479, %484 : vector<16x128xf32>
    %c2_351 = arith.constant 2 : index
    %c0_352 = arith.constant 0 : index
    %c0_353 = arith.constant 0 : index
    %486 = vector.load %arg7[%c2_351, %c0_352, %c0_353] : memref<8x16x128xf32, #tpu.memory_space<vmem>>, vector<1x16x128xf32>
    %487 = vector.shape_cast %486 : vector<1x16x128xf32> to vector<16x128xf32>
    %cst_354 = arith.constant 1.000000e+00 : f32
    %488 = vector.broadcast %cst_354 : f32 to vector<16x128xf32>
    %489 = arith.mulf %488, %487 : vector<16x128xf32>
    %490 = arith.addf %485, %489 : vector<16x128xf32>
    %c2_355 = arith.constant 2 : index
    %c0_356 = arith.constant 0 : index
    %c0_357 = arith.constant 0 : index
    %491 = vector.load %arg4[%c2_355, %c0_356, %c0_357] : memref<8x16x128xbf16, #tpu.memory_space<vmem>>, vector<1x16x128xbf16>
    %492 = vector.shape_cast %491 : vector<1x16x128xbf16> to vector<16x128xbf16>
    %493 = arith.extf %492 : vector<16x128xbf16> to vector<16x128xf32>
    %cst_358 = arith.constant -2.000000e+01 : f32
    %494 = vector.broadcast %cst_358 : f32 to vector<16x128xf32>
    %495 = arith.mulf %494, %493 : vector<16x128xf32>
    %496 = arith.addf %490, %495 : vector<16x128xf32>
    %cst_359 = arith.constant 1.000000e+01 : f32
    %497 = vector.broadcast %cst_359 : f32 to vector<16x128xf32>
    %498 = arith.cmpf oge, %496, %497 : vector<16x128xf32>
    %cst_360 = arith.constant 1.000000e+00 : f32
    %cst_361 = arith.constant 0.000000e+00 : f32
    %499 = vector.broadcast %cst_360 : f32 to vector<16x128xf32>
    %500 = vector.broadcast %cst_361 : f32 to vector<16x128xf32>
    %501 = arith.select %498, %499, %500 : vector<16x128xi1>, vector<16x128xf32>
    %502 = arith.truncf %501 : vector<16x128xf32> to vector<16x128xbf16>
    %c3_362 = arith.constant 3 : index
    %c0_363 = arith.constant 0 : index
    %c0_364 = arith.constant 0 : index
    %503 = vector.load %arg4[%c3_362, %c0_363, %c0_364] : memref<8x16x128xbf16, #tpu.memory_space<vmem>>, vector<1x16x128xbf16>
    %504 = vector.shape_cast %503 : vector<1x16x128xbf16> to vector<16x128xbf16>
    %505 = vector.shape_cast %502 : vector<16x128xbf16> to vector<1x16x128xbf16>
    tpu.vector_store %arg4[%c3_362, %c0_363, %c0_364], %505 {strides = array<i32>} : memref<8x16x128xbf16, #tpu.memory_space<vmem>>, vector<1x16x128xbf16>,
    %cst_365 = arith.constant 0.000000e+00 : f32
    %506 = vector.broadcast %cst_365 : f32 to vector<16x128xf32>
    %c0_366 = arith.constant 0 : index
    %c0_367 = arith.constant 0 : index
    %c0_368 = arith.constant 0 : index
    %507 = vector.load %arg7[%c0_366, %c0_367, %c0_368] : memref<8x16x128xf32, #tpu.memory_space<vmem>>, vector<1x16x128xf32>
    %508 = vector.shape_cast %507 : vector<1x16x128xf32> to vector<16x128xf32>
    %cst_369 = arith.constant 0.199148268 : f32
    %509 = vector.broadcast %cst_369 : f32 to vector<16x128xf32>
    %510 = arith.mulf %509, %508 : vector<16x128xf32>
    %511 = arith.addf %506, %510 : vector<16x128xf32>
    %c0_370 = arith.constant 0 : index
    %c0_371 = arith.constant 0 : index
    %c0_372 = arith.constant 0 : index
    %512 = vector.load %arg4[%c0_370, %c0_371, %c0_372] : memref<8x16x128xbf16, #tpu.memory_space<vmem>>, vector<1x16x128xbf16>
    %513 = vector.shape_cast %512 : vector<1x16x128xbf16> to vector<16x128xbf16>
    %514 = arith.extf %513 : vector<16x128xbf16> to vector<16x128xf32>
    %cst_373 = arith.constant -3.98296547 : f32
    %515 = vector.broadcast %cst_373 : f32 to vector<16x128xf32>
    %516 = arith.mulf %515, %514 : vector<16x128xf32>
    %517 = arith.addf %511, %516 : vector<16x128xf32>
    %c1_374 = arith.constant 1 : index
    %c0_375 = arith.constant 0 : index
    %c0_376 = arith.constant 0 : index
    %518 = vector.load %arg7[%c1_374, %c0_375, %c0_376] : memref<8x16x128xf32, #tpu.memory_space<vmem>>, vector<1x16x128xf32>
    %519 = vector.shape_cast %518 : vector<1x16x128xf32> to vector<16x128xf32>
    %cst_377 = arith.constant 0.406005859 : f32
    %520 = vector.broadcast %cst_377 : f32 to vector<16x128xf32>
    %521 = arith.mulf %520, %519 : vector<16x128xf32>
    %522 = arith.addf %517, %521 : vector<16x128xf32>
    %c1_378 = arith.constant 1 : index
    %c0_379 = arith.constant 0 : index
    %c0_380 = arith.constant 0 : index
    %523 = vector.load %arg4[%c1_378, %c0_379, %c0_380] : memref<8x16x128xbf16, #tpu.memory_space<vmem>>, vector<1x16x128xbf16>
    %524 = vector.shape_cast %523 : vector<1x16x128xbf16> to vector<16x128xbf16>
    %525 = arith.extf %524 : vector<16x128xbf16> to vector<16x128xf32>
    %cst_381 = arith.constant -8.12011718 : f32
    %526 = vector.broadcast %cst_381 : f32 to vector<16x128xf32>
    %527 = arith.mulf %526, %525 : vector<16x128xf32>
    %528 = arith.addf %522, %527 : vector<16x128xf32>
    %c2_382 = arith.constant 2 : index
    %c0_383 = arith.constant 0 : index
    %c0_384 = arith.constant 0 : index
    %529 = vector.load %arg7[%c2_382, %c0_383, %c0_384] : memref<8x16x128xf32, #tpu.memory_space<vmem>>, vector<1x16x128xf32>
    %530 = vector.shape_cast %529 : vector<1x16x128xf32> to vector<16x128xf32>
    %cst_385 = arith.constant 0.735758901 : f32
    %531 = vector.broadcast %cst_385 : f32 to vector<16x128xf32>
    %532 = arith.mulf %531, %530 : vector<16x128xf32>
    %533 = arith.addf %528, %532 : vector<16x128xf32>
    %c2_386 = arith.constant 2 : index
    %c0_387 = arith.constant 0 : index
    %c0_388 = arith.constant 0 : index
    %534 = vector.load %arg4[%c2_386, %c0_387, %c0_388] : memref<8x16x128xbf16, #tpu.memory_space<vmem>>, vector<1x16x128xbf16>
    %535 = vector.shape_cast %534 : vector<1x16x128xbf16> to vector<16x128xbf16>
    %536 = arith.extf %535 : vector<16x128xbf16> to vector<16x128xf32>
    %cst_389 = arith.constant -14.7151775 : f32
    %537 = vector.broadcast %cst_389 : f32 to vector<16x128xf32>
    %538 = arith.mulf %537, %536 : vector<16x128xf32>
    %539 = arith.addf %533, %538 : vector<16x128xf32>
    %c3_390 = arith.constant 3 : index
    %c0_391 = arith.constant 0 : index
    %c0_392 = arith.constant 0 : index
    %540 = vector.load %arg7[%c3_390, %c0_391, %c0_392] : memref<8x16x128xf32, #tpu.memory_space<vmem>>, vector<1x16x128xf32>
    %541 = vector.shape_cast %540 : vector<1x16x128xf32> to vector<16x128xf32>
    %cst_393 = arith.constant 1.000000e+00 : f32
    %542 = vector.broadcast %cst_393 : f32 to vector<16x128xf32>
    %543 = arith.mulf %542, %541 : vector<16x128xf32>
    %544 = arith.addf %539, %543 : vector<16x128xf32>
    %c3_394 = arith.constant 3 : index
    %c0_395 = arith.constant 0 : index
    %c0_396 = arith.constant 0 : index
    %545 = vector.load %arg4[%c3_394, %c0_395, %c0_396] : memref<8x16x128xbf16, #tpu.memory_space<vmem>>, vector<1x16x128xbf16>
    %546 = vector.shape_cast %545 : vector<1x16x128xbf16> to vector<16x128xbf16>
    %547 = arith.extf %546 : vector<16x128xbf16> to vector<16x128xf32>
    %cst_397 = arith.constant -2.000000e+01 : f32
    %548 = vector.broadcast %cst_397 : f32 to vector<16x128xf32>
    %549 = arith.mulf %548, %547 : vector<16x128xf32>
    %550 = arith.addf %544, %549 : vector<16x128xf32>
    %cst_398 = arith.constant 1.000000e+01 : f32
    %551 = vector.broadcast %cst_398 : f32 to vector<16x128xf32>
    %552 = arith.cmpf oge, %550, %551 : vector<16x128xf32>
    %cst_399 = arith.constant 1.000000e+00 : f32
    %cst_400 = arith.constant 0.000000e+00 : f32
    %553 = vector.broadcast %cst_399 : f32 to vector<16x128xf32>
    %554 = vector.broadcast %cst_400 : f32 to vector<16x128xf32>
    %555 = arith.select %552, %553, %554 : vector<16x128xi1>, vector<16x128xf32>
    %556 = arith.truncf %555 : vector<16x128xf32> to vector<16x128xbf16>
    %c4_401 = arith.constant 4 : index
    %c0_402 = arith.constant 0 : index
    %c0_403 = arith.constant 0 : index
    %557 = vector.load %arg4[%c4_401, %c0_402, %c0_403] : memref<8x16x128xbf16, #tpu.memory_space<vmem>>, vector<1x16x128xbf16>
    %558 = vector.shape_cast %557 : vector<1x16x128xbf16> to vector<16x128xbf16>
    %559 = vector.shape_cast %556 : vector<16x128xbf16> to vector<1x16x128xbf16>
    tpu.vector_store %arg4[%c4_401, %c0_402, %c0_403], %559 {strides = array<i32>} : memref<8x16x128xbf16, #tpu.memory_space<vmem>>, vector<1x16x128xbf16>,
    %cst_404 = arith.constant 0.000000e+00 : f32
    %560 = vector.broadcast %cst_404 : f32 to vector<16x128xf32>
    %c0_405 = arith.constant 0 : index
    %c0_406 = arith.constant 0 : index
    %c0_407 = arith.constant 0 : index
    %561 = vector.load %arg7[%c0_405, %c0_406, %c0_407] : memref<8x16x128xf32, #tpu.memory_space<vmem>>, vector<1x16x128xf32>
    %562 = vector.shape_cast %561 : vector<1x16x128xf32> to vector<16x128xf32>
    %cst_408 = arith.constant 0.091578193 : f32
    %563 = vector.broadcast %cst_408 : f32 to vector<16x128xf32>
    %564 = arith.mulf %563, %562 : vector<16x128xf32>
    %565 = arith.addf %560, %564 : vector<16x128xf32>
    %c0_409 = arith.constant 0 : index
    %c0_410 = arith.constant 0 : index
    %c0_411 = arith.constant 0 : index
    %566 = vector.load %arg4[%c0_409, %c0_410, %c0_411] : memref<8x16x128xbf16, #tpu.memory_space<vmem>>, vector<1x16x128xbf16>
    %567 = vector.shape_cast %566 : vector<1x16x128xbf16> to vector<16x128xbf16>
    %568 = arith.extf %567 : vector<16x128xbf16> to vector<16x128xf32>
    %cst_412 = arith.constant -1.83156383 : f32
    %569 = vector.broadcast %cst_412 : f32 to vector<16x128xf32>
    %570 = arith.mulf %569, %568 : vector<16x128xf32>
    %571 = arith.addf %565, %570 : vector<16x128xf32>
    %c1_413 = arith.constant 1 : index
    %c0_414 = arith.constant 0 : index
    %c0_415 = arith.constant 0 : index
    %572 = vector.load %arg7[%c1_413, %c0_414, %c0_415] : memref<8x16x128xf32, #tpu.memory_space<vmem>>, vector<1x16x128xf32>
    %573 = vector.shape_cast %572 : vector<1x16x128xf32> to vector<16x128xf32>
    %cst_416 = arith.constant 0.199148268 : f32
    %574 = vector.broadcast %cst_416 : f32 to vector<16x128xf32>
    %575 = arith.mulf %574, %573 : vector<16x128xf32>
    %576 = arith.addf %571, %575 : vector<16x128xf32>
    %c1_417 = arith.constant 1 : index
    %c0_418 = arith.constant 0 : index
    %c0_419 = arith.constant 0 : index
    %577 = vector.load %arg4[%c1_417, %c0_418, %c0_419] : memref<8x16x128xbf16, #tpu.memory_space<vmem>>, vector<1x16x128xbf16>
    %578 = vector.shape_cast %577 : vector<1x16x128xbf16> to vector<16x128xbf16>
    %579 = arith.extf %578 : vector<16x128xbf16> to vector<16x128xf32>
    %cst_420 = arith.constant -3.98296547 : f32
    %580 = vector.broadcast %cst_420 : f32 to vector<16x128xf32>
    %581 = arith.mulf %580, %579 : vector<16x128xf32>
    %582 = arith.addf %576, %581 : vector<16x128xf32>
    %c2_421 = arith.constant 2 : index
    %c0_422 = arith.constant 0 : index
    %c0_423 = arith.constant 0 : index
    %583 = vector.load %arg7[%c2_421, %c0_422, %c0_423] : memref<8x16x128xf32, #tpu.memory_space<vmem>>, vector<1x16x128xf32>
    %584 = vector.shape_cast %583 : vector<1x16x128xf32> to vector<16x128xf32>
    %cst_424 = arith.constant 0.406005859 : f32
    %585 = vector.broadcast %cst_424 : f32 to vector<16x128xf32>
    %586 = arith.mulf %585, %584 : vector<16x128xf32>
    %587 = arith.addf %582, %586 : vector<16x128xf32>
    %c2_425 = arith.constant 2 : index
    %c0_426 = arith.constant 0 : index
    %c0_427 = arith.constant 0 : index
    %588 = vector.load %arg4[%c2_425, %c0_426, %c0_427] : memref<8x16x128xbf16, #tpu.memory_space<vmem>>, vector<1x16x128xbf16>
    %589 = vector.shape_cast %588 : vector<1x16x128xbf16> to vector<16x128xbf16>
    %590 = arith.extf %589 : vector<16x128xbf16> to vector<16x128xf32>
    %cst_428 = arith.constant -8.12011718 : f32
    %591 = vector.broadcast %cst_428 : f32 to vector<16x128xf32>
    %592 = arith.mulf %591, %590 : vector<16x128xf32>
    %593 = arith.addf %587, %592 : vector<16x128xf32>
    %c3_429 = arith.constant 3 : index
    %c0_430 = arith.constant 0 : index
    %c0_431 = arith.constant 0 : index
    %594 = vector.load %arg7[%c3_429, %c0_430, %c0_431] : memref<8x16x128xf32, #tpu.memory_space<vmem>>, vector<1x16x128xf32>
    %595 = vector.shape_cast %594 : vector<1x16x128xf32> to vector<16x128xf32>
    %cst_432 = arith.constant 0.735758901 : f32
    %596 = vector.broadcast %cst_432 : f32 to vector<16x128xf32>
    %597 = arith.mulf %596, %595 : vector<16x128xf32>
    %598 = arith.addf %593, %597 : vector<16x128xf32>
    %c3_433 = arith.constant 3 : index
    %c0_434 = arith.constant 0 : index
    %c0_435 = arith.constant 0 : index
    %599 = vector.load %arg4[%c3_433, %c0_434, %c0_435] : memref<8x16x128xbf16, #tpu.memory_space<vmem>>, vector<1x16x128xbf16>
    %600 = vector.shape_cast %599 : vector<1x16x128xbf16> to vector<16x128xbf16>
    %601 = arith.extf %600 : vector<16x128xbf16> to vector<16x128xf32>
    %cst_436 = arith.constant -14.7151775 : f32
    %602 = vector.broadcast %cst_436 : f32 to vector<16x128xf32>
    %603 = arith.mulf %602, %601 : vector<16x128xf32>
    %604 = arith.addf %598, %603 : vector<16x128xf32>
    %c4_437 = arith.constant 4 : index
    %c0_438 = arith.constant 0 : index
    %c0_439 = arith.constant 0 : index
    %605 = vector.load %arg7[%c4_437, %c0_438, %c0_439] : memref<8x16x128xf32, #tpu.memory_space<vmem>>, vector<1x16x128xf32>
    %606 = vector.shape_cast %605 : vector<1x16x128xf32> to vector<16x128xf32>
    %cst_440 = arith.constant 1.000000e+00 : f32
    %607 = vector.broadcast %cst_440 : f32 to vector<16x128xf32>
    %608 = arith.mulf %607, %606 : vector<16x128xf32>
    %609 = arith.addf %604, %608 : vector<16x128xf32>
    %c4_441 = arith.constant 4 : index
    %c0_442 = arith.constant 0 : index
    %c0_443 = arith.constant 0 : index
    %610 = vector.load %arg4[%c4_441, %c0_442, %c0_443] : memref<8x16x128xbf16, #tpu.memory_space<vmem>>, vector<1x16x128xbf16>
    %611 = vector.shape_cast %610 : vector<1x16x128xbf16> to vector<16x128xbf16>
    %612 = arith.extf %611 : vector<16x128xbf16> to vector<16x128xf32>
    %cst_444 = arith.constant -2.000000e+01 : f32
    %613 = vector.broadcast %cst_444 : f32 to vector<16x128xf32>
    %614 = arith.mulf %613, %612 : vector<16x128xf32>
    %615 = arith.addf %609, %614 : vector<16x128xf32>
    %cst_445 = arith.constant 1.000000e+01 : f32
    %616 = vector.broadcast %cst_445 : f32 to vector<16x128xf32>
    %617 = arith.cmpf oge, %615, %616 : vector<16x128xf32>
    %cst_446 = arith.constant 1.000000e+00 : f32
    %cst_447 = arith.constant 0.000000e+00 : f32
    %618 = vector.broadcast %cst_446 : f32 to vector<16x128xf32>
    %619 = vector.broadcast %cst_447 : f32 to vector<16x128xf32>
    %620 = arith.select %617, %618, %619 : vector<16x128xi1>, vector<16x128xf32>
    %621 = arith.truncf %620 : vector<16x128xf32> to vector<16x128xbf16>
    %c5_448 = arith.constant 5 : index
    %c0_449 = arith.constant 0 : index
    %c0_450 = arith.constant 0 : index
    %622 = vector.load %arg4[%c5_448, %c0_449, %c0_450] : memref<8x16x128xbf16, #tpu.memory_space<vmem>>, vector<1x16x128xbf16>
    %623 = vector.shape_cast %622 : vector<1x16x128xbf16> to vector<16x128xbf16>
    %624 = vector.shape_cast %621 : vector<16x128xbf16> to vector<1x16x128xbf16>
    tpu.vector_store %arg4[%c5_448, %c0_449, %c0_450], %624 {strides = array<i32>} : memref<8x16x128xbf16, #tpu.memory_space<vmem>>, vector<1x16x128xbf16>,
    %cst_451 = arith.constant 0.000000e+00 : f32
    %625 = vector.broadcast %cst_451 : f32 to vector<16x128xf32>
    %c0_452 = arith.constant 0 : index
    %c0_453 = arith.constant 0 : index
    %c0_454 = arith.constant 0 : index
    %626 = vector.load %arg7[%c0_452, %c0_453, %c0_454] : memref<8x16x128xf32, #tpu.memory_space<vmem>>, vector<1x16x128xf32>
    %627 = vector.shape_cast %626 : vector<1x16x128xf32> to vector<16x128xf32>
    %cst_455 = arith.constant 0.0404276811 : f32
    %628 = vector.broadcast %cst_455 : f32 to vector<16x128xf32>
    %629 = arith.mulf %628, %627 : vector<16x128xf32>
    %630 = arith.addf %625, %629 : vector<16x128xf32>
    %c0_456 = arith.constant 0 : index
    %c0_457 = arith.constant 0 : index
    %c0_458 = arith.constant 0 : index
    %631 = vector.load %arg4[%c0_456, %c0_457, %c0_458] : memref<8x16x128xbf16, #tpu.memory_space<vmem>>, vector<1x16x128xbf16>
    %632 = vector.shape_cast %631 : vector<1x16x128xbf16> to vector<16x128xbf16>
    %633 = arith.extf %632 : vector<16x128xbf16> to vector<16x128xf32>
    %cst_459 = arith.constant -0.808553636 : f32
    %634 = vector.broadcast %cst_459 : f32 to vector<16x128xf32>
    %635 = arith.mulf %634, %633 : vector<16x128xf32>
    %636 = arith.addf %630, %635 : vector<16x128xf32>
    %c1_460 = arith.constant 1 : index
    %c0_461 = arith.constant 0 : index
    %c0_462 = arith.constant 0 : index
    %637 = vector.load %arg7[%c1_460, %c0_461, %c0_462] : memref<8x16x128xf32, #tpu.memory_space<vmem>>, vector<1x16x128xf32>
    %638 = vector.shape_cast %637 : vector<1x16x128xf32> to vector<16x128xf32>
    %cst_463 = arith.constant 0.091578193 : f32
    %639 = vector.broadcast %cst_463 : f32 to vector<16x128xf32>
    %640 = arith.mulf %639, %638 : vector<16x128xf32>
    %641 = arith.addf %636, %640 : vector<16x128xf32>
    %c1_464 = arith.constant 1 : index
    %c0_465 = arith.constant 0 : index
    %c0_466 = arith.constant 0 : index
    %642 = vector.load %arg4[%c1_464, %c0_465, %c0_466] : memref<8x16x128xbf16, #tpu.memory_space<vmem>>, vector<1x16x128xbf16>
    %643 = vector.shape_cast %642 : vector<1x16x128xbf16> to vector<16x128xbf16>
    %644 = arith.extf %643 : vector<16x128xbf16> to vector<16x128xf32>
    %cst_467 = arith.constant -1.83156383 : f32
    %645 = vector.broadcast %cst_467 : f32 to vector<16x128xf32>
    %646 = arith.mulf %645, %644 : vector<16x128xf32>
    %647 = arith.addf %641, %646 : vector<16x128xf32>
    %c2_468 = arith.constant 2 : index
    %c0_469 = arith.constant 0 : index
    %c0_470 = arith.constant 0 : index
    %648 = vector.load %arg7[%c2_468, %c0_469, %c0_470] : memref<8x16x128xf32, #tpu.memory_space<vmem>>, vector<1x16x128xf32>
    %649 = vector.shape_cast %648 : vector<1x16x128xf32> to vector<16x128xf32>
    %cst_471 = arith.constant 0.199148268 : f32
    %650 = vector.broadcast %cst_471 : f32 to vector<16x128xf32>
    %651 = arith.mulf %650, %649 : vector<16x128xf32>
    %652 = arith.addf %647, %651 : vector<16x128xf32>
    %c2_472 = arith.constant 2 : index
    %c0_473 = arith.constant 0 : index
    %c0_474 = arith.constant 0 : index
    %653 = vector.load %arg4[%c2_472, %c0_473, %c0_474] : memref<8x16x128xbf16, #tpu.memory_space<vmem>>, vector<1x16x128xbf16>
    %654 = vector.shape_cast %653 : vector<1x16x128xbf16> to vector<16x128xbf16>
    %655 = arith.extf %654 : vector<16x128xbf16> to vector<16x128xf32>
    %cst_475 = arith.constant -3.98296547 : f32
    %656 = vector.broadcast %cst_475 : f32 to vector<16x128xf32>
    %657 = arith.mulf %656, %655 : vector<16x128xf32>
    %658 = arith.addf %652, %657 : vector<16x128xf32>
    %c3_476 = arith.constant 3 : index
    %c0_477 = arith.constant 0 : index
    %c0_478 = arith.constant 0 : index
    %659 = vector.load %arg7[%c3_476, %c0_477, %c0_478] : memref<8x16x128xf32, #tpu.memory_space<vmem>>, vector<1x16x128xf32>
    %660 = vector.shape_cast %659 : vector<1x16x128xf32> to vector<16x128xf32>
    %cst_479 = arith.constant 0.406005859 : f32
    %661 = vector.broadcast %cst_479 : f32 to vector<16x128xf32>
    %662 = arith.mulf %661, %660 : vector<16x128xf32>
    %663 = arith.addf %658, %662 : vector<16x128xf32>
    %c3_480 = arith.constant 3 : index
    %c0_481 = arith.constant 0 : index
    %c0_482 = arith.constant 0 : index
    %664 = vector.load %arg4[%c3_480, %c0_481, %c0_482] : memref<8x16x128xbf16, #tpu.memory_space<vmem>>, vector<1x16x128xbf16>
    %665 = vector.shape_cast %664 : vector<1x16x128xbf16> to vector<16x128xbf16>
    %666 = arith.extf %665 : vector<16x128xbf16> to vector<16x128xf32>
    %cst_483 = arith.constant -8.12011718 : f32
    %667 = vector.broadcast %cst_483 : f32 to vector<16x128xf32>
    %668 = arith.mulf %667, %666 : vector<16x128xf32>
    %669 = arith.addf %663, %668 : vector<16x128xf32>
    %c4_484 = arith.constant 4 : index
    %c0_485 = arith.constant 0 : index
    %c0_486 = arith.constant 0 : index
    %670 = vector.load %arg7[%c4_484, %c0_485, %c0_486] : memref<8x16x128xf32, #tpu.memory_space<vmem>>, vector<1x16x128xf32>
    %671 = vector.shape_cast %670 : vector<1x16x128xf32> to vector<16x128xf32>
    %cst_487 = arith.constant 0.735758901 : f32
    %672 = vector.broadcast %cst_487 : f32 to vector<16x128xf32>
    %673 = arith.mulf %672, %671 : vector<16x128xf32>
    %674 = arith.addf %669, %673 : vector<16x128xf32>
    %c4_488 = arith.constant 4 : index
    %c0_489 = arith.constant 0 : index
    %c0_490 = arith.constant 0 : index
    %675 = vector.load %arg4[%c4_488, %c0_489, %c0_490] : memref<8x16x128xbf16, #tpu.memory_space<vmem>>, vector<1x16x128xbf16>
    %676 = vector.shape_cast %675 : vector<1x16x128xbf16> to vector<16x128xbf16>
    %677 = arith.extf %676 : vector<16x128xbf16> to vector<16x128xf32>
    %cst_491 = arith.constant -14.7151775 : f32
    %678 = vector.broadcast %cst_491 : f32 to vector<16x128xf32>
    %679 = arith.mulf %678, %677 : vector<16x128xf32>
    %680 = arith.addf %674, %679 : vector<16x128xf32>
    %c5_492 = arith.constant 5 : index
    %c0_493 = arith.constant 0 : index
    %c0_494 = arith.constant 0 : index
    %681 = vector.load %arg7[%c5_492, %c0_493, %c0_494] : memref<8x16x128xf32, #tpu.memory_space<vmem>>, vector<1x16x128xf32>
    %682 = vector.shape_cast %681 : vector<1x16x128xf32> to vector<16x128xf32>
    %cst_495 = arith.constant 1.000000e+00 : f32
    %683 = vector.broadcast %cst_495 : f32 to vector<16x128xf32>
    %684 = arith.mulf %683, %682 : vector<16x128xf32>
    %685 = arith.addf %680, %684 : vector<16x128xf32>
    %c5_496 = arith.constant 5 : index
    %c0_497 = arith.constant 0 : index
    %c0_498 = arith.constant 0 : index
    %686 = vector.load %arg4[%c5_496, %c0_497, %c0_498] : memref<8x16x128xbf16, #tpu.memory_space<vmem>>, vector<1x16x128xbf16>
    %687 = vector.shape_cast %686 : vector<1x16x128xbf16> to vector<16x128xbf16>
    %688 = arith.extf %687 : vector<16x128xbf16> to vector<16x128xf32>
    %cst_499 = arith.constant -2.000000e+01 : f32
    %689 = vector.broadcast %cst_499 : f32 to vector<16x128xf32>
    %690 = arith.mulf %689, %688 : vector<16x128xf32>
    %691 = arith.addf %685, %690 : vector<16x128xf32>
    %cst_500 = arith.constant 1.000000e+01 : f32
    %692 = vector.broadcast %cst_500 : f32 to vector<16x128xf32>
    %693 = arith.cmpf oge, %691, %692 : vector<16x128xf32>
    %cst_501 = arith.constant 1.000000e+00 : f32
    %cst_502 = arith.constant 0.000000e+00 : f32
    %694 = vector.broadcast %cst_501 : f32 to vector<16x128xf32>
    %695 = vector.broadcast %cst_502 : f32 to vector<16x128xf32>
    %696 = arith.select %693, %694, %695 : vector<16x128xi1>, vector<16x128xf32>
    %697 = arith.truncf %696 : vector<16x128xf32> to vector<16x128xbf16>
    %c6_503 = arith.constant 6 : index
    %c0_504 = arith.constant 0 : index
    %c0_505 = arith.constant 0 : index
    %698 = vector.load %arg4[%c6_503, %c0_504, %c0_505] : memref<8x16x128xbf16, #tpu.memory_space<vmem>>, vector<1x16x128xbf16>
    %699 = vector.shape_cast %698 : vector<1x16x128xbf16> to vector<16x128xbf16>
    %700 = vector.shape_cast %697 : vector<16x128xbf16> to vector<1x16x128xbf16>
    tpu.vector_store %arg4[%c6_503, %c0_504, %c0_505], %700 {strides = array<i32>} : memref<8x16x128xbf16, #tpu.memory_space<vmem>>, vector<1x16x128xbf16>,
    %cst_506 = arith.constant 0.000000e+00 : f32
    %701 = vector.broadcast %cst_506 : f32 to vector<16x128xf32>
    %c0_507 = arith.constant 0 : index
    %c0_508 = arith.constant 0 : index
    %c0_509 = arith.constant 0 : index
    %702 = vector.load %arg7[%c0_507, %c0_508, %c0_509] : memref<8x16x128xf32, #tpu.memory_space<vmem>>, vector<1x16x128xf32>
    %703 = vector.shape_cast %702 : vector<1x16x128xf32> to vector<16x128xf32>
    %cst_510 = arith.constant 0.017351266 : f32
    %704 = vector.broadcast %cst_510 : f32 to vector<16x128xf32>
    %705 = arith.mulf %704, %703 : vector<16x128xf32>
    %706 = arith.addf %701, %705 : vector<16x128xf32>
    %c0_511 = arith.constant 0 : index
    %c0_512 = arith.constant 0 : index
    %c0_513 = arith.constant 0 : index
    %707 = vector.load %arg4[%c0_511, %c0_512, %c0_513] : memref<8x16x128xbf16, #tpu.memory_space<vmem>>, vector<1x16x128xbf16>
    %708 = vector.shape_cast %707 : vector<1x16x128xbf16> to vector<16x128xbf16>
    %709 = arith.extf %708 : vector<16x128xbf16> to vector<16x128xf32>
    %cst_514 = arith.constant -0.347025305 : f32
    %710 = vector.broadcast %cst_514 : f32 to vector<16x128xf32>
    %711 = arith.mulf %710, %709 : vector<16x128xf32>
    %712 = arith.addf %706, %711 : vector<16x128xf32>
    %c1_515 = arith.constant 1 : index
    %c0_516 = arith.constant 0 : index
    %c0_517 = arith.constant 0 : index
    %713 = vector.load %arg7[%c1_515, %c0_516, %c0_517] : memref<8x16x128xf32, #tpu.memory_space<vmem>>, vector<1x16x128xf32>
    %714 = vector.shape_cast %713 : vector<1x16x128xf32> to vector<16x128xf32>
    %cst_518 = arith.constant 0.0404276811 : f32
    %715 = vector.broadcast %cst_518 : f32 to vector<16x128xf32>
    %716 = arith.mulf %715, %714 : vector<16x128xf32>
    %717 = arith.addf %712, %716 : vector<16x128xf32>
    %c1_519 = arith.constant 1 : index
    %c0_520 = arith.constant 0 : index
    %c0_521 = arith.constant 0 : index
    %718 = vector.load %arg4[%c1_519, %c0_520, %c0_521] : memref<8x16x128xbf16, #tpu.memory_space<vmem>>, vector<1x16x128xbf16>
    %719 = vector.shape_cast %718 : vector<1x16x128xbf16> to vector<16x128xbf16>
    %720 = arith.extf %719 : vector<16x128xbf16> to vector<16x128xf32>
    %cst_522 = arith.constant -0.808553636 : f32
    %721 = vector.broadcast %cst_522 : f32 to vector<16x128xf32>
    %722 = arith.mulf %721, %720 : vector<16x128xf32>
    %723 = arith.addf %717, %722 : vector<16x128xf32>
    %c2_523 = arith.constant 2 : index
    %c0_524 = arith.constant 0 : index
    %c0_525 = arith.constant 0 : index
    %724 = vector.load %arg7[%c2_523, %c0_524, %c0_525] : memref<8x16x128xf32, #tpu.memory_space<vmem>>, vector<1x16x128xf32>
    %725 = vector.shape_cast %724 : vector<1x16x128xf32> to vector<16x128xf32>
    %cst_526 = arith.constant 0.091578193 : f32
    %726 = vector.broadcast %cst_526 : f32 to vector<16x128xf32>
    %727 = arith.mulf %726, %725 : vector<16x128xf32>
    %728 = arith.addf %723, %727 : vector<16x128xf32>
    %c2_527 = arith.constant 2 : index
    %c0_528 = arith.constant 0 : index
    %c0_529 = arith.constant 0 : index
    %729 = vector.load %arg4[%c2_527, %c0_528, %c0_529] : memref<8x16x128xbf16, #tpu.memory_space<vmem>>, vector<1x16x128xbf16>
    %730 = vector.shape_cast %729 : vector<1x16x128xbf16> to vector<16x128xbf16>
    %731 = arith.extf %730 : vector<16x128xbf16> to vector<16x128xf32>
    %cst_530 = arith.constant -1.83156383 : f32
    %732 = vector.broadcast %cst_530 : f32 to vector<16x128xf32>
    %733 = arith.mulf %732, %731 : vector<16x128xf32>
    %734 = arith.addf %728, %733 : vector<16x128xf32>
    %c3_531 = arith.constant 3 : index
    %c0_532 = arith.constant 0 : index
    %c0_533 = arith.constant 0 : index
    %735 = vector.load %arg7[%c3_531, %c0_532, %c0_533] : memref<8x16x128xf32, #tpu.memory_space<vmem>>, vector<1x16x128xf32>
    %736 = vector.shape_cast %735 : vector<1x16x128xf32> to vector<16x128xf32>
    %cst_534 = arith.constant 0.199148268 : f32
    %737 = vector.broadcast %cst_534 : f32 to vector<16x128xf32>
    %738 = arith.mulf %737, %736 : vector<16x128xf32>
    %739 = arith.addf %734, %738 : vector<16x128xf32>
    %c3_535 = arith.constant 3 : index
    %c0_536 = arith.constant 0 : index
    %c0_537 = arith.constant 0 : index
    %740 = vector.load %arg4[%c3_535, %c0_536, %c0_537] : memref<8x16x128xbf16, #tpu.memory_space<vmem>>, vector<1x16x128xbf16>
    %741 = vector.shape_cast %740 : vector<1x16x128xbf16> to vector<16x128xbf16>
    %742 = arith.extf %741 : vector<16x128xbf16> to vector<16x128xf32>
    %cst_538 = arith.constant -3.98296547 : f32
    %743 = vector.broadcast %cst_538 : f32 to vector<16x128xf32>
    %744 = arith.mulf %743, %742 : vector<16x128xf32>
    %745 = arith.addf %739, %744 : vector<16x128xf32>
    %c4_539 = arith.constant 4 : index
    %c0_540 = arith.constant 0 : index
    %c0_541 = arith.constant 0 : index
    %746 = vector.load %arg7[%c4_539, %c0_540, %c0_541] : memref<8x16x128xf32, #tpu.memory_space<vmem>>, vector<1x16x128xf32>
    %747 = vector.shape_cast %746 : vector<1x16x128xf32> to vector<16x128xf32>
    %cst_542 = arith.constant 0.406005859 : f32
    %748 = vector.broadcast %cst_542 : f32 to vector<16x128xf32>
    %749 = arith.mulf %748, %747 : vector<16x128xf32>
    %750 = arith.addf %745, %749 : vector<16x128xf32>
    %c4_543 = arith.constant 4 : index
    %c0_544 = arith.constant 0 : index
    %c0_545 = arith.constant 0 : index
    %751 = vector.load %arg4[%c4_543, %c0_544, %c0_545] : memref<8x16x128xbf16, #tpu.memory_space<vmem>>, vector<1x16x128xbf16>
    %752 = vector.shape_cast %751 : vector<1x16x128xbf16> to vector<16x128xbf16>
    %753 = arith.extf %752 : vector<16x128xbf16> to vector<16x128xf32>
    %cst_546 = arith.constant -8.12011718 : f32
    %754 = vector.broadcast %cst_546 : f32 to vector<16x128xf32>
    %755 = arith.mulf %754, %753 : vector<16x128xf32>
    %756 = arith.addf %750, %755 : vector<16x128xf32>
    %c5_547 = arith.constant 5 : index
    %c0_548 = arith.constant 0 : index
    %c0_549 = arith.constant 0 : index
    %757 = vector.load %arg7[%c5_547, %c0_548, %c0_549] : memref<8x16x128xf32, #tpu.memory_space<vmem>>, vector<1x16x128xf32>
    %758 = vector.shape_cast %757 : vector<1x16x128xf32> to vector<16x128xf32>
    %cst_550 = arith.constant 0.735758901 : f32
    %759 = vector.broadcast %cst_550 : f32 to vector<16x128xf32>
    %760 = arith.mulf %759, %758 : vector<16x128xf32>
    %761 = arith.addf %756, %760 : vector<16x128xf32>
    %c5_551 = arith.constant 5 : index
    %c0_552 = arith.constant 0 : index
    %c0_553 = arith.constant 0 : index
    %762 = vector.load %arg4[%c5_551, %c0_552, %c0_553] : memref<8x16x128xbf16, #tpu.memory_space<vmem>>, vector<1x16x128xbf16>
    %763 = vector.shape_cast %762 : vector<1x16x128xbf16> to vector<16x128xbf16>
    %764 = arith.extf %763 : vector<16x128xbf16> to vector<16x128xf32>
    %cst_554 = arith.constant -14.7151775 : f32
    %765 = vector.broadcast %cst_554 : f32 to vector<16x128xf32>
    %766 = arith.mulf %765, %764 : vector<16x128xf32>
    %767 = arith.addf %761, %766 : vector<16x128xf32>
    %c6_555 = arith.constant 6 : index
    %c0_556 = arith.constant 0 : index
    %c0_557 = arith.constant 0 : index
    %768 = vector.load %arg7[%c6_555, %c0_556, %c0_557] : memref<8x16x128xf32, #tpu.memory_space<vmem>>, vector<1x16x128xf32>
    %769 = vector.shape_cast %768 : vector<1x16x128xf32> to vector<16x128xf32>
    %cst_558 = arith.constant 1.000000e+00 : f32
    %770 = vector.broadcast %cst_558 : f32 to vector<16x128xf32>
    %771 = arith.mulf %770, %769 : vector<16x128xf32>
    %772 = arith.addf %767, %771 : vector<16x128xf32>
    %c6_559 = arith.constant 6 : index
    %c0_560 = arith.constant 0 : index
    %c0_561 = arith.constant 0 : index
    %773 = vector.load %arg4[%c6_559, %c0_560, %c0_561] : memref<8x16x128xbf16, #tpu.memory_space<vmem>>, vector<1x16x128xbf16>
    %774 = vector.shape_cast %773 : vector<1x16x128xbf16> to vector<16x128xbf16>
    %775 = arith.extf %774 : vector<16x128xbf16> to vector<16x128xf32>
    %cst_562 = arith.constant -2.000000e+01 : f32
    %776 = vector.broadcast %cst_562 : f32 to vector<16x128xf32>
    %777 = arith.mulf %776, %775 : vector<16x128xf32>
    %778 = arith.addf %772, %777 : vector<16x128xf32>
    %cst_563 = arith.constant 1.000000e+01 : f32
    %779 = vector.broadcast %cst_563 : f32 to vector<16x128xf32>
    %780 = arith.cmpf oge, %778, %779 : vector<16x128xf32>
    %cst_564 = arith.constant 1.000000e+00 : f32
    %cst_565 = arith.constant 0.000000e+00 : f32
    %781 = vector.broadcast %cst_564 : f32 to vector<16x128xf32>
    %782 = vector.broadcast %cst_565 : f32 to vector<16x128xf32>
    %783 = arith.select %780, %781, %782 : vector<16x128xi1>, vector<16x128xf32>
    %784 = arith.truncf %783 : vector<16x128xf32> to vector<16x128xbf16>
    %c7_566 = arith.constant 7 : index
    %c0_567 = arith.constant 0 : index
    %c0_568 = arith.constant 0 : index
    %785 = vector.load %arg4[%c7_566, %c0_567, %c0_568] : memref<8x16x128xbf16, #tpu.memory_space<vmem>>, vector<1x16x128xbf16>
    %786 = vector.shape_cast %785 : vector<1x16x128xbf16> to vector<16x128xbf16>
    %787 = vector.shape_cast %784 : vector<16x128xbf16> to vector<1x16x128xbf16>
    tpu.vector_store %arg4[%c7_566, %c0_567, %c0_568], %787 {strides = array<i32>} : memref<8x16x128xbf16, #tpu.memory_space<vmem>>, vector<1x16x128xbf16>,
    return
  }
  func.func @transform_0(%arg0: i32) -> (i32, i32, i32) {
    %c0_i32 = arith.constant 0 : i32
    %c0_i32_0 = arith.constant 0 : i32
    %c0_i32_1 = arith.constant 0 : i32
    return %c0_i32, %arg0, %c0_i32_0 : i32, i32, i32
  }
  func.func @transform_1(%arg0: i32) -> (i32, i32) {
    %c0_i32 = arith.constant 0 : i32
    %c0_i32_0 = arith.constant 0 : i32
    %c0_i32_1 = arith.constant 0 : i32
    return %c0_i32, %c0_i32_0 : i32, i32
  }
  func.func @transform_2(%arg0: i32) -> (i32, i32) {
    %c0_i32 = arith.constant 0 : i32
    %c0_i32_0 = arith.constant 0 : i32
    %c0_i32_1 = arith.constant 0 : i32
    return %c0_i32, %c0_i32_0 : i32, i32
  }
  func.func @transform_3(%arg0: i32) -> (i32, i32, i32) {
    %c0_i32 = arith.constant 0 : i32
    %c0_i32_0 = arith.constant 0 : i32
    %c0_i32_1 = arith.constant 0 : i32
    return %c0_i32, %arg0, %c0_i32_0 : i32, i32, i32
  }
}

</mosaic_0001>

<bundles_post_ra>
// kernel: tpu_custom_call.1
= control target key start
LH: loop header
LB: loop body
LE: loop exit
PB: predicated region body
PF: predicated region fallthrough
CT: control target
= control target key end

     0   :  { %8 = vsyncpa [#allocation6], 0  ;;  %s16117_s0 = inlined_call_operand.hbm [shape: bf16[8,16,3072], index: 0, kind: input, shape index: {}]   ;;  %s16118_s1 = inlined_call_operand.hbm [shape: bf16[3072,512], index: 1, kind: input, shape index: {}]   ;;  %s16119_s2 = inlined_call_operand.hbm [shape: bf16[512,128], index: 2, kind: input, shape index: {}]   ;;  %s16120_s3 = inlined_call_operand.hbm [shape: bf16[8,16,128], index: 3, kind: output, shape index: {}]  }
   0x1   :  { %9 = vsyncpa [#allocation9], 0 }
   0x2   :  { %10 = vsyncpa [#allocation7], 0  ;;  %s14438_s12 = smov [#allocation8]   ;;  %s14344_s16 = scalar_lea.hbm %s16118_s1, 98304 }
   0x3   :  { %s28_s13 = sshll.u32 %s14438_s12, 4  ;;  %p14345_p0 = scmp.ne.s32.totalorder %s16118_s1, %s14344_s16  ;;  %s29_s13 = int_to_ptr.vmem [resolvable:$true] %s28_s13 }
   0x4   :  { %p14348_p1 = scmp.lt.u32.totalorder %s14344_s16, %s16118_s1 }
   0x6   :  { %p14350_p2 = pnand %p14348_p1, %p14345_p0 }
   0x8   :  { %14353 = shalt.err (!%p14350_p2)
}
   0x9   :  { %s14354_s21 = scalar_lea.vmem %s29_s13, 98304  ;;  %p14359_p4 = scmp.lt.s32.totalorder %s29_s13, %s29_s13 }
   0xa   :  { %p14355_p3 = scmp.ne.s32.totalorder %s29_s13, %s14354_s21  ;;  %p14360_p5 = scmp.lt.s32.totalorder %s14354_s21, %s14354_s21 }
   0xc   :  { %p14361_p6 = por %p14360_p5, %p14359_p4 }
   0xe   :  { %p14362_p7 = pnand %p14361_p6, %p14355_p3 }
  0x10   :  { %14365 = shalt.err (!%p14362_p7)
}
  0x11   :  { %s14439_s22 = smov 256   ;;  %s14440_s23 = smov 16  }
  0x12   :  { %34 = dma.hbm_to_vmem [thread:$0]  %s16118_s1, 98304, %s29_s13, [#allocation9], %s14439_s22, %s14439_s22, %s14440_s23  }
  0x13   :  { %s14441_s26 = smov [#allocation5]   ;;  %s14366_s30 = scalar_lea.hbm %s16117_s0, 24576 }
  0x14   :  { %s16_s27 = sshll.u32 %s14441_s26, 4  ;;  %p14367_p8 = scmp.ne.s32.totalorder %s16117_s0, %s14366_s30  ;;  %s17_s27 = int_to_ptr.vmem [resolvable:$true] %s16_s27 }
  0x15   :  { %p14370_p9 = scmp.lt.u32.totalorder %s14366_s30, %s16117_s0 }
  0x17   :  { %p14372_p10 = pnand %p14370_p9, %p14367_p8 }
  0x19   :  { %14375 = shalt.err (!%p14372_p10)
}
  0x1a   :  { %s14376_s8 = scalar_lea.vmem %s17_s27, 24576  ;;  %p14381_p12 = scmp.lt.s32.totalorder %s17_s27, %s17_s27 }
  0x1b   :  { %p14377_p11 = scmp.ne.s32.totalorder %s17_s27, %s14376_s8  ;;  %p14382_p13 = scmp.lt.s32.totalorder %s14376_s8, %s14376_s8 }
  0x1d   :  { %p14383_p0 = por %p14382_p13, %p14381_p12 }
  0x1f   :  { %p14384_p1 = pnand %p14383_p0, %p14377_p11 }
  0x21   :  { %14387 = shalt.err (!%p14384_p1)
}
  0x22   :  { %s14442_s1 = smov 1536   ;;  %s14443_s9 = smov 96  }
  0x23   :  { %22 = dma.hbm_to_vmem [thread:$0]  %s16117_s0, 24576, %s17_s27, [#allocation6], %s14442_s1, %s14442_s1, %s14443_s9  }
  0x24   :  { %s14444_s12 = smov [#allocation10]   ;;  %s14388_s16 = scalar_lea.hbm %s16119_s2, 4096 }
  0x25   :  { %s40_s13 = sshll.u32 %s14444_s12, 4  ;;  %p14389_p2 = scmp.ne.s32.totalorder %s16119_s2, %s14388_s16  ;;  %s41_s13 = int_to_ptr.vmem [resolvable:$true] %s40_s13 }
  0x26   :  { %p14392_p3 = scmp.lt.u32.totalorder %s14388_s16, %s16119_s2 }
  0x28   :  { %p14394_p4 = pnand %p14392_p3, %p14389_p2 }
  0x2a   :  { %14397 = shalt.err (!%p14394_p4)
}
  0x2b   :  { %s14398_s21 = scalar_lea.vmem %s41_s13, 4096  ;;  %p14403_p6 = scmp.lt.s32.totalorder %s41_s13, %s41_s13 }
  0x2c   :  { %p14399_p5 = scmp.ne.s32.totalorder %s41_s13, %s14398_s21  ;;  %p14404_p7 = scmp.lt.s32.totalorder %s14398_s21, %s14398_s21 }
  0x2e   :  { %p14405_p8 = por %p14404_p7, %p14403_p6 }
  0x30   :  { %p14406_p9 = pnand %p14405_p8, %p14399_p5 }
  0x32   :  { %14409 = shalt.err (!%p14406_p9)
}
  0x33   :  { %s14445_s0 = smov 64   ;;  %s14446_s22 = smov 4  }
  0x34   :  { %46 = dma.hbm_to_vmem [thread:$0]  %s16119_s2, 4096, %s41_s13, [#allocation9], %s14445_s0, %s14445_s0, %s14446_s22  }
  0x35   :  { %14432 = dma.done.wait [#allocation6], 24576  }
  0x36   :  { %14433 = vsyncadd [#allocation6], 4294942720 }
  0x37   :  { %14434 = dma.done.wait [#allocation9], 102400  }
  0x38   :  { %14435 = vsyncadd [#allocation9], 4294864896  ;;  %v13160_v0 = vld [vmem:[#allocation8 + $0x4] ss:$16 sps:$4 sm:$0xff]   ;;  %v13162_v1 = vld [vmem:[#allocation8 + $0xc] ss:$16 sps:$4 sm:$0xff]  }
  0x39   :  { %5817 = vmatprep.subr.bf16.mxu0 %v13160_v0  ;;  %v13164_v2 = vld [vmem:[#allocation8] ss:$16 sps:$4 sm:$0xff]   ;;  %v13165_v3 = vld [vmem:[#allocation8 + $0x8] ss:$16 sps:$4 sm:$0xff]   ;;  %7173 = vmatprep.subr.bf16.mxu1 %v13162_v1  ;;  %v13166_v4 = vld [vmem:[#allocation8 + $0x24] ss:$16 sps:$4 sm:$0xff]  }
  0x3a   :  { %5818 = vmatpush1.bf16.msra.mxu0 %v13164_v2  ;;  %7174 = vmatpush1.bf16.msra.mxu1 %v13165_v3  ;;  %v13168_v5 = vld [vmem:[#allocation8 + $0x2c] ss:$16 sps:$4 sm:$0xff]   ;;  %v13170_v6 = vld [vmem:[#allocation8 + $0x20] ss:$16 sps:$4 sm:$0xff]   ;;  %v13171_v7 = vld [vmem:[#allocation8 + $0x28] ss:$16 sps:$4 sm:$0xff]  }
  0x3b   :  { %5819 = vmatprep.subr.bf16.mxu0 %v13166_v4  ;;  %7175 = vmatprep.subr.bf16.mxu1 %v13168_v5  ;;  %v13172_v8 = vld [vmem:[#allocation8 + $0x44] ss:$16 sps:$4 sm:$0xff]   ;;  %v13174_v9 = vld [vmem:[#allocation8 + $0x4c] ss:$16 sps:$4 sm:$0xff]   ;;  %v13176_v10 = vld [vmem:[#allocation8 + $0x40] ss:$16 sps:$4 sm:$0xff]  }
  0x3c   :  { %v13177_v11 = vld [vmem:[#allocation8 + $0x48] ss:$16 sps:$4 sm:$0xff]   ;;  %v13178_v12 = vld [vmem:[#allocation8 + $0x64] ss:$16 sps:$4 sm:$0xff]   ;;  %v13180_v13 = vld [vmem:[#allocation8 + $0x6c] ss:$16 sps:$4 sm:$0xff]  }
  0x3d   :  { %v13182_v14 = vld [vmem:[#allocation8 + $0x60] ss:$16 sps:$4 sm:$0xff]   ;;  %v13183_v15 = vld [vmem:[#allocation8 + $0x68] ss:$16 sps:$4 sm:$0xff]   ;;  %v13184_v16 = vld [vmem:[#allocation8 + $0x84] ss:$16 sps:$4 sm:$0xff]  }
  0x3e   :  { %5820 = vmatpush1.bf16.msra.mxu0 %v13170_v6  ;;  %7176 = vmatpush1.bf16.msra.mxu1 %v13171_v7  ;;  %v13186_v17 = vld [vmem:[#allocation8 + $0x8c] ss:$16 sps:$4 sm:$0xff]   ;;  %v13188_v18 = vld [vmem:[#allocation8 + $0x80] ss:$16 sps:$4 sm:$0xff]   ;;  %v13189_v19 = vld [vmem:[#allocation8 + $0x88] ss:$16 sps:$4 sm:$0xff]  }
  0x3f   :  { %5821 = vmatprep.subr.bf16.mxu0 %v13172_v8  ;;  %7177 = vmatprep.subr.bf16.mxu1 %v13174_v9  ;;  %v13190_v20 = vld [vmem:[#allocation8 + $0xa4] ss:$16 sps:$4 sm:$0xff]   ;;  %v13192_v21 = vld [vmem:[#allocation8 + $0xac] ss:$16 sps:$4 sm:$0xff]   ;;  %v13194_v22 = vld [vmem:[#allocation8 + $0xa0] ss:$16 sps:$4 sm:$0xff]  }
  0x40   :  { %v13195_v23 = vld [vmem:[#allocation8 + $0xa8] ss:$16 sps:$4 sm:$0xff]   ;;  %v13196_v24 = vld [vmem:[#allocation8 + $0xc4] ss:$16 sps:$4 sm:$0xff]   ;;  %v13198_v25 = vld [vmem:[#allocation8 + $0xcc] ss:$16 sps:$4 sm:$0xff]  }
  0x41   :  { %v13200_v26 = vld [vmem:[#allocation8 + $0xc0] ss:$16 sps:$4 sm:$0xff]   ;;  %v13201_v27 = vld [vmem:[#allocation8 + $0xc8] ss:$16 sps:$4 sm:$0xff]   ;;  %v13202_v28 = vld [vmem:[#allocation8 + $0xe4] ss:$16 sps:$4 sm:$0xff]  }
  0x42   :  { %5822 = vmatpush1.bf16.msra.mxu0 %v13176_v10  ;;  %7178 = vmatpush1.bf16.msra.mxu1 %v13177_v11  ;;  %v13204_v29 = vld [vmem:[#allocation8 + $0xec] ss:$16 sps:$4 sm:$0xff]   ;;  %v13206_v30 = vld [vmem:[#allocation8 + $0xe0] ss:$16 sps:$4 sm:$0xff]   ;;  %v13207_v31 = vld [vmem:[#allocation8 + $0xe8] ss:$16 sps:$4 sm:$0xff]  }
  0x43   :  { %5823 = vmatprep.subr.bf16.mxu0 %v13178_v12  ;;  %7179 = vmatprep.subr.bf16.mxu1 %v13180_v13  ;;  %v13208_v32 = vld [vmem:[#allocation8 + $0x104] ss:$16 sps:$4 sm:$0xff]   ;;  %v13210_v33 = vld [vmem:[#allocation8 + $0x10c] ss:$16 sps:$4 sm:$0xff]   ;;  %v13212_v34 = vld [vmem:[#allocation8 + $0x100] ss:$16 sps:$4 sm:$0xff]  }
  0x44   :  { %v13213_v35 = vld [vmem:[#allocation8 + $0x108] ss:$16 sps:$4 sm:$0xff]   ;;  %v13214_v36 = vld [vmem:[#allocation8 + $0x124] ss:$16 sps:$4 sm:$0xff]   ;;  %v13216_v37 = vld [vmem:[#allocation8 + $0x12c] ss:$16 sps:$4 sm:$0xff]  }
  0x45   :  { %v13218_v38 = vld [vmem:[#allocation8 + $0x120] ss:$16 sps:$4 sm:$0xff]   ;;  %v13219_v39 = vld [vmem:[#allocation8 + $0x128] ss:$16 sps:$4 sm:$0xff]   ;;  %v13220_v40 = vld [vmem:[#allocation8 + $0x144] ss:$16 sps:$4 sm:$0xff]  }
  0x46   :  { %5824 = vmatpush1.bf16.msra.mxu0 %v13182_v14  ;;  %7180 = vmatpush1.bf16.msra.mxu1 %v13183_v15  ;;  %v13222_v41 = vld [vmem:[#allocation8 + $0x14c] ss:$16 sps:$4 sm:$0xff]   ;;  %v13224_v42 = vld [vmem:[#allocation8 + $0x140] ss:$16 sps:$4 sm:$0xff]   ;;  %v13225_v43 = vld [vmem:[#allocation8 + $0x148] ss:$16 sps:$4 sm:$0xff]  }
  0x47   :  { %5825 = vmatprep.subr.bf16.mxu0 %v13184_v16  ;;  %7181 = vmatprep.subr.bf16.mxu1 %v13186_v17  ;;  %v13226_v44 = vld [vmem:[#allocation8 + $0x164] ss:$16 sps:$4 sm:$0xff]   ;;  %v13228_v45 = vld [vmem:[#allocation8 + $0x16c] ss:$16 sps:$4 sm:$0xff]   ;;  %v13230_v48 = vld [vmem:[#allocation8 + $0x160] ss:$16 sps:$4 sm:$0xff]  }
  0x48   :  { %v57_v46 = vld [vmem:[#allocation5] sm:$0xff]  ;;  %v13231_v49 = vld [vmem:[#allocation8 + $0x168] ss:$16 sps:$4 sm:$0xff]   ;;  %v13234_v52 = vld [vmem:[#allocation8 + $0x18c] ss:$16 sps:$4 sm:$0xff]   ;;  %s14450_s2 = smov [#allocation11]  }
  0x49   :  { %v69_v47 = vld [vmem:[#allocation5 + $0x60] sm:$0xff]  ;;  %v13237_v54 = vld [vmem:[#allocation8 + $0x188] ss:$16 sps:$4 sm:$0xff]   ;;  %v13240_v56 = vld [vmem:[#allocation8 + $0x1ac] ss:$16 sps:$4 sm:$0xff]   ;;  %s11175_s25 = sshll.u32 %s14450_s2, 4  ;;  %s11176_s25 = int_to_ptr.vmem [resolvable:$true] %s11175_s25 }
  0x4a   :  { %5826 = vmatpush1.bf16.msra.mxu0 %v13188_v18  ;;  %7182 = vmatpush1.bf16.msra.mxu1 %v13189_v19  ;;  %v11189_v50 = vcombine.high %v57_v46, %v69_v47  ;;  %v13232_v51 = vld [vmem:[#allocation8 + $0x184] ss:$16 sps:$4 sm:$0xff]   ;;  %v13236_v53 = vld [vmem:[#allocation8 + $0x180] ss:$16 sps:$4 sm:$0xff]   ;;  %v13243_v58 = vld [vmem:[#allocation8 + $0x1a8] ss:$16 sps:$4 sm:$0xff]   ;;  %v11188_v7 = vcombine.low %v57_v46, %v69_v47  ;;  %p14415_p11 = scmp.lt.s32.totalorder %s11176_s25, %s11176_s25 }
  0x4b   :  { %5827 = vmatprep.subr.bf16.mxu0 %v13190_v20  ;;  %7183 = vmatprep.subr.bf16.mxu1 %v13192_v21  ;;  %v13238_v55 = vld [vmem:[#allocation8 + $0x1a4] ss:$16 sps:$4 sm:$0xff]   ;;  %v13242_v57 = vld [vmem:[#allocation8 + $0x1a0] ss:$16 sps:$4 sm:$0xff]   ;;  %v13246_v60 = vld [vmem:[#allocation8 + $0x1cc] ss:$16 sps:$4 sm:$0xff]  }
  0x4c   :  { %5849 = vmatprep.mubr.bf16.mxu0 %v11189_v50  ;;  %7205 = vmatprep.mubr.bf16.mxu1 %v11189_v50  ;;  %v13244_v59 = vld [vmem:[#allocation8 + $0x1c4] ss:$16 sps:$4 sm:$0xff]   ;;  %v13248_v61 = vld [vmem:[#allocation8 + $0x1c0] ss:$16 sps:$4 sm:$0xff]   ;;  %v13249_v62 = vld [vmem:[#allocation8 + $0x1c8] ss:$16 sps:$4 sm:$0xff]  }
  0x4d   :  { %v13250_v63 = vld [vmem:[#allocation8 + $0x1e4] ss:$16 sps:$4 sm:$0xff]   ;;  %v13252_v0 = vld [vmem:[#allocation8 + $0x1ec] ss:$16 sps:$4 sm:$0xff]   ;;  %v13254_v1 = vld [vmem:[#allocation8 + $0x1e0] ss:$16 sps:$4 sm:$0xff]  }
  0x4e   :  { %5828 = vmatpush1.bf16.msra.mxu0 %v13194_v22  ;;  %7184 = vmatpush1.bf16.msra.mxu1 %v13195_v23  ;;  %v13255_v2 = vld [vmem:[#allocation8 + $0x1e8] ss:$16 sps:$4 sm:$0xff]   ;;  %v13258_v3 = vld [vmem:[#allocation8 + $0x204] ss:$16 sps:$4 sm:$0xff]   ;;  %v13261_v4 = vld [vmem:[#allocation8 + $0x20c] ss:$16 sps:$4 sm:$0xff]  }
  0x4f   :  { %5829 = vmatprep.subr.bf16.mxu0 %v13196_v24  ;;  %7185 = vmatprep.subr.bf16.mxu1 %v13198_v25  ;;  %v13256_v5 = vld [vmem:[#allocation8 + $0x200] ss:$16 sps:$4 sm:$0xff]   ;;  %v13259_v6 = vld [vmem:[#allocation8 + $0x208] ss:$16 sps:$4 sm:$0xff]   ;;  %v13264_v10 = vld [vmem:[#allocation8 + $0x224] ss:$16 sps:$4 sm:$0xff]  }
  0x50   :  { %v81_v8 = vld [vmem:[#allocation5 + $0xc0] sm:$0xff]  ;;  %v13267_v11 = vld [vmem:[#allocation8 + $0x22c] ss:$16 sps:$4 sm:$0xff]   ;;  %v13265_v14 = vld [vmem:[#allocation8 + $0x228] ss:$16 sps:$4 sm:$0xff]   ;;  %s14410_s26 = scalar_lea.vmem %s11176_s25, 1024 }
  0x51   :  { %v93_v9 = vld [vmem:[#allocation5 + $0x120] sm:$0xff]  ;;  %v13273_v16 = vld [vmem:[#allocation8 + $0x24c] ss:$16 sps:$4 sm:$0xff]   ;;  %v13271_v21 = vld [vmem:[#allocation8 + $0x248] ss:$16 sps:$4 sm:$0xff]   ;;  %p14411_p10 = scmp.ne.s32.totalorder %s11176_s25, %s14410_s26  ;;  %p14416_p12 = scmp.lt.s32.totalorder %s14410_s26, %s14410_s26 }
  0x52   :  { %5830 = vmatpush1.bf16.msra.mxu0 %v13200_v26  ;;  %7186 = vmatpush1.bf16.msra.mxu1 %v13201_v27  ;;  %v11213_v12 = vcombine.high %v81_v8, %v93_v9  ;;  %v13262_v13 = vld [vmem:[#allocation8 + $0x220] ss:$16 sps:$4 sm:$0xff]   ;;  %v13270_v15 = vld [vmem:[#allocation8 + $0x244] ss:$16 sps:$4 sm:$0xff]   ;;  %v11212_v18 = vcombine.low %v81_v8, %v93_v9  ;;  %v13279_v23 = vld [vmem:[#allocation8 + $0x26c] ss:$16 sps:$4 sm:$0xff]  }
  0x53   :  { %5831 = vmatprep.subr.bf16.mxu0 %v13202_v28  ;;  %7187 = vmatprep.subr.bf16.mxu1 %v13204_v29  ;;  %v105_v17 = vld [vmem:[#allocation5 + $0x180] sm:$0xff]  ;;  %v13277_v26 = vld [vmem:[#allocation8 + $0x268] ss:$16 sps:$4 sm:$0xff]   ;;  %v13285_v28 = vld [vmem:[#allocation8 + $0x28c] ss:$16 sps:$4 sm:$0xff]   ;;  %p14417_p13 = por %p14416_p12, %p14415_p11 }
  0x54   :  { %v117_v19 = vld [vmem:[#allocation5 + $0x1e0] sm:$0xff]  ;;  %v13303_v47 = vld [vmem:[#allocation8 + $0x2ec] ss:$16 sps:$4 sm:$0xff]   ;;  %v13301_v50 = vld [vmem:[#allocation8 + $0x2e8] ss:$16 sps:$4 sm:$0xff]  }
  0x55   :  { %v13268_v20 = vld [vmem:[#allocation8 + $0x240] ss:$16 sps:$4 sm:$0xff]   ;;  %v13276_v22 = vld [vmem:[#allocation8 + $0x264] ss:$16 sps:$4 sm:$0xff]   ;;  %v11237_v24 = vcombine.high %v105_v17, %v117_v19  ;;  %p14418_p0 = pnand %p14417_p13, %p14411_p10 }
  0x56   :  { %5832 = vmatpush1.bf16.msra.mxu0 %v13206_v30  ;;  %7188 = vmatpush1.bf16.msra.mxu1 %v13207_v31  ;;  %v13274_v25 = vld [vmem:[#allocation8 + $0x260] ss:$16 sps:$4 sm:$0xff]   ;;  %v13282_v27 = vld [vmem:[#allocation8 + $0x284] ss:$16 sps:$4 sm:$0xff]   ;;  %v11236_v30 = vcombine.low %v105_v17, %v117_v19  ;;  %v13339_v19 = vld [vmem:[#allocation8 + $0x3ac] ss:$16 sps:$4 sm:$0xff]  }
  0x57   :  { %5833 = vmatprep.subr.bf16.mxu0 %v13208_v32  ;;  %7189 = vmatprep.subr.bf16.mxu1 %v13210_v33  ;;  %v129_v29 = vld [vmem:[#allocation5 + $0x240] sm:$0xff]  ;;  %v13283_v33 = vld [vmem:[#allocation8 + $0x288] ss:$16 sps:$4 sm:$0xff]  }
  0x58   :  { %v141_v31 = vld [vmem:[#allocation5 + $0x2a0] sm:$0xff] }
  0x59   :  { %v13280_v32 = vld [vmem:[#allocation8 + $0x280] ss:$16 sps:$4 sm:$0xff]   ;;  %v13300_v46 = vld [vmem:[#allocation8 + $0x2e4] ss:$16 sps:$4 sm:$0xff]  }
  0x5a   :  { %5834 = vmatpush1.bf16.msra.mxu0 %v13212_v34  ;;  %7190 = vmatpush1.bf16.msra.mxu1 %v13213_v35  ;;  %v13288_v34 = vld [vmem:[#allocation8 + $0x2a4] ss:$16 sps:$4 sm:$0xff]   ;;  %v13291_v35 = vld [vmem:[#allocation8 + $0x2ac] ss:$16 sps:$4 sm:$0xff]   ;;  %v13322_v9 = vld [vmem:[#allocation8 + $0x360] ss:$16 sps:$4 sm:$0xff]  }
  0x5b   :  { %5835 = vmatprep.subr.bf16.mxu0 %v13214_v36  ;;  %7191 = vmatprep.subr.bf16.mxu1 %v13216_v37  ;;  %v11261_v36 = vcombine.high %v129_v29, %v141_v31  ;;  %v13286_v37 = vld [vmem:[#allocation8 + $0x2a0] ss:$16 sps:$4 sm:$0xff]  }
  0x5c   :  { %v237_v17 = vld [vmem:[#allocation5 + $0x5a0] sm:$0xff] }
  0x5e   :  { %5836 = vmatpush1.bf16.msra.mxu0 %v13218_v38  ;;  %7192 = vmatpush1.bf16.msra.mxu1 %v13219_v39  ;;  %v13289_v38 = vld [vmem:[#allocation8 + $0x2a8] ss:$16 sps:$4 sm:$0xff]   ;;  %v13294_v39 = vld [vmem:[#allocation8 + $0x2c4] ss:$16 sps:$4 sm:$0xff]  }
  0x5f   :  { %5837 = vmatprep.subr.bf16.mxu0 %v13220_v40  ;;  %7193 = vmatprep.subr.bf16.mxu1 %v13222_v41  ;;  %v13297_v40 = vld [vmem:[#allocation8 + $0x2cc] ss:$16 sps:$4 sm:$0xff]   ;;  %v13292_v41 = vld [vmem:[#allocation8 + $0x2c0] ss:$16 sps:$4 sm:$0xff]  }
  0x62   :  { %5838 = vmatpush1.bf16.msra.mxu0 %v13224_v42  ;;  %7194 = vmatpush1.bf16.msra.mxu1 %v13225_v43  ;;  %v13295_v42 = vld [vmem:[#allocation8 + $0x2c8] ss:$16 sps:$4 sm:$0xff]   ;;  %v11260_v43 = vcombine.low %v129_v29, %v141_v31  ;;  %v13351_v31 = vld [vmem:[#allocation8 + $0x3ec] ss:$16 sps:$4 sm:$0xff]  }
  0x63   :  { %5839 = vmatprep.subr.bf16.mxu0 %v13226_v44  ;;  %7195 = vmatprep.subr.bf16.mxu1 %v13228_v45  ;;  %v153_v44 = vld [vmem:[#allocation5 + $0x300] sm:$0xff]  ;;  %v13343_v29 = vld [vmem:[#allocation8 + $0x3c8] ss:$16 sps:$4 sm:$0xff]  }
  0x64   :  { %v165_v45 = vld [vmem:[#allocation5 + $0x360] sm:$0xff] }
  0x66   :  { %5840 = vmatpush1.bf16.msra.mxu0 %v13230_v48  ;;  %7196 = vmatpush1.bf16.msra.mxu1 %v13231_v49  ;;  %v11285_v48 = vcombine.high %v153_v44, %v165_v45  ;;  %v13298_v49 = vld [vmem:[#allocation8 + $0x2e0] ss:$16 sps:$4 sm:$0xff]  }
  0x67   :  { %5841 = vmatprep.subr.bf16.mxu0 %v13232_v51  ;;  %7197 = vmatprep.subr.bf16.mxu1 %v13234_v52  ;;  %v13306_v51 = vld [vmem:[#allocation8 + $0x304] ss:$16 sps:$4 sm:$0xff]   ;;  %v13309_v52 = vld [vmem:[#allocation8 + $0x30c] ss:$16 sps:$4 sm:$0xff]  }
  0x6a   :  { %5842 = vmatpush1.bf16.msra.mxu0 %v13236_v53  ;;  %7198 = vmatpush1.bf16.msra.mxu1 %v13237_v54  ;;  %v177_v53 = vld [vmem:[#allocation5 + $0x3c0] sm:$0xff]  ;;  %v11284_v54 = vcombine.low %v153_v44, %v165_v45 }
  0x6b   :  { %5843 = vmatprep.subr.bf16.mxu0 %v13238_v55  ;;  %7199 = vmatprep.subr.bf16.mxu1 %v13240_v56  ;;  %v189_v55 = vld [vmem:[#allocation5 + $0x420] sm:$0xff] }
  0x6c   :  { %v13304_v56 = vld [vmem:[#allocation8 + $0x300] ss:$16 sps:$4 sm:$0xff]  }
  0x6d   :  { %v13358_v45 = vld [vmem:[#allocation8 + $0x420] ss:$16 sps:$4 sm:$0xff]  }
  0x6e   :  { %5844 = vmatpush1.bf16.msra.mxu0 %v13242_v57  ;;  %7200 = vmatpush1.bf16.msra.mxu1 %v13243_v58  ;;  %v13307_v57 = vld [vmem:[#allocation8 + $0x308] ss:$16 sps:$4 sm:$0xff]   ;;  %v13312_v58 = vld [vmem:[#allocation8 + $0x324] ss:$16 sps:$4 sm:$0xff]  }
  0x6f   :  { %5845 = vmatprep.subr.bf16.mxu0 %v13244_v59  ;;  %7201 = vmatprep.subr.bf16.mxu1 %v13246_v60  ;;  %v13315_v59 = vld [vmem:[#allocation8 + $0x32c] ss:$16 sps:$4 sm:$0xff]   ;;  %v11309_v60 = vcombine.high %v177_v53, %v189_v55 }
  0x72   :  { %5846 = vmatpush1.bf16.msra.mxu0 %v13248_v61  ;;  %7202 = vmatpush1.bf16.msra.mxu1 %v13249_v62  ;;  %v13310_v61 = vld [vmem:[#allocation8 + $0x320] ss:$16 sps:$4 sm:$0xff]   ;;  %v13313_v62 = vld [vmem:[#allocation8 + $0x328] ss:$16 sps:$4 sm:$0xff]  }
  0x73   :  { %5847 = vmatprep.subr.bf16.mxu0 %v13250_v63  ;;  %7203 = vmatprep.subr.bf16.mxu1 %v13252_v0  ;;  %v13318_v63 = vld [vmem:[#allocation8 + $0x344] ss:$16 sps:$4 sm:$0xff]   ;;  %v13321_v0 = vld [vmem:[#allocation8 + $0x34c] ss:$16 sps:$4 sm:$0xff]  }
  0x76   :  { %5848 = vmatpush1.bf16.msra.mxu0 %v13254_v1  ;;  %7204 = vmatpush1.bf16.msra.mxu1 %v13255_v2  ;;  %v201_v1 = vld [vmem:[#allocation5 + $0x480] sm:$0xff]  ;;  %v11308_v2 = vcombine.low %v177_v53, %v189_v55  ;;  %v118_v53 = vld [vmem:[#allocation5 + $0x1e8] sm:$0xff] }
  0x77   :  { %5930 = vmatprep.subr.bf16.mxu0 %v13258_v3  ;;  %7286 = vmatprep.subr.bf16.mxu1 %v13261_v4  ;;  %v213_v3 = vld [vmem:[#allocation5 + $0x4e0] sm:$0xff]  ;;  %v13375_v55 = vld [vmem:[#allocation8 + $0x46c] ss:$16 sps:$4 sm:$0xff]  }
  0x78   :  { %v13316_v4 = vld [vmem:[#allocation8 + $0x340] ss:$16 sps:$4 sm:$0xff]   ;;  %v11333_v8 = vcombine.high %v201_v1, %v213_v3 }
  0x79   :  { %5850 = vmatmul.mubr.bf16.vlgmr.msra.gmra.mrb[0].mxu0 %v11188_v7  ;;  %7206 = vmatmul.mubr.bf16.vlgmr.msra.gmra.mrb[0].mxu1 %v11188_v7  ;;  %v13327_v7 = vld [vmem:[#allocation8 + $0x36c] ss:$16 sps:$4 sm:$0xff]  }
  0x7a   :  { %5931 = vmatpush1.bf16.msra.mxu0 %v13256_v5  ;;  %7287 = vmatpush1.bf16.msra.mxu1 %v13259_v6  ;;  %v13319_v5 = vld [vmem:[#allocation8 + $0x348] ss:$16 sps:$4 sm:$0xff]   ;;  %v13324_v6 = vld [vmem:[#allocation8 + $0x364] ss:$16 sps:$4 sm:$0xff]  }
  0x7b   :  { %5932 = vmatprep.subr.bf16.mxu0 %v13264_v10  ;;  %7288 = vmatprep.subr.bf16.mxu1 %v13267_v11  ;;  %v13325_v10 = vld [vmem:[#allocation8 + $0x368] ss:$16 sps:$4 sm:$0xff]   ;;  %v13330_v11 = vld [vmem:[#allocation8 + $0x384] ss:$16 sps:$4 sm:$0xff]  }
  0x7c   :  { %5859 = vmatprep.mubr.bf16.mxu0 %v11213_v12  ;;  %7215 = vmatprep.mubr.bf16.mxu1 %v11213_v12  ;;  %v13333_v12 = vld [vmem:[#allocation8 + $0x38c] ss:$16 sps:$4 sm:$0xff]  }
  0x7e   :  { %5933 = vmatpush1.bf16.msra.mxu0 %v13262_v13  ;;  %7289 = vmatpush1.bf16.msra.mxu1 %v13265_v14  ;;  %v13328_v13 = vld [vmem:[#allocation8 + $0x380] ss:$16 sps:$4 sm:$0xff]   ;;  %v13331_v14 = vld [vmem:[#allocation8 + $0x388] ss:$16 sps:$4 sm:$0xff]  }
  0x7f   :  { %5934 = vmatprep.subr.bf16.mxu0 %v13270_v15  ;;  %7290 = vmatprep.subr.bf16.mxu1 %v13273_v16  ;;  %v11332_v15 = vcombine.low %v201_v1, %v213_v3  ;;  %v225_v16 = vld [vmem:[#allocation5 + $0x540] sm:$0xff]  ;;  %v13379_v1 = vld [vmem:[#allocation8 + $0x488] ss:$16 sps:$4 sm:$0xff]   ;;  %v13387_v3 = vld [vmem:[#allocation8 + $0x4ac] ss:$16 sps:$4 sm:$0xff]  }
  0x81   :  { %5860 = vmatmul.mubr.bf16.gmra.mrb[4].mxu0 %v11212_v18  ;;  %7216 = vmatmul.mubr.bf16.gmra.mrb[4].mxu1 %v11212_v18  ;;  %v13336_v18 = vld [vmem:[#allocation8 + $0x3a4] ss:$16 sps:$4 sm:$0xff]  }
  0x82   :  { %5935 = vmatpush1.bf16.msra.mxu0 %v13268_v20  ;;  %7291 = vmatpush1.bf16.msra.mxu1 %v13271_v21  ;;  %v11357_v20 = vcombine.high %v225_v16, %v237_v17  ;;  %v13334_v21 = vld [vmem:[#allocation8 + $0x3a0] ss:$16 sps:$4 sm:$0xff]  }
  0x83   :  { %5936 = vmatprep.subr.bf16.mxu0 %v13276_v22  ;;  %7292 = vmatprep.subr.bf16.mxu1 %v13279_v23  ;;  %v13337_v22 = vld [vmem:[#allocation8 + $0x3a8] ss:$16 sps:$4 sm:$0xff]   ;;  %v13342_v23 = vld [vmem:[#allocation8 + $0x3c4] ss:$16 sps:$4 sm:$0xff]  }
  0x84   :  { %5869 = vmatprep.mubr.bf16.mxu0 %v11237_v24  ;;  %7225 = vmatprep.mubr.bf16.mxu1 %v11237_v24  ;;  %v13345_v24 = vld [vmem:[#allocation8 + $0x3cc] ss:$16 sps:$4 sm:$0xff]  }
  0x86   :  { %5937 = vmatpush1.bf16.msra.mxu0 %v13274_v25  ;;  %7293 = vmatpush1.bf16.msra.mxu1 %v13277_v26  ;;  %v58_v25 = vld [vmem:[#allocation5 + $0x8] sm:$0xff]  ;;  %v11356_v26 = vcombine.low %v225_v16, %v237_v17  ;;  %v13394_v17 = vld [vmem:[#allocation8 + $0x4e0] ss:$16 sps:$4 sm:$0xff]  }
  0x87   :  { %5938 = vmatprep.subr.bf16.mxu0 %v13282_v27  ;;  %7294 = vmatprep.subr.bf16.mxu1 %v13285_v28  ;;  %v70_v27 = vld [vmem:[#allocation5 + $0x68] sm:$0xff]  ;;  %v13340_v28 = vld [vmem:[#allocation8 + $0x3c0] ss:$16 sps:$4 sm:$0xff]  }
  0x89   :  { %5870 = vmatmul.mubr.bf16.gmra.mrb[8].mxu0 %v11236_v30  ;;  %7226 = vmatmul.mubr.bf16.gmra.mrb[8].mxu1 %v11236_v30  ;;  %v13348_v30 = vld [vmem:[#allocation8 + $0x3e4] ss:$16 sps:$4 sm:$0xff]  }
  0x8a   :  { %5939 = vmatpush1.bf16.msra.mxu0 %v13280_v32  ;;  %7295 = vmatpush1.bf16.msra.mxu1 %v13283_v33  ;;  %v11191_v32 = vcombine.high %v58_v25, %v70_v27  ;;  %v13346_v33 = vld [vmem:[#allocation8 + $0x3e0] ss:$16 sps:$4 sm:$0xff]  }
  0x8b   :  { %5940 = vmatprep.subr.bf16.mxu0 %v13288_v34  ;;  %7296 = vmatprep.subr.bf16.mxu1 %v13291_v35  ;;  %v13349_v34 = vld [vmem:[#allocation8 + $0x3e8] ss:$16 sps:$4 sm:$0xff]   ;;  %v13354_v35 = vld [vmem:[#allocation8 + $0x404] ss:$16 sps:$4 sm:$0xff]  }
  0x8c   :  { %5879 = vmatprep.mubr.bf16.mxu0 %v11261_v36  ;;  %7235 = vmatprep.mubr.bf16.mxu1 %v11261_v36  ;;  %v13357_v36 = vld [vmem:[#allocation8 + $0x40c] ss:$16 sps:$4 sm:$0xff]  }
  0x8e   :  { %5941 = vmatpush1.bf16.msra.mxu0 %v13286_v37  ;;  %7297 = vmatpush1.bf16.msra.mxu1 %v13289_v38  ;;  %v82_v37 = vld [vmem:[#allocation5 + $0xc8] sm:$0xff]  ;;  %v11190_v38 = vcombine.low %v58_v25, %v70_v27 }
  0x8f   :  { %5942 = vmatprep.subr.bf16.mxu0 %v13294_v39  ;;  %7298 = vmatprep.subr.bf16.mxu1 %v13297_v40  ;;  %v94_v39 = vld [vmem:[#allocation5 + $0x128] sm:$0xff]  ;;  %v13352_v40 = vld [vmem:[#allocation8 + $0x400] ss:$16 sps:$4 sm:$0xff]  }
  0x90   :  { %v11215_v44 = vcombine.high %v82_v37, %v94_v39  ;;  %v190_v25 = vld [vmem:[#allocation5 + $0x428] sm:$0xff] }
  0x91   :  { %5880 = vmatmul.mubr.bf16.gmra.mrb[12].mxu0 %v11260_v43  ;;  %7236 = vmatmul.mubr.bf16.gmra.mrb[12].mxu1 %v11260_v43  ;;  %v13363_v43 = vld [vmem:[#allocation8 + $0x42c] ss:$16 sps:$4 sm:$0xff]  }
  0x92   :  { %5943 = vmatpush1.bf16.msra.mxu0 %v13292_v41  ;;  %7299 = vmatpush1.bf16.msra.mxu1 %v13295_v42  ;;  %v13355_v41 = vld [vmem:[#allocation8 + $0x408] ss:$16 sps:$4 sm:$0xff]   ;;  %v13360_v42 = vld [vmem:[#allocation8 + $0x424] ss:$16 sps:$4 sm:$0xff]   ;;  %v13411_v27 = vld [vmem:[#allocation8 + $0x52c] ss:$16 sps:$4 sm:$0xff]  }
  0x93   :  { %5944 = vmatprep.subr.bf16.mxu0 %v13300_v46  ;;  %7300 = vmatprep.subr.bf16.mxu1 %v13303_v47  ;;  %v13361_v46 = vld [vmem:[#allocation8 + $0x428] ss:$16 sps:$4 sm:$0xff]   ;;  %v13366_v47 = vld [vmem:[#allocation8 + $0x444] ss:$16 sps:$4 sm:$0xff]  }
  0x94   :  { %5889 = vmatprep.mubr.bf16.mxu0 %v11285_v48  ;;  %7245 = vmatprep.mubr.bf16.mxu1 %v11285_v48  ;;  %v13369_v48 = vld [vmem:[#allocation8 + $0x44c] ss:$16 sps:$4 sm:$0xff]  }
  0x96   :  { %5945 = vmatpush1.bf16.msra.mxu0 %v13298_v49  ;;  %7301 = vmatpush1.bf16.msra.mxu1 %v13301_v50  ;;  %v13364_v49 = vld [vmem:[#allocation8 + $0x440] ss:$16 sps:$4 sm:$0xff]   ;;  %v13367_v50 = vld [vmem:[#allocation8 + $0x448] ss:$16 sps:$4 sm:$0xff]  }
  0x97   :  { %5946 = vmatprep.subr.bf16.mxu0 %v13306_v51  ;;  %7302 = vmatprep.subr.bf16.mxu1 %v13309_v52  ;;  %v11214_v51 = vcombine.low %v82_v37, %v94_v39  ;;  %v106_v52 = vld [vmem:[#allocation5 + $0x188] sm:$0xff] }
  0x98   :  { %v13415_v37 = vld [vmem:[#allocation8 + $0x548] ss:$16 sps:$4 sm:$0xff]   ;;  %v13423_v39 = vld [vmem:[#allocation8 + $0x56c] ss:$16 sps:$4 sm:$0xff]  }
  0x99   :  { %5890 = vmatmul.mubr.bf16.gmra.mrb[16].mxu0 %v11284_v54  ;;  %7246 = vmatmul.mubr.bf16.gmra.mrb[16].mxu1 %v11284_v54  ;;  %v13372_v54 = vld [vmem:[#allocation8 + $0x464] ss:$16 sps:$4 sm:$0xff]  }
  0x9a   :  { %5947 = vmatpush1.bf16.msra.mxu0 %v13304_v56  ;;  %7303 = vmatpush1.bf16.msra.mxu1 %v13307_v57  ;;  %v11239_v56 = vcombine.high %v106_v52, %v118_v53  ;;  %v13370_v57 = vld [vmem:[#allocation8 + $0x460] ss:$16 sps:$4 sm:$0xff]  }
  0x9b   :  { %5948 = vmatprep.subr.bf16.mxu0 %v13312_v58  ;;  %7304 = vmatprep.subr.bf16.mxu1 %v13315_v59  ;;  %v13373_v58 = vld [vmem:[#allocation8 + $0x468] ss:$16 sps:$4 sm:$0xff]   ;;  %v13378_v59 = vld [vmem:[#allocation8 + $0x484] ss:$16 sps:$4 sm:$0xff]  }
  0x9c   :  { %5899 = vmatprep.mubr.bf16.mxu0 %v11309_v60  ;;  %7255 = vmatprep.mubr.bf16.mxu1 %v11309_v60  ;;  %v13381_v60 = vld [vmem:[#allocation8 + $0x48c] ss:$16 sps:$4 sm:$0xff]  }
  0x9e   :  { %5949 = vmatpush1.bf16.msra.mxu0 %v13310_v61  ;;  %7305 = vmatpush1.bf16.msra.mxu1 %v13313_v62  ;;  %v130_v61 = vld [vmem:[#allocation5 + $0x248] sm:$0xff]  ;;  %v11238_v62 = vcombine.low %v106_v52, %v118_v53  ;;  %v13430_v53 = vld [vmem:[#allocation8 + $0x5a0] ss:$16 sps:$4 sm:$0xff]  }
  0x9f   :  { %5950 = vmatprep.subr.bf16.mxu0 %v13318_v63  ;;  %7306 = vmatprep.subr.bf16.mxu1 %v13321_v0  ;;  %v142_v63 = vld [vmem:[#allocation5 + $0x2a8] sm:$0xff]  ;;  %v13376_v0 = vld [vmem:[#allocation8 + $0x480] ss:$16 sps:$4 sm:$0xff]  }
  0xa1   :  { %5900 = vmatmul.mubr.bf16.gmra.mrb[20].mxu0 %v11308_v2  ;;  %7256 = vmatmul.mubr.bf16.gmra.mrb[20].mxu1 %v11308_v2  ;;  %v13384_v2 = vld [vmem:[#allocation8 + $0x4a4] ss:$16 sps:$4 sm:$0xff]  }
  0xa2   :  { %5951 = vmatpush1.bf16.msra.mxu0 %v13316_v4  ;;  %7307 = vmatpush1.bf16.msra.mxu1 %v13319_v5  ;;  %v11263_v4 = vcombine.high %v130_v61, %v142_v63  ;;  %v13382_v5 = vld [vmem:[#allocation8 + $0x4a0] ss:$16 sps:$4 sm:$0xff]  }
  0xa3   :  { %5952 = vmatprep.subr.bf16.mxu0 %v13324_v6  ;;  %7308 = vmatprep.subr.bf16.mxu1 %v13327_v7  ;;  %v13385_v6 = vld [vmem:[#allocation8 + $0x4a8] ss:$16 sps:$4 sm:$0xff]   ;;  %v13390_v7 = vld [vmem:[#allocation8 + $0x4c4] ss:$16 sps:$4 sm:$0xff]  }
  0xa4   :  { %5909 = vmatprep.mubr.bf16.mxu0 %v11333_v8  ;;  %7265 = vmatprep.mubr.bf16.mxu1 %v11333_v8  ;;  %v13393_v8 = vld [vmem:[#allocation8 + $0x4cc] ss:$16 sps:$4 sm:$0xff]  }
  0xa6   :  { %5953 = vmatpush1.bf16.msra.mxu0 %v13322_v9  ;;  %7309 = vmatpush1.bf16.msra.mxu1 %v13325_v10  ;;  %v154_v9 = vld [vmem:[#allocation5 + $0x308] sm:$0xff]  ;;  %v11262_v10 = vcombine.low %v130_v61, %v142_v63  ;;  %v71_v61 = vld [vmem:[#allocation5 + $0x70] sm:$0xff] }
  0xa7   :  { %5954 = vmatprep.subr.bf16.mxu0 %v13330_v11  ;;  %7310 = vmatprep.subr.bf16.mxu1 %v13333_v12  ;;  %v166_v11 = vld [vmem:[#allocation5 + $0x368] sm:$0xff]  ;;  %v13388_v12 = vld [vmem:[#allocation8 + $0x4c0] ss:$16 sps:$4 sm:$0xff]  }
  0xa8   :  { %v11287_v16 = vcombine.high %v154_v9, %v166_v11  ;;  %v13447_v63 = vld [vmem:[#allocation8 + $0x5ec] ss:$16 sps:$4 sm:$0xff]  }
  0xa9   :  { %5910 = vmatmul.mubr.bf16.gmra.mrb[24].mxu0 %v11332_v15  ;;  %7266 = vmatmul.mubr.bf16.gmra.mrb[24].mxu1 %v11332_v15  ;;  %v13399_v15 = vld [vmem:[#allocation8 + $0x4ec] ss:$16 sps:$4 sm:$0xff]  }
  0xaa   :  { %5955 = vmatpush1.bf16.msra.mxu0 %v13328_v13  ;;  %7311 = vmatpush1.bf16.msra.mxu1 %v13331_v14  ;;  %v13391_v13 = vld [vmem:[#allocation8 + $0x4c8] ss:$16 sps:$4 sm:$0xff]   ;;  %v13396_v14 = vld [vmem:[#allocation8 + $0x4e4] ss:$16 sps:$4 sm:$0xff]  }
  0xab   :  { %5956 = vmatprep.subr.bf16.mxu0 %v13336_v18  ;;  %7312 = vmatprep.subr.bf16.mxu1 %v13339_v19  ;;  %v13397_v18 = vld [vmem:[#allocation8 + $0x4e8] ss:$16 sps:$4 sm:$0xff]   ;;  %v13402_v19 = vld [vmem:[#allocation8 + $0x504] ss:$16 sps:$4 sm:$0xff]  }
  0xac   :  { %5919 = vmatprep.mubr.bf16.mxu0 %v11357_v20  ;;  %7275 = vmatprep.mubr.bf16.mxu1 %v11357_v20  ;;  %v13405_v20 = vld [vmem:[#allocation8 + $0x50c] ss:$16 sps:$4 sm:$0xff]  }
  0xae   :  { %5957 = vmatpush1.bf16.msra.mxu0 %v13334_v21  ;;  %7313 = vmatpush1.bf16.msra.mxu1 %v13337_v22  ;;  %v13400_v21 = vld [vmem:[#allocation8 + $0x500] ss:$16 sps:$4 sm:$0xff]   ;;  %v13403_v22 = vld [vmem:[#allocation8 + $0x508] ss:$16 sps:$4 sm:$0xff]  }
  0xaf   :  { %5958 = vmatprep.subr.bf16.mxu0 %v13342_v23  ;;  %7314 = vmatprep.subr.bf16.mxu1 %v13345_v24  ;;  %v11286_v23 = vcombine.low %v154_v9, %v166_v11  ;;  %v178_v24 = vld [vmem:[#allocation5 + $0x3c8] sm:$0xff] }
  0xb0   :  { %v13451_v9 = vld [vmem:[#allocation8 + $0x608] ss:$16 sps:$4 sm:$0xff]   ;;  %v13459_v11 = vld [vmem:[#allocation8 + $0x62c] ss:$16 sps:$4 sm:$0xff]  }
  0xb1   :  { %5920 = vmatmul.mubr.bf16.gmra.mrb[28].mxu0 %v11356_v26  ;;  %7276 = vmatmul.mubr.bf16.gmra.mrb[28].mxu1 %v11356_v26  ;;  %v13408_v26 = vld [vmem:[#allocation8 + $0x524] ss:$16 sps:$4 sm:$0xff]  }
  0xb2   :  { %5959 = vmatpush1.bf16.msra.mxu0 %v13340_v28  ;;  %7315 = vmatpush1.bf16.msra.mxu1 %v13343_v29  ;;  %v11311_v28 = vcombine.high %v178_v24, %v190_v25  ;;  %v13406_v29 = vld [vmem:[#allocation8 + $0x520] ss:$16 sps:$4 sm:$0xff]  }
  0xb3   :  { %5960 = vmatprep.subr.bf16.mxu0 %v13348_v30  ;;  %7316 = vmatprep.subr.bf16.mxu1 %v13351_v31  ;;  %v13409_v30 = vld [vmem:[#allocation8 + $0x528] ss:$16 sps:$4 sm:$0xff]   ;;  %v13414_v31 = vld [vmem:[#allocation8 + $0x544] ss:$16 sps:$4 sm:$0xff]  }
  0xb4   :  { %5962 = vmatprep.mubr.bf16.mxu0 %v11191_v32  ;;  %7318 = vmatprep.mubr.bf16.mxu1 %v11191_v32  ;;  %v13417_v32 = vld [vmem:[#allocation8 + $0x54c] ss:$16 sps:$4 sm:$0xff]  }
  0xb6   :  { %5961 = vmatpush1.bf16.msra.mxu0 %v13346_v33  ;;  %7317 = vmatpush1.bf16.msra.mxu1 %v13349_v34  ;;  %v202_v33 = vld [vmem:[#allocation5 + $0x488] sm:$0xff]  ;;  %v11310_v34 = vcombine.low %v178_v24, %v190_v25  ;;  %v13466_v25 = vld [vmem:[#allocation8 + $0x660] ss:$16 sps:$4 sm:$0xff]  }
  0xb7   :  { %6043 = vmatprep.subr.bf16.mxu0 %v13354_v35  ;;  %7399 = vmatprep.subr.bf16.mxu1 %v13357_v36  ;;  %v214_v35 = vld [vmem:[#allocation5 + $0x4e8] sm:$0xff]  ;;  %v13412_v36 = vld [vmem:[#allocation8 + $0x540] ss:$16 sps:$4 sm:$0xff]  }
  0xb9   :  { %5963 = vmatmul.mubr.bf16.vlgmr.msra.gmra.mrb[0].mxu0 %v11190_v38  ;;  %7319 = vmatmul.mubr.bf16.vlgmr.msra.gmra.mrb[0].mxu1 %v11190_v38  ;;  %v13420_v38 = vld [vmem:[#allocation8 + $0x564] ss:$16 sps:$4 sm:$0xff]  }
  0xba   :  { %6044 = vmatpush1.bf16.msra.mxu0 %v13352_v40  ;;  %7400 = vmatpush1.bf16.msra.mxu1 %v13355_v41  ;;  %v11335_v40 = vcombine.high %v202_v33, %v214_v35  ;;  %v13418_v41 = vld [vmem:[#allocation8 + $0x560] ss:$16 sps:$4 sm:$0xff]  }
  0xbb   :  { %6045 = vmatprep.subr.bf16.mxu0 %v13360_v42  ;;  %7401 = vmatprep.subr.bf16.mxu1 %v13363_v43  ;;  %v13421_v42 = vld [vmem:[#allocation8 + $0x568] ss:$16 sps:$4 sm:$0xff]   ;;  %v13426_v43 = vld [vmem:[#allocation8 + $0x584] ss:$16 sps:$4 sm:$0xff]  }
  0xbc   :  { %5972 = vmatprep.mubr.bf16.mxu0 %v11215_v44  ;;  %7328 = vmatprep.mubr.bf16.mxu1 %v11215_v44  ;;  %v13429_v44 = vld [vmem:[#allocation8 + $0x58c] ss:$16 sps:$4 sm:$0xff]  }
  0xbe   :  { %6046 = vmatpush1.bf16.msra.mxu0 %v13358_v45  ;;  %7402 = vmatpush1.bf16.msra.mxu1 %v13361_v46  ;;  %v226_v45 = vld [vmem:[#allocation5 + $0x548] sm:$0xff]  ;;  %v11334_v46 = vcombine.low %v202_v33, %v214_v35  ;;  %v143_v33 = vld [vmem:[#allocation5 + $0x2b0] sm:$0xff] }
  0xbf   :  { %6047 = vmatprep.subr.bf16.mxu0 %v13366_v47  ;;  %7403 = vmatprep.subr.bf16.mxu1 %v13369_v48  ;;  %v238_v47 = vld [vmem:[#allocation5 + $0x5a8] sm:$0xff]  ;;  %v13424_v48 = vld [vmem:[#allocation8 + $0x580] ss:$16 sps:$4 sm:$0xff]  }
  0xc0   :  { %v11359_v52 = vcombine.high %v226_v45, %v238_v47  ;;  %v13483_v35 = vld [vmem:[#allocation8 + $0x6ac] ss:$16 sps:$4 sm:$0xff]  }
  0xc1   :  { %5973 = vmatmul.mubr.bf16.gmra.mrb[4].mxu0 %v11214_v51  ;;  %7329 = vmatmul.mubr.bf16.gmra.mrb[4].mxu1 %v11214_v51  ;;  %v13435_v51 = vld [vmem:[#allocation8 + $0x5ac] ss:$16 sps:$4 sm:$0xff]  }
  0xc2   :  { %6048 = vmatpush1.bf16.msra.mxu0 %v13364_v49  ;;  %7404 = vmatpush1.bf16.msra.mxu1 %v13367_v50  ;;  %v13427_v49 = vld [vmem:[#allocation8 + $0x588] ss:$16 sps:$4 sm:$0xff]   ;;  %v13432_v50 = vld [vmem:[#allocation8 + $0x5a4] ss:$16 sps:$4 sm:$0xff]  }
  0xc3   :  { %6049 = vmatprep.subr.bf16.mxu0 %v13372_v54  ;;  %7405 = vmatprep.subr.bf16.mxu1 %v13375_v55  ;;  %v13433_v54 = vld [vmem:[#allocation8 + $0x5a8] ss:$16 sps:$4 sm:$0xff]   ;;  %v13438_v55 = vld [vmem:[#allocation8 + $0x5c4] ss:$16 sps:$4 sm:$0xff]  }
  0xc4   :  { %5982 = vmatprep.mubr.bf16.mxu0 %v11239_v56  ;;  %7338 = vmatprep.mubr.bf16.mxu1 %v11239_v56  ;;  %v13441_v56 = vld [vmem:[#allocation8 + $0x5cc] ss:$16 sps:$4 sm:$0xff]  }
  0xc6   :  { %6050 = vmatpush1.bf16.msra.mxu0 %v13370_v57  ;;  %7406 = vmatpush1.bf16.msra.mxu1 %v13373_v58  ;;  %v13436_v57 = vld [vmem:[#allocation8 + $0x5c0] ss:$16 sps:$4 sm:$0xff]   ;;  %v13439_v58 = vld [vmem:[#allocation8 + $0x5c8] ss:$16 sps:$4 sm:$0xff]  }
  0xc7   :  { %6051 = vmatprep.subr.bf16.mxu0 %v13378_v59  ;;  %7407 = vmatprep.subr.bf16.mxu1 %v13381_v60  ;;  %v11358_v59 = vcombine.low %v226_v45, %v238_v47  ;;  %v59_v60 = vld [vmem:[#allocation5 + $0x10] sm:$0xff]  ;;  %v13487_v45 = vld [vmem:[#allocation8 + $0x6c8] ss:$16 sps:$4 sm:$0xff]   ;;  %v13495_v47 = vld [vmem:[#allocation8 + $0x6ec] ss:$16 sps:$4 sm:$0xff]  }
  0xc9   :  { %5983 = vmatmul.mubr.bf16.gmra.mrb[8].mxu0 %v11238_v62  ;;  %7339 = vmatmul.mubr.bf16.gmra.mrb[8].mxu1 %v11238_v62  ;;  %v13444_v62 = vld [vmem:[#allocation8 + $0x5e4] ss:$16 sps:$4 sm:$0xff]  }
  0xca   :  { %6052 = vmatpush1.bf16.msra.mxu0 %v13376_v0  ;;  %7408 = vmatpush1.bf16.msra.mxu1 %v13379_v1  ;;  %v11193_v0 = vcombine.high %v59_v60, %v71_v61  ;;  %v13442_v1 = vld [vmem:[#allocation8 + $0x5e0] ss:$16 sps:$4 sm:$0xff]  }
  0xcb   :  { %6053 = vmatprep.subr.bf16.mxu0 %v13384_v2  ;;  %7409 = vmatprep.subr.bf16.mxu1 %v13387_v3  ;;  %v13445_v2 = vld [vmem:[#allocation8 + $0x5e8] ss:$16 sps:$4 sm:$0xff]   ;;  %v13450_v3 = vld [vmem:[#allocation8 + $0x604] ss:$16 sps:$4 sm:$0xff]  }
  0xcc   :  { %5992 = vmatprep.mubr.bf16.mxu0 %v11263_v4  ;;  %7348 = vmatprep.mubr.bf16.mxu1 %v11263_v4  ;;  %v13453_v4 = vld [vmem:[#allocation8 + $0x60c] ss:$16 sps:$4 sm:$0xff]  }
  0xce   :  { %6054 = vmatpush1.bf16.msra.mxu0 %v13382_v5  ;;  %7410 = vmatpush1.bf16.msra.mxu1 %v13385_v6  ;;  %v83_v5 = vld [vmem:[#allocation5 + $0xd0] sm:$0xff]  ;;  %v11192_v6 = vcombine.low %v59_v60, %v71_v61 }
  0xcf   :  { %6055 = vmatprep.subr.bf16.mxu0 %v13390_v7  ;;  %7411 = vmatprep.subr.bf16.mxu1 %v13393_v8  ;;  %v95_v7 = vld [vmem:[#allocation5 + $0x130] sm:$0xff] }
  0xd0   :  { %v13448_v8 = vld [vmem:[#allocation8 + $0x600] ss:$16 sps:$4 sm:$0xff]  }
  0xd1   :  { %5993 = vmatmul.mubr.bf16.gmra.mrb[12].mxu0 %v11262_v10  ;;  %7349 = vmatmul.mubr.bf16.gmra.mrb[12].mxu1 %v11262_v10  ;;  %v13456_v10 = vld [vmem:[#allocation8 + $0x624] ss:$16 sps:$4 sm:$0xff]   ;;  %v13502_v61 = vld [vmem:[#allocation8 + $0x720] ss:$16 sps:$4 sm:$0xff]  }
  0xd2   :  { %6056 = vmatpush1.bf16.msra.mxu0 %v13388_v12  ;;  %7412 = vmatpush1.bf16.msra.mxu1 %v13391_v13  ;;  %v11217_v12 = vcombine.high %v83_v5, %v95_v7  ;;  %v13454_v13 = vld [vmem:[#allocation8 + $0x620] ss:$16 sps:$4 sm:$0xff]  }
  0xd3   :  { %6057 = vmatprep.subr.bf16.mxu0 %v13396_v14  ;;  %7413 = vmatprep.subr.bf16.mxu1 %v13399_v15  ;;  %v13457_v14 = vld [vmem:[#allocation8 + $0x628] ss:$16 sps:$4 sm:$0xff]   ;;  %v13462_v15 = vld [vmem:[#allocation8 + $0x644] ss:$16 sps:$4 sm:$0xff]  }
  0xd4   :  { %6002 = vmatprep.mubr.bf16.mxu0 %v11287_v16  ;;  %7358 = vmatprep.mubr.bf16.mxu1 %v11287_v16  ;;  %v13465_v16 = vld [vmem:[#allocation8 + $0x64c] ss:$16 sps:$4 sm:$0xff]  }
  0xd6   :  { %6058 = vmatpush1.bf16.msra.mxu0 %v13394_v17  ;;  %7414 = vmatpush1.bf16.msra.mxu1 %v13397_v18  ;;  %v107_v17 = vld [vmem:[#allocation5 + $0x190] sm:$0xff]  ;;  %v11216_v18 = vcombine.low %v83_v5, %v95_v7  ;;  %v13519_v7 = vld [vmem:[#allocation8 + $0x76c] ss:$16 sps:$4 sm:$0xff]  }
  0xd7   :  { %6059 = vmatprep.subr.bf16.mxu0 %v13402_v19  ;;  %7415 = vmatprep.subr.bf16.mxu1 %v13405_v20  ;;  %v119_v19 = vld [vmem:[#allocation5 + $0x1f0] sm:$0xff] }
  0xd8   :  { %v13460_v20 = vld [vmem:[#allocation8 + $0x640] ss:$16 sps:$4 sm:$0xff]   ;;  %v11241_v24 = vcombine.high %v107_v17, %v119_v19 }
  0xd9   :  { %6003 = vmatmul.mubr.bf16.gmra.mrb[16].mxu0 %v11286_v23  ;;  %7359 = vmatmul.mubr.bf16.gmra.mrb[16].mxu1 %v11286_v23  ;;  %v13471_v23 = vld [vmem:[#allocation8 + $0x66c] ss:$16 sps:$4 sm:$0xff]   ;;  %v215_v5 = vld [vmem:[#allocation5 + $0x4f0] sm:$0xff] }
  0xda   :  { %6060 = vmatpush1.bf16.msra.mxu0 %v13400_v21  ;;  %7416 = vmatpush1.bf16.msra.mxu1 %v13403_v22  ;;  %v13463_v21 = vld [vmem:[#allocation8 + $0x648] ss:$16 sps:$4 sm:$0xff]   ;;  %v13468_v22 = vld [vmem:[#allocation8 + $0x664] ss:$16 sps:$4 sm:$0xff]  }
  0xdb   :  { %6061 = vmatprep.subr.bf16.mxu0 %v13408_v26  ;;  %7417 = vmatprep.subr.bf16.mxu1 %v13411_v27  ;;  %v13469_v26 = vld [vmem:[#allocation8 + $0x668] ss:$16 sps:$4 sm:$0xff]   ;;  %v13474_v27 = vld [vmem:[#allocation8 + $0x684] ss:$16 sps:$4 sm:$0xff]  }
  0xdc   :  { %6012 = vmatprep.mubr.bf16.mxu0 %v11311_v28  ;;  %7368 = vmatprep.mubr.bf16.mxu1 %v11311_v28  ;;  %v13477_v28 = vld [vmem:[#allocation8 + $0x68c] ss:$16 sps:$4 sm:$0xff]  }
  0xde   :  { %6062 = vmatpush1.bf16.msra.mxu0 %v13406_v29  ;;  %7418 = vmatpush1.bf16.msra.mxu1 %v13409_v30  ;;  %v13472_v29 = vld [vmem:[#allocation8 + $0x680] ss:$16 sps:$4 sm:$0xff]   ;;  %v13475_v30 = vld [vmem:[#allocation8 + $0x688] ss:$16 sps:$4 sm:$0xff]  }
  0xdf   :  { %6063 = vmatprep.subr.bf16.mxu0 %v13414_v31  ;;  %7419 = vmatprep.subr.bf16.mxu1 %v13417_v32  ;;  %v11240_v31 = vcombine.low %v107_v17, %v119_v19  ;;  %v131_v32 = vld [vmem:[#allocation5 + $0x250] sm:$0xff]  ;;  %v13523_v17 = vld [vmem:[#allocation8 + $0x788] ss:$16 sps:$4 sm:$0xff]   ;;  %v13531_v19 = vld [vmem:[#allocation8 + $0x7ac] ss:$16 sps:$4 sm:$0xff]  }
  0xe1   :  { %6013 = vmatmul.mubr.bf16.gmra.mrb[20].mxu0 %v11310_v34  ;;  %7369 = vmatmul.mubr.bf16.gmra.mrb[20].mxu1 %v11310_v34  ;;  %v13480_v34 = vld [vmem:[#allocation8 + $0x6a4] ss:$16 sps:$4 sm:$0xff]  }
  0xe2   :  { %6064 = vmatpush1.bf16.msra.mxu0 %v13412_v36  ;;  %7420 = vmatpush1.bf16.msra.mxu1 %v13415_v37  ;;  %v11265_v36 = vcombine.high %v131_v32, %v143_v33  ;;  %v13478_v37 = vld [vmem:[#allocation8 + $0x6a0] ss:$16 sps:$4 sm:$0xff]  }
  0xe3   :  { %6065 = vmatprep.subr.bf16.mxu0 %v13420_v38  ;;  %7421 = vmatprep.subr.bf16.mxu1 %v13423_v39  ;;  %v13481_v38 = vld [vmem:[#allocation8 + $0x6a8] ss:$16 sps:$4 sm:$0xff]   ;;  %v13486_v39 = vld [vmem:[#allocation8 + $0x6c4] ss:$16 sps:$4 sm:$0xff]  }
  0xe4   :  { %6022 = vmatprep.mubr.bf16.mxu0 %v11335_v40  ;;  %7378 = vmatprep.mubr.bf16.mxu1 %v11335_v40  ;;  %v13489_v40 = vld [vmem:[#allocation8 + $0x6cc] ss:$16 sps:$4 sm:$0xff]  }
  0xe6   :  { %6066 = vmatpush1.bf16.msra.mxu0 %v13418_v41  ;;  %7422 = vmatpush1.bf16.msra.mxu1 %v13421_v42  ;;  %v155_v41 = vld [vmem:[#allocation5 + $0x310] sm:$0xff]  ;;  %v11264_v42 = vcombine.low %v131_v32, %v143_v33 }
  0xe7   :  { %6067 = vmatprep.subr.bf16.mxu0 %v13426_v43  ;;  %7423 = vmatprep.subr.bf16.mxu1 %v13429_v44  ;;  %v167_v43 = vld [vmem:[#allocation5 + $0x370] sm:$0xff] }
  0xe8   :  { %v13484_v44 = vld [vmem:[#allocation8 + $0x6c0] ss:$16 sps:$4 sm:$0xff]  }
  0xe9   :  { %6023 = vmatmul.mubr.bf16.gmra.mrb[24].mxu0 %v11334_v46  ;;  %7379 = vmatmul.mubr.bf16.gmra.mrb[24].mxu1 %v11334_v46  ;;  %v13492_v46 = vld [vmem:[#allocation8 + $0x6e4] ss:$16 sps:$4 sm:$0xff]   ;;  %v13538_v33 = vld [vmem:[#allocation8 + $0x7e0] ss:$16 sps:$4 sm:$0xff]  }
  0xea   :  { %6068 = vmatpush1.bf16.msra.mxu0 %v13424_v48  ;;  %7424 = vmatpush1.bf16.msra.mxu1 %v13427_v49  ;;  %v11289_v48 = vcombine.high %v155_v41, %v167_v43  ;;  %v13490_v49 = vld [vmem:[#allocation8 + $0x6e0] ss:$16 sps:$4 sm:$0xff]  }
  0xeb   :  { %6069 = vmatprep.subr.bf16.mxu0 %v13432_v50  ;;  %7425 = vmatprep.subr.bf16.mxu1 %v13435_v51  ;;  %v13493_v50 = vld [vmem:[#allocation8 + $0x6e8] ss:$16 sps:$4 sm:$0xff]   ;;  %v13498_v51 = vld [vmem:[#allocation8 + $0x704] ss:$16 sps:$4 sm:$0xff]  }
  0xec   :  { %6032 = vmatprep.mubr.bf16.mxu0 %v11359_v52  ;;  %7388 = vmatprep.mubr.bf16.mxu1 %v11359_v52  ;;  %v13501_v52 = vld [vmem:[#allocation8 + $0x70c] ss:$16 sps:$4 sm:$0xff]  }
  0xee   :  { %6070 = vmatpush1.bf16.msra.mxu0 %v13430_v53  ;;  %7426 = vmatpush1.bf16.msra.mxu1 %v13433_v54  ;;  %v179_v53 = vld [vmem:[#allocation5 + $0x3d0] sm:$0xff]  ;;  %v11288_v54 = vcombine.low %v155_v41, %v167_v43  ;;  %v96_v41 = vld [vmem:[#allocation5 + $0x138] sm:$0xff] }
  0xef   :  { %6071 = vmatprep.subr.bf16.mxu0 %v13438_v55  ;;  %7427 = vmatprep.subr.bf16.mxu1 %v13441_v56  ;;  %v191_v55 = vld [vmem:[#allocation5 + $0x430] sm:$0xff]  ;;  %v13555_v43 = vld [vmem:[#allocation8 + $0x82c] ss:$16 sps:$4 sm:$0xff]  }
  0xf0   :  { %v13496_v56 = vld [vmem:[#allocation8 + $0x700] ss:$16 sps:$4 sm:$0xff]   ;;  %v11313_v60 = vcombine.high %v179_v53, %v191_v55 }
  0xf1   :  { %6033 = vmatmul.mubr.bf16.gmra.mrb[32].mxu0 %v11358_v59  ;;  %7389 = vmatmul.mubr.bf16.gmra.mrb[32].mxu1 %v11358_v59  ;;  %v13507_v59 = vld [vmem:[#allocation8 + $0x72c] ss:$16 sps:$4 sm:$0xff]  }
  0xf2   :  { %6072 = vmatpush1.bf16.msra.mxu0 %v13436_v57  ;;  %7428 = vmatpush1.bf16.msra.mxu1 %v13439_v58  ;;  %v13499_v57 = vld [vmem:[#allocation8 + $0x708] ss:$16 sps:$4 sm:$0xff]   ;;  %v13504_v58 = vld [vmem:[#allocation8 + $0x724] ss:$16 sps:$4 sm:$0xff]  }
  0xf3   :  { %6073 = vmatprep.subr.bf16.mxu0 %v13444_v62  ;;  %7429 = vmatprep.subr.bf16.mxu1 %v13447_v63  ;;  %v13505_v62 = vld [vmem:[#allocation8 + $0x728] ss:$16 sps:$4 sm:$0xff]   ;;  %v13510_v63 = vld [vmem:[#allocation8 + $0x744] ss:$16 sps:$4 sm:$0xff]  }
  0xf4   :  { %6075 = vmatprep.mubr.bf16.mxu0 %v11193_v0  ;;  %7431 = vmatprep.mubr.bf16.mxu1 %v11193_v0  ;;  %v13513_v0 = vld [vmem:[#allocation8 + $0x74c] ss:$16 sps:$4 sm:$0xff]  }
  0xf6   :  { %6074 = vmatpush1.bf16.msra.mxu0 %v13442_v1  ;;  %7430 = vmatpush1.bf16.msra.mxu1 %v13445_v2  ;;  %v13508_v1 = vld [vmem:[#allocation8 + $0x740] ss:$16 sps:$4 sm:$0xff]   ;;  %v13511_v2 = vld [vmem:[#allocation8 + $0x748] ss:$16 sps:$4 sm:$0xff]  }
  0xf7   :  { %6156 = vmatprep.subr.bf16.mxu0 %v13450_v3  ;;  %7512 = vmatprep.subr.bf16.mxu1 %v13453_v4  ;;  %v11312_v3 = vcombine.low %v179_v53, %v191_v55  ;;  %v203_v4 = vld [vmem:[#allocation5 + $0x490] sm:$0xff]  ;;  %v13559_v53 = vld [vmem:[#allocation8 + $0x848] ss:$16 sps:$4 sm:$0xff]   ;;  %v13567_v55 = vld [vmem:[#allocation8 + $0x86c] ss:$16 sps:$4 sm:$0xff]  }
  0xf9   :  { %6076 = vmatmul.mubr.bf16.vlgmr.msra.gmra.mrb[0].mxu0 %v11192_v6  ;;  %7432 = vmatmul.mubr.bf16.vlgmr.msra.gmra.mrb[0].mxu1 %v11192_v6  ;;  %v13516_v6 = vld [vmem:[#allocation8 + $0x764] ss:$16 sps:$4 sm:$0xff]  }
  0xfa   :  { %6157 = vmatpush1.bf16.msra.mxu0 %v13448_v8  ;;  %7513 = vmatpush1.bf16.msra.mxu1 %v13451_v9  ;;  %v11337_v8 = vcombine.high %v203_v4, %v215_v5  ;;  %v13514_v9 = vld [vmem:[#allocation8 + $0x760] ss:$16 sps:$4 sm:$0xff]  }
  0xfb   :  { %6158 = vmatprep.subr.bf16.mxu0 %v13456_v10  ;;  %7514 = vmatprep.subr.bf16.mxu1 %v13459_v11  ;;  %v13517_v10 = vld [vmem:[#allocation8 + $0x768] ss:$16 sps:$4 sm:$0xff]   ;;  %v13522_v11 = vld [vmem:[#allocation8 + $0x784] ss:$16 sps:$4 sm:$0xff]  }
  0xfc   :  { %6085 = vmatprep.mubr.bf16.mxu0 %v11217_v12  ;;  %7441 = vmatprep.mubr.bf16.mxu1 %v11217_v12  ;;  %v13525_v12 = vld [vmem:[#allocation8 + $0x78c] ss:$16 sps:$4 sm:$0xff]  }
  0xfe   :  { %6159 = vmatpush1.bf16.msra.mxu0 %v13454_v13  ;;  %7515 = vmatpush1.bf16.msra.mxu1 %v13457_v14  ;;  %v227_v13 = vld [vmem:[#allocation5 + $0x550] sm:$0xff]  ;;  %v11336_v14 = vcombine.low %v203_v4, %v215_v5 }
  0xff   :  { %6160 = vmatprep.subr.bf16.mxu0 %v13462_v15  ;;  %7516 = vmatprep.subr.bf16.mxu1 %v13465_v16  ;;  %v239_v15 = vld [vmem:[#allocation5 + $0x5b0] sm:$0xff] }
 0x100   :  { %v13520_v16 = vld [vmem:[#allocation8 + $0x780] ss:$16 sps:$4 sm:$0xff]  }
 0x101   :  { %6086 = vmatmul.mubr.bf16.gmra.mrb[4].mxu0 %v11216_v18  ;;  %7442 = vmatmul.mubr.bf16.gmra.mrb[4].mxu1 %v11216_v18  ;;  %v13528_v18 = vld [vmem:[#allocation8 + $0x7a4] ss:$16 sps:$4 sm:$0xff]   ;;  %v13574_v5 = vld [vmem:[#allocation8 + $0x8a0] ss:$16 sps:$4 sm:$0xff]  }
 0x102   :  { %6161 = vmatpush1.bf16.msra.mxu0 %v13460_v20  ;;  %7517 = vmatpush1.bf16.msra.mxu1 %v13463_v21  ;;  %v11361_v20 = vcombine.high %v227_v13, %v239_v15  ;;  %v13526_v21 = vld [vmem:[#allocation8 + $0x7a0] ss:$16 sps:$4 sm:$0xff]  }
 0x103   :  { %6162 = vmatprep.subr.bf16.mxu0 %v13468_v22  ;;  %7518 = vmatprep.subr.bf16.mxu1 %v13471_v23  ;;  %v13529_v22 = vld [vmem:[#allocation8 + $0x7a8] ss:$16 sps:$4 sm:$0xff]   ;;  %v13534_v23 = vld [vmem:[#allocation8 + $0x7c4] ss:$16 sps:$4 sm:$0xff]  }
 0x104   :  { %6095 = vmatprep.mubr.bf16.mxu0 %v11241_v24  ;;  %7451 = vmatprep.mubr.bf16.mxu1 %v11241_v24  ;;  %v13537_v24 = vld [vmem:[#allocation8 + $0x7cc] ss:$16 sps:$4 sm:$0xff]  }
 0x106   :  { %6163 = vmatpush1.bf16.msra.mxu0 %v13466_v25  ;;  %7519 = vmatpush1.bf16.msra.mxu1 %v13469_v26  ;;  %v60_v25 = vld [vmem:[#allocation5 + $0x18] sm:$0xff]  ;;  %v11360_v26 = vcombine.low %v227_v13, %v239_v15 }
 0x107   :  { %6164 = vmatprep.subr.bf16.mxu0 %v13474_v27  ;;  %7520 = vmatprep.subr.bf16.mxu1 %v13477_v28  ;;  %v72_v27 = vld [vmem:[#allocation5 + $0x78] sm:$0xff]  ;;  %v13532_v28 = vld [vmem:[#allocation8 + $0x7c0] ss:$16 sps:$4 sm:$0xff]  }
 0x108   :  { %v11195_v32 = vcombine.high %v60_v25, %v72_v27  ;;  %v168_v13 = vld [vmem:[#allocation5 + $0x378] sm:$0xff] }
 0x109   :  { %6096 = vmatmul.mubr.bf16.gmra.mrb[8].mxu0 %v11240_v31  ;;  %7452 = vmatmul.mubr.bf16.gmra.mrb[8].mxu1 %v11240_v31  ;;  %v13543_v31 = vld [vmem:[#allocation8 + $0x7ec] ss:$16 sps:$4 sm:$0xff]  }
 0x10a   :  { %6165 = vmatpush1.bf16.msra.mxu0 %v13472_v29  ;;  %7521 = vmatpush1.bf16.msra.mxu1 %v13475_v30  ;;  %v13535_v29 = vld [vmem:[#allocation8 + $0x7c8] ss:$16 sps:$4 sm:$0xff]   ;;  %v13540_v30 = vld [vmem:[#allocation8 + $0x7e4] ss:$16 sps:$4 sm:$0xff]   ;;  %v13591_v15 = vld [vmem:[#allocation8 + $0x8ec] ss:$16 sps:$4 sm:$0xff]  }
 0x10b   :  { %6166 = vmatprep.subr.bf16.mxu0 %v13480_v34  ;;  %7522 = vmatprep.subr.bf16.mxu1 %v13483_v35  ;;  %v13541_v34 = vld [vmem:[#allocation8 + $0x7e8] ss:$16 sps:$4 sm:$0xff]   ;;  %v13546_v35 = vld [vmem:[#allocation8 + $0x804] ss:$16 sps:$4 sm:$0xff]  }
 0x10c   :  { %6105 = vmatprep.mubr.bf16.mxu0 %v11265_v36  ;;  %7461 = vmatprep.mubr.bf16.mxu1 %v11265_v36  ;;  %v13549_v36 = vld [vmem:[#allocation8 + $0x80c] ss:$16 sps:$4 sm:$0xff]  }
 0x10e   :  { %6167 = vmatpush1.bf16.msra.mxu0 %v13478_v37  ;;  %7523 = vmatpush1.bf16.msra.mxu1 %v13481_v38  ;;  %v13544_v37 = vld [vmem:[#allocation8 + $0x800] ss:$16 sps:$4 sm:$0xff]   ;;  %v13547_v38 = vld [vmem:[#allocation8 + $0x808] ss:$16 sps:$4 sm:$0xff]  }
 0x10f   :  { %6168 = vmatprep.subr.bf16.mxu0 %v13486_v39  ;;  %7524 = vmatprep.subr.bf16.mxu1 %v13489_v40  ;;  %v11194_v39 = vcombine.low %v60_v25, %v72_v27  ;;  %v84_v40 = vld [vmem:[#allocation5 + $0xd8] sm:$0xff] }
 0x110   :  { %v13595_v25 = vld [vmem:[#allocation8 + $0x908] ss:$16 sps:$4 sm:$0xff]   ;;  %v13603_v27 = vld [vmem:[#allocation8 + $0x92c] ss:$16 sps:$4 sm:$0xff]  }
 0x111   :  { %6106 = vmatmul.mubr.bf16.gmra.mrb[12].mxu0 %v11264_v42  ;;  %7462 = vmatmul.mubr.bf16.gmra.mrb[12].mxu1 %v11264_v42  ;;  %v13552_v42 = vld [vmem:[#allocation8 + $0x824] ss:$16 sps:$4 sm:$0xff]  }
 0x112   :  { %6169 = vmatpush1.bf16.msra.mxu0 %v13484_v44  ;;  %7525 = vmatpush1.bf16.msra.mxu1 %v13487_v45  ;;  %v11219_v44 = vcombine.high %v84_v40, %v96_v41  ;;  %v13550_v45 = vld [vmem:[#allocation8 + $0x820] ss:$16 sps:$4 sm:$0xff]  }
 0x113   :  { %6170 = vmatprep.subr.bf16.mxu0 %v13492_v46  ;;  %7526 = vmatprep.subr.bf16.mxu1 %v13495_v47  ;;  %v13553_v46 = vld [vmem:[#allocation8 + $0x828] ss:$16 sps:$4 sm:$0xff]   ;;  %v13558_v47 = vld [vmem:[#allocation8 + $0x844] ss:$16 sps:$4 sm:$0xff]  }
 0x114   :  { %6115 = vmatprep.mubr.bf16.mxu0 %v11289_v48  ;;  %7471 = vmatprep.mubr.bf16.mxu1 %v11289_v48  ;;  %v13561_v48 = vld [vmem:[#allocation8 + $0x84c] ss:$16 sps:$4 sm:$0xff]  }
 0x116   :  { %6171 = vmatpush1.bf16.msra.mxu0 %v13490_v49  ;;  %7527 = vmatpush1.bf16.msra.mxu1 %v13493_v50  ;;  %v108_v49 = vld [vmem:[#allocation5 + $0x198] sm:$0xff]  ;;  %v11218_v50 = vcombine.low %v84_v40, %v96_v41  ;;  %v13610_v41 = vld [vmem:[#allocation8 + $0x960] ss:$16 sps:$4 sm:$0xff]  }
 0x117   :  { %6172 = vmatprep.subr.bf16.mxu0 %v13498_v51  ;;  %7528 = vmatprep.subr.bf16.mxu1 %v13501_v52  ;;  %v120_v51 = vld [vmem:[#allocation5 + $0x1f8] sm:$0xff]  ;;  %v13556_v52 = vld [vmem:[#allocation8 + $0x840] ss:$16 sps:$4 sm:$0xff]  }
 0x119   :  { %6116 = vmatmul.mubr.bf16.gmra.mrb[16].mxu0 %v11288_v54  ;;  %7472 = vmatmul.mubr.bf16.gmra.mrb[16].mxu1 %v11288_v54  ;;  %v13564_v54 = vld [vmem:[#allocation8 + $0x864] ss:$16 sps:$4 sm:$0xff]  }
 0x11a   :  { %6173 = vmatpush1.bf16.msra.mxu0 %v13496_v56  ;;  %7529 = vmatpush1.bf16.msra.mxu1 %v13499_v57  ;;  %v11243_v56 = vcombine.high %v108_v49, %v120_v51  ;;  %v13562_v57 = vld [vmem:[#allocation8 + $0x860] ss:$16 sps:$4 sm:$0xff]  }
 0x11b   :  { %6174 = vmatprep.subr.bf16.mxu0 %v13504_v58  ;;  %7530 = vmatprep.subr.bf16.mxu1 %v13507_v59  ;;  %v13565_v58 = vld [vmem:[#allocation8 + $0x868] ss:$16 sps:$4 sm:$0xff]   ;;  %v13570_v59 = vld [vmem:[#allocation8 + $0x884] ss:$16 sps:$4 sm:$0xff]  }
 0x11c   :  { %6125 = vmatprep.mubr.bf16.mxu0 %v11313_v60  ;;  %7481 = vmatprep.mubr.bf16.mxu1 %v11313_v60  ;;  %v13573_v60 = vld [vmem:[#allocation8 + $0x88c] ss:$16 sps:$4 sm:$0xff]  }
 0x11e   :  { %6175 = vmatpush1.bf16.msra.mxu0 %v13502_v61  ;;  %7531 = vmatpush1.bf16.msra.mxu1 %v13505_v62  ;;  %v132_v61 = vld [vmem:[#allocation5 + $0x258] sm:$0xff]  ;;  %v11242_v62 = vcombine.low %v108_v49, %v120_v51 }
 0x11f   :  { %6176 = vmatprep.subr.bf16.mxu0 %v13510_v63  ;;  %7532 = vmatprep.subr.bf16.mxu1 %v13513_v0  ;;  %v144_v63 = vld [vmem:[#allocation5 + $0x2b8] sm:$0xff]  ;;  %v13568_v0 = vld [vmem:[#allocation8 + $0x880] ss:$16 sps:$4 sm:$0xff]  }
 0x120   :  { %v11267_v4 = vcombine.high %v132_v61, %v144_v63  ;;  %v240_v49 = vld [vmem:[#allocation5 + $0x5b8] sm:$0xff] }
 0x121   :  { %6126 = vmatmul.mubr.bf16.gmra.mrb[20].mxu0 %v11312_v3  ;;  %7482 = vmatmul.mubr.bf16.gmra.mrb[20].mxu1 %v11312_v3  ;;  %v13579_v3 = vld [vmem:[#allocation8 + $0x8ac] ss:$16 sps:$4 sm:$0xff]  }
 0x122   :  { %6177 = vmatpush1.bf16.msra.mxu0 %v13508_v1  ;;  %7533 = vmatpush1.bf16.msra.mxu1 %v13511_v2  ;;  %v13571_v1 = vld [vmem:[#allocation8 + $0x888] ss:$16 sps:$4 sm:$0xff]   ;;  %v13576_v2 = vld [vmem:[#allocation8 + $0x8a4] ss:$16 sps:$4 sm:$0xff]   ;;  %v13627_v51 = vld [vmem:[#allocation8 + $0x9ac] ss:$16 sps:$4 sm:$0xff]  }
 0x123   :  { %6178 = vmatprep.subr.bf16.mxu0 %v13516_v6  ;;  %7534 = vmatprep.subr.bf16.mxu1 %v13519_v7  ;;  %v13577_v6 = vld [vmem:[#allocation8 + $0x8a8] ss:$16 sps:$4 sm:$0xff]   ;;  %v13582_v7 = vld [vmem:[#allocation8 + $0x8c4] ss:$16 sps:$4 sm:$0xff]  }
 0x124   :  { %6135 = vmatprep.mubr.bf16.mxu0 %v11337_v8  ;;  %7491 = vmatprep.mubr.bf16.mxu1 %v11337_v8  ;;  %v13585_v8 = vld [vmem:[#allocation8 + $0x8cc] ss:$16 sps:$4 sm:$0xff]  }
 0x126   :  { %6179 = vmatpush1.bf16.msra.mxu0 %v13514_v9  ;;  %7535 = vmatpush1.bf16.msra.mxu1 %v13517_v10  ;;  %v13580_v9 = vld [vmem:[#allocation8 + $0x8c0] ss:$16 sps:$4 sm:$0xff]   ;;  %v13583_v10 = vld [vmem:[#allocation8 + $0x8c8] ss:$16 sps:$4 sm:$0xff]  }
 0x127   :  { %6180 = vmatprep.subr.bf16.mxu0 %v13522_v11  ;;  %7536 = vmatprep.subr.bf16.mxu1 %v13525_v12  ;;  %v11266_v11 = vcombine.low %v132_v61, %v144_v63  ;;  %v156_v12 = vld [vmem:[#allocation5 + $0x318] sm:$0xff] }
 0x128   :  { %v13631_v61 = vld [vmem:[#allocation8 + $0x9c8] ss:$16 sps:$4 sm:$0xff]   ;;  %v13639_v63 = vld [vmem:[#allocation8 + $0x9ec] ss:$16 sps:$4 sm:$0xff]  }
 0x129   :  { %6136 = vmatmul.mubr.bf16.gmra.mrb[24].mxu0 %v11336_v14  ;;  %7492 = vmatmul.mubr.bf16.gmra.mrb[24].mxu1 %v11336_v14  ;;  %v13588_v14 = vld [vmem:[#allocation8 + $0x8e4] ss:$16 sps:$4 sm:$0xff]  }
 0x12a   :  { %6181 = vmatpush1.bf16.msra.mxu0 %v13520_v16  ;;  %7537 = vmatpush1.bf16.msra.mxu1 %v13523_v17  ;;  %v11291_v16 = vcombine.high %v156_v12, %v168_v13  ;;  %v13586_v17 = vld [vmem:[#allocation8 + $0x8e0] ss:$16 sps:$4 sm:$0xff]  }
 0x12b   :  { %6182 = vmatprep.subr.bf16.mxu0 %v13528_v18  ;;  %7538 = vmatprep.subr.bf16.mxu1 %v13531_v19  ;;  %v13589_v18 = vld [vmem:[#allocation8 + $0x8e8] ss:$16 sps:$4 sm:$0xff]   ;;  %v13594_v19 = vld [vmem:[#allocation8 + $0x904] ss:$16 sps:$4 sm:$0xff]  }
 0x12c   :  { %6145 = vmatprep.mubr.bf16.mxu0 %v11361_v20  ;;  %7501 = vmatprep.mubr.bf16.mxu1 %v11361_v20  ;;  %v13597_v20 = vld [vmem:[#allocation8 + $0x90c] ss:$16 sps:$4 sm:$0xff]  }
 0x12e   :  { %6183 = vmatpush1.bf16.msra.mxu0 %v13526_v21  ;;  %7539 = vmatpush1.bf16.msra.mxu1 %v13529_v22  ;;  %v180_v21 = vld [vmem:[#allocation5 + $0x3d8] sm:$0xff]  ;;  %v11290_v22 = vcombine.low %v156_v12, %v168_v13  ;;  %v13646_v13 = vld [vmem:[#allocation8 + $0xa20] ss:$16 sps:$4 sm:$0xff]  }
 0x12f   :  { %6184 = vmatprep.subr.bf16.mxu0 %v13534_v23  ;;  %7540 = vmatprep.subr.bf16.mxu1 %v13537_v24  ;;  %v192_v23 = vld [vmem:[#allocation5 + $0x438] sm:$0xff]  ;;  %v13592_v24 = vld [vmem:[#allocation8 + $0x900] ss:$16 sps:$4 sm:$0xff]  }
 0x131   :  { %6146 = vmatmul.mubr.bf16.gmra.mrb[36].mxu0 %v11360_v26  ;;  %7502 = vmatmul.mubr.bf16.gmra.mrb[36].mxu1 %v11360_v26  ;;  %v13600_v26 = vld [vmem:[#allocation8 + $0x924] ss:$16 sps:$4 sm:$0xff]  }
 0x132   :  { %6185 = vmatpush1.bf16.msra.mxu0 %v13532_v28  ;;  %7541 = vmatpush1.bf16.msra.mxu1 %v13535_v29  ;;  %v11315_v28 = vcombine.high %v180_v21, %v192_v23  ;;  %v13598_v29 = vld [vmem:[#allocation8 + $0x920] ss:$16 sps:$4 sm:$0xff]  }
 0x133   :  { %6186 = vmatprep.subr.bf16.mxu0 %v13540_v30  ;;  %7542 = vmatprep.subr.bf16.mxu1 %v13543_v31  ;;  %v13601_v30 = vld [vmem:[#allocation8 + $0x928] ss:$16 sps:$4 sm:$0xff]   ;;  %v13606_v31 = vld [vmem:[#allocation8 + $0x944] ss:$16 sps:$4 sm:$0xff]  }
 0x134   :  { %6188 = vmatprep.mubr.bf16.mxu0 %v11195_v32  ;;  %7544 = vmatprep.mubr.bf16.mxu1 %v11195_v32  ;;  %v13609_v32 = vld [vmem:[#allocation8 + $0x94c] ss:$16 sps:$4 sm:$0xff]  }
 0x136   :  { %6187 = vmatpush1.bf16.msra.mxu0 %v13538_v33  ;;  %7543 = vmatpush1.bf16.msra.mxu1 %v13541_v34  ;;  %v204_v33 = vld [vmem:[#allocation5 + $0x498] sm:$0xff]  ;;  %v11314_v34 = vcombine.low %v180_v21, %v192_v23  ;;  %v121_v21 = vld [vmem:[#allocation5 + $0x200] sm:$0xff] }
 0x137   :  { %6269 = vmatprep.subr.bf16.mxu0 %v13546_v35  ;;  %7625 = vmatprep.subr.bf16.mxu1 %v13549_v36  ;;  %v216_v35 = vld [vmem:[#allocation5 + $0x4f8] sm:$0xff]  ;;  %v13604_v36 = vld [vmem:[#allocation8 + $0x940] ss:$16 sps:$4 sm:$0xff]  }
 0x138   :  { %v11339_v40 = vcombine.high %v204_v33, %v216_v35  ;;  %v13663_v23 = vld [vmem:[#allocation8 + $0xa6c] ss:$16 sps:$4 sm:$0xff]  }
 0x139   :  { %6189 = vmatmul.mubr.bf16.vlgmr.msra.gmra.mrb[0].mxu0 %v11194_v39  ;;  %7545 = vmatmul.mubr.bf16.vlgmr.msra.gmra.mrb[0].mxu1 %v11194_v39  ;;  %v13615_v39 = vld [vmem:[#allocation8 + $0x96c] ss:$16 sps:$4 sm:$0xff]  }
 0x13a   :  { %6270 = vmatpush1.bf16.msra.mxu0 %v13544_v37  ;;  %7626 = vmatpush1.bf16.msra.mxu1 %v13547_v38  ;;  %v13607_v37 = vld [vmem:[#allocation8 + $0x948] ss:$16 sps:$4 sm:$0xff]   ;;  %v13612_v38 = vld [vmem:[#allocation8 + $0x964] ss:$16 sps:$4 sm:$0xff]  }
 0x13b   :  { %6271 = vmatprep.subr.bf16.mxu0 %v13552_v42  ;;  %7627 = vmatprep.subr.bf16.mxu1 %v13555_v43  ;;  %v13613_v42 = vld [vmem:[#allocation8 + $0x968] ss:$16 sps:$4 sm:$0xff]   ;;  %v13618_v43 = vld [vmem:[#allocation8 + $0x984] ss:$16 sps:$4 sm:$0xff]  }
 0x13c   :  { %6198 = vmatprep.mubr.bf16.mxu0 %v11219_v44  ;;  %7554 = vmatprep.mubr.bf16.mxu1 %v11219_v44  ;;  %v13621_v44 = vld [vmem:[#allocation8 + $0x98c] ss:$16 sps:$4 sm:$0xff]  }
 0x13e   :  { %6272 = vmatpush1.bf16.msra.mxu0 %v13550_v45  ;;  %7628 = vmatpush1.bf16.msra.mxu1 %v13553_v46  ;;  %v13616_v45 = vld [vmem:[#allocation8 + $0x980] ss:$16 sps:$4 sm:$0xff]   ;;  %v13619_v46 = vld [vmem:[#allocation8 + $0x988] ss:$16 sps:$4 sm:$0xff]  }
 0x13f   :  { %6273 = vmatprep.subr.bf16.mxu0 %v13558_v47  ;;  %7629 = vmatprep.subr.bf16.mxu1 %v13561_v48  ;;  %v11338_v47 = vcombine.low %v204_v33, %v216_v35  ;;  %v228_v48 = vld [vmem:[#allocation5 + $0x558] sm:$0xff] }
 0x141   :  { %6199 = vmatmul.mubr.bf16.gmra.mrb[4].mxu0 %v11218_v50  ;;  %7555 = vmatmul.mubr.bf16.gmra.mrb[4].mxu1 %v11218_v50  ;;  %v13624_v50 = vld [vmem:[#allocation8 + $0x9a4] ss:$16 sps:$4 sm:$0xff]  }
 0x142   :  { %6274 = vmatpush1.bf16.msra.mxu0 %v13556_v52  ;;  %7630 = vmatpush1.bf16.msra.mxu1 %v13559_v53  ;;  %v11363_v52 = vcombine.high %v228_v48, %v240_v49  ;;  %v13622_v53 = vld [vmem:[#allocation8 + $0x9a0] ss:$16 sps:$4 sm:$0xff]  }
 0x143   :  { %6275 = vmatprep.subr.bf16.mxu0 %v13564_v54  ;;  %7631 = vmatprep.subr.bf16.mxu1 %v13567_v55  ;;  %v13625_v54 = vld [vmem:[#allocation8 + $0x9a8] ss:$16 sps:$4 sm:$0xff]   ;;  %v13630_v55 = vld [vmem:[#allocation8 + $0x9c4] ss:$16 sps:$4 sm:$0xff]  }
 0x144   :  { %6208 = vmatprep.mubr.bf16.mxu0 %v11243_v56  ;;  %7564 = vmatprep.mubr.bf16.mxu1 %v11243_v56  ;;  %v13633_v56 = vld [vmem:[#allocation8 + $0x9cc] ss:$16 sps:$4 sm:$0xff]  }
 0x146   :  { %6276 = vmatpush1.bf16.msra.mxu0 %v13562_v57  ;;  %7632 = vmatpush1.bf16.msra.mxu1 %v13565_v58  ;;  %v61_v57 = vld [vmem:[#allocation5 + $0x20] sm:$0xff]  ;;  %v11362_v58 = vcombine.low %v228_v48, %v240_v49  ;;  %v13681_v48 = vld [vmem:[#allocation8 + $0xacc] ss:$16 sps:$4 sm:$0xff]  }
 0x147   :  { %6277 = vmatprep.subr.bf16.mxu0 %v13570_v59  ;;  %7633 = vmatprep.subr.bf16.mxu1 %v13573_v60  ;;  %v73_v59 = vld [vmem:[#allocation5 + $0x80] sm:$0xff] }
 0x148   :  { %v13628_v60 = vld [vmem:[#allocation8 + $0x9c0] ss:$16 sps:$4 sm:$0xff]  }
 0x149   :  { %6209 = vmatmul.mubr.bf16.gmra.mrb[8].mxu0 %v11242_v62  ;;  %7565 = vmatmul.mubr.bf16.gmra.mrb[8].mxu1 %v11242_v62  ;;  %v13636_v62 = vld [vmem:[#allocation8 + $0x9e4] ss:$16 sps:$4 sm:$0xff]   ;;  %v13676_v49 = vld [vmem:[#allocation8 + $0xac0] ss:$16 sps:$4 sm:$0xff]  }
 0x14a   :  { %6278 = vmatpush1.bf16.msra.mxu0 %v13568_v0  ;;  %7634 = vmatpush1.bf16.msra.mxu1 %v13571_v1  ;;  %v11197_v0 = vcombine.high %v61_v57, %v73_v59  ;;  %v13634_v1 = vld [vmem:[#allocation8 + $0x9e0] ss:$16 sps:$4 sm:$0xff]  }
 0x14b   :  { %6279 = vmatprep.subr.bf16.mxu0 %v13576_v2  ;;  %7635 = vmatprep.subr.bf16.mxu1 %v13579_v3  ;;  %v13637_v2 = vld [vmem:[#allocation8 + $0x9e8] ss:$16 sps:$4 sm:$0xff]   ;;  %v13642_v3 = vld [vmem:[#allocation8 + $0xa04] ss:$16 sps:$4 sm:$0xff]  }
 0x14c   :  { %6218 = vmatprep.mubr.bf16.mxu0 %v11267_v4  ;;  %7574 = vmatprep.mubr.bf16.mxu1 %v11267_v4  ;;  %v13645_v4 = vld [vmem:[#allocation8 + $0xa0c] ss:$16 sps:$4 sm:$0xff]  }
 0x14e   :  { %6280 = vmatpush1.bf16.msra.mxu0 %v13574_v5  ;;  %7636 = vmatpush1.bf16.msra.mxu1 %v13577_v6  ;;  %v85_v5 = vld [vmem:[#allocation5 + $0xe0] sm:$0xff]  ;;  %v11196_v6 = vcombine.low %v61_v57, %v73_v59 }
 0x14f   :  { %6281 = vmatprep.subr.bf16.mxu0 %v13582_v7  ;;  %7637 = vmatprep.subr.bf16.mxu1 %v13585_v8  ;;  %v97_v7 = vld [vmem:[#allocation5 + $0x140] sm:$0xff] }
 0x150   :  { %v13640_v8 = vld [vmem:[#allocation8 + $0xa00] ss:$16 sps:$4 sm:$0xff]   ;;  %v11221_v12 = vcombine.high %v85_v5, %v97_v7  ;;  %v13690_v59 = vld [vmem:[#allocation8 + $0xb04] ss:$16 sps:$4 sm:$0xff]  }
 0x151   :  { %6219 = vmatmul.mubr.bf16.gmra.mrb[12].mxu0 %v11266_v11  ;;  %7575 = vmatmul.mubr.bf16.gmra.mrb[12].mxu1 %v11266_v11  ;;  %v13651_v11 = vld [vmem:[#allocation8 + $0xa2c] ss:$16 sps:$4 sm:$0xff]   ;;  %v13682_v57 = vld [vmem:[#allocation8 + $0xae0] ss:$16 sps:$4 sm:$0xff]  }
 0x152   :  { %6282 = vmatpush1.bf16.msra.mxu0 %v13580_v9  ;;  %7638 = vmatpush1.bf16.msra.mxu1 %v13583_v10  ;;  %v13643_v9 = vld [vmem:[#allocation8 + $0xa08] ss:$16 sps:$4 sm:$0xff]   ;;  %v13648_v10 = vld [vmem:[#allocation8 + $0xa24] ss:$16 sps:$4 sm:$0xff]  }
 0x153   :  { %6283 = vmatprep.subr.bf16.mxu0 %v13588_v14  ;;  %7639 = vmatprep.subr.bf16.mxu1 %v13591_v15  ;;  %v13649_v14 = vld [vmem:[#allocation8 + $0xa28] ss:$16 sps:$4 sm:$0xff]   ;;  %v13654_v15 = vld [vmem:[#allocation8 + $0xa44] ss:$16 sps:$4 sm:$0xff]  }
 0x154   :  { %6228 = vmatprep.mubr.bf16.mxu0 %v11291_v16  ;;  %7584 = vmatprep.mubr.bf16.mxu1 %v11291_v16  ;;  %v13657_v16 = vld [vmem:[#allocation8 + $0xa4c] ss:$16 sps:$4 sm:$0xff]  }
 0x156   :  { %6284 = vmatpush1.bf16.msra.mxu0 %v13586_v17  ;;  %7640 = vmatpush1.bf16.msra.mxu1 %v13589_v18  ;;  %v13652_v17 = vld [vmem:[#allocation8 + $0xa40] ss:$16 sps:$4 sm:$0xff]   ;;  %v13655_v18 = vld [vmem:[#allocation8 + $0xa48] ss:$16 sps:$4 sm:$0xff]  }
 0x157   :  { %6285 = vmatprep.subr.bf16.mxu0 %v13594_v19  ;;  %7641 = vmatprep.subr.bf16.mxu1 %v13597_v20  ;;  %v11220_v19 = vcombine.low %v85_v5, %v97_v7  ;;  %v109_v20 = vld [vmem:[#allocation5 + $0x1a0] sm:$0xff] }
 0x158   :  { %v11244_v35 = vcombine.low %v109_v20, %v121_v21  ;;  %v13694_v5 = vld [vmem:[#allocation8 + $0xb20] ss:$16 sps:$4 sm:$0xff]   ;;  %v13702_v7 = vld [vmem:[#allocation8 + $0xb44] ss:$16 sps:$4 sm:$0xff]  }
 0x159   :  { %6229 = vmatmul.mubr.bf16.gmra.mrb[16].mxu0 %v11290_v22  ;;  %7585 = vmatmul.mubr.bf16.gmra.mrb[16].mxu1 %v11290_v22  ;;  %v13660_v22 = vld [vmem:[#allocation8 + $0xa64] ss:$16 sps:$4 sm:$0xff]  }
 0x15a   :  { %6286 = vmatpush1.bf16.msra.mxu0 %v13592_v24  ;;  %7642 = vmatpush1.bf16.msra.mxu1 %v13595_v25  ;;  %v11245_v24 = vcombine.high %v109_v20, %v121_v21  ;;  %v13658_v25 = vld [vmem:[#allocation8 + $0xa60] ss:$16 sps:$4 sm:$0xff]   ;;  %v13717_v20 = vld [vmem:[#allocation8 + $0xb8c] ss:$16 sps:$4 sm:$0xff]  }
 0x15b   :  { %6287 = vmatprep.subr.bf16.mxu0 %v13600_v26  ;;  %7643 = vmatprep.subr.bf16.mxu1 %v13603_v27  ;;  %v13661_v26 = vld [vmem:[#allocation8 + $0xa68] ss:$16 sps:$4 sm:$0xff]   ;;  %v13666_v27 = vld [vmem:[#allocation8 + $0xa84] ss:$16 sps:$4 sm:$0xff]   ;;  %v13712_v21 = vld [vmem:[#allocation8 + $0xb80] ss:$16 sps:$4 sm:$0xff]  }
 0x15c   :  { %6238 = vmatprep.mubr.bf16.mxu0 %v11315_v28  ;;  %7594 = vmatprep.mubr.bf16.mxu1 %v11315_v28  ;;  %v13669_v28 = vld [vmem:[#allocation8 + $0xa8c] ss:$16 sps:$4 sm:$0xff]  }
 0x15e   :  { %6288 = vmatpush1.bf16.msra.mxu0 %v13598_v29  ;;  %7644 = vmatpush1.bf16.msra.mxu1 %v13601_v30 }
 0x15f   :  { %6289 = vmatprep.subr.bf16.mxu0 %v13606_v31  ;;  %7645 = vmatprep.subr.bf16.mxu1 %v13609_v32  ;;  %v13664_v31 = vld [vmem:[#allocation8 + $0xa80] ss:$16 sps:$4 sm:$0xff]  }
 0x160   :  { %v133_v32 = vld [vmem:[#allocation5 + $0x260] sm:$0xff] }
 0x161   :  { %6239 = vmatmul.mubr.bf16.gmra.mrb[20].mxu0 %v11314_v34  ;;  %7595 = vmatmul.mubr.bf16.gmra.mrb[20].mxu1 %v11314_v34 }
 0x162   :  { %6290 = vmatpush1.bf16.msra.mxu0 %v13604_v36  ;;  %7646 = vmatpush1.bf16.msra.mxu1 %v13607_v37  ;;  %v145_v36 = vld [vmem:[#allocation5 + $0x2c0] sm:$0xff] }
 0x163   :  { %6291 = vmatprep.subr.bf16.mxu0 %v13612_v38  ;;  %7647 = vmatprep.subr.bf16.mxu1 %v13615_v39  ;;  %v13667_v39 = vld [vmem:[#allocation8 + $0xa88] ss:$16 sps:$4 sm:$0xff]  }
 0x164   :  { %6248 = vmatprep.mubr.bf16.mxu0 %v11339_v40  ;;  %7604 = vmatprep.mubr.bf16.mxu1 %v11339_v40  ;;  %v13672_v40 = vld [vmem:[#allocation8 + $0xaa4] ss:$16 sps:$4 sm:$0xff]  }
 0x166   :  { %6292 = vmatpush1.bf16.msra.mxu0 %v13610_v41  ;;  %7648 = vmatpush1.bf16.msra.mxu1 %v13613_v42 }
 0x167   :  { %6293 = vmatprep.subr.bf16.mxu0 %v13618_v43  ;;  %7649 = vmatprep.subr.bf16.mxu1 %v13621_v44  ;;  %v13675_v43 = vld [vmem:[#allocation8 + $0xaac] ss:$16 sps:$4 sm:$0xff]   ;;  %v11269_v44 = vcombine.high %v133_v32, %v145_v36 }
 0x169   :  { %6249 = vmatmul.mubr.bf16.gmra.mrb[24].mxu0 %v11338_v47  ;;  %7605 = vmatmul.mubr.bf16.gmra.mrb[24].mxu1 %v11338_v47  ;;  %v13678_v47 = vld [vmem:[#allocation8 + $0xac4] ss:$16 sps:$4 sm:$0xff]  }
 0x16a   :  { %6294 = vmatpush1.bf16.msra.mxu0 %v13616_v45  ;;  %7650 = vmatpush1.bf16.msra.mxu1 %v13619_v46  ;;  %v13670_v45 = vld [vmem:[#allocation8 + $0xaa0] ss:$16 sps:$4 sm:$0xff]   ;;  %v13673_v46 = vld [vmem:[#allocation8 + $0xaa8] ss:$16 sps:$4 sm:$0xff]  }
 0x16b   :  { %6295 = vmatprep.subr.bf16.mxu0 %v13624_v50  ;;  %7651 = vmatprep.subr.bf16.mxu1 %v13627_v51  ;;  %v11268_v50 = vcombine.low %v133_v32, %v145_v36  ;;  %v157_v51 = vld [vmem:[#allocation5 + $0x320] sm:$0xff]  ;;  %v13729_v32 = vld [vmem:[#allocation8 + $0xbcc] ss:$16 sps:$4 sm:$0xff]  }
 0x16c   :  { %6258 = vmatprep.mubr.bf16.mxu0 %v11363_v52  ;;  %7614 = vmatprep.mubr.bf16.mxu1 %v11363_v52  ;;  %v169_v52 = vld [vmem:[#allocation5 + $0x380] sm:$0xff]  ;;  %v62_v36 = vld [vmem:[#allocation5 + $0x28] sm:$0xff] }
 0x16e   :  { %6296 = vmatpush1.bf16.msra.mxu0 %v13622_v53  ;;  %7652 = vmatpush1.bf16.msra.mxu1 %v13625_v54  ;;  %v13679_v53 = vld [vmem:[#allocation8 + $0xac8] ss:$16 sps:$4 sm:$0xff]   ;;  %v13684_v54 = vld [vmem:[#allocation8 + $0xae4] ss:$16 sps:$4 sm:$0xff]  }
 0x16f   :  { %6297 = vmatprep.subr.bf16.mxu0 %v13630_v55  ;;  %7653 = vmatprep.subr.bf16.mxu1 %v13633_v56  ;;  %v13687_v55 = vld [vmem:[#allocation8 + $0xaec] ss:$16 sps:$4 sm:$0xff]   ;;  %v11293_v56 = vcombine.high %v157_v51, %v169_v52 }
 0x171   :  { %6259 = vmatmul.mubr.bf16.gmra.mrb[40].mxu0 %v11362_v58  ;;  %7615 = vmatmul.mubr.bf16.gmra.mrb[40].mxu1 %v11362_v58  ;;  %v13685_v58 = vld [vmem:[#allocation8 + $0xae8] ss:$16 sps:$4 sm:$0xff]  }
 0x172   :  { %6298 = vmatpush1.bf16.msra.mxu0 %v13628_v60  ;;  %7654 = vmatpush1.bf16.msra.mxu1 %v13631_v61  ;;  %v13693_v60 = vld [vmem:[#allocation8 + $0xb0c] ss:$16 sps:$4 sm:$0xff]   ;;  %v13688_v61 = vld [vmem:[#allocation8 + $0xb00] ss:$16 sps:$4 sm:$0xff]  }
 0x173   :  { %6299 = vmatprep.subr.bf16.mxu0 %v13636_v62  ;;  %7655 = vmatprep.subr.bf16.mxu1 %v13639_v63  ;;  %v181_v62 = vld [vmem:[#allocation5 + $0x3e0] sm:$0xff]  ;;  %v11292_v63 = vcombine.low %v157_v51, %v169_v52  ;;  %v13747_v51 = vld [vmem:[#allocation8 + $0xc2c] ss:$16 sps:$4 sm:$0xff]  }
 0x174   :  { %6301 = vmatprep.mubr.bf16.mxu0 %v11197_v0  ;;  %7657 = vmatprep.mubr.bf16.mxu1 %v11197_v0  ;;  %v193_v0 = vld [vmem:[#allocation5 + $0x440] sm:$0xff] }
 0x176   :  { %6300 = vmatpush1.bf16.msra.mxu0 %v13634_v1  ;;  %7656 = vmatpush1.bf16.msra.mxu1 %v13637_v2  ;;  %v13691_v1 = vld [vmem:[#allocation8 + $0xb08] ss:$16 sps:$4 sm:$0xff]   ;;  %v13696_v2 = vld [vmem:[#allocation8 + $0xb24] ss:$16 sps:$4 sm:$0xff]  }
 0x177   :  { %6382 = vmatprep.subr.bf16.mxu0 %v13642_v3  ;;  %7738 = vmatprep.subr.bf16.mxu1 %v13645_v4  ;;  %v13699_v3 = vld [vmem:[#allocation8 + $0xb2c] ss:$16 sps:$4 sm:$0xff]   ;;  %v11317_v4 = vcombine.high %v181_v62, %v193_v0 }
 0x179   :  { %6302 = vmatmul.mubr.bf16.vlgmr.msra.gmra.mrb[0].mxu0 %v11196_v6  ;;  %7658 = vmatmul.mubr.bf16.vlgmr.msra.gmra.mrb[0].mxu1 %v11196_v6  ;;  %v13697_v6 = vld [vmem:[#allocation8 + $0xb28] ss:$16 sps:$4 sm:$0xff]  }
 0x17a   :  { %6383 = vmatpush1.bf16.msra.mxu0 %v13640_v8  ;;  %7739 = vmatpush1.bf16.msra.mxu1 %v13643_v9  ;;  %v13705_v8 = vld [vmem:[#allocation8 + $0xb4c] ss:$16 sps:$4 sm:$0xff]   ;;  %v11316_v9 = vcombine.low %v181_v62, %v193_v0  ;;  %v13756_v62 = vld [vmem:[#allocation8 + $0xc64] ss:$16 sps:$4 sm:$0xff]   ;;  %v13754_v0 = vld [vmem:[#allocation8 + $0xc60] ss:$16 sps:$4 sm:$0xff]  }
 0x17b   :  { %6384 = vmatprep.subr.bf16.mxu0 %v13648_v10  ;;  %7740 = vmatprep.subr.bf16.mxu1 %v13651_v11  ;;  %v205_v10 = vld [vmem:[#allocation5 + $0x4a0] sm:$0xff] }
 0x17c   :  { %6311 = vmatprep.mubr.bf16.mxu0 %v11221_v12  ;;  %7667 = vmatprep.mubr.bf16.mxu1 %v11221_v12  ;;  %v217_v11 = vld [vmem:[#allocation5 + $0x500] sm:$0xff] }
 0x17d   :  { %v13700_v12 = vld [vmem:[#allocation8 + $0xb40] ss:$16 sps:$4 sm:$0xff]  }
 0x17e   :  { %6385 = vmatpush1.bf16.msra.mxu0 %v13646_v13  ;;  %7741 = vmatpush1.bf16.msra.mxu1 %v13649_v14  ;;  %v13703_v13 = vld [vmem:[#allocation8 + $0xb48] ss:$16 sps:$4 sm:$0xff]   ;;  %v13708_v14 = vld [vmem:[#allocation8 + $0xb64] ss:$16 sps:$4 sm:$0xff]  }
 0x17f   :  { %6386 = vmatprep.subr.bf16.mxu0 %v13654_v15  ;;  %7742 = vmatprep.subr.bf16.mxu1 %v13657_v16  ;;  %v13711_v15 = vld [vmem:[#allocation8 + $0xb6c] ss:$16 sps:$4 sm:$0xff]   ;;  %v11341_v16 = vcombine.high %v205_v10, %v217_v11 }
 0x181   :  { %6312 = vmatmul.mubr.bf16.gmra.mrb[4].mxu0 %v11220_v19  ;;  %7668 = vmatmul.mubr.bf16.gmra.mrb[4].mxu1 %v11220_v19  ;;  %v13714_v19 = vld [vmem:[#allocation8 + $0xb84] ss:$16 sps:$4 sm:$0xff]  }
 0x182   :  { %6387 = vmatpush1.bf16.msra.mxu0 %v13652_v17  ;;  %7743 = vmatpush1.bf16.msra.mxu1 %v13655_v18  ;;  %v13706_v17 = vld [vmem:[#allocation8 + $0xb60] ss:$16 sps:$4 sm:$0xff]   ;;  %v13709_v18 = vld [vmem:[#allocation8 + $0xb68] ss:$16 sps:$4 sm:$0xff]  }
 0x183   :  { %6388 = vmatprep.subr.bf16.mxu0 %v13660_v22  ;;  %7744 = vmatprep.subr.bf16.mxu1 %v13663_v23  ;;  %v13715_v22 = vld [vmem:[#allocation8 + $0xb88] ss:$16 sps:$4 sm:$0xff]   ;;  %v11340_v23 = vcombine.low %v205_v10, %v217_v11 }
 0x184   :  { %v5921_v29 = vpop.f32.mrb[28].mxu0  ;;  %v7277_v30 = vpop.f32.mrb[28].mxu1  ;;  %6321 = vmatprep.mubr.bf16.mxu0 %v11245_v24  ;;  %7677 = vmatprep.mubr.bf16.mxu1 %v11245_v24  ;;  %v229_v24 = vld [vmem:[#allocation5 + $0x560] sm:$0xff] }
 0x185   :  { %v5923_v33 = vpop.f32.mrb[29].mxu0  ;;  %v7279_v34 = vpop.f32.mrb[29].mxu1  ;;  %v13718_v29 = vld [vmem:[#allocation8 + $0xba0] ss:$16 sps:$4 sm:$0xff]   ;;  %v13721_v30 = vld [vmem:[#allocation8 + $0xba8] ss:$16 sps:$4 sm:$0xff]  }
 0x186   :  { %v5925_v37 = vpop.f32.mrb[30].mxu0  ;;  %6389 = vmatpush1.bf16.msra.mxu0 %v13658_v25  ;;  %v7281_v38 = vpop.f32.mrb[30].mxu1  ;;  %7745 = vmatpush1.bf16.msra.mxu1 %v13661_v26  ;;  %v241_v25 = vld [vmem:[#allocation5 + $0x5c0] sm:$0xff]  ;;  %v13727_v34 = vld [vmem:[#allocation8 + $0xbc8] ss:$16 sps:$4 sm:$0xff]  }
 0x187   :  { %v5927_v41 = vpop.f32.mrb[31].mxu0  ;;  %v7283_v42 = vpop.f32.mrb[31].mxu1  ;;  %6390 = vmatprep.subr.bf16.mxu0 %v13666_v27  ;;  %7746 = vmatprep.subr.bf16.mxu1 %v13669_v28  ;;  %v13720_v26 = vld [vmem:[#allocation8 + $0xba4] ss:$16 sps:$4 sm:$0xff]   ;;  %v13723_v27 = vld [vmem:[#allocation8 + $0xbac] ss:$16 sps:$4 sm:$0xff]   ;;  %v11365_v28 = vcombine.high %v229_v24, %v241_v25 }
 0x188   :  { %v13724_v33 = vld [vmem:[#allocation8 + $0xbc0] ss:$16 sps:$4 sm:$0xff]   ;;  %v74_v37 = vld [vmem:[#allocation5 + $0x88] sm:$0xff]  ;;  %v13732_v38 = vld [vmem:[#allocation8 + $0xbe4] ss:$16 sps:$4 sm:$0xff]  }
 0x189   :  { %6322 = vmatmul.mubr.bf16.gmra.mrb[8].mxu0 %v11244_v35  ;;  %7678 = vmatmul.mubr.bf16.gmra.mrb[8].mxu1 %v11244_v35  ;;  %v11364_v35 = vcombine.low %v229_v24, %v241_v25  ;;  %v13730_v41 = vld [vmem:[#allocation8 + $0xbe0] ss:$16 sps:$4 sm:$0xff]   ;;  %v13733_v42 = vld [vmem:[#allocation8 + $0xbe8] ss:$16 sps:$4 sm:$0xff]   ;;  %v13777_v24 = vld [vmem:[#allocation8 + $0xccc] ss:$16 sps:$4 sm:$0xff]  }
 0x18a   :  { %6391 = vmatpush1.bf16.msra.mxu0 %v13664_v31  ;;  %7747 = vmatpush1.bf16.msra.mxu1 %v13667_v39  ;;  %v13726_v31 = vld [vmem:[#allocation8 + $0xbc4] ss:$16 sps:$4 sm:$0xff]   ;;  %v13735_v39 = vld [vmem:[#allocation8 + $0xbec] ss:$16 sps:$4 sm:$0xff]   ;;  %v13772_v25 = vld [vmem:[#allocation8 + $0xcc0] ss:$16 sps:$4 sm:$0xff]  }
 0x18b   :  { %6392 = vmatprep.subr.bf16.mxu0 %v13672_v40  ;;  %7748 = vmatprep.subr.bf16.mxu1 %v13675_v43  ;;  %v11199_v40 = vcombine.high %v62_v36, %v74_v37  ;;  %v13738_v43 = vld [vmem:[#allocation8 + $0xc04] ss:$16 sps:$4 sm:$0xff]  }
 0x18c   :  { %6331 = vmatprep.mubr.bf16.mxu0 %v11269_v44  ;;  %7687 = vmatprep.mubr.bf16.mxu1 %v11269_v44  ;;  %v13741_v44 = vld [vmem:[#allocation8 + $0xc0c] ss:$16 sps:$4 sm:$0xff]  }
 0x18e   :  { %6393 = vmatpush1.bf16.msra.mxu0 %v13670_v45  ;;  %7749 = vmatpush1.bf16.msra.mxu1 %v13673_v46  ;;  %v13736_v45 = vld [vmem:[#allocation8 + $0xc00] ss:$16 sps:$4 sm:$0xff]   ;;  %v13739_v46 = vld [vmem:[#allocation8 + $0xc08] ss:$16 sps:$4 sm:$0xff]  }
 0x18f   :  { %6394 = vmatprep.subr.bf16.mxu0 %v13678_v47  ;;  %7750 = vmatprep.subr.bf16.mxu1 %v13681_v48  ;;  %v11198_v47 = vcombine.low %v62_v36, %v74_v37  ;;  %v86_v48 = vld [vmem:[#allocation5 + $0xe8] sm:$0xff]  ;;  %v13784_v37 = vld [vmem:[#allocation8 + $0xd00] ss:$16 sps:$4 sm:$0xff]  }
 0x190   :  { %v13789_v36 = vld [vmem:[#allocation8 + $0xd0c] ss:$16 sps:$4 sm:$0xff]  }
 0x191   :  { %6332 = vmatmul.mubr.bf16.gmra.mrb[12].mxu0 %v11268_v50  ;;  %7688 = vmatmul.mubr.bf16.gmra.mrb[12].mxu1 %v11268_v50  ;;  %v13744_v50 = vld [vmem:[#allocation8 + $0xc24] ss:$16 sps:$4 sm:$0xff]  }
 0x192   :  { %6395 = vmatpush1.bf16.msra.mxu0 %v13676_v49  ;;  %7751 = vmatpush1.bf16.msra.mxu1 %v13679_v53  ;;  %v98_v49 = vld [vmem:[#allocation5 + $0x148] sm:$0xff]  ;;  %v13742_v53 = vld [vmem:[#allocation8 + $0xc20] ss:$16 sps:$4 sm:$0xff]  }
 0x193   :  { %6396 = vmatprep.subr.bf16.mxu0 %v13684_v54  ;;  %7752 = vmatprep.subr.bf16.mxu1 %v13687_v55  ;;  %v11223_v52 = vcombine.high %v86_v48, %v98_v49  ;;  %v13745_v54 = vld [vmem:[#allocation8 + $0xc28] ss:$16 sps:$4 sm:$0xff]   ;;  %v13750_v55 = vld [vmem:[#allocation8 + $0xc44] ss:$16 sps:$4 sm:$0xff]  }
 0x194   :  { %6341 = vmatprep.mubr.bf16.mxu0 %v11293_v56  ;;  %7697 = vmatprep.mubr.bf16.mxu1 %v11293_v56  ;;  %v13753_v56 = vld [vmem:[#allocation8 + $0xc4c] ss:$16 sps:$4 sm:$0xff]  }
 0x196   :  { %6397 = vmatpush1.bf16.msra.mxu0 %v13682_v57  ;;  %7753 = vmatpush1.bf16.msra.mxu1 %v13685_v58  ;;  %v13748_v57 = vld [vmem:[#allocation8 + $0xc40] ss:$16 sps:$4 sm:$0xff]   ;;  %v13751_v58 = vld [vmem:[#allocation8 + $0xc48] ss:$16 sps:$4 sm:$0xff]  }
 0x197   :  { %6398 = vmatprep.subr.bf16.mxu0 %v13690_v59  ;;  %7754 = vmatprep.subr.bf16.mxu1 %v13693_v60  ;;  %v11222_v59 = vcombine.low %v86_v48, %v98_v49  ;;  %v110_v60 = vld [vmem:[#allocation5 + $0x1a8] sm:$0xff]  ;;  %v13796_v49 = vld [vmem:[#allocation8 + $0xd40] ss:$16 sps:$4 sm:$0xff]  }
 0x198   :  { %v13801_v48 = vld [vmem:[#allocation8 + $0xd4c] ss:$16 sps:$4 sm:$0xff]  }
 0x199   :  { %6342 = vmatmul.mubr.bf16.gmra.mrb[16].mxu0 %v11292_v63  ;;  %7698 = vmatmul.mubr.bf16.gmra.mrb[16].mxu1 %v11292_v63  ;;  %v13759_v63 = vld [vmem:[#allocation8 + $0xc6c] ss:$16 sps:$4 sm:$0xff]  }
 0x19a   :  { %6399 = vmatpush1.bf16.msra.mxu0 %v13688_v61  ;;  %7755 = vmatpush1.bf16.msra.mxu1 %v13691_v1  ;;  %v122_v61 = vld [vmem:[#allocation5 + $0x208] sm:$0xff] }
 0x19b   :  { %6400 = vmatprep.subr.bf16.mxu0 %v13696_v2  ;;  %7756 = vmatprep.subr.bf16.mxu1 %v13699_v3  ;;  %v13757_v1 = vld [vmem:[#allocation8 + $0xc68] ss:$16 sps:$4 sm:$0xff]   ;;  %v11247_v2 = vcombine.high %v110_v60, %v122_v61  ;;  %v13762_v3 = vld [vmem:[#allocation8 + $0xc84] ss:$16 sps:$4 sm:$0xff]   ;;  %v11246_v11 = vcombine.low %v110_v60, %v122_v61  ;;  %v13813_v60 = vld [vmem:[#allocation8 + $0xd8c] ss:$16 sps:$4 sm:$0xff]  }
 0x19c   :  { %6351 = vmatprep.mubr.bf16.mxu0 %v11317_v4  ;;  %7707 = vmatprep.mubr.bf16.mxu1 %v11317_v4  ;;  %v13765_v4 = vld [vmem:[#allocation8 + $0xc8c] ss:$16 sps:$4 sm:$0xff]   ;;  %v13808_v61 = vld [vmem:[#allocation8 + $0xd80] ss:$16 sps:$4 sm:$0xff]  }
 0x19e   :  { %6401 = vmatpush1.bf16.msra.mxu0 %v13694_v5  ;;  %7757 = vmatpush1.bf16.msra.mxu1 %v13697_v6 }
 0x19f   :  { %6402 = vmatprep.subr.bf16.mxu0 %v13702_v7  ;;  %7758 = vmatprep.subr.bf16.mxu1 %v13705_v8  ;;  %v13760_v7 = vld [vmem:[#allocation8 + $0xc80] ss:$16 sps:$4 sm:$0xff]   ;;  %v13763_v8 = vld [vmem:[#allocation8 + $0xc88] ss:$16 sps:$4 sm:$0xff]  }
 0x1a1   :  { %6352 = vmatmul.mubr.bf16.gmra.mrb[20].mxu0 %v11316_v9  ;;  %7708 = vmatmul.mubr.bf16.gmra.mrb[20].mxu1 %v11316_v9 }
 0x1a2   :  { %6403 = vmatpush1.bf16.msra.mxu0 %v13700_v12  ;;  %7759 = vmatpush1.bf16.msra.mxu1 %v13703_v13  ;;  %v134_v12 = vld [vmem:[#allocation5 + $0x268] sm:$0xff] }
 0x1a3   :  { %6404 = vmatprep.subr.bf16.mxu0 %v13708_v14  ;;  %7760 = vmatprep.subr.bf16.mxu1 %v13711_v15  ;;  %v146_v13 = vld [vmem:[#allocation5 + $0x2c8] sm:$0xff] }
 0x1a4   :  { %6361 = vmatprep.mubr.bf16.mxu0 %v11341_v16  ;;  %7717 = vmatprep.mubr.bf16.mxu1 %v11341_v16 }
 0x1a6   :  { %6405 = vmatpush1.bf16.msra.mxu0 %v13706_v17  ;;  %7761 = vmatpush1.bf16.msra.mxu1 %v13709_v18  ;;  %v13768_v18 = vld [vmem:[#allocation8 + $0xca4] ss:$16 sps:$4 sm:$0xff]  }
 0x1a7   :  { %6406 = vmatprep.subr.bf16.mxu0 %v13714_v19  ;;  %7762 = vmatprep.subr.bf16.mxu1 %v13717_v20  ;;  %v13771_v19 = vld [vmem:[#allocation8 + $0xcac] ss:$16 sps:$4 sm:$0xff]   ;;  %v11271_v20 = vcombine.high %v134_v12, %v146_v13 }
 0x1a9   :  { %6362 = vmatmul.mubr.bf16.gmra.mrb[24].mxu0 %v11340_v23  ;;  %7718 = vmatmul.mubr.bf16.gmra.mrb[24].mxu1 %v11340_v23  ;;  %v13774_v23 = vld [vmem:[#allocation8 + $0xcc4] ss:$16 sps:$4 sm:$0xff]  }
 0x1aa   :  { %6407 = vmatpush1.bf16.msra.mxu0 %v13712_v21  ;;  %7763 = vmatpush1.bf16.msra.mxu1 %v13715_v22  ;;  %v13766_v21 = vld [vmem:[#allocation8 + $0xca0] ss:$16 sps:$4 sm:$0xff]   ;;  %v13769_v22 = vld [vmem:[#allocation8 + $0xca8] ss:$16 sps:$4 sm:$0xff]  }
 0x1ab   :  { %6408 = vmatprep.subr.bf16.mxu0 %v13720_v26  ;;  %7764 = vmatprep.subr.bf16.mxu1 %v13723_v27  ;;  %v13775_v26 = vld [vmem:[#allocation8 + $0xcc8] ss:$16 sps:$4 sm:$0xff]   ;;  %v11270_v27 = vcombine.low %v134_v12, %v146_v13  ;;  %v63_v12 = vld [vmem:[#allocation5 + $0x30] sm:$0xff] }
 0x1ac   :  { %6371 = vmatprep.mubr.bf16.mxu0 %v11365_v28  ;;  %7727 = vmatprep.mubr.bf16.mxu1 %v11365_v28  ;;  %v158_v28 = vld [vmem:[#allocation5 + $0x328] sm:$0xff]  ;;  %v75_v13 = vld [vmem:[#allocation5 + $0x90] sm:$0xff] }
 0x1ae   :  { %6409 = vmatpush1.bf16.msra.mxu0 %v13718_v29  ;;  %7765 = vmatpush1.bf16.msra.mxu1 %v13721_v30  ;;  %v170_v29 = vld [vmem:[#allocation5 + $0x388] sm:$0xff]  ;;  %v13780_v30 = vld [vmem:[#allocation8 + $0xce4] ss:$16 sps:$4 sm:$0xff]  }
 0x1af   :  { %6410 = vmatprep.subr.bf16.mxu0 %v13726_v31  ;;  %7766 = vmatprep.subr.bf16.mxu1 %v13729_v32  ;;  %v13783_v31 = vld [vmem:[#allocation8 + $0xcec] ss:$16 sps:$4 sm:$0xff]   ;;  %v11295_v32 = vcombine.high %v158_v28, %v170_v29 }
 0x1b1   :  { %6372 = vmatmul.mubr.bf16.gmra.mrb[44].mxu0 %v11364_v35  ;;  %7728 = vmatmul.mubr.bf16.gmra.mrb[44].mxu1 %v11364_v35  ;;  %v13786_v35 = vld [vmem:[#allocation8 + $0xd04] ss:$16 sps:$4 sm:$0xff]  }
 0x1b2   :  { %6411 = vmatpush1.bf16.msra.mxu0 %v13724_v33  ;;  %7767 = vmatpush1.bf16.msra.mxu1 %v13727_v34  ;;  %v13778_v33 = vld [vmem:[#allocation8 + $0xce0] ss:$16 sps:$4 sm:$0xff]   ;;  %v13781_v34 = vld [vmem:[#allocation8 + $0xce8] ss:$16 sps:$4 sm:$0xff]  }
 0x1b3   :  { %6412 = vmatprep.subr.bf16.mxu0 %v13732_v38  ;;  %7768 = vmatprep.subr.bf16.mxu1 %v13735_v39  ;;  %v13787_v38 = vld [vmem:[#allocation8 + $0xd08] ss:$16 sps:$4 sm:$0xff]   ;;  %v11294_v39 = vcombine.low %v158_v28, %v170_v29  ;;  %v13838_v29 = vld [vmem:[#allocation8 + $0xe20] ss:$16 sps:$4 sm:$0xff]  }
 0x1b4   :  { %6414 = vmatprep.mubr.bf16.mxu0 %v11199_v40  ;;  %7770 = vmatprep.mubr.bf16.mxu1 %v11199_v40  ;;  %v182_v40 = vld [vmem:[#allocation5 + $0x3e8] sm:$0xff] }
 0x1b6   :  { %6413 = vmatpush1.bf16.msra.mxu0 %v13730_v41  ;;  %7769 = vmatpush1.bf16.msra.mxu1 %v13733_v42  ;;  %v194_v41 = vld [vmem:[#allocation5 + $0x448] sm:$0xff]  ;;  %v13792_v42 = vld [vmem:[#allocation8 + $0xd24] ss:$16 sps:$4 sm:$0xff]  }
 0x1b7   :  { %6495 = vmatprep.subr.bf16.mxu0 %v13738_v43  ;;  %7851 = vmatprep.subr.bf16.mxu1 %v13741_v44  ;;  %v13795_v43 = vld [vmem:[#allocation8 + $0xd2c] ss:$16 sps:$4 sm:$0xff]   ;;  %v11319_v44 = vcombine.high %v182_v40, %v194_v41 }
 0x1b9   :  { %6415 = vmatmul.mubr.bf16.vlgmr.msra.gmra.mrb[0].mxu0 %v11198_v47  ;;  %7771 = vmatmul.mubr.bf16.vlgmr.msra.gmra.mrb[0].mxu1 %v11198_v47  ;;  %v13798_v47 = vld [vmem:[#allocation8 + $0xd44] ss:$16 sps:$4 sm:$0xff]  }
 0x1ba   :  { %6496 = vmatpush1.bf16.msra.mxu0 %v13736_v45  ;;  %7852 = vmatpush1.bf16.msra.mxu1 %v13739_v46  ;;  %v13790_v45 = vld [vmem:[#allocation8 + $0xd20] ss:$16 sps:$4 sm:$0xff]   ;;  %v13793_v46 = vld [vmem:[#allocation8 + $0xd28] ss:$16 sps:$4 sm:$0xff]  }
 0x1bb   :  { %6497 = vmatprep.subr.bf16.mxu0 %v13744_v50  ;;  %7853 = vmatprep.subr.bf16.mxu1 %v13747_v51  ;;  %v13799_v50 = vld [vmem:[#allocation8 + $0xd48] ss:$16 sps:$4 sm:$0xff]   ;;  %v11318_v51 = vcombine.low %v182_v40, %v194_v41  ;;  %v13850_v40 = vld [vmem:[#allocation8 + $0xe60] ss:$16 sps:$4 sm:$0xff]  }
 0x1bc   :  { %6424 = vmatprep.mubr.bf16.mxu0 %v11223_v52  ;;  %7780 = vmatprep.mubr.bf16.mxu1 %v11223_v52  ;;  %v206_v52 = vld [vmem:[#allocation5 + $0x4a8] sm:$0xff] }
 0x1bd   :  { %v13853_v41 = vld [vmem:[#allocation8 + $0xe68] ss:$16 sps:$4 sm:$0xff]  }
 0x1be   :  { %6498 = vmatpush1.bf16.msra.mxu0 %v13742_v53  ;;  %7854 = vmatpush1.bf16.msra.mxu1 %v13745_v54  ;;  %v218_v53 = vld [vmem:[#allocation5 + $0x508] sm:$0xff]  ;;  %v13804_v54 = vld [vmem:[#allocation8 + $0xd64] ss:$16 sps:$4 sm:$0xff]  }
 0x1bf   :  { %6499 = vmatprep.subr.bf16.mxu0 %v13750_v55  ;;  %7855 = vmatprep.subr.bf16.mxu1 %v13753_v56  ;;  %v13807_v55 = vld [vmem:[#allocation8 + $0xd6c] ss:$16 sps:$4 sm:$0xff]   ;;  %v11343_v56 = vcombine.high %v206_v52, %v218_v53 }
 0x1c1   :  { %6425 = vmatmul.mubr.bf16.gmra.mrb[4].mxu0 %v11222_v59  ;;  %7781 = vmatmul.mubr.bf16.gmra.mrb[4].mxu1 %v11222_v59  ;;  %v13810_v59 = vld [vmem:[#allocation8 + $0xd84] ss:$16 sps:$4 sm:$0xff]  }
 0x1c2   :  { %6500 = vmatpush1.bf16.msra.mxu0 %v13748_v57  ;;  %7856 = vmatpush1.bf16.msra.mxu1 %v13751_v58  ;;  %v13802_v57 = vld [vmem:[#allocation8 + $0xd60] ss:$16 sps:$4 sm:$0xff]   ;;  %v13805_v58 = vld [vmem:[#allocation8 + $0xd68] ss:$16 sps:$4 sm:$0xff]  }
 0x1c3   :  { %6501 = vmatprep.subr.bf16.mxu0 %v13756_v62  ;;  %7857 = vmatprep.subr.bf16.mxu1 %v13759_v63  ;;  %v13811_v62 = vld [vmem:[#allocation8 + $0xd88] ss:$16 sps:$4 sm:$0xff]   ;;  %v11342_v63 = vcombine.low %v206_v52, %v218_v53  ;;  %v135_v52 = vld [vmem:[#allocation5 + $0x270] sm:$0xff] }
 0x1c4   :  { %v6034_v5 = vpop.f32.mrb[32].mxu0  ;;  %v7390_v6 = vpop.f32.mrb[32].mxu1  ;;  %6434 = vmatprep.mubr.bf16.mxu0 %v11247_v2  ;;  %7790 = vmatprep.mubr.bf16.mxu1 %v11247_v2  ;;  %v13816_v2 = vld [vmem:[#allocation8 + $0xda4] ss:$16 sps:$4 sm:$0xff]  }
 0x1c5   :  { %v6036_v9 = vpop.f32.mrb[33].mxu0  ;;  %v7392_v10 = vpop.f32.mrb[33].mxu1  ;;  %v13814_v5 = vld [vmem:[#allocation8 + $0xda0] ss:$16 sps:$4 sm:$0xff]   ;;  %v13817_v6 = vld [vmem:[#allocation8 + $0xda8] ss:$16 sps:$4 sm:$0xff]  }
 0x1c6   :  { %v6038_v14 = vpop.f32.mrb[34].mxu0  ;;  %6502 = vmatpush1.bf16.msra.mxu0 %v13754_v0  ;;  %v7394_v15 = vpop.f32.mrb[34].mxu1  ;;  %7858 = vmatpush1.bf16.msra.mxu1 %v13757_v1  ;;  %v230_v0 = vld [vmem:[#allocation5 + $0x568] sm:$0xff]  ;;  %v13820_v9 = vld [vmem:[#allocation8 + $0xdc0] ss:$16 sps:$4 sm:$0xff]  }
 0x1c7   :  { %v6040_v16 = vpop.f32.mrb[35].mxu0  ;;  %v7396_v17 = vpop.f32.mrb[35].mxu1  ;;  %6503 = vmatprep.subr.bf16.mxu0 %v13762_v3  ;;  %7859 = vmatprep.subr.bf16.mxu1 %v13765_v4  ;;  %v242_v1 = vld [vmem:[#allocation5 + $0x5c8] sm:$0xff]  ;;  %v13828_v14 = vld [vmem:[#allocation8 + $0xde4] ss:$16 sps:$4 sm:$0xff]  }
 0x1c8   :  { %v13819_v3 = vld [vmem:[#allocation8 + $0xdac] ss:$16 sps:$4 sm:$0xff]   ;;  %v11367_v4 = vcombine.high %v230_v0, %v242_v1  ;;  %v13823_v10 = vld [vmem:[#allocation8 + $0xdc8] ss:$16 sps:$4 sm:$0xff]   ;;  %v11201_v16 = vcombine.high %v63_v12, %v75_v13  ;;  %v13826_v17 = vld [vmem:[#allocation8 + $0xde0] ss:$16 sps:$4 sm:$0xff]  }
 0x1c9   :  { %6435 = vmatmul.mubr.bf16.gmra.mrb[8].mxu0 %v11246_v11  ;;  %7791 = vmatmul.mubr.bf16.gmra.mrb[8].mxu1 %v11246_v11  ;;  %v11366_v11 = vcombine.low %v230_v0, %v242_v1  ;;  %v13831_v15 = vld [vmem:[#allocation8 + $0xdec] ss:$16 sps:$4 sm:$0xff]   ;;  %v147_v53 = vld [vmem:[#allocation5 + $0x2d0] sm:$0xff] }
 0x1ca   :  { %6504 = vmatpush1.bf16.msra.mxu0 %v13760_v7  ;;  %7860 = vmatpush1.bf16.msra.mxu1 %v13763_v8  ;;  %v13822_v7 = vld [vmem:[#allocation8 + $0xdc4] ss:$16 sps:$4 sm:$0xff]   ;;  %v13825_v8 = vld [vmem:[#allocation8 + $0xdcc] ss:$16 sps:$4 sm:$0xff]   ;;  %v13868_v1 = vld [vmem:[#allocation8 + $0xec0] ss:$16 sps:$4 sm:$0xff]  }
 0x1cb   :  { %6505 = vmatprep.subr.bf16.mxu0 %v13768_v18  ;;  %7861 = vmatprep.subr.bf16.mxu1 %v13771_v19  ;;  %v13829_v18 = vld [vmem:[#allocation8 + $0xde8] ss:$16 sps:$4 sm:$0xff]   ;;  %v13834_v19 = vld [vmem:[#allocation8 + $0xe04] ss:$16 sps:$4 sm:$0xff]   ;;  %v13873_v0 = vld [vmem:[#allocation8 + $0xecc] ss:$16 sps:$4 sm:$0xff]  }
 0x1cc   :  { %6444 = vmatprep.mubr.bf16.mxu0 %v11271_v20  ;;  %7800 = vmatprep.mubr.bf16.mxu1 %v11271_v20  ;;  %v13837_v20 = vld [vmem:[#allocation8 + $0xe0c] ss:$16 sps:$4 sm:$0xff]  }
 0x1ce   :  { %6506 = vmatpush1.bf16.msra.mxu0 %v13766_v21  ;;  %7862 = vmatpush1.bf16.msra.mxu1 %v13769_v22  ;;  %v13832_v21 = vld [vmem:[#allocation8 + $0xe00] ss:$16 sps:$4 sm:$0xff]   ;;  %v13835_v22 = vld [vmem:[#allocation8 + $0xe08] ss:$16 sps:$4 sm:$0xff]  }
 0x1cf   :  { %6507 = vmatprep.subr.bf16.mxu0 %v13774_v23  ;;  %7863 = vmatprep.subr.bf16.mxu1 %v13777_v24  ;;  %v11200_v23 = vcombine.low %v63_v12, %v75_v13  ;;  %v87_v24 = vld [vmem:[#allocation5 + $0xf0] sm:$0xff]  ;;  %v13885_v12 = vld [vmem:[#allocation8 + $0xf0c] ss:$16 sps:$4 sm:$0xff]  }
 0x1d0   :  { %v13880_v13 = vld [vmem:[#allocation8 + $0xf00] ss:$16 sps:$4 sm:$0xff]  }
 0x1d1   :  { %6445 = vmatmul.mubr.bf16.gmra.mrb[12].mxu0 %v11270_v27  ;;  %7801 = vmatmul.mubr.bf16.gmra.mrb[12].mxu1 %v11270_v27  ;;  %v13843_v27 = vld [vmem:[#allocation8 + $0xe2c] ss:$16 sps:$4 sm:$0xff]  }
 0x1d2   :  { %6508 = vmatpush1.bf16.msra.mxu0 %v13772_v25  ;;  %7864 = vmatpush1.bf16.msra.mxu1 %v13775_v26  ;;  %v99_v25 = vld [vmem:[#allocation5 + $0x150] sm:$0xff] }
 0x1d3   :  { %6509 = vmatprep.subr.bf16.mxu0 %v13780_v30  ;;  %7865 = vmatprep.subr.bf16.mxu1 %v13783_v31  ;;  %v13840_v26 = vld [vmem:[#allocation8 + $0xe24] ss:$16 sps:$4 sm:$0xff]   ;;  %v11225_v28 = vcombine.high %v87_v24, %v99_v25  ;;  %v13841_v30 = vld [vmem:[#allocation8 + $0xe28] ss:$16 sps:$4 sm:$0xff]  }
 0x1d4   :  { %6454 = vmatprep.mubr.bf16.mxu0 %v11295_v32  ;;  %7810 = vmatprep.mubr.bf16.mxu1 %v11295_v32  ;;  %v13846_v31 = vld [vmem:[#allocation8 + $0xe44] ss:$16 sps:$4 sm:$0xff]   ;;  %v13849_v32 = vld [vmem:[#allocation8 + $0xe4c] ss:$16 sps:$4 sm:$0xff]  }
 0x1d6   :  { %6510 = vmatpush1.bf16.msra.mxu0 %v13778_v33  ;;  %7866 = vmatpush1.bf16.msra.mxu1 %v13781_v34  ;;  %v13844_v33 = vld [vmem:[#allocation8 + $0xe40] ss:$16 sps:$4 sm:$0xff]   ;;  %v13847_v34 = vld [vmem:[#allocation8 + $0xe48] ss:$16 sps:$4 sm:$0xff]  }
 0x1d7   :  { %6511 = vmatprep.subr.bf16.mxu0 %v13786_v35  ;;  %7867 = vmatprep.subr.bf16.mxu1 %v13789_v36  ;;  %v11224_v35 = vcombine.low %v87_v24, %v99_v25  ;;  %v111_v36 = vld [vmem:[#allocation5 + $0x1b0] sm:$0xff]  ;;  %v13897_v24 = vld [vmem:[#allocation8 + $0xf4c] ss:$16 sps:$4 sm:$0xff]  }
 0x1d8   :  { %v13892_v25 = vld [vmem:[#allocation8 + $0xf40] ss:$16 sps:$4 sm:$0xff]  }
 0x1d9   :  { %6455 = vmatmul.mubr.bf16.gmra.mrb[16].mxu0 %v11294_v39  ;;  %7811 = vmatmul.mubr.bf16.gmra.mrb[16].mxu1 %v11294_v39  ;;  %v13855_v39 = vld [vmem:[#allocation8 + $0xe6c] ss:$16 sps:$4 sm:$0xff]  }
 0x1da   :  { %6512 = vmatpush1.bf16.msra.mxu0 %v13784_v37  ;;  %7868 = vmatpush1.bf16.msra.mxu1 %v13787_v38  ;;  %v123_v37 = vld [vmem:[#allocation5 + $0x210] sm:$0xff] }
 0x1db   :  { %6513 = vmatprep.subr.bf16.mxu0 %v13792_v42  ;;  %7869 = vmatprep.subr.bf16.mxu1 %v13795_v43  ;;  %v13852_v38 = vld [vmem:[#allocation8 + $0xe64] ss:$16 sps:$4 sm:$0xff]   ;;  %v11249_v42 = vcombine.high %v111_v36, %v123_v37 }
 0x1dc   :  { %6464 = vmatprep.mubr.bf16.mxu0 %v11319_v44  ;;  %7820 = vmatprep.mubr.bf16.mxu1 %v11319_v44  ;;  %v13858_v43 = vld [vmem:[#allocation8 + $0xe84] ss:$16 sps:$4 sm:$0xff]   ;;  %v13861_v44 = vld [vmem:[#allocation8 + $0xe8c] ss:$16 sps:$4 sm:$0xff]  }
 0x1de   :  { %6514 = vmatpush1.bf16.msra.mxu0 %v13790_v45  ;;  %7870 = vmatpush1.bf16.msra.mxu1 %v13793_v46 }
 0x1df   :  { %6515 = vmatprep.subr.bf16.mxu0 %v13798_v47  ;;  %7871 = vmatprep.subr.bf16.mxu1 %v13801_v48  ;;  %v13856_v47 = vld [vmem:[#allocation8 + $0xe80] ss:$16 sps:$4 sm:$0xff]   ;;  %v13859_v48 = vld [vmem:[#allocation8 + $0xe88] ss:$16 sps:$4 sm:$0xff]  }
 0x1e1   :  { %6465 = vmatmul.mubr.bf16.gmra.mrb[20].mxu0 %v11318_v51  ;;  %7821 = vmatmul.mubr.bf16.gmra.mrb[20].mxu1 %v11318_v51  ;;  %v11248_v51 = vcombine.low %v111_v36, %v123_v37  ;;  %v13909_v36 = vld [vmem:[#allocation8 + $0xf8c] ss:$16 sps:$4 sm:$0xff]   ;;  %v13904_v37 = vld [vmem:[#allocation8 + $0xf80] ss:$16 sps:$4 sm:$0xff]  }
 0x1e2   :  { %6516 = vmatpush1.bf16.msra.mxu0 %v13796_v49  ;;  %7872 = vmatpush1.bf16.msra.mxu1 %v13799_v50 }
 0x1e3   :  { %6517 = vmatprep.subr.bf16.mxu0 %v13804_v54  ;;  %7873 = vmatprep.subr.bf16.mxu1 %v13807_v55 }
 0x1e4   :  { %6474 = vmatprep.mubr.bf16.mxu0 %v11343_v56  ;;  %7830 = vmatprep.mubr.bf16.mxu1 %v11343_v56 }
 0x1e6   :  { %6518 = vmatpush1.bf16.msra.mxu0 %v13802_v57  ;;  %7874 = vmatpush1.bf16.msra.mxu1 %v13805_v58  ;;  %v13864_v58 = vld [vmem:[#allocation8 + $0xea4] ss:$16 sps:$4 sm:$0xff]  }
 0x1e7   :  { %6519 = vmatprep.subr.bf16.mxu0 %v13810_v59  ;;  %7875 = vmatprep.subr.bf16.mxu1 %v13813_v60  ;;  %v13867_v59 = vld [vmem:[#allocation8 + $0xeac] ss:$16 sps:$4 sm:$0xff]   ;;  %v11273_v60 = vcombine.high %v135_v52, %v147_v53 }
 0x1e9   :  { %6475 = vmatmul.mubr.bf16.gmra.mrb[24].mxu0 %v11342_v63  ;;  %7831 = vmatmul.mubr.bf16.gmra.mrb[24].mxu1 %v11342_v63  ;;  %v13870_v63 = vld [vmem:[#allocation8 + $0xec4] ss:$16 sps:$4 sm:$0xff]  }
 0x1ea   :  { %6520 = vmatpush1.bf16.msra.mxu0 %v13808_v61  ;;  %7876 = vmatpush1.bf16.msra.mxu1 %v13811_v62  ;;  %v13862_v61 = vld [vmem:[#allocation8 + $0xea0] ss:$16 sps:$4 sm:$0xff]   ;;  %v13865_v62 = vld [vmem:[#allocation8 + $0xea8] ss:$16 sps:$4 sm:$0xff]  }
 0x1eb   :  { %6521 = vmatprep.subr.bf16.mxu0 %v13816_v2  ;;  %7877 = vmatprep.subr.bf16.mxu1 %v13819_v3  ;;  %v13871_v2 = vld [vmem:[#allocation8 + $0xec8] ss:$16 sps:$4 sm:$0xff]   ;;  %v11272_v3 = vcombine.low %v135_v52, %v147_v53 }
 0x1ec   :  { %6484 = vmatprep.mubr.bf16.mxu0 %v11367_v4  ;;  %7840 = vmatprep.mubr.bf16.mxu1 %v11367_v4  ;;  %v159_v4 = vld [vmem:[#allocation5 + $0x330] sm:$0xff]  ;;  %v64_v52 = vld [vmem:[#allocation5 + $0x38] sm:$0xff] }
 0x1ed   :  { %v76_v53 = vld [vmem:[#allocation5 + $0x98] sm:$0xff] }
 0x1ee   :  { %6522 = vmatpush1.bf16.msra.mxu0 %v13814_v5  ;;  %7878 = vmatpush1.bf16.msra.mxu1 %v13817_v6  ;;  %v171_v5 = vld [vmem:[#allocation5 + $0x390] sm:$0xff] }
 0x1ef   :  { %6523 = vmatprep.subr.bf16.mxu0 %v13822_v7  ;;  %7879 = vmatprep.subr.bf16.mxu1 %v13825_v8  ;;  %v13876_v6 = vld [vmem:[#allocation8 + $0xee4] ss:$16 sps:$4 sm:$0xff]   ;;  %v13879_v7 = vld [vmem:[#allocation8 + $0xeec] ss:$16 sps:$4 sm:$0xff]   ;;  %v11297_v8 = vcombine.high %v159_v4, %v171_v5 }
 0x1f1   :  { %6485 = vmatmul.mubr.bf16.gmra.mrb[48].mxu0 %v11366_v11  ;;  %7841 = vmatmul.mubr.bf16.gmra.mrb[48].mxu1 %v11366_v11  ;;  %v13882_v11 = vld [vmem:[#allocation8 + $0xf04] ss:$16 sps:$4 sm:$0xff]  }
 0x1f2   :  { %6524 = vmatpush1.bf16.msra.mxu0 %v13820_v9  ;;  %7880 = vmatpush1.bf16.msra.mxu1 %v13823_v10  ;;  %v13874_v9 = vld [vmem:[#allocation8 + $0xee0] ss:$16 sps:$4 sm:$0xff]   ;;  %v13877_v10 = vld [vmem:[#allocation8 + $0xee8] ss:$16 sps:$4 sm:$0xff]  }
 0x1f3   :  { %6525 = vmatprep.subr.bf16.mxu0 %v13828_v14  ;;  %7881 = vmatprep.subr.bf16.mxu1 %v13831_v15  ;;  %v13883_v14 = vld [vmem:[#allocation8 + $0xf08] ss:$16 sps:$4 sm:$0xff]   ;;  %v11296_v15 = vcombine.low %v159_v4, %v171_v5  ;;  %v13934_v5 = vld [vmem:[#allocation8 + $0x1020] ss:$16 sps:$4 sm:$0xff]  }
 0x1f4   :  { %6527 = vmatprep.mubr.bf16.mxu0 %v11201_v16  ;;  %7883 = vmatprep.mubr.bf16.mxu1 %v11201_v16  ;;  %v183_v16 = vld [vmem:[#allocation5 + $0x3f0] sm:$0xff] }
 0x1f6   :  { %6526 = vmatpush1.bf16.msra.mxu0 %v13826_v17  ;;  %7882 = vmatpush1.bf16.msra.mxu1 %v13829_v18  ;;  %v195_v17 = vld [vmem:[#allocation5 + $0x450] sm:$0xff] }
 0x1f7   :  { %6608 = vmatprep.subr.bf16.mxu0 %v13834_v19  ;;  %7964 = vmatprep.subr.bf16.mxu1 %v13837_v20  ;;  %v13888_v18 = vld [vmem:[#allocation8 + $0xf24] ss:$16 sps:$4 sm:$0xff]   ;;  %v13891_v19 = vld [vmem:[#allocation8 + $0xf2c] ss:$16 sps:$4 sm:$0xff]   ;;  %v11321_v20 = vcombine.high %v183_v16, %v195_v17 }
 0x1f9   :  { %6528 = vmatmul.mubr.bf16.vlgmr.msra.gmra.mrb[0].mxu0 %v11200_v23  ;;  %7884 = vmatmul.mubr.bf16.vlgmr.msra.gmra.mrb[0].mxu1 %v11200_v23  ;;  %v13894_v23 = vld [vmem:[#allocation8 + $0xf44] ss:$16 sps:$4 sm:$0xff]  }
 0x1fa   :  { %6609 = vmatpush1.bf16.msra.mxu0 %v13832_v21  ;;  %7965 = vmatpush1.bf16.msra.mxu1 %v13835_v22  ;;  %v13886_v21 = vld [vmem:[#allocation8 + $0xf20] ss:$16 sps:$4 sm:$0xff]   ;;  %v13889_v22 = vld [vmem:[#allocation8 + $0xf28] ss:$16 sps:$4 sm:$0xff]  }
 0x1fb   :  { %6610 = vmatprep.subr.bf16.mxu0 %v13840_v26  ;;  %7966 = vmatprep.subr.bf16.mxu1 %v13843_v27  ;;  %v13895_v26 = vld [vmem:[#allocation8 + $0xf48] ss:$16 sps:$4 sm:$0xff]   ;;  %v11320_v27 = vcombine.low %v183_v16, %v195_v17  ;;  %v13946_v16 = vld [vmem:[#allocation8 + $0x1060] ss:$16 sps:$4 sm:$0xff]  }
 0x1fc   :  { %6537 = vmatprep.mubr.bf16.mxu0 %v11225_v28  ;;  %7893 = vmatprep.mubr.bf16.mxu1 %v11225_v28  ;;  %v207_v28 = vld [vmem:[#allocation5 + $0x4b0] sm:$0xff]  ;;  %v13949_v17 = vld [vmem:[#allocation8 + $0x1068] ss:$16 sps:$4 sm:$0xff]  }
 0x1fe   :  { %6611 = vmatpush1.bf16.msra.mxu0 %v13838_v29  ;;  %7967 = vmatpush1.bf16.msra.mxu1 %v13841_v30  ;;  %v219_v29 = vld [vmem:[#allocation5 + $0x510] sm:$0xff] }
 0x1ff   :  { %6612 = vmatprep.subr.bf16.mxu0 %v13846_v31  ;;  %7968 = vmatprep.subr.bf16.mxu1 %v13849_v32  ;;  %v13900_v30 = vld [vmem:[#allocation8 + $0xf64] ss:$16 sps:$4 sm:$0xff]   ;;  %v13903_v31 = vld [vmem:[#allocation8 + $0xf6c] ss:$16 sps:$4 sm:$0xff]   ;;  %v11345_v32 = vcombine.high %v207_v28, %v219_v29 }
 0x201   :  { %6538 = vmatmul.mubr.bf16.gmra.mrb[4].mxu0 %v11224_v35  ;;  %7894 = vmatmul.mubr.bf16.gmra.mrb[4].mxu1 %v11224_v35  ;;  %v13906_v35 = vld [vmem:[#allocation8 + $0xf84] ss:$16 sps:$4 sm:$0xff]  }
 0x202   :  { %6613 = vmatpush1.bf16.msra.mxu0 %v13844_v33  ;;  %7969 = vmatpush1.bf16.msra.mxu1 %v13847_v34  ;;  %v13898_v33 = vld [vmem:[#allocation8 + $0xf60] ss:$16 sps:$4 sm:$0xff]   ;;  %v13901_v34 = vld [vmem:[#allocation8 + $0xf68] ss:$16 sps:$4 sm:$0xff]  }
 0x203   :  { %6614 = vmatprep.subr.bf16.mxu0 %v13852_v38  ;;  %7970 = vmatprep.subr.bf16.mxu1 %v13855_v39  ;;  %v13907_v38 = vld [vmem:[#allocation8 + $0xf88] ss:$16 sps:$4 sm:$0xff]   ;;  %v11344_v39 = vcombine.low %v207_v28, %v219_v29 }
 0x204   :  { %v6147_v45 = vpop.f32.mrb[36].mxu0  ;;  %v7503_v46 = vpop.f32.mrb[36].mxu1  ;;  %6547 = vmatprep.mubr.bf16.mxu0 %v11249_v42  ;;  %7903 = vmatprep.mubr.bf16.mxu1 %v11249_v42  ;;  %v13912_v42 = vld [vmem:[#allocation8 + $0xfa4] ss:$16 sps:$4 sm:$0xff]   ;;  %v136_v28 = vld [vmem:[#allocation5 + $0x278] sm:$0xff] }
 0x205   :  { %v6149_v49 = vpop.f32.mrb[37].mxu0  ;;  %v7505_v50 = vpop.f32.mrb[37].mxu1  ;;  %v13910_v45 = vld [vmem:[#allocation8 + $0xfa0] ss:$16 sps:$4 sm:$0xff]   ;;  %v13913_v46 = vld [vmem:[#allocation8 + $0xfa8] ss:$16 sps:$4 sm:$0xff]  }
 0x206   :  { %v6151_v54 = vpop.f32.mrb[38].mxu0  ;;  %6615 = vmatpush1.bf16.msra.mxu0 %v13850_v40  ;;  %v7507_v55 = vpop.f32.mrb[38].mxu1  ;;  %7971 = vmatpush1.bf16.msra.mxu1 %v13853_v41  ;;  %v231_v40 = vld [vmem:[#allocation5 + $0x570] sm:$0xff]  ;;  %v13919_v50 = vld [vmem:[#allocation8 + $0xfc8] ss:$16 sps:$4 sm:$0xff]  }
 0x207   :  { %v6153_v56 = vpop.f32.mrb[39].mxu0  ;;  %v7509_v57 = vpop.f32.mrb[39].mxu1  ;;  %6616 = vmatprep.subr.bf16.mxu0 %v13858_v43  ;;  %7972 = vmatprep.subr.bf16.mxu1 %v13861_v44  ;;  %v243_v41 = vld [vmem:[#allocation5 + $0x5d0] sm:$0xff]  ;;  %v13915_v43 = vld [vmem:[#allocation8 + $0xfac] ss:$16 sps:$4 sm:$0xff]  }
 0x208   :  { %v11369_v44 = vcombine.high %v231_v40, %v243_v41  ;;  %v13916_v49 = vld [vmem:[#allocation8 + $0xfc0] ss:$16 sps:$4 sm:$0xff]   ;;  %v13924_v54 = vld [vmem:[#allocation8 + $0xfe4] ss:$16 sps:$4 sm:$0xff]   ;;  %v13927_v55 = vld [vmem:[#allocation8 + $0xfec] ss:$16 sps:$4 sm:$0xff]   ;;  %v11203_v56 = vcombine.high %v64_v52, %v76_v53 }
 0x209   :  { %6548 = vmatmul.mubr.bf16.gmra.mrb[8].mxu0 %v11248_v51  ;;  %7904 = vmatmul.mubr.bf16.gmra.mrb[8].mxu1 %v11248_v51  ;;  %v11368_v51 = vcombine.low %v231_v40, %v243_v41  ;;  %v13922_v57 = vld [vmem:[#allocation8 + $0xfe0] ss:$16 sps:$4 sm:$0xff]   ;;  %v148_v29 = vld [vmem:[#allocation5 + $0x2d8] sm:$0xff] }
 0x20a   :  { %6617 = vmatpush1.bf16.msra.mxu0 %v13856_v47  ;;  %7973 = vmatpush1.bf16.msra.mxu1 %v13859_v48  ;;  %v13918_v47 = vld [vmem:[#allocation8 + $0xfc4] ss:$16 sps:$4 sm:$0xff]   ;;  %v13921_v48 = vld [vmem:[#allocation8 + $0xfcc] ss:$16 sps:$4 sm:$0xff]   ;;  %v13964_v41 = vld [vmem:[#allocation8 + $0x10c0] ss:$16 sps:$4 sm:$0xff]  }
 0x20b   :  { %6618 = vmatprep.subr.bf16.mxu0 %v13864_v58  ;;  %7974 = vmatprep.subr.bf16.mxu1 %v13867_v59  ;;  %v13925_v58 = vld [vmem:[#allocation8 + $0xfe8] ss:$16 sps:$4 sm:$0xff]   ;;  %v13930_v59 = vld [vmem:[#allocation8 + $0x1004] ss:$16 sps:$4 sm:$0xff]   ;;  %v13969_v40 = vld [vmem:[#allocation8 + $0x10cc] ss:$16 sps:$4 sm:$0xff]  }
 0x20c   :  { %6557 = vmatprep.mubr.bf16.mxu0 %v11273_v60  ;;  %7913 = vmatprep.mubr.bf16.mxu1 %v11273_v60  ;;  %v13933_v60 = vld [vmem:[#allocation8 + $0x100c] ss:$16 sps:$4 sm:$0xff]  }
 0x20e   :  { %6619 = vmatpush1.bf16.msra.mxu0 %v13862_v61  ;;  %7975 = vmatpush1.bf16.msra.mxu1 %v13865_v62  ;;  %v13928_v61 = vld [vmem:[#allocation8 + $0x1000] ss:$16 sps:$4 sm:$0xff]   ;;  %v13931_v62 = vld [vmem:[#allocation8 + $0x1008] ss:$16 sps:$4 sm:$0xff]  }
 0x20f   :  { %6620 = vmatprep.subr.bf16.mxu0 %v13870_v63  ;;  %7976 = vmatprep.subr.bf16.mxu1 %v13873_v0  ;;  %v11202_v63 = vcombine.low %v64_v52, %v76_v53  ;;  %v88_v0 = vld [vmem:[#allocation5 + $0xf8] sm:$0xff]  ;;  %v13976_v53 = vld [vmem:[#allocation8 + $0x1100] ss:$16 sps:$4 sm:$0xff]  }
 0x210   :  { %v13981_v52 = vld [vmem:[#allocation8 + $0x110c] ss:$16 sps:$4 sm:$0xff]  }
 0x211   :  { %6558 = vmatmul.mubr.bf16.gmra.mrb[12].mxu0 %v11272_v3  ;;  %7914 = vmatmul.mubr.bf16.gmra.mrb[12].mxu1 %v11272_v3  ;;  %v13939_v3 = vld [vmem:[#allocation8 + $0x102c] ss:$16 sps:$4 sm:$0xff]  }
 0x212   :  { %6621 = vmatpush1.bf16.msra.mxu0 %v13868_v1  ;;  %7977 = vmatpush1.bf16.msra.mxu1 %v13871_v2  ;;  %v100_v1 = vld [vmem:[#allocation5 + $0x158] sm:$0xff]  ;;  %v13936_v2 = vld [vmem:[#allocation8 + $0x1024] ss:$16 sps:$4 sm:$0xff]  }
 0x213   :  { %6622 = vmatprep.subr.bf16.mxu0 %v13876_v6  ;;  %7978 = vmatprep.subr.bf16.mxu1 %v13879_v7  ;;  %v11227_v4 = vcombine.high %v88_v0, %v100_v1  ;;  %v13937_v6 = vld [vmem:[#allocation8 + $0x1028] ss:$16 sps:$4 sm:$0xff]   ;;  %v13942_v7 = vld [vmem:[#allocation8 + $0x1044] ss:$16 sps:$4 sm:$0xff]  }
 0x214   :  { %6567 = vmatprep.mubr.bf16.mxu0 %v11297_v8  ;;  %7923 = vmatprep.mubr.bf16.mxu1 %v11297_v8  ;;  %v13945_v8 = vld [vmem:[#allocation8 + $0x104c] ss:$16 sps:$4 sm:$0xff]  }
 0x216   :  { %6623 = vmatpush1.bf16.msra.mxu0 %v13874_v9  ;;  %7979 = vmatpush1.bf16.msra.mxu1 %v13877_v10  ;;  %v13940_v9 = vld [vmem:[#allocation8 + $0x1040] ss:$16 sps:$4 sm:$0xff]   ;;  %v13943_v10 = vld [vmem:[#allocation8 + $0x1048] ss:$16 sps:$4 sm:$0xff]  }
 0x217   :  { %6624 = vmatprep.subr.bf16.mxu0 %v13882_v11  ;;  %7980 = vmatprep.subr.bf16.mxu1 %v13885_v12  ;;  %v11226_v11 = vcombine.low %v88_v0, %v100_v1  ;;  %v112_v12 = vld [vmem:[#allocation5 + $0x1b8] sm:$0xff]  ;;  %v13988_v1 = vld [vmem:[#allocation8 + $0x1140] ss:$16 sps:$4 sm:$0xff]  }
 0x218   :  { %v13993_v0 = vld [vmem:[#allocation8 + $0x114c] ss:$16 sps:$4 sm:$0xff]  }
 0x219   :  { %6568 = vmatmul.mubr.bf16.gmra.mrb[16].mxu0 %v11296_v15  ;;  %7924 = vmatmul.mubr.bf16.gmra.mrb[16].mxu1 %v11296_v15  ;;  %v13951_v15 = vld [vmem:[#allocation8 + $0x106c] ss:$16 sps:$4 sm:$0xff]  }
 0x21a   :  { %6625 = vmatpush1.bf16.msra.mxu0 %v13880_v13  ;;  %7981 = vmatpush1.bf16.msra.mxu1 %v13883_v14  ;;  %v124_v13 = vld [vmem:[#allocation5 + $0x218] sm:$0xff]  ;;  %v13948_v14 = vld [vmem:[#allocation8 + $0x1064] ss:$16 sps:$4 sm:$0xff]  }
 0x21b   :  { %6626 = vmatprep.subr.bf16.mxu0 %v13888_v18  ;;  %7982 = vmatprep.subr.bf16.mxu1 %v13891_v19  ;;  %v11251_v18 = vcombine.high %v112_v12, %v124_v13  ;;  %v13954_v19 = vld [vmem:[#allocation8 + $0x1084] ss:$16 sps:$4 sm:$0xff]  }
 0x21c   :  { %6577 = vmatprep.mubr.bf16.mxu0 %v11321_v20  ;;  %7933 = vmatprep.mubr.bf16.mxu1 %v11321_v20  ;;  %v13957_v20 = vld [vmem:[#allocation8 + $0x108c] ss:$16 sps:$4 sm:$0xff]  }
 0x21e   :  { %6627 = vmatpush1.bf16.msra.mxu0 %v13886_v21  ;;  %7983 = vmatpush1.bf16.msra.mxu1 %v13889_v22 }
 0x21f   :  { %6628 = vmatprep.subr.bf16.mxu0 %v13894_v23  ;;  %7984 = vmatprep.subr.bf16.mxu1 %v13897_v24  ;;  %v13952_v23 = vld [vmem:[#allocation8 + $0x1080] ss:$16 sps:$4 sm:$0xff]   ;;  %v13955_v24 = vld [vmem:[#allocation8 + $0x1088] ss:$16 sps:$4 sm:$0xff]  }
 0x221   :  { %6578 = vmatmul.mubr.bf16.gmra.mrb[20].mxu0 %v11320_v27  ;;  %7934 = vmatmul.mubr.bf16.gmra.mrb[20].mxu1 %v11320_v27  ;;  %v11250_v27 = vcombine.low %v112_v12, %v124_v13  ;;  %v14005_v12 = vld [vmem:[#allocation8 + $0x118c] ss:$16 sps:$4 sm:$0xff]   ;;  %v14000_v13 = vld [vmem:[#allocation8 + $0x1180] ss:$16 sps:$4 sm:$0xff]  }
 0x222   :  { %6629 = vmatpush1.bf16.msra.mxu0 %v13892_v25  ;;  %7985 = vmatpush1.bf16.msra.mxu1 %v13895_v26 }
 0x223   :  { %6630 = vmatprep.subr.bf16.mxu0 %v13900_v30  ;;  %7986 = vmatprep.subr.bf16.mxu1 %v13903_v31 }
 0x224   :  { %6587 = vmatprep.mubr.bf16.mxu0 %v11345_v32  ;;  %7943 = vmatprep.mubr.bf16.mxu1 %v11345_v32 }
 0x226   :  { %6631 = vmatpush1.bf16.msra.mxu0 %v13898_v33  ;;  %7987 = vmatpush1.bf16.msra.mxu1 %v13901_v34  ;;  %v13960_v34 = vld [vmem:[#allocation8 + $0x10a4] ss:$16 sps:$4 sm:$0xff]  }
 0x227   :  { %6632 = vmatprep.subr.bf16.mxu0 %v13906_v35  ;;  %7988 = vmatprep.subr.bf16.mxu1 %v13909_v36  ;;  %v13963_v35 = vld [vmem:[#allocation8 + $0x10ac] ss:$16 sps:$4 sm:$0xff]   ;;  %v11275_v36 = vcombine.high %v136_v28, %v148_v29 }
 0x229   :  { %6588 = vmatmul.mubr.bf16.gmra.mrb[24].mxu0 %v11344_v39  ;;  %7944 = vmatmul.mubr.bf16.gmra.mrb[24].mxu1 %v11344_v39  ;;  %v13966_v39 = vld [vmem:[#allocation8 + $0x10c4] ss:$16 sps:$4 sm:$0xff]  }
 0x22a   :  { %6633 = vmatpush1.bf16.msra.mxu0 %v13904_v37  ;;  %7989 = vmatpush1.bf16.msra.mxu1 %v13907_v38  ;;  %v13958_v37 = vld [vmem:[#allocation8 + $0x10a0] ss:$16 sps:$4 sm:$0xff]   ;;  %v13961_v38 = vld [vmem:[#allocation8 + $0x10a8] ss:$16 sps:$4 sm:$0xff]  }
 0x22b   :  { %6634 = vmatprep.subr.bf16.mxu0 %v13912_v42  ;;  %7990 = vmatprep.subr.bf16.mxu1 %v13915_v43  ;;  %v13967_v42 = vld [vmem:[#allocation8 + $0x10c8] ss:$16 sps:$4 sm:$0xff]   ;;  %v11274_v43 = vcombine.low %v136_v28, %v148_v29  ;;  %v14012_v28 = vld [vmem:[#allocation8 + $0x11c0] ss:$16 sps:$4 sm:$0xff]  }
 0x22c   :  { %6597 = vmatprep.mubr.bf16.mxu0 %v11369_v44  ;;  %7953 = vmatprep.mubr.bf16.mxu1 %v11369_v44  ;;  %v160_v44 = vld [vmem:[#allocation5 + $0x338] sm:$0xff] }
 0x22d   :  { %v14015_v29 = vld [vmem:[#allocation8 + $0x11c8] ss:$16 sps:$4 sm:$0xff]  }
 0x22e   :  { %6635 = vmatpush1.bf16.msra.mxu0 %v13910_v45  ;;  %7991 = vmatpush1.bf16.msra.mxu1 %v13913_v46  ;;  %v172_v45 = vld [vmem:[#allocation5 + $0x398] sm:$0xff]  ;;  %v13972_v46 = vld [vmem:[#allocation8 + $0x10e4] ss:$16 sps:$4 sm:$0xff]  }
 0x22f   :  { %6636 = vmatprep.subr.bf16.mxu0 %v13918_v47  ;;  %7992 = vmatprep.subr.bf16.mxu1 %v13921_v48  ;;  %v13975_v47 = vld [vmem:[#allocation8 + $0x10ec] ss:$16 sps:$4 sm:$0xff]   ;;  %v11299_v48 = vcombine.high %v160_v44, %v172_v45 }
 0x231   :  { %6598 = vmatmul.mubr.bf16.gmra.mrb[52].mxu0 %v11368_v51  ;;  %7954 = vmatmul.mubr.bf16.gmra.mrb[52].mxu1 %v11368_v51  ;;  %v13978_v51 = vld [vmem:[#allocation8 + $0x1104] ss:$16 sps:$4 sm:$0xff]  }
 0x232   :  { %6637 = vmatpush1.bf16.msra.mxu0 %v13916_v49  ;;  %7993 = vmatpush1.bf16.msra.mxu1 %v13919_v50  ;;  %v13970_v49 = vld [vmem:[#allocation8 + $0x10e0] ss:$16 sps:$4 sm:$0xff]   ;;  %v13973_v50 = vld [vmem:[#allocation8 + $0x10e8] ss:$16 sps:$4 sm:$0xff]  }
 0x233   :  { %6638 = vmatprep.subr.bf16.mxu0 %v13924_v54  ;;  %7994 = vmatprep.subr.bf16.mxu1 %v13927_v55  ;;  %v13979_v54 = vld [vmem:[#allocation8 + $0x1108] ss:$16 sps:$4 sm:$0xff]   ;;  %v11298_v55 = vcombine.low %v160_v44, %v172_v45  ;;  %v14030_v45 = vld [vmem:[#allocation8 + $0x1220] ss:$16 sps:$4 sm:$0xff]  }
 0x234   :  { %6640 = vmatprep.mubr.bf16.mxu0 %v11203_v56  ;;  %7996 = vmatprep.mubr.bf16.mxu1 %v11203_v56  ;;  %v184_v56 = vld [vmem:[#allocation5 + $0x3f8] sm:$0xff] }
 0x236   :  { %6639 = vmatpush1.bf16.msra.mxu0 %v13922_v57  ;;  %7995 = vmatpush1.bf16.msra.mxu1 %v13925_v58  ;;  %v196_v57 = vld [vmem:[#allocation5 + $0x458] sm:$0xff]  ;;  %v13984_v58 = vld [vmem:[#allocation8 + $0x1124] ss:$16 sps:$4 sm:$0xff]  }
 0x237   :  { %6721 = vmatprep.subr.bf16.mxu0 %v13930_v59  ;;  %8077 = vmatprep.subr.bf16.mxu1 %v13933_v60  ;;  %v13987_v59 = vld [vmem:[#allocation8 + $0x112c] ss:$16 sps:$4 sm:$0xff]   ;;  %v11323_v60 = vcombine.high %v184_v56, %v196_v57 }
 0x239   :  { %6641 = vmatmul.mubr.bf16.vlgmr.msra.gmra.mrb[0].mxu0 %v11202_v63  ;;  %7997 = vmatmul.mubr.bf16.vlgmr.msra.gmra.mrb[0].mxu1 %v11202_v63  ;;  %v13990_v63 = vld [vmem:[#allocation8 + $0x1144] ss:$16 sps:$4 sm:$0xff]  }
 0x23a   :  { %6722 = vmatpush1.bf16.msra.mxu0 %v13928_v61  ;;  %8078 = vmatpush1.bf16.msra.mxu1 %v13931_v62  ;;  %v13982_v61 = vld [vmem:[#allocation8 + $0x1120] ss:$16 sps:$4 sm:$0xff]   ;;  %v13985_v62 = vld [vmem:[#allocation8 + $0x1128] ss:$16 sps:$4 sm:$0xff]  }
 0x23b   :  { %6723 = vmatprep.subr.bf16.mxu0 %v13936_v2  ;;  %8079 = vmatprep.subr.bf16.mxu1 %v13939_v3  ;;  %v13991_v2 = vld [vmem:[#allocation8 + $0x1148] ss:$16 sps:$4 sm:$0xff]   ;;  %v11322_v3 = vcombine.low %v184_v56, %v196_v57  ;;  %v14042_v57 = vld [vmem:[#allocation8 + $0x1260] ss:$16 sps:$4 sm:$0xff]  }
 0x23c   :  { %6650 = vmatprep.mubr.bf16.mxu0 %v11227_v4  ;;  %8006 = vmatprep.mubr.bf16.mxu1 %v11227_v4  ;;  %v208_v4 = vld [vmem:[#allocation5 + $0x4b8] sm:$0xff] }
 0x23e   :  { %6724 = vmatpush1.bf16.msra.mxu0 %v13934_v5  ;;  %8080 = vmatpush1.bf16.msra.mxu1 %v13937_v6  ;;  %v220_v5 = vld [vmem:[#allocation5 + $0x518] sm:$0xff]  ;;  %v13996_v6 = vld [vmem:[#allocation8 + $0x1164] ss:$16 sps:$4 sm:$0xff]  }
 0x23f   :  { %6725 = vmatprep.subr.bf16.mxu0 %v13942_v7  ;;  %8081 = vmatprep.subr.bf16.mxu1 %v13945_v8  ;;  %v13999_v7 = vld [vmem:[#allocation8 + $0x116c] ss:$16 sps:$4 sm:$0xff]   ;;  %v11347_v8 = vcombine.high %v208_v4, %v220_v5 }
 0x241   :  { %6651 = vmatmul.mubr.bf16.gmra.mrb[4].mxu0 %v11226_v11  ;;  %8007 = vmatmul.mubr.bf16.gmra.mrb[4].mxu1 %v11226_v11  ;;  %v14002_v11 = vld [vmem:[#allocation8 + $0x1184] ss:$16 sps:$4 sm:$0xff]  }
 0x242   :  { %6726 = vmatpush1.bf16.msra.mxu0 %v13940_v9  ;;  %8082 = vmatpush1.bf16.msra.mxu1 %v13943_v10  ;;  %v13994_v9 = vld [vmem:[#allocation8 + $0x1160] ss:$16 sps:$4 sm:$0xff]   ;;  %v13997_v10 = vld [vmem:[#allocation8 + $0x1168] ss:$16 sps:$4 sm:$0xff]  }
 0x243   :  { %6727 = vmatprep.subr.bf16.mxu0 %v13948_v14  ;;  %8083 = vmatprep.subr.bf16.mxu1 %v13951_v15  ;;  %v14003_v14 = vld [vmem:[#allocation8 + $0x1188] ss:$16 sps:$4 sm:$0xff]   ;;  %v11346_v15 = vcombine.low %v208_v4, %v220_v5 }
 0x244   :  { %v6260_v21 = vpop.f32.mrb[40].mxu0  ;;  %v7616_v22 = vpop.f32.mrb[40].mxu1  ;;  %6660 = vmatprep.mubr.bf16.mxu0 %v11251_v18  ;;  %8016 = vmatprep.mubr.bf16.mxu1 %v11251_v18  ;;  %v14008_v18 = vld [vmem:[#allocation8 + $0x11a4] ss:$16 sps:$4 sm:$0xff]  }
 0x245   :  { %v6262_v25 = vpop.f32.mrb[41].mxu0  ;;  %v7618_v26 = vpop.f32.mrb[41].mxu1  ;;  %v14006_v21 = vld [vmem:[#allocation8 + $0x11a0] ss:$16 sps:$4 sm:$0xff]   ;;  %v14009_v22 = vld [vmem:[#allocation8 + $0x11a8] ss:$16 sps:$4 sm:$0xff]  }
 0x246   :  { %v6264_v30 = vpop.f32.mrb[42].mxu0  ;;  %6728 = vmatpush1.bf16.msra.mxu0 %v13946_v16  ;;  %v7620_v31 = vpop.f32.mrb[42].mxu1  ;;  %8084 = vmatpush1.bf16.msra.mxu1 %v13949_v17  ;;  %v232_v16 = vld [vmem:[#allocation5 + $0x578] sm:$0xff]  ;;  %v65_v26 = vld [vmem:[#allocation5 + $0x40] sm:$0xff] }
 0x247   :  { %v6266_v32 = vpop.f32.mrb[43].mxu0  ;;  %v7622_v33 = vpop.f32.mrb[43].mxu1  ;;  %6729 = vmatprep.subr.bf16.mxu0 %v13954_v19  ;;  %8085 = vmatprep.subr.bf16.mxu1 %v13957_v20  ;;  %v244_v17 = vld [vmem:[#allocation5 + $0x5d8] sm:$0xff]  ;;  %v14020_v30 = vld [vmem:[#allocation8 + $0x11e4] ss:$16 sps:$4 sm:$0xff]  }
 0x248   :  { %v14011_v19 = vld [vmem:[#allocation8 + $0x11ac] ss:$16 sps:$4 sm:$0xff]   ;;  %v11371_v20 = vcombine.high %v232_v16, %v244_v17  ;;  %v11370_v25 = vcombine.low %v232_v16, %v244_v17  ;;  %v14018_v33 = vld [vmem:[#allocation8 + $0x11e0] ss:$16 sps:$4 sm:$0xff]  }
 0x249   :  { %6661 = vmatmul.mubr.bf16.gmra.mrb[8].mxu0 %v11250_v27  ;;  %8017 = vmatmul.mubr.bf16.gmra.mrb[8].mxu1 %v11250_v27  ;;  %v77_v27 = vld [vmem:[#allocation5 + $0xa0] sm:$0xff]  ;;  %v14023_v31 = vld [vmem:[#allocation8 + $0x11ec] ss:$16 sps:$4 sm:$0xff]  }
 0x24a   :  { %6730 = vmatpush1.bf16.msra.mxu0 %v13952_v23  ;;  %8086 = vmatpush1.bf16.msra.mxu1 %v13955_v24  ;;  %v14014_v23 = vld [vmem:[#allocation8 + $0x11c4] ss:$16 sps:$4 sm:$0xff]   ;;  %v14017_v24 = vld [vmem:[#allocation8 + $0x11cc] ss:$16 sps:$4 sm:$0xff]   ;;  %v11205_v32 = vcombine.high %v65_v26, %v77_v27 }
 0x24b   :  { %6731 = vmatprep.subr.bf16.mxu0 %v13960_v34  ;;  %8087 = vmatprep.subr.bf16.mxu1 %v13963_v35  ;;  %v14021_v34 = vld [vmem:[#allocation8 + $0x11e8] ss:$16 sps:$4 sm:$0xff]   ;;  %v14026_v35 = vld [vmem:[#allocation8 + $0x1204] ss:$16 sps:$4 sm:$0xff]   ;;  %v14065_v16 = vld [vmem:[#allocation8 + $0x12cc] ss:$16 sps:$4 sm:$0xff]  }
 0x24c   :  { %6670 = vmatprep.mubr.bf16.mxu0 %v11275_v36  ;;  %8026 = vmatprep.mubr.bf16.mxu1 %v11275_v36  ;;  %v14029_v36 = vld [vmem:[#allocation8 + $0x120c] ss:$16 sps:$4 sm:$0xff]  }
 0x24e   :  { %6732 = vmatpush1.bf16.msra.mxu0 %v13958_v37  ;;  %8088 = vmatpush1.bf16.msra.mxu1 %v13961_v38  ;;  %v11204_v37 = vcombine.low %v65_v26, %v77_v27  ;;  %v89_v38 = vld [vmem:[#allocation5 + $0x100] sm:$0xff]  ;;  %v14069_v26 = vld [vmem:[#allocation8 + $0x12e8] ss:$16 sps:$4 sm:$0xff]  }
 0x24f   :  { %6733 = vmatprep.subr.bf16.mxu0 %v13966_v39  ;;  %8089 = vmatprep.subr.bf16.mxu1 %v13969_v40  ;;  %v101_v39 = vld [vmem:[#allocation5 + $0x160] sm:$0xff] }
 0x250   :  { %v14024_v40 = vld [vmem:[#allocation8 + $0x1200] ss:$16 sps:$4 sm:$0xff]   ;;  %v11229_v44 = vcombine.high %v89_v38, %v101_v39  ;;  %v14074_v27 = vld [vmem:[#allocation8 + $0x1304] ss:$16 sps:$4 sm:$0xff]  }
 0x251   :  { %6671 = vmatmul.mubr.bf16.gmra.mrb[12].mxu0 %v11274_v43  ;;  %8027 = vmatmul.mubr.bf16.gmra.mrb[12].mxu1 %v11274_v43  ;;  %v14035_v43 = vld [vmem:[#allocation8 + $0x122c] ss:$16 sps:$4 sm:$0xff]  }
 0x252   :  { %6734 = vmatpush1.bf16.msra.mxu0 %v13964_v41  ;;  %8090 = vmatpush1.bf16.msra.mxu1 %v13967_v42  ;;  %v14027_v41 = vld [vmem:[#allocation8 + $0x1208] ss:$16 sps:$4 sm:$0xff]   ;;  %v14032_v42 = vld [vmem:[#allocation8 + $0x1224] ss:$16 sps:$4 sm:$0xff]  }
 0x253   :  { %6735 = vmatprep.subr.bf16.mxu0 %v13972_v46  ;;  %8091 = vmatprep.subr.bf16.mxu1 %v13975_v47  ;;  %v14033_v46 = vld [vmem:[#allocation8 + $0x1228] ss:$16 sps:$4 sm:$0xff]   ;;  %v14038_v47 = vld [vmem:[#allocation8 + $0x1244] ss:$16 sps:$4 sm:$0xff]  }
 0x254   :  { %6680 = vmatprep.mubr.bf16.mxu0 %v11299_v48  ;;  %8036 = vmatprep.mubr.bf16.mxu1 %v11299_v48  ;;  %v14041_v48 = vld [vmem:[#allocation8 + $0x124c] ss:$16 sps:$4 sm:$0xff]  }
 0x256   :  { %6736 = vmatpush1.bf16.msra.mxu0 %v13970_v49  ;;  %8092 = vmatpush1.bf16.msra.mxu1 %v13973_v50  ;;  %v11228_v49 = vcombine.low %v89_v38, %v101_v39  ;;  %v113_v50 = vld [vmem:[#allocation5 + $0x1c0] sm:$0xff]  ;;  %v14081_v38 = vld [vmem:[#allocation8 + $0x1328] ss:$16 sps:$4 sm:$0xff]  }
 0x257   :  { %6737 = vmatprep.subr.bf16.mxu0 %v13978_v51  ;;  %8093 = vmatprep.subr.bf16.mxu1 %v13981_v52  ;;  %v125_v51 = vld [vmem:[#allocation5 + $0x220] sm:$0xff] }
 0x258   :  { %v14036_v52 = vld [vmem:[#allocation8 + $0x1240] ss:$16 sps:$4 sm:$0xff]   ;;  %v11253_v56 = vcombine.high %v113_v50, %v125_v51  ;;  %v14086_v39 = vld [vmem:[#allocation8 + $0x1344] ss:$16 sps:$4 sm:$0xff]  }
 0x259   :  { %6681 = vmatmul.mubr.bf16.gmra.mrb[16].mxu0 %v11298_v55  ;;  %8037 = vmatmul.mubr.bf16.gmra.mrb[16].mxu1 %v11298_v55  ;;  %v14047_v55 = vld [vmem:[#allocation8 + $0x126c] ss:$16 sps:$4 sm:$0xff]  }
 0x25a   :  { %6738 = vmatpush1.bf16.msra.mxu0 %v13976_v53  ;;  %8094 = vmatpush1.bf16.msra.mxu1 %v13979_v54  ;;  %v14039_v53 = vld [vmem:[#allocation8 + $0x1248] ss:$16 sps:$4 sm:$0xff]   ;;  %v14044_v54 = vld [vmem:[#allocation8 + $0x1264] ss:$16 sps:$4 sm:$0xff]  }
 0x25b   :  { %6739 = vmatprep.subr.bf16.mxu0 %v13984_v58  ;;  %8095 = vmatprep.subr.bf16.mxu1 %v13987_v59  ;;  %v14045_v58 = vld [vmem:[#allocation8 + $0x1268] ss:$16 sps:$4 sm:$0xff]   ;;  %v14050_v59 = vld [vmem:[#allocation8 + $0x1284] ss:$16 sps:$4 sm:$0xff]  }
 0x25c   :  { %6690 = vmatprep.mubr.bf16.mxu0 %v11323_v60  ;;  %8046 = vmatprep.mubr.bf16.mxu1 %v11323_v60  ;;  %v14053_v60 = vld [vmem:[#allocation8 + $0x128c] ss:$16 sps:$4 sm:$0xff]  }
 0x25e   :  { %6740 = vmatpush1.bf16.msra.mxu0 %v13982_v61  ;;  %8096 = vmatpush1.bf16.msra.mxu1 %v13985_v62 }
 0x25f   :  { %6741 = vmatprep.subr.bf16.mxu0 %v13990_v63  ;;  %8097 = vmatprep.subr.bf16.mxu1 %v13993_v0 }
 0x261   :  { %6691 = vmatmul.mubr.bf16.gmra.mrb[20].mxu0 %v11322_v3  ;;  %8047 = vmatmul.mubr.bf16.gmra.mrb[20].mxu1 %v11322_v3  ;;  %v149_v3 = vld [vmem:[#allocation5 + $0x2e0] sm:$0xff] }
 0x262   :  { %6742 = vmatpush1.bf16.msra.mxu0 %v13988_v1  ;;  %8098 = vmatpush1.bf16.msra.mxu1 %v13991_v2  ;;  %v11252_v1 = vcombine.low %v113_v50, %v125_v51  ;;  %v137_v2 = vld [vmem:[#allocation5 + $0x280] sm:$0xff]  ;;  %v14093_v50 = vld [vmem:[#allocation8 + $0x1368] ss:$16 sps:$4 sm:$0xff]  }
 0x263   :  { %6743 = vmatprep.subr.bf16.mxu0 %v13996_v6  ;;  %8099 = vmatprep.subr.bf16.mxu1 %v13999_v7  ;;  %v14048_v6 = vld [vmem:[#allocation8 + $0x1280] ss:$16 sps:$4 sm:$0xff]   ;;  %v14051_v7 = vld [vmem:[#allocation8 + $0x1288] ss:$16 sps:$4 sm:$0xff]   ;;  %v11276_v17 = vcombine.low %v137_v2, %v149_v3  ;;  %v14098_v51 = vld [vmem:[#allocation8 + $0x1384] ss:$16 sps:$4 sm:$0xff]  }
 0x264   :  { %6700 = vmatprep.mubr.bf16.mxu0 %v11347_v8  ;;  %8056 = vmatprep.mubr.bf16.mxu1 %v11347_v8 }
 0x266   :  { %6744 = vmatpush1.bf16.msra.mxu0 %v13994_v9  ;;  %8100 = vmatpush1.bf16.msra.mxu1 %v13997_v10  ;;  %v14056_v10 = vld [vmem:[#allocation8 + $0x12a4] ss:$16 sps:$4 sm:$0xff]  }
 0x267   :  { %6745 = vmatprep.subr.bf16.mxu0 %v14002_v11  ;;  %8101 = vmatprep.subr.bf16.mxu1 %v14005_v12  ;;  %v14059_v11 = vld [vmem:[#allocation8 + $0x12ac] ss:$16 sps:$4 sm:$0xff]   ;;  %v11277_v12 = vcombine.high %v137_v2, %v149_v3 }
 0x268   :  { %v66_v2 = vld [vmem:[#allocation5 + $0x48] sm:$0xff] }
 0x269   :  { %6701 = vmatmul.mubr.bf16.gmra.mrb[24].mxu0 %v11346_v15  ;;  %8057 = vmatmul.mubr.bf16.gmra.mrb[24].mxu1 %v11346_v15  ;;  %v14062_v15 = vld [vmem:[#allocation8 + $0x12c4] ss:$16 sps:$4 sm:$0xff]   ;;  %v78_v3 = vld [vmem:[#allocation5 + $0xa8] sm:$0xff] }
 0x26a   :  { %6746 = vmatpush1.bf16.msra.mxu0 %v14000_v13  ;;  %8102 = vmatpush1.bf16.msra.mxu1 %v14003_v14  ;;  %v14054_v13 = vld [vmem:[#allocation8 + $0x12a0] ss:$16 sps:$4 sm:$0xff]   ;;  %v14057_v14 = vld [vmem:[#allocation8 + $0x12a8] ss:$16 sps:$4 sm:$0xff]  }
 0x26b   :  { %6747 = vmatprep.subr.bf16.mxu0 %v14008_v18  ;;  %8103 = vmatprep.subr.bf16.mxu1 %v14011_v19  ;;  %v161_v18 = vld [vmem:[#allocation5 + $0x340] sm:$0xff] }
 0x26c   :  { %6710 = vmatprep.mubr.bf16.mxu0 %v11371_v20  ;;  %8066 = vmatprep.mubr.bf16.mxu1 %v11371_v20  ;;  %v173_v19 = vld [vmem:[#allocation5 + $0x3a0] sm:$0xff] }
 0x26d   :  { %v14060_v20 = vld [vmem:[#allocation8 + $0x12c0] ss:$16 sps:$4 sm:$0xff]  }
 0x26e   :  { %6748 = vmatpush1.bf16.msra.mxu0 %v14006_v21  ;;  %8104 = vmatpush1.bf16.msra.mxu1 %v14009_v22  ;;  %v14063_v21 = vld [vmem:[#allocation8 + $0x12c8] ss:$16 sps:$4 sm:$0xff]   ;;  %v14068_v22 = vld [vmem:[#allocation8 + $0x12e4] ss:$16 sps:$4 sm:$0xff]  }
 0x26f   :  { %6749 = vmatprep.subr.bf16.mxu0 %v14014_v23  ;;  %8105 = vmatprep.subr.bf16.mxu1 %v14017_v24  ;;  %v14071_v23 = vld [vmem:[#allocation8 + $0x12ec] ss:$16 sps:$4 sm:$0xff]   ;;  %v11301_v24 = vcombine.high %v161_v18, %v173_v19 }
 0x271   :  { %6711 = vmatmul.mubr.bf16.gmra.mrb[56].mxu0 %v11370_v25  ;;  %8067 = vmatmul.mubr.bf16.gmra.mrb[56].mxu1 %v11370_v25  ;;  %v14066_v25 = vld [vmem:[#allocation8 + $0x12e0] ss:$16 sps:$4 sm:$0xff]  }
 0x272   :  { %6750 = vmatpush1.bf16.msra.mxu0 %v14012_v28  ;;  %8106 = vmatpush1.bf16.msra.mxu1 %v14015_v29  ;;  %v14077_v28 = vld [vmem:[#allocation8 + $0x130c] ss:$16 sps:$4 sm:$0xff]   ;;  %v11300_v29 = vcombine.low %v161_v18, %v173_v19  ;;  %v14128_v18 = vld [vmem:[#allocation8 + $0x1424] ss:$16 sps:$4 sm:$0xff]  }
 0x273   :  { %6751 = vmatprep.subr.bf16.mxu0 %v14020_v30  ;;  %8107 = vmatprep.subr.bf16.mxu1 %v14023_v31  ;;  %v185_v30 = vld [vmem:[#allocation5 + $0x400] sm:$0xff]  ;;  %v14131_v19 = vld [vmem:[#allocation8 + $0x142c] ss:$16 sps:$4 sm:$0xff]  }
 0x274   :  { %6753 = vmatprep.mubr.bf16.mxu0 %v11205_v32  ;;  %8109 = vmatprep.mubr.bf16.mxu1 %v11205_v32  ;;  %v197_v31 = vld [vmem:[#allocation5 + $0x460] sm:$0xff] }
 0x275   :  { %v14072_v32 = vld [vmem:[#allocation8 + $0x1300] ss:$16 sps:$4 sm:$0xff]  }
 0x276   :  { %6752 = vmatpush1.bf16.msra.mxu0 %v14018_v33  ;;  %8108 = vmatpush1.bf16.msra.mxu1 %v14021_v34  ;;  %v14075_v33 = vld [vmem:[#allocation8 + $0x1308] ss:$16 sps:$4 sm:$0xff]   ;;  %v14080_v34 = vld [vmem:[#allocation8 + $0x1324] ss:$16 sps:$4 sm:$0xff]  }
 0x277   :  { %6834 = vmatprep.subr.bf16.mxu0 %v14026_v35  ;;  %8190 = vmatprep.subr.bf16.mxu1 %v14029_v36  ;;  %v14083_v35 = vld [vmem:[#allocation8 + $0x132c] ss:$16 sps:$4 sm:$0xff]   ;;  %v11325_v36 = vcombine.high %v185_v30, %v197_v31 }
 0x279   :  { %6754 = vmatmul.mubr.bf16.vlgmr.msra.gmra.mrb[0].mxu0 %v11204_v37  ;;  %8110 = vmatmul.mubr.bf16.vlgmr.msra.gmra.mrb[0].mxu1 %v11204_v37  ;;  %v14078_v37 = vld [vmem:[#allocation8 + $0x1320] ss:$16 sps:$4 sm:$0xff]  }
 0x27a   :  { %6835 = vmatpush1.bf16.msra.mxu0 %v14024_v40  ;;  %8191 = vmatpush1.bf16.msra.mxu1 %v14027_v41  ;;  %v14089_v40 = vld [vmem:[#allocation8 + $0x134c] ss:$16 sps:$4 sm:$0xff]   ;;  %v11324_v41 = vcombine.low %v185_v30, %v197_v31  ;;  %v14140_v30 = vld [vmem:[#allocation8 + $0x1464] ss:$16 sps:$4 sm:$0xff]  }
 0x27b   :  { %6836 = vmatprep.subr.bf16.mxu0 %v14032_v42  ;;  %8192 = vmatprep.subr.bf16.mxu1 %v14035_v43  ;;  %v209_v42 = vld [vmem:[#allocation5 + $0x4c0] sm:$0xff]  ;;  %v14143_v31 = vld [vmem:[#allocation8 + $0x146c] ss:$16 sps:$4 sm:$0xff]  }
 0x27c   :  { %6763 = vmatprep.mubr.bf16.mxu0 %v11229_v44  ;;  %8119 = vmatprep.mubr.bf16.mxu1 %v11229_v44  ;;  %v221_v43 = vld [vmem:[#allocation5 + $0x520] sm:$0xff] }
 0x27d   :  { %v14084_v44 = vld [vmem:[#allocation8 + $0x1340] ss:$16 sps:$4 sm:$0xff]  }
 0x27e   :  { %6837 = vmatpush1.bf16.msra.mxu0 %v14030_v45  ;;  %8193 = vmatpush1.bf16.msra.mxu1 %v14033_v46  ;;  %v14087_v45 = vld [vmem:[#allocation8 + $0x1348] ss:$16 sps:$4 sm:$0xff]   ;;  %v14092_v46 = vld [vmem:[#allocation8 + $0x1364] ss:$16 sps:$4 sm:$0xff]  }
 0x27f   :  { %6838 = vmatprep.subr.bf16.mxu0 %v14038_v47  ;;  %8194 = vmatprep.subr.bf16.mxu1 %v14041_v48  ;;  %v14095_v47 = vld [vmem:[#allocation8 + $0x136c] ss:$16 sps:$4 sm:$0xff]   ;;  %v11349_v48 = vcombine.high %v209_v42, %v221_v43 }
 0x281   :  { %6764 = vmatmul.mubr.bf16.gmra.mrb[4].mxu0 %v11228_v49  ;;  %8120 = vmatmul.mubr.bf16.gmra.mrb[4].mxu1 %v11228_v49  ;;  %v14090_v49 = vld [vmem:[#allocation8 + $0x1360] ss:$16 sps:$4 sm:$0xff]  }
 0x282   :  { %6839 = vmatpush1.bf16.msra.mxu0 %v14036_v52  ;;  %8195 = vmatpush1.bf16.msra.mxu1 %v14039_v53  ;;  %v14101_v52 = vld [vmem:[#allocation8 + $0x138c] ss:$16 sps:$4 sm:$0xff]   ;;  %v11348_v53 = vcombine.low %v209_v42, %v221_v43 }
 0x283   :  { %6840 = vmatprep.subr.bf16.mxu0 %v14044_v54  ;;  %8196 = vmatprep.subr.bf16.mxu1 %v14047_v55  ;;  %v233_v54 = vld [vmem:[#allocation5 + $0x580] sm:$0xff]  ;;  %v138_v42 = vld [vmem:[#allocation5 + $0x288] sm:$0xff] }
 0x284   :  { %v6373_v61 = vpop.f32.mrb[44].mxu0  ;;  %v7729_v62 = vpop.f32.mrb[44].mxu1  ;;  %6773 = vmatprep.mubr.bf16.mxu0 %v11253_v56  ;;  %8129 = vmatprep.mubr.bf16.mxu1 %v11253_v56  ;;  %v245_v55 = vld [vmem:[#allocation5 + $0x5e0] sm:$0xff]  ;;  %v150_v43 = vld [vmem:[#allocation5 + $0x2e8] sm:$0xff] }
 0x285   :  { %v6375_v63 = vpop.f32.mrb[45].mxu0  ;;  %v7731_v0 = vpop.f32.mrb[45].mxu1  ;;  %v14096_v56 = vld [vmem:[#allocation8 + $0x1380] ss:$16 sps:$4 sm:$0xff]   ;;  %v14105_v62 = vld [vmem:[#allocation8 + $0x13a8] ss:$16 sps:$4 sm:$0xff]  }
 0x286   :  { %v6377_v4 = vpop.f32.mrb[46].mxu0  ;;  %6841 = vmatpush1.bf16.msra.mxu0 %v14042_v57  ;;  %v7733_v5 = vpop.f32.mrb[46].mxu1  ;;  %8197 = vmatpush1.bf16.msra.mxu1 %v14045_v58  ;;  %v14099_v57 = vld [vmem:[#allocation8 + $0x1388] ss:$16 sps:$4 sm:$0xff]   ;;  %v14104_v58 = vld [vmem:[#allocation8 + $0x13a4] ss:$16 sps:$4 sm:$0xff]  }
 0x287   :  { %v6379_v8 = vpop.f32.mrb[47].mxu0  ;;  %v7735_v9 = vpop.f32.mrb[47].mxu1  ;;  %6842 = vmatprep.subr.bf16.mxu0 %v14050_v59  ;;  %8198 = vmatprep.subr.bf16.mxu1 %v14053_v60  ;;  %v14107_v59 = vld [vmem:[#allocation8 + $0x13ac] ss:$16 sps:$4 sm:$0xff]   ;;  %v11373_v60 = vcombine.high %v233_v54, %v245_v55  ;;  %v14102_v61 = vld [vmem:[#allocation8 + $0x13a0] ss:$16 sps:$4 sm:$0xff]  }
 0x288   :  { %v14110_v63 = vld [vmem:[#allocation8 + $0x13c4] ss:$16 sps:$4 sm:$0xff]   ;;  %v14113_v0 = vld [vmem:[#allocation8 + $0x13cc] ss:$16 sps:$4 sm:$0xff]   ;;  %v14108_v4 = vld [vmem:[#allocation8 + $0x13c0] ss:$16 sps:$4 sm:$0xff]   ;;  %v11207_v8 = vcombine.high %v66_v2, %v78_v3 }
 0x289   :  { %6774 = vmatmul.mubr.bf16.gmra.mrb[8].mxu0 %v11252_v1  ;;  %8130 = vmatmul.mubr.bf16.gmra.mrb[8].mxu1 %v11252_v1  ;;  %v11372_v1 = vcombine.low %v233_v54, %v245_v55  ;;  %v14111_v5 = vld [vmem:[#allocation8 + $0x13c8] ss:$16 sps:$4 sm:$0xff]   ;;  %v14114_v9 = vld [vmem:[#allocation8 + $0x13e0] ss:$16 sps:$4 sm:$0xff]   ;;  %v14158_v55 = vld [vmem:[#allocation8 + $0x14c4] ss:$16 sps:$4 sm:$0xff]  }
 0x28a   :  { %6843 = vmatpush1.bf16.msra.mxu0 %v14048_v6  ;;  %8199 = vmatpush1.bf16.msra.mxu1 %v14051_v7  ;;  %v14116_v6 = vld [vmem:[#allocation8 + $0x13e4] ss:$16 sps:$4 sm:$0xff]   ;;  %v14119_v7 = vld [vmem:[#allocation8 + $0x13ec] ss:$16 sps:$4 sm:$0xff]   ;;  %v14153_v54 = vld [vmem:[#allocation8 + $0x14a8] ss:$16 sps:$4 sm:$0xff]  }
 0x28b   :  { %6844 = vmatprep.subr.bf16.mxu0 %v14056_v10  ;;  %8200 = vmatprep.subr.bf16.mxu1 %v14059_v11  ;;  %v14117_v10 = vld [vmem:[#allocation8 + $0x13e8] ss:$16 sps:$4 sm:$0xff]   ;;  %v14122_v11 = vld [vmem:[#allocation8 + $0x1404] ss:$16 sps:$4 sm:$0xff]  }
 0x28c   :  { %6783 = vmatprep.mubr.bf16.mxu0 %v11277_v12  ;;  %8139 = vmatprep.mubr.bf16.mxu1 %v11277_v12  ;;  %v14125_v12 = vld [vmem:[#allocation8 + $0x140c] ss:$16 sps:$4 sm:$0xff]  }
 0x28e   :  { %6845 = vmatpush1.bf16.msra.mxu0 %v14054_v13  ;;  %8201 = vmatpush1.bf16.msra.mxu1 %v14057_v14  ;;  %v11206_v13 = vcombine.low %v66_v2, %v78_v3  ;;  %v90_v14 = vld [vmem:[#allocation5 + $0x108] sm:$0xff]  ;;  %v14170_v3 = vld [vmem:[#allocation8 + $0x1504] ss:$16 sps:$4 sm:$0xff]  }
 0x28f   :  { %6846 = vmatprep.subr.bf16.mxu0 %v14062_v15  ;;  %8202 = vmatprep.subr.bf16.mxu1 %v14065_v16  ;;  %v102_v15 = vld [vmem:[#allocation5 + $0x168] sm:$0xff]  ;;  %v14120_v16 = vld [vmem:[#allocation8 + $0x1400] ss:$16 sps:$4 sm:$0xff]  }
 0x290   :  { %v14165_v2 = vld [vmem:[#allocation8 + $0x14e8] ss:$16 sps:$4 sm:$0xff]  }
 0x291   :  { %6784 = vmatmul.mubr.bf16.gmra.mrb[12].mxu0 %v11276_v17  ;;  %8140 = vmatmul.mubr.bf16.gmra.mrb[12].mxu1 %v11276_v17  ;;  %v14123_v17 = vld [vmem:[#allocation8 + $0x1408] ss:$16 sps:$4 sm:$0xff]  }
 0x292   :  { %6847 = vmatpush1.bf16.msra.mxu0 %v14060_v20  ;;  %8203 = vmatpush1.bf16.msra.mxu1 %v14063_v21  ;;  %v11231_v20 = vcombine.high %v90_v14, %v102_v15  ;;  %v14126_v21 = vld [vmem:[#allocation8 + $0x1420] ss:$16 sps:$4 sm:$0xff]  }
 0x293   :  { %6848 = vmatprep.subr.bf16.mxu0 %v14068_v22  ;;  %8204 = vmatprep.subr.bf16.mxu1 %v14071_v23  ;;  %v14129_v22 = vld [vmem:[#allocation8 + $0x1428] ss:$16 sps:$4 sm:$0xff]   ;;  %v14134_v23 = vld [vmem:[#allocation8 + $0x1444] ss:$16 sps:$4 sm:$0xff]  }
 0x294   :  { %6793 = vmatprep.mubr.bf16.mxu0 %v11301_v24  ;;  %8149 = vmatprep.mubr.bf16.mxu1 %v11301_v24  ;;  %v14137_v24 = vld [vmem:[#allocation8 + $0x144c] ss:$16 sps:$4 sm:$0xff]  }
 0x296   :  { %6849 = vmatpush1.bf16.msra.mxu0 %v14066_v25  ;;  %8205 = vmatpush1.bf16.msra.mxu1 %v14069_v26  ;;  %v11230_v25 = vcombine.low %v90_v14, %v102_v15  ;;  %v114_v26 = vld [vmem:[#allocation5 + $0x1c8] sm:$0xff]  ;;  %v14182_v15 = vld [vmem:[#allocation8 + $0x1544] ss:$16 sps:$4 sm:$0xff]  }
 0x297   :  { %6850 = vmatprep.subr.bf16.mxu0 %v14074_v27  ;;  %8206 = vmatprep.subr.bf16.mxu1 %v14077_v28  ;;  %v126_v27 = vld [vmem:[#allocation5 + $0x228] sm:$0xff]  ;;  %v14132_v28 = vld [vmem:[#allocation8 + $0x1440] ss:$16 sps:$4 sm:$0xff]  }
 0x298   :  { %v14177_v14 = vld [vmem:[#allocation8 + $0x1528] ss:$16 sps:$4 sm:$0xff]  }
 0x299   :  { %6794 = vmatmul.mubr.bf16.gmra.mrb[16].mxu0 %v11300_v29  ;;  %8150 = vmatmul.mubr.bf16.gmra.mrb[16].mxu1 %v11300_v29  ;;  %v14135_v29 = vld [vmem:[#allocation8 + $0x1448] ss:$16 sps:$4 sm:$0xff]  }
 0x29a   :  { %6851 = vmatpush1.bf16.msra.mxu0 %v14072_v32  ;;  %8207 = vmatpush1.bf16.msra.mxu1 %v14075_v33  ;;  %v11255_v32 = vcombine.high %v114_v26, %v126_v27  ;;  %v14138_v33 = vld [vmem:[#allocation8 + $0x1460] ss:$16 sps:$4 sm:$0xff]  }
 0x29b   :  { %6852 = vmatprep.subr.bf16.mxu0 %v14080_v34  ;;  %8208 = vmatprep.subr.bf16.mxu1 %v14083_v35  ;;  %v14141_v34 = vld [vmem:[#allocation8 + $0x1468] ss:$16 sps:$4 sm:$0xff]   ;;  %v14146_v35 = vld [vmem:[#allocation8 + $0x1484] ss:$16 sps:$4 sm:$0xff]  }
 0x29c   :  { %6803 = vmatprep.mubr.bf16.mxu0 %v11325_v36  ;;  %8159 = vmatprep.mubr.bf16.mxu1 %v11325_v36  ;;  %v14149_v36 = vld [vmem:[#allocation8 + $0x148c] ss:$16 sps:$4 sm:$0xff]  }
 0x29e   :  { %6853 = vmatpush1.bf16.msra.mxu0 %v14078_v37  ;;  %8209 = vmatpush1.bf16.msra.mxu1 %v14081_v38 }
 0x29f   :  { %6854 = vmatprep.subr.bf16.mxu0 %v14086_v39  ;;  %8210 = vmatprep.subr.bf16.mxu1 %v14089_v40 }
 0x2a1   :  { %6804 = vmatmul.mubr.bf16.gmra.mrb[20].mxu0 %v11324_v41  ;;  %8160 = vmatmul.mubr.bf16.gmra.mrb[20].mxu1 %v11324_v41  ;;  %v11254_v41 = vcombine.low %v114_v26, %v126_v27  ;;  %v14189_v26 = vld [vmem:[#allocation8 + $0x1568] ss:$16 sps:$4 sm:$0xff]   ;;  %v14194_v27 = vld [vmem:[#allocation8 + $0x1584] ss:$16 sps:$4 sm:$0xff]  }
 0x2a2   :  { %6855 = vmatpush1.bf16.msra.mxu0 %v14084_v44  ;;  %8211 = vmatpush1.bf16.msra.mxu1 %v14087_v45 }
 0x2a3   :  { %6856 = vmatprep.subr.bf16.mxu0 %v14092_v46  ;;  %8212 = vmatprep.subr.bf16.mxu1 %v14095_v47  ;;  %v14144_v46 = vld [vmem:[#allocation8 + $0x1480] ss:$16 sps:$4 sm:$0xff]   ;;  %v14147_v47 = vld [vmem:[#allocation8 + $0x1488] ss:$16 sps:$4 sm:$0xff]  }
 0x2a4   :  { %6813 = vmatprep.mubr.bf16.mxu0 %v11349_v48  ;;  %8169 = vmatprep.mubr.bf16.mxu1 %v11349_v48 }
 0x2a6   :  { %6857 = vmatpush1.bf16.msra.mxu0 %v14090_v49  ;;  %8213 = vmatpush1.bf16.msra.mxu1 %v14093_v50  ;;  %v14152_v50 = vld [vmem:[#allocation8 + $0x14a4] ss:$16 sps:$4 sm:$0xff]  }
 0x2a7   :  { %6858 = vmatprep.subr.bf16.mxu0 %v14098_v51  ;;  %8214 = vmatprep.subr.bf16.mxu1 %v14101_v52  ;;  %v14155_v51 = vld [vmem:[#allocation8 + $0x14ac] ss:$16 sps:$4 sm:$0xff]   ;;  %v11279_v52 = vcombine.high %v138_v42, %v150_v43 }
 0x2a9   :  { %6814 = vmatmul.mubr.bf16.gmra.mrb[24].mxu0 %v11348_v53  ;;  %8170 = vmatmul.mubr.bf16.gmra.mrb[24].mxu1 %v11348_v53  ;;  %v14150_v53 = vld [vmem:[#allocation8 + $0x14a0] ss:$16 sps:$4 sm:$0xff]  }
 0x2aa   :  { %6859 = vmatpush1.bf16.msra.mxu0 %v14096_v56  ;;  %8215 = vmatpush1.bf16.msra.mxu1 %v14099_v57  ;;  %v14161_v56 = vld [vmem:[#allocation8 + $0x14cc] ss:$16 sps:$4 sm:$0xff]   ;;  %v11278_v57 = vcombine.low %v138_v42, %v150_v43  ;;  %v67_v42 = vld [vmem:[#allocation5 + $0x50] sm:$0xff] }
 0x2ab   :  { %6860 = vmatprep.subr.bf16.mxu0 %v14104_v58  ;;  %8216 = vmatprep.subr.bf16.mxu1 %v14107_v59  ;;  %v162_v58 = vld [vmem:[#allocation5 + $0x348] sm:$0xff]  ;;  %v79_v43 = vld [vmem:[#allocation5 + $0xb0] sm:$0xff] }
 0x2ac   :  { %6823 = vmatprep.mubr.bf16.mxu0 %v11373_v60  ;;  %8179 = vmatprep.mubr.bf16.mxu1 %v11373_v60  ;;  %v174_v59 = vld [vmem:[#allocation5 + $0x3a8] sm:$0xff]  ;;  %v14156_v60 = vld [vmem:[#allocation8 + $0x14c0] ss:$16 sps:$4 sm:$0xff]  }
 0x2ae   :  { %6861 = vmatpush1.bf16.msra.mxu0 %v14102_v61  ;;  %8217 = vmatpush1.bf16.msra.mxu1 %v14105_v62  ;;  %v14159_v61 = vld [vmem:[#allocation8 + $0x14c8] ss:$16 sps:$4 sm:$0xff]   ;;  %v14164_v62 = vld [vmem:[#allocation8 + $0x14e4] ss:$16 sps:$4 sm:$0xff]  }
 0x2af   :  { %6862 = vmatprep.subr.bf16.mxu0 %v14110_v63  ;;  %8218 = vmatprep.subr.bf16.mxu1 %v14113_v0  ;;  %v14167_v63 = vld [vmem:[#allocation8 + $0x14ec] ss:$16 sps:$4 sm:$0xff]   ;;  %v11303_v0 = vcombine.high %v162_v58, %v174_v59 }
 0x2b1   :  { %6824 = vmatmul.mubr.bf16.gmra.mrb[60].mxu0 %v11372_v1  ;;  %8180 = vmatmul.mubr.bf16.gmra.mrb[60].mxu1 %v11372_v1  ;;  %v14162_v1 = vld [vmem:[#allocation8 + $0x14e0] ss:$16 sps:$4 sm:$0xff]  }
 0x2b2   :  { %6863 = vmatpush1.bf16.msra.mxu0 %v14108_v4  ;;  %8219 = vmatpush1.bf16.msra.mxu1 %v14111_v5  ;;  %v14173_v4 = vld [vmem:[#allocation8 + $0x150c] ss:$16 sps:$4 sm:$0xff]   ;;  %v11302_v5 = vcombine.low %v162_v58, %v174_v59  ;;  %v14224_v58 = vld [vmem:[#allocation8 + $0x1624] ss:$16 sps:$4 sm:$0xff]  }
 0x2b3   :  { %6864 = vmatprep.subr.bf16.mxu0 %v14116_v6  ;;  %8220 = vmatprep.subr.bf16.mxu1 %v14119_v7  ;;  %v186_v6 = vld [vmem:[#allocation5 + $0x408] sm:$0xff] }
 0x2b4   :  { %6866 = vmatprep.mubr.bf16.mxu0 %v11207_v8  ;;  %8222 = vmatprep.mubr.bf16.mxu1 %v11207_v8  ;;  %v198_v7 = vld [vmem:[#allocation5 + $0x468] sm:$0xff]  ;;  %v14168_v8 = vld [vmem:[#allocation8 + $0x1500] ss:$16 sps:$4 sm:$0xff]  }
 0x2b5   :  { %v14227_v59 = vld [vmem:[#allocation8 + $0x162c] ss:$16 sps:$4 sm:$0xff]  }
 0x2b6   :  { %6865 = vmatpush1.bf16.msra.mxu0 %v14114_v9  ;;  %8221 = vmatpush1.bf16.msra.mxu1 %v14117_v10  ;;  %v14171_v9 = vld [vmem:[#allocation8 + $0x1508] ss:$16 sps:$4 sm:$0xff]   ;;  %v14176_v10 = vld [vmem:[#allocation8 + $0x1524] ss:$16 sps:$4 sm:$0xff]  }
 0x2b7   :  { %6947 = vmatprep.subr.bf16.mxu0 %v14122_v11  ;;  %8303 = vmatprep.subr.bf16.mxu1 %v14125_v12  ;;  %v14179_v11 = vld [vmem:[#allocation8 + $0x152c] ss:$16 sps:$4 sm:$0xff]   ;;  %v11327_v12 = vcombine.high %v186_v6, %v198_v7 }
 0x2b9   :  { %6867 = vmatmul.mubr.bf16.vlgmr.msra.gmra.mrb[0].mxu0 %v11206_v13  ;;  %8223 = vmatmul.mubr.bf16.vlgmr.msra.gmra.mrb[0].mxu1 %v11206_v13  ;;  %v14174_v13 = vld [vmem:[#allocation8 + $0x1520] ss:$16 sps:$4 sm:$0xff]  }
 0x2ba   :  { %6948 = vmatpush1.bf16.msra.mxu0 %v14120_v16  ;;  %8304 = vmatpush1.bf16.msra.mxu1 %v14123_v17  ;;  %v14185_v16 = vld [vmem:[#allocation8 + $0x154c] ss:$16 sps:$4 sm:$0xff]   ;;  %v11326_v17 = vcombine.low %v186_v6, %v198_v7  ;;  %v14236_v6 = vld [vmem:[#allocation8 + $0x1664] ss:$16 sps:$4 sm:$0xff]  }
 0x2bb   :  { %6949 = vmatprep.subr.bf16.mxu0 %v14128_v18  ;;  %8305 = vmatprep.subr.bf16.mxu1 %v14131_v19  ;;  %v210_v18 = vld [vmem:[#allocation5 + $0x4c8] sm:$0xff] }
 0x2bc   :  { %6876 = vmatprep.mubr.bf16.mxu0 %v11231_v20  ;;  %8232 = vmatprep.mubr.bf16.mxu1 %v11231_v20  ;;  %v222_v19 = vld [vmem:[#allocation5 + $0x528] sm:$0xff]  ;;  %v14180_v20 = vld [vmem:[#allocation8 + $0x1540] ss:$16 sps:$4 sm:$0xff]  }
 0x2bd   :  { %v14239_v7 = vld [vmem:[#allocation8 + $0x166c] ss:$16 sps:$4 sm:$0xff]  }
 0x2be   :  { %6950 = vmatpush1.bf16.msra.mxu0 %v14126_v21  ;;  %8306 = vmatpush1.bf16.msra.mxu1 %v14129_v22  ;;  %v14183_v21 = vld [vmem:[#allocation8 + $0x1548] ss:$16 sps:$4 sm:$0xff]   ;;  %v14188_v22 = vld [vmem:[#allocation8 + $0x1564] ss:$16 sps:$4 sm:$0xff]  }
 0x2bf   :  { %6951 = vmatprep.subr.bf16.mxu0 %v14134_v23  ;;  %8307 = vmatprep.subr.bf16.mxu1 %v14137_v24  ;;  %v14191_v23 = vld [vmem:[#allocation8 + $0x156c] ss:$16 sps:$4 sm:$0xff]   ;;  %v11351_v24 = vcombine.high %v210_v18, %v222_v19 }
 0x2c1   :  { %6877 = vmatmul.mubr.bf16.gmra.mrb[4].mxu0 %v11230_v25  ;;  %8233 = vmatmul.mubr.bf16.gmra.mrb[4].mxu1 %v11230_v25  ;;  %v14186_v25 = vld [vmem:[#allocation8 + $0x1560] ss:$16 sps:$4 sm:$0xff]  }
 0x2c2   :  { %6952 = vmatpush1.bf16.msra.mxu0 %v14132_v28  ;;  %8308 = vmatpush1.bf16.msra.mxu1 %v14135_v29  ;;  %v14197_v28 = vld [vmem:[#allocation8 + $0x158c] ss:$16 sps:$4 sm:$0xff]   ;;  %v11350_v29 = vcombine.low %v210_v18, %v222_v19  ;;  %v139_v18 = vld [vmem:[#allocation5 + $0x290] sm:$0xff] }
 0x2c3   :  { %6953 = vmatprep.subr.bf16.mxu0 %v14140_v30  ;;  %8309 = vmatprep.subr.bf16.mxu1 %v14143_v31  ;;  %v234_v30 = vld [vmem:[#allocation5 + $0x588] sm:$0xff]  ;;  %v151_v19 = vld [vmem:[#allocation5 + $0x2f0] sm:$0xff] }
 0x2c4   :  { %v6486_v37 = vpop.f32.mrb[48].mxu0  ;;  %v7842_v38 = vpop.f32.mrb[48].mxu1  ;;  %6886 = vmatprep.mubr.bf16.mxu0 %v11255_v32  ;;  %8242 = vmatprep.mubr.bf16.mxu1 %v11255_v32  ;;  %v246_v31 = vld [vmem:[#allocation5 + $0x5e8] sm:$0xff]  ;;  %v14192_v32 = vld [vmem:[#allocation8 + $0x1580] ss:$16 sps:$4 sm:$0xff]  }
 0x2c5   :  { %v6488_v39 = vpop.f32.mrb[49].mxu0  ;;  %v7844_v40 = vpop.f32.mrb[49].mxu1  ;;  %v14198_v37 = vld [vmem:[#allocation8 + $0x15a0] ss:$16 sps:$4 sm:$0xff]   ;;  %v14201_v38 = vld [vmem:[#allocation8 + $0x15a8] ss:$16 sps:$4 sm:$0xff]  }
 0x2c6   :  { %v6490_v44 = vpop.f32.mrb[50].mxu0  ;;  %6954 = vmatpush1.bf16.msra.mxu0 %v14138_v33  ;;  %v7846_v45 = vpop.f32.mrb[50].mxu1  ;;  %8310 = vmatpush1.bf16.msra.mxu1 %v14141_v34  ;;  %v14195_v33 = vld [vmem:[#allocation8 + $0x1588] ss:$16 sps:$4 sm:$0xff]   ;;  %v14200_v34 = vld [vmem:[#allocation8 + $0x15a4] ss:$16 sps:$4 sm:$0xff]  }
 0x2c7   :  { %v6492_v48 = vpop.f32.mrb[51].mxu0  ;;  %v7848_v49 = vpop.f32.mrb[51].mxu1  ;;  %6955 = vmatprep.subr.bf16.mxu0 %v14146_v35  ;;  %8311 = vmatprep.subr.bf16.mxu1 %v14149_v36  ;;  %v14203_v35 = vld [vmem:[#allocation8 + $0x15ac] ss:$16 sps:$4 sm:$0xff]   ;;  %v11375_v36 = vcombine.high %v234_v30, %v246_v31  ;;  %v14206_v39 = vld [vmem:[#allocation8 + $0x15c4] ss:$16 sps:$4 sm:$0xff]  }
 0x2c8   :  { %v14209_v40 = vld [vmem:[#allocation8 + $0x15cc] ss:$16 sps:$4 sm:$0xff]   ;;  %v14204_v44 = vld [vmem:[#allocation8 + $0x15c0] ss:$16 sps:$4 sm:$0xff]   ;;  %v14207_v45 = vld [vmem:[#allocation8 + $0x15c8] ss:$16 sps:$4 sm:$0xff]   ;;  %v11209_v48 = vcombine.high %v67_v42, %v79_v43 }
 0x2c9   :  { %6887 = vmatmul.mubr.bf16.gmra.mrb[8].mxu0 %v11254_v41  ;;  %8243 = vmatmul.mubr.bf16.gmra.mrb[8].mxu1 %v11254_v41  ;;  %v11374_v41 = vcombine.low %v234_v30, %v246_v31  ;;  %v14210_v49 = vld [vmem:[#allocation8 + $0x15e0] ss:$16 sps:$4 sm:$0xff]   ;;  %v14249_v30 = vld [vmem:[#allocation8 + $0x16a8] ss:$16 sps:$4 sm:$0xff]   ;;  %v14254_v31 = vld [vmem:[#allocation8 + $0x16c4] ss:$16 sps:$4 sm:$0xff]  }
 0x2ca   :  { %6956 = vmatpush1.bf16.msra.mxu0 %v14144_v46  ;;  %8312 = vmatpush1.bf16.msra.mxu1 %v14147_v47  ;;  %v14212_v46 = vld [vmem:[#allocation8 + $0x15e4] ss:$16 sps:$4 sm:$0xff]   ;;  %v14215_v47 = vld [vmem:[#allocation8 + $0x15ec] ss:$16 sps:$4 sm:$0xff]  }
 0x2cb   :  { %6957 = vmatprep.subr.bf16.mxu0 %v14152_v50  ;;  %8313 = vmatprep.subr.bf16.mxu1 %v14155_v51  ;;  %v14213_v50 = vld [vmem:[#allocation8 + $0x15e8] ss:$16 sps:$4 sm:$0xff]   ;;  %v14218_v51 = vld [vmem:[#allocation8 + $0x1604] ss:$16 sps:$4 sm:$0xff]  }
 0x2cc   :  { %6896 = vmatprep.mubr.bf16.mxu0 %v11279_v52  ;;  %8252 = vmatprep.mubr.bf16.mxu1 %v11279_v52  ;;  %v14221_v52 = vld [vmem:[#allocation8 + $0x160c] ss:$16 sps:$4 sm:$0xff]  }
 0x2ce   :  { %6958 = vmatpush1.bf16.msra.mxu0 %v14150_v53  ;;  %8314 = vmatpush1.bf16.msra.mxu1 %v14153_v54  ;;  %v11208_v53 = vcombine.low %v67_v42, %v79_v43  ;;  %v91_v54 = vld [vmem:[#allocation5 + $0x110] sm:$0xff]  ;;  %v14261_v42 = vld [vmem:[#allocation8 + $0x16e8] ss:$16 sps:$4 sm:$0xff]  }
 0x2cf   :  { %6959 = vmatprep.subr.bf16.mxu0 %v14158_v55  ;;  %8315 = vmatprep.subr.bf16.mxu1 %v14161_v56  ;;  %v103_v55 = vld [vmem:[#allocation5 + $0x170] sm:$0xff] }
 0x2d0   :  { %v14216_v56 = vld [vmem:[#allocation8 + $0x1600] ss:$16 sps:$4 sm:$0xff]   ;;  %v14266_v43 = vld [vmem:[#allocation8 + $0x1704] ss:$16 sps:$4 sm:$0xff]  }
 0x2d1   :  { %6897 = vmatmul.mubr.bf16.gmra.mrb[12].mxu0 %v11278_v57  ;;  %8253 = vmatmul.mubr.bf16.gmra.mrb[12].mxu1 %v11278_v57  ;;  %v14219_v57 = vld [vmem:[#allocation8 + $0x1608] ss:$16 sps:$4 sm:$0xff]  }
 0x2d2   :  { %6960 = vmatpush1.bf16.msra.mxu0 %v14156_v60  ;;  %8316 = vmatpush1.bf16.msra.mxu1 %v14159_v61  ;;  %v11233_v60 = vcombine.high %v91_v54, %v103_v55  ;;  %v14222_v61 = vld [vmem:[#allocation8 + $0x1620] ss:$16 sps:$4 sm:$0xff]  }
 0x2d3   :  { %6961 = vmatprep.subr.bf16.mxu0 %v14164_v62  ;;  %8317 = vmatprep.subr.bf16.mxu1 %v14167_v63  ;;  %v14225_v62 = vld [vmem:[#allocation8 + $0x1628] ss:$16 sps:$4 sm:$0xff]   ;;  %v14230_v63 = vld [vmem:[#allocation8 + $0x1644] ss:$16 sps:$4 sm:$0xff]  }
 0x2d4   :  { %6906 = vmatprep.mubr.bf16.mxu0 %v11303_v0  ;;  %8262 = vmatprep.mubr.bf16.mxu1 %v11303_v0  ;;  %v14233_v0 = vld [vmem:[#allocation8 + $0x164c] ss:$16 sps:$4 sm:$0xff]  }
 0x2d6   :  { %6962 = vmatpush1.bf16.msra.mxu0 %v14162_v1  ;;  %8318 = vmatpush1.bf16.msra.mxu1 %v14165_v2  ;;  %v11232_v1 = vcombine.low %v91_v54, %v103_v55  ;;  %v115_v2 = vld [vmem:[#allocation5 + $0x1d0] sm:$0xff]  ;;  %v14273_v54 = vld [vmem:[#allocation8 + $0x1728] ss:$16 sps:$4 sm:$0xff]  }
 0x2d7   :  { %6963 = vmatprep.subr.bf16.mxu0 %v14170_v3  ;;  %8319 = vmatprep.subr.bf16.mxu1 %v14173_v4  ;;  %v127_v3 = vld [vmem:[#allocation5 + $0x230] sm:$0xff] }
 0x2d8   :  { %v14228_v4 = vld [vmem:[#allocation8 + $0x1640] ss:$16 sps:$4 sm:$0xff]   ;;  %v14278_v55 = vld [vmem:[#allocation8 + $0x1744] ss:$16 sps:$4 sm:$0xff]  }
 0x2d9   :  { %6907 = vmatmul.mubr.bf16.gmra.mrb[16].mxu0 %v11302_v5  ;;  %8263 = vmatmul.mubr.bf16.gmra.mrb[16].mxu1 %v11302_v5  ;;  %v14231_v5 = vld [vmem:[#allocation8 + $0x1648] ss:$16 sps:$4 sm:$0xff]  }
 0x2da   :  { %6964 = vmatpush1.bf16.msra.mxu0 %v14168_v8  ;;  %8320 = vmatpush1.bf16.msra.mxu1 %v14171_v9  ;;  %v11257_v8 = vcombine.high %v115_v2, %v127_v3  ;;  %v14234_v9 = vld [vmem:[#allocation8 + $0x1660] ss:$16 sps:$4 sm:$0xff]  }
 0x2db   :  { %6965 = vmatprep.subr.bf16.mxu0 %v14176_v10  ;;  %8321 = vmatprep.subr.bf16.mxu1 %v14179_v11  ;;  %v14237_v10 = vld [vmem:[#allocation8 + $0x1668] ss:$16 sps:$4 sm:$0xff]   ;;  %v14242_v11 = vld [vmem:[#allocation8 + $0x1684] ss:$16 sps:$4 sm:$0xff]  }
 0x2dc   :  { %6916 = vmatprep.mubr.bf16.mxu0 %v11327_v12  ;;  %8272 = vmatprep.mubr.bf16.mxu1 %v11327_v12  ;;  %v14245_v12 = vld [vmem:[#allocation8 + $0x168c] ss:$16 sps:$4 sm:$0xff]  }
 0x2de   :  { %6966 = vmatpush1.bf16.msra.mxu0 %v14174_v13  ;;  %8322 = vmatpush1.bf16.msra.mxu1 %v14177_v14 }
 0x2df   :  { %6967 = vmatprep.subr.bf16.mxu0 %v14182_v15  ;;  %8323 = vmatprep.subr.bf16.mxu1 %v14185_v16 }
 0x2e1   :  { %6917 = vmatmul.mubr.bf16.gmra.mrb[20].mxu0 %v11326_v17  ;;  %8273 = vmatmul.mubr.bf16.gmra.mrb[20].mxu1 %v11326_v17  ;;  %v11256_v17 = vcombine.low %v115_v2, %v127_v3  ;;  %v14285_v2 = vld [vmem:[#allocation8 + $0x1768] ss:$16 sps:$4 sm:$0xff]   ;;  %v14290_v3 = vld [vmem:[#allocation8 + $0x1784] ss:$16 sps:$4 sm:$0xff]  }
 0x2e2   :  { %6968 = vmatpush1.bf16.msra.mxu0 %v14180_v20  ;;  %8324 = vmatpush1.bf16.msra.mxu1 %v14183_v21 }
 0x2e3   :  { %6969 = vmatprep.subr.bf16.mxu0 %v14188_v22  ;;  %8325 = vmatprep.subr.bf16.mxu1 %v14191_v23  ;;  %v14240_v22 = vld [vmem:[#allocation8 + $0x1680] ss:$16 sps:$4 sm:$0xff]   ;;  %v14243_v23 = vld [vmem:[#allocation8 + $0x1688] ss:$16 sps:$4 sm:$0xff]  }
 0x2e4   :  { %6926 = vmatprep.mubr.bf16.mxu0 %v11351_v24  ;;  %8282 = vmatprep.mubr.bf16.mxu1 %v11351_v24 }
 0x2e6   :  { %6970 = vmatpush1.bf16.msra.mxu0 %v14186_v25  ;;  %8326 = vmatpush1.bf16.msra.mxu1 %v14189_v26  ;;  %v14248_v26 = vld [vmem:[#allocation8 + $0x16a4] ss:$16 sps:$4 sm:$0xff]  }
 0x2e7   :  { %6971 = vmatprep.subr.bf16.mxu0 %v14194_v27  ;;  %8327 = vmatprep.subr.bf16.mxu1 %v14197_v28  ;;  %v14251_v27 = vld [vmem:[#allocation8 + $0x16ac] ss:$16 sps:$4 sm:$0xff]   ;;  %v11281_v28 = vcombine.high %v139_v18, %v151_v19 }
 0x2e9   :  { %6927 = vmatmul.mubr.bf16.gmra.mrb[24].mxu0 %v11350_v29  ;;  %8283 = vmatmul.mubr.bf16.gmra.mrb[24].mxu1 %v11350_v29  ;;  %v14246_v29 = vld [vmem:[#allocation8 + $0x16a0] ss:$16 sps:$4 sm:$0xff]  }
 0x2ea   :  { %6972 = vmatpush1.bf16.msra.mxu0 %v14192_v32  ;;  %8328 = vmatpush1.bf16.msra.mxu1 %v14195_v33  ;;  %v14257_v32 = vld [vmem:[#allocation8 + $0x16cc] ss:$16 sps:$4 sm:$0xff]   ;;  %v11280_v33 = vcombine.low %v139_v18, %v151_v19 }
 0x2eb   :  { %6973 = vmatprep.subr.bf16.mxu0 %v14200_v34  ;;  %8329 = vmatprep.subr.bf16.mxu1 %v14203_v35  ;;  %v163_v34 = vld [vmem:[#allocation5 + $0x350] sm:$0xff]  ;;  %v68_v18 = vld [vmem:[#allocation5 + $0x58] sm:$0xff] }
 0x2ec   :  { %6936 = vmatprep.mubr.bf16.mxu0 %v11375_v36  ;;  %8292 = vmatprep.mubr.bf16.mxu1 %v11375_v36  ;;  %v175_v35 = vld [vmem:[#allocation5 + $0x3b0] sm:$0xff]  ;;  %v80_v19 = vld [vmem:[#allocation5 + $0xb8] sm:$0xff] }
 0x2ed   :  { %v14252_v36 = vld [vmem:[#allocation8 + $0x16c0] ss:$16 sps:$4 sm:$0xff]  }
 0x2ee   :  { %6974 = vmatpush1.bf16.msra.mxu0 %v14198_v37  ;;  %8330 = vmatpush1.bf16.msra.mxu1 %v14201_v38  ;;  %v14255_v37 = vld [vmem:[#allocation8 + $0x16c8] ss:$16 sps:$4 sm:$0xff]   ;;  %v14260_v38 = vld [vmem:[#allocation8 + $0x16e4] ss:$16 sps:$4 sm:$0xff]  }
 0x2ef   :  { %6975 = vmatprep.subr.bf16.mxu0 %v14206_v39  ;;  %8331 = vmatprep.subr.bf16.mxu1 %v14209_v40  ;;  %v14263_v39 = vld [vmem:[#allocation8 + $0x16ec] ss:$16 sps:$4 sm:$0xff]   ;;  %v11305_v40 = vcombine.high %v163_v34, %v175_v35 }
 0x2f1   :  { %6937 = vmatmul.mubr.bf16.gmra.mrb[64].mxu0 %v11374_v41  ;;  %8293 = vmatmul.mubr.bf16.gmra.mrb[64].mxu1 %v11374_v41  ;;  %v14258_v41 = vld [vmem:[#allocation8 + $0x16e0] ss:$16 sps:$4 sm:$0xff]  }
 0x2f2   :  { %6976 = vmatpush1.bf16.msra.mxu0 %v14204_v44  ;;  %8332 = vmatpush1.bf16.msra.mxu1 %v14207_v45  ;;  %v14269_v44 = vld [vmem:[#allocation8 + $0x170c] ss:$16 sps:$4 sm:$0xff]   ;;  %v11304_v45 = vcombine.low %v163_v34, %v175_v35 }
 0x2f3   :  { %6977 = vmatprep.subr.bf16.mxu0 %v14212_v46  ;;  %8333 = vmatprep.subr.bf16.mxu1 %v14215_v47  ;;  %v187_v46 = vld [vmem:[#allocation5 + $0x410] sm:$0xff]  ;;  %v140_v35 = vld [vmem:[#allocation5 + $0x298] sm:$0xff] }
 0x2f4   :  { %6979 = vmatprep.mubr.bf16.mxu0 %v11209_v48  ;;  %8335 = vmatprep.mubr.bf16.mxu1 %v11209_v48  ;;  %v199_v47 = vld [vmem:[#allocation5 + $0x470] sm:$0xff] }
 0x2f5   :  { %v14264_v48 = vld [vmem:[#allocation8 + $0x1700] ss:$16 sps:$4 sm:$0xff]  }
 0x2f6   :  { %6978 = vmatpush1.bf16.msra.mxu0 %v14210_v49  ;;  %8334 = vmatpush1.bf16.msra.mxu1 %v14213_v50  ;;  %v14267_v49 = vld [vmem:[#allocation8 + $0x1708] ss:$16 sps:$4 sm:$0xff]   ;;  %v14272_v50 = vld [vmem:[#allocation8 + $0x1724] ss:$16 sps:$4 sm:$0xff]  }
 0x2f7   :  { %7060 = vmatprep.subr.bf16.mxu0 %v14218_v51  ;;  %8416 = vmatprep.subr.bf16.mxu1 %v14221_v52  ;;  %v14275_v51 = vld [vmem:[#allocation8 + $0x172c] ss:$16 sps:$4 sm:$0xff]   ;;  %v11329_v52 = vcombine.high %v187_v46, %v199_v47 }
 0x2f9   :  { %6980 = vmatmul.mubr.bf16.vlgmr.msra.gmra.mrb[0].mxu0 %v11208_v53  ;;  %8336 = vmatmul.mubr.bf16.vlgmr.msra.gmra.mrb[0].mxu1 %v11208_v53  ;;  %v14270_v53 = vld [vmem:[#allocation8 + $0x1720] ss:$16 sps:$4 sm:$0xff]  }
 0x2fa   :  { %7061 = vmatpush1.bf16.msra.mxu0 %v14216_v56  ;;  %8417 = vmatpush1.bf16.msra.mxu1 %v14219_v57  ;;  %v14281_v56 = vld [vmem:[#allocation8 + $0x174c] ss:$16 sps:$4 sm:$0xff]   ;;  %v11328_v57 = vcombine.low %v187_v46, %v199_v47  ;;  %v14314_v47 = vld [vmem:[#allocation10] sm:$0xff]  }
 0x2fb   :  { %7062 = vmatprep.subr.bf16.mxu0 %v14224_v58  ;;  %8418 = vmatprep.subr.bf16.mxu1 %v14227_v59  ;;  %v211_v58 = vld [vmem:[#allocation5 + $0x4d0] sm:$0xff] }
 0x2fc   :  { %6989 = vmatprep.mubr.bf16.mxu0 %v11233_v60  ;;  %8345 = vmatprep.mubr.bf16.mxu1 %v11233_v60  ;;  %v223_v59 = vld [vmem:[#allocation5 + $0x530] sm:$0xff] }
 0x2fd   :  { %v14276_v60 = vld [vmem:[#allocation8 + $0x1740] ss:$16 sps:$4 sm:$0xff]  }
 0x2fe   :  { %7063 = vmatpush1.bf16.msra.mxu0 %v14222_v61  ;;  %8419 = vmatpush1.bf16.msra.mxu1 %v14225_v62  ;;  %v14279_v61 = vld [vmem:[#allocation8 + $0x1748] ss:$16 sps:$4 sm:$0xff]   ;;  %v14284_v62 = vld [vmem:[#allocation8 + $0x1764] ss:$16 sps:$4 sm:$0xff]  }
 0x2ff   :  { %7064 = vmatprep.subr.bf16.mxu0 %v14230_v63  ;;  %8420 = vmatprep.subr.bf16.mxu1 %v14233_v0  ;;  %v14287_v63 = vld [vmem:[#allocation8 + $0x176c] ss:$16 sps:$4 sm:$0xff]   ;;  %v11353_v0 = vcombine.high %v211_v58, %v223_v59 }
 0x301   :  { %6990 = vmatmul.mubr.bf16.gmra.mrb[4].mxu0 %v11232_v1  ;;  %8346 = vmatmul.mubr.bf16.gmra.mrb[4].mxu1 %v11232_v1  ;;  %v14282_v1 = vld [vmem:[#allocation8 + $0x1760] ss:$16 sps:$4 sm:$0xff]  }
 0x302   :  { %7065 = vmatpush1.bf16.msra.mxu0 %v14228_v4  ;;  %8421 = vmatpush1.bf16.msra.mxu1 %v14231_v5  ;;  %v14293_v4 = vld [vmem:[#allocation8 + $0x178c] ss:$16 sps:$4 sm:$0xff]   ;;  %v11352_v5 = vcombine.low %v211_v58, %v223_v59  ;;  %v14321_v58 = vld [vmem:[#allocation10 + $0xd0] sm:$0xff]  }
 0x303   :  { %7066 = vmatprep.subr.bf16.mxu0 %v14236_v6  ;;  %8422 = vmatprep.subr.bf16.mxu1 %v14239_v7  ;;  %v235_v6 = vld [vmem:[#allocation5 + $0x590] sm:$0xff]  ;;  %v164_v59 = vld [vmem:[#allocation5 + $0x358] sm:$0xff] }
 0x304   :  { %v6599_v13 = vpop.f32.mrb[52].mxu0  ;;  %v7955_v14 = vpop.f32.mrb[52].mxu1  ;;  %6999 = vmatprep.mubr.bf16.mxu0 %v11257_v8  ;;  %8355 = vmatprep.mubr.bf16.mxu1 %v11257_v8  ;;  %v247_v7 = vld [vmem:[#allocation5 + $0x5f0] sm:$0xff] }
 0x305   :  { %v6601_v15 = vpop.f32.mrb[53].mxu0  ;;  %v7957_v16 = vpop.f32.mrb[53].mxu1  ;;  %v14288_v8 = vld [vmem:[#allocation8 + $0x1780] ss:$16 sps:$4 sm:$0xff]   ;;  %v14297_v14 = vld [vmem:[#allocation8 + $0x17a8] ss:$16 sps:$4 sm:$0xff]  }
 0x306   :  { %v6603_v20 = vpop.f32.mrb[54].mxu0  ;;  %7067 = vmatpush1.bf16.msra.mxu0 %v14234_v9  ;;  %v7959_v21 = vpop.f32.mrb[54].mxu1  ;;  %8423 = vmatpush1.bf16.msra.mxu1 %v14237_v10  ;;  %v14291_v9 = vld [vmem:[#allocation8 + $0x1788] ss:$16 sps:$4 sm:$0xff]   ;;  %v14296_v10 = vld [vmem:[#allocation8 + $0x17a4] ss:$16 sps:$4 sm:$0xff]  }
 0x307   :  { %v6605_v24 = vpop.f32.mrb[55].mxu0  ;;  %v7961_v25 = vpop.f32.mrb[55].mxu1  ;;  %7068 = vmatprep.subr.bf16.mxu0 %v14242_v11  ;;  %8424 = vmatprep.subr.bf16.mxu1 %v14245_v12  ;;  %v14299_v11 = vld [vmem:[#allocation8 + $0x17ac] ss:$16 sps:$4 sm:$0xff]   ;;  %v11377_v12 = vcombine.high %v235_v6, %v247_v7  ;;  %v14294_v13 = vld [vmem:[#allocation8 + $0x17a0] ss:$16 sps:$4 sm:$0xff]  }
 0x308   :  { %v14302_v15 = vld [vmem:[#allocation8 + $0x17c4] ss:$16 sps:$4 sm:$0xff]   ;;  %v14305_v16 = vld [vmem:[#allocation8 + $0x17cc] ss:$16 sps:$4 sm:$0xff]   ;;  %v14300_v20 = vld [vmem:[#allocation8 + $0x17c0] ss:$16 sps:$4 sm:$0xff]   ;;  %v11211_v24 = vcombine.high %v68_v18, %v80_v19 }
 0x309   :  { %7000 = vmatmul.mubr.bf16.gmra.mrb[8].mxu0 %v11256_v17  ;;  %8356 = vmatmul.mubr.bf16.gmra.mrb[8].mxu1 %v11256_v17  ;;  %v11376_v17 = vcombine.low %v235_v6, %v247_v7  ;;  %v14303_v21 = vld [vmem:[#allocation8 + $0x17c8] ss:$16 sps:$4 sm:$0xff]   ;;  %v14306_v25 = vld [vmem:[#allocation8 + $0x17e0] ss:$16 sps:$4 sm:$0xff]  }
 0x30a   :  { %7069 = vmatpush1.bf16.msra.mxu0 %v14240_v22  ;;  %8425 = vmatpush1.bf16.msra.mxu1 %v14243_v23  ;;  %v14308_v22 = vld [vmem:[#allocation8 + $0x17e4] ss:$16 sps:$4 sm:$0xff]   ;;  %v14311_v23 = vld [vmem:[#allocation8 + $0x17ec] ss:$16 sps:$4 sm:$0xff]  }
 0x30b   :  { %7070 = vmatprep.subr.bf16.mxu0 %v14248_v26  ;;  %8426 = vmatprep.subr.bf16.mxu1 %v14251_v27  ;;  %v14309_v26 = vld [vmem:[#allocation8 + $0x17e8] ss:$16 sps:$4 sm:$0xff]   ;;  %v14329_v6 = vld [vmem:[#allocation10 + $0xe0] sm:$0xff]  }
 0x30c   :  { %7009 = vmatprep.mubr.bf16.mxu0 %v11281_v28  ;;  %8365 = vmatprep.mubr.bf16.mxu1 %v11281_v28  ;;  %v92_v27 = vld [vmem:[#allocation5 + $0x118] sm:$0xff] }
 0x30d   :  { %v104_v28 = vld [vmem:[#allocation5 + $0x178] sm:$0xff] }
 0x30e   :  { %7071 = vmatpush1.bf16.msra.mxu0 %v14246_v29  ;;  %8427 = vmatpush1.bf16.msra.mxu1 %v14249_v30  ;;  %v11210_v29 = vcombine.low %v68_v18, %v80_v19  ;;  %v11235_v30 = vcombine.high %v92_v27, %v104_v28  ;;  %v188_v7 = vld [vmem:[#allocation5 + $0x418] sm:$0xff]  ;;  %v14337_v18 = vld [vmem:[#allocation10 + $0xf0] sm:$0xff]  }
 0x30f   :  { %7072 = vmatprep.subr.bf16.mxu0 %v14254_v31  ;;  %8428 = vmatprep.subr.bf16.mxu1 %v14257_v32  ;;  %v116_v31 = vld [vmem:[#allocation5 + $0x1d8] sm:$0xff] }
 0x310   :  { %v128_v32 = vld [vmem:[#allocation5 + $0x238] sm:$0xff] }
 0x311   :  { %7010 = vmatmul.mubr.bf16.gmra.mrb[12].mxu0 %v11280_v33  ;;  %8366 = vmatmul.mubr.bf16.gmra.mrb[12].mxu1 %v11280_v33  ;;  %v11234_v33 = vcombine.low %v92_v27, %v104_v28  ;;  %v11259_v34 = vcombine.high %v116_v31, %v128_v32  ;;  %v212_v19 = vld [vmem:[#allocation5 + $0x4d8] sm:$0xff] }
 0x312   :  { %7073 = vmatpush1.bf16.msra.mxu0 %v14252_v36  ;;  %8429 = vmatpush1.bf16.msra.mxu1 %v14255_v37  ;;  %v152_v36 = vld [vmem:[#allocation5 + $0x2f8] sm:$0xff] }
 0x313   :  { %7074 = vmatprep.subr.bf16.mxu0 %v14260_v38  ;;  %8430 = vmatprep.subr.bf16.mxu1 %v14263_v39  ;;  %v11283_v46 = vcombine.high %v140_v35, %v152_v36  ;;  %v14342_v27 = vld [vmem:[#allocation10 + $0x38] sm:$0xff]  }
 0x314   :  { %7019 = vmatprep.mubr.bf16.mxu0 %v11305_v40  ;;  %8375 = vmatprep.mubr.bf16.mxu1 %v11305_v40  ;;  %v14343_v28 = vld [vmem:[#allocation10 + $0xb8] sm:$0xff]  }
 0x316   :  { %7075 = vmatpush1.bf16.msra.mxu0 %v14258_v41  ;;  %8431 = vmatpush1.bf16.msra.mxu1 %v14261_v42  ;;  %v11258_v41 = vcombine.low %v116_v31, %v128_v32  ;;  %v14312_v42 = vld [vmem:[#allocation10 + $0x40] sm:$0xff]  }
 0x317   :  { %7076 = vmatprep.subr.bf16.mxu0 %v14266_v43  ;;  %8432 = vmatprep.subr.bf16.mxu1 %v14269_v44  ;;  %v14313_v43 = vld [vmem:[#allocation10 + $0xc0] sm:$0xff]  }
 0x319   :  { %7020 = vmatmul.mubr.bf16.gmra.mrb[16].mxu0 %v11304_v45  ;;  %8376 = vmatmul.mubr.bf16.gmra.mrb[16].mxu1 %v11304_v45 }
 0x31a   :  { %7077 = vmatpush1.bf16.msra.mxu0 %v14264_v48  ;;  %8433 = vmatpush1.bf16.msra.mxu1 %v14267_v49  ;;  %v14315_v48 = vld [vmem:[#allocation10 + $0x80] sm:$0xff]  }
 0x31b   :  { %7078 = vmatprep.subr.bf16.mxu0 %v14272_v50  ;;  %8434 = vmatprep.subr.bf16.mxu1 %v14275_v51  ;;  %v14316_v51 = vld [vmem:[#allocation10 + $0x48] sm:$0xff]  }
 0x31c   :  { %7029 = vmatprep.mubr.bf16.mxu0 %v11329_v52  ;;  %8385 = vmatprep.mubr.bf16.mxu1 %v11329_v52  ;;  %v14317_v52 = vld [vmem:[#allocation10 + $0xc8] sm:$0xff]  }
 0x31e   :  { %7079 = vmatpush1.bf16.msra.mxu0 %v14270_v53  ;;  %8435 = vmatpush1.bf16.msra.mxu1 %v14273_v54  ;;  %v14318_v53 = vld [vmem:[#allocation10 + $0x8] sm:$0xff]  }
 0x31f   :  { %7080 = vmatprep.subr.bf16.mxu0 %v14278_v55  ;;  %8436 = vmatprep.subr.bf16.mxu1 %v14281_v56  ;;  %v14319_v54 = vld [vmem:[#allocation10 + $0x88] sm:$0xff]   ;;  %v14447_v55 = vmov 0.0|0.0  }
 0x320   :  { %v12346_v56 = vcombine.low %v14447_v55, %v14447_v55 }
 0x321   :  { %7030 = vmatmul.mubr.bf16.gmra.mrb[20].mxu0 %v11328_v57  ;;  %8386 = vmatmul.mubr.bf16.gmra.mrb[20].mxu1 %v11328_v57  ;;  %v14320_v57 = vld [vmem:[#allocation10 + $0x50] sm:$0xff]  }
 0x322   :  { %7081 = vmatpush1.bf16.msra.mxu0 %v14276_v60  ;;  %8437 = vmatpush1.bf16.msra.mxu1 %v14279_v61  ;;  %12212 = vst [vmem:[#allocation11] sm:$0xff] %v12346_v56   ;;  %v176_v60 = vld [vmem:[#allocation5 + $0x3b8] sm:$0xff]  ;;  %v14322_v61 = vld [vmem:[#allocation10 + $0x10] sm:$0xff]  }
 0x323   :  { %7082 = vmatprep.subr.bf16.mxu0 %v14284_v62  ;;  %8438 = vmatprep.subr.bf16.mxu1 %v14287_v63  ;;  %v14323_v62 = vld [vmem:[#allocation10 + $0x90] sm:$0xff]   ;;  %v11282_v63 = vcombine.low %v140_v35, %v152_v36 }
 0x324   :  { %7039 = vmatprep.mubr.bf16.mxu0 %v11353_v0  ;;  %8395 = vmatprep.mubr.bf16.mxu1 %v11353_v0  ;;  %v11307_v0 = vcombine.high %v164_v59, %v176_v60 }
 0x326   :  { %7083 = vmatpush1.bf16.msra.mxu0 %v14282_v1  ;;  %8439 = vmatpush1.bf16.msra.mxu1 %v14285_v2  ;;  %v14324_v1 = vld [vmem:[#allocation10 + $0x58] sm:$0xff]  }
 0x327   :  { %7084 = vmatprep.subr.bf16.mxu0 %v14290_v3  ;;  %8440 = vmatprep.subr.bf16.mxu1 %v14293_v4  ;;  %v14325_v2 = vld [vmem:[#allocation10 + $0xd8] sm:$0xff]  }
 0x328   :  { %v14326_v3 = vld [vmem:[#allocation10 + $0x18] sm:$0xff]  }
 0x329   :  { %7040 = vmatmul.mubr.bf16.gmra.mrb[24].mxu0 %v11352_v5  ;;  %8396 = vmatmul.mubr.bf16.gmra.mrb[24].mxu1 %v11352_v5  ;;  %v14327_v4 = vld [vmem:[#allocation10 + $0x98] sm:$0xff]   ;;  %v14328_v5 = vld [vmem:[#allocation10 + $0x60] sm:$0xff]  }
 0x32a   :  { %7085 = vmatpush1.bf16.msra.mxu0 %v14288_v8  ;;  %8441 = vmatpush1.bf16.msra.mxu1 %v14291_v9  ;;  %v200_v8 = vld [vmem:[#allocation5 + $0x478] sm:$0xff]  ;;  %v14330_v9 = vld [vmem:[#allocation10 + $0x20] sm:$0xff]  }
 0x32b   :  { %7086 = vmatprep.subr.bf16.mxu0 %v14296_v10  ;;  %8442 = vmatprep.subr.bf16.mxu1 %v14299_v11  ;;  %v14331_v10 = vld [vmem:[#allocation10 + $0xa0] sm:$0xff]   ;;  %v11306_v11 = vcombine.low %v164_v59, %v176_v60 }
 0x32c   :  { %7049 = vmatprep.mubr.bf16.mxu0 %v11377_v12  ;;  %8405 = vmatprep.mubr.bf16.mxu1 %v11377_v12  ;;  %v11331_v12 = vcombine.high %v188_v7, %v200_v8 }
 0x32e   :  { %7087 = vmatpush1.bf16.msra.mxu0 %v14294_v13  ;;  %8443 = vmatpush1.bf16.msra.mxu1 %v14297_v14  ;;  %v14332_v13 = vld [vmem:[#allocation10 + $0x68] sm:$0xff]  }
 0x32f   :  { %7088 = vmatprep.subr.bf16.mxu0 %v14302_v15  ;;  %8444 = vmatprep.subr.bf16.mxu1 %v14305_v16  ;;  %v14333_v14 = vld [vmem:[#allocation10 + $0xe8] sm:$0xff]  }
 0x330   :  { %v14334_v15 = vld [vmem:[#allocation10 + $0x28] sm:$0xff]  }
 0x331   :  { %7050 = vmatmul.mubr.bf16.gmra.mrb[68].mxu0 %v11376_v17  ;;  %8406 = vmatmul.mubr.bf16.gmra.mrb[68].mxu1 %v11376_v17  ;;  %v14335_v16 = vld [vmem:[#allocation10 + $0xa8] sm:$0xff]   ;;  %v14336_v17 = vld [vmem:[#allocation10 + $0x70] sm:$0xff]  }
 0x332   :  { %7089 = vmatpush1.bf16.msra.mxu0 %v14300_v20  ;;  %8445 = vmatpush1.bf16.msra.mxu1 %v14303_v21  ;;  %v224_v20 = vld [vmem:[#allocation5 + $0x538] sm:$0xff]  ;;  %v14338_v21 = vld [vmem:[#allocation10 + $0x30] sm:$0xff]  }
 0x333   :  { %7090 = vmatprep.subr.bf16.mxu0 %v14308_v22  ;;  %8446 = vmatprep.subr.bf16.mxu1 %v14311_v23  ;;  %v14339_v22 = vld [vmem:[#allocation10 + $0xb0] sm:$0xff]   ;;  %v11330_v23 = vcombine.low %v188_v7, %v200_v8  ;;  %v11354_v31 = vcombine.low %v212_v19, %v224_v20 }
 0x334   :  { %7092 = vmatprep.mubr.bf16.mxu0 %v11211_v24  ;;  %8448 = vmatprep.mubr.bf16.mxu1 %v11211_v24  ;;  %v11355_v24 = vcombine.high %v212_v19, %v224_v20 }
 0x336   :  { %7091 = vmatpush1.bf16.msra.mxu0 %v14306_v25  ;;  %8447 = vmatpush1.bf16.msra.mxu1 %v14309_v26  ;;  %v14340_v25 = vld [vmem:[#allocation10 + $0x78] sm:$0xff]  }
 0x337   :  { %12403 = vmatprep.subr.bf16.mxu0 %v14312_v42  ;;  %12467 = vmatprep.subr.bf16.mxu1 %v14313_v43  ;;  %v14341_v26 = vld [vmem:[#allocation10 + $0xf8] sm:$0xff]  }
 0x339   :  { %7093 = vmatmul.mubr.bf16.vlgmr.msra.gmra.mrb[0].mxu0 %v11210_v29  ;;  %8449 = vmatmul.mubr.bf16.vlgmr.msra.gmra.mrb[0].mxu1 %v11210_v29  ;;  %v236_v29 = vld [vmem:[#allocation5 + $0x598] sm:$0xff] }
 0x33a   :  { %7102 = vmatprep.mubr.bf16.mxu0 %v11235_v30  ;;  %8458 = vmatprep.mubr.bf16.mxu1 %v11235_v30  ;;  %v248_v30 = vld [vmem:[#allocation5 + $0x5f8] sm:$0xff] }
 0x33b   :  { %12404 = vmatpush3.bf16.msra.mxu0 %v14314_v47  ;;  %12468 = vmatpush3.bf16.msra.mxu1 %v14315_v48  ;;  %v11379_v32 = vcombine.high %v236_v29, %v248_v30 }
 0x33c   :  { %12405 = vmatprep.subr.bf16.mxu0 %v14316_v51  ;;  %12469 = vmatprep.subr.bf16.mxu1 %v14317_v52 }
 0x33f   :  { %12406 = vmatpush3.bf16.msra.mxu0 %v14318_v53  ;;  %12470 = vmatpush3.bf16.msra.mxu1 %v14319_v54  ;;  %v8624_v53 = vunpack.c.h.bf16 %v14447_v55 }
 0x340   :  { %12407 = vmatprep.subr.bf16.mxu0 %v14320_v57  ;;  %12471 = vmatprep.subr.bf16.mxu1 %v14321_v58 }
 0x341   :  { %7103 = vmatmul.mubr.bf16.gmra.mrb[4].mxu0 %v11234_v33  ;;  %8459 = vmatmul.mubr.bf16.gmra.mrb[4].mxu1 %v11234_v33  ;;  %v11378_v33 = vcombine.low %v236_v29, %v248_v30 }
 0x342   :  { %7112 = vmatprep.mubr.bf16.mxu0 %v11259_v34  ;;  %8468 = vmatprep.mubr.bf16.mxu1 %v11259_v34 }
 0x343   :  { %12408 = vmatpush3.bf16.msra.mxu0 %v14322_v61  ;;  %12472 = vmatpush3.bf16.msra.mxu1 %v14323_v62 }
 0x344   :  { %v6712_v37 = vpop.f32.mrb[56].mxu0  ;;  %v8068_v38 = vpop.f32.mrb[56].mxu1  ;;  %12409 = vmatprep.subr.bf16.mxu0 %v14324_v1  ;;  %12473 = vmatprep.subr.bf16.mxu1 %v14325_v2  ;;  %v14528_v2 = vmul.f32 -20.0, %v8624_v53 }
 0x345   :  { %v6714_v39 = vpop.f32.mrb[57].mxu0  ;;  %v8070_v40 = vpop.f32.mrb[57].mxu1 }
 0x346   :  { %v6716_v44 = vpop.f32.mrb[58].mxu0  ;;  %v8072_v45 = vpop.f32.mrb[58].mxu1 }
 0x347   :  { %v6718_v49 = vpop.f32.mrb[59].mxu0  ;;  %v8074_v50 = vpop.f32.mrb[59].mxu1  ;;  %12410 = vmatpush3.bf16.msra.mxu0 %v14326_v3  ;;  %12474 = vmatpush3.bf16.msra.mxu1 %v14327_v4  ;;  %v14530_v3 = vmul.f32 -14.715178, %v8624_v53  ;;  %v14534_v4 = vmul.f32 -0.80855364, %v8624_v53 }
 0x348   :  { %12411 = vmatprep.subr.bf16.mxu0 %v14328_v5  ;;  %12475 = vmatprep.subr.bf16.mxu1 %v14329_v6  ;;  %v8620_v50 = vunpack.c.l.bf16 %v14447_v55  ;;  %v14536_v5 = vmul.f32 -0.3470253, %v8624_v53 }
 0x349   :  { %7113 = vmatmul.mubr.bf16.gmra.mrb[8].mxu0 %v11258_v41  ;;  %8469 = vmatmul.mubr.bf16.gmra.mrb[8].mxu1 %v11258_v41 }
 0x34a   :  { %7122 = vmatprep.mubr.bf16.mxu0 %v11283_v46  ;;  %8478 = vmatprep.mubr.bf16.mxu1 %v11283_v46  ;;  %v14518_v61 = vmul.f32 -20.0, %v8620_v50  ;;  %v14520_v62 = vmul.f32 -14.715178, %v8620_v50  ;;  %v14526_v1 = vmul.f32 -0.3470253, %v8620_v50 }
 0x34b   :  { %12412 = vmatpush3.bf16.msra.mxu0 %v14330_v9  ;;  %12476 = vmatpush3.bf16.msra.mxu1 %v14331_v10  ;;  %v14538_v6 = vmul.f32 -8.120117, %v8620_v50  ;;  %v14540_v9 = vmul.f32 -8.120117, %v8624_v53  ;;  %v14542_v10 = vmul.f32 -3.9829655, %v8620_v50 }
 0x34c   :  { %12413 = vmatprep.subr.bf16.mxu0 %v14332_v13  ;;  %12477 = vmatprep.subr.bf16.mxu1 %v14333_v14 }
 0x34d   :  { %16188 = vst [vmem:[#allocation15_spill] sm:$0xff] %v14538_v6  ;;  %16189 = vst [vmem:[#allocation16_spill] sm:$0xff] %v14540_v9 }
 0x34e   :  { %16190 = vst [vmem:[#allocation17_spill] sm:$0xff] %v14542_v10 }
 0x34f   :  { %12414 = vmatpush3.bf16.msra.mxu0 %v14334_v15  ;;  %12478 = vmatpush3.bf16.msra.mxu1 %v14335_v16  ;;  %v14551_v15 = vmul.f32 -3.9829655, %v8624_v53 }
 0x350   :  { %12415 = vmatprep.subr.bf16.mxu0 %v14336_v17  ;;  %12479 = vmatprep.subr.bf16.mxu1 %v14337_v18 }
 0x351   :  { %7123 = vmatmul.mubr.bf16.gmra.mrb[12].mxu0 %v11282_v63  ;;  %8479 = vmatmul.mubr.bf16.gmra.mrb[12].mxu1 %v11282_v63  ;;  %v14522_v63 = vmul.f32 -1.8315638, %v8620_v50  ;;  %16192 = vst [vmem:[#allocation19_spill] sm:$0xff] %v14551_v15 }
 0x352   :  { %7132 = vmatprep.mubr.bf16.mxu0 %v11307_v0  ;;  %8488 = vmatprep.mubr.bf16.mxu1 %v11307_v0  ;;  %v14524_v0 = vmul.f32 -0.80855364, %v8620_v50 }
 0x353   :  { %12416 = vmatpush3.bf16.msra.mxu0 %v14338_v21  ;;  %12480 = vmatpush3.bf16.msra.mxu1 %v14339_v22 }
 0x354   :  { %12417 = vmatprep.subr.bf16.mxu0 %v14340_v25  ;;  %12481 = vmatprep.subr.bf16.mxu1 %v14341_v26 }
 0x357   :  { %12418 = vmatpush3.bf16.msra.mxu0 %v14342_v27  ;;  %12482 = vmatpush3.bf16.msra.mxu1 %v14343_v28 }
 0x359   :  { %7133 = vmatmul.mubr.bf16.gmra.mrb[16].mxu0 %v11306_v11  ;;  %8489 = vmatmul.mubr.bf16.gmra.mrb[16].mxu1 %v11306_v11 }
 0x35a   :  { %7142 = vmatprep.mubr.bf16.mxu0 %v11331_v12  ;;  %8498 = vmatprep.mubr.bf16.mxu1 %v11331_v12 }
 0x361   :  { %7143 = vmatmul.mubr.bf16.gmra.mrb[20].mxu0 %v11330_v23  ;;  %8499 = vmatmul.mubr.bf16.gmra.mrb[20].mxu1 %v11330_v23  ;;  %v16121_v23 = vmov 0.0  }
 0x362   :  { %7152 = vmatprep.mubr.bf16.mxu0 %v11355_v24  ;;  %8508 = vmatprep.mubr.bf16.mxu1 %v11355_v24 }
 0x369   :  { %7153 = vmatmul.mubr.bf16.gmra.mrb[24].mxu0 %v11354_v31  ;;  %8509 = vmatmul.mubr.bf16.gmra.mrb[24].mxu1 %v11354_v31 }
 0x36a   :  { %7162 = vmatprep.mubr.bf16.mxu0 %v11379_v32  ;;  %8518 = vmatprep.mubr.bf16.mxu1 %v11379_v32 }
 0x371   :  { %7163 = vmatmul.mubr.bf16.gmra.mrb[72].mxu0 %v11378_v33  ;;  %8519 = vmatmul.mubr.bf16.gmra.mrb[72].mxu1 %v11378_v33 }
 0x372   :  { %10501 = vmatprep.mubr.bf16.mxu0 %v14447_v55  ;;  %10598 = vmatprep.mubr.bf16.mxu1 %v14447_v55 }
 0x379   :  { %10502 = vmatmul.mubr.bf16.vlgmr.msra.gmra.mrb[76].mxu0 %v14447_v55  ;;  %10599 = vmatmul.mubr.bf16.vlgmr.msra.gmra.mrb[76].mxu1 %v14447_v55  ;;  %v14532_v55 = vmul.f32 -1.8315638, %v8624_v53 }
 0x384   :  { %v6825_v34 = vpop.f32.mrb[60].mxu0  ;;  %v8181_v35 = vpop.f32.mrb[60].mxu1 }
 0x385   :  { %v6827_v36 = vpop.f32.mrb[61].mxu0  ;;  %v8183_v37 = vpop.f32.mrb[61].mxu1 }
 0x386   :  { %v6829_v38 = vpop.f32.mrb[62].mxu0  ;;  %v8185_v39 = vpop.f32.mrb[62].mxu1 }
 0x387   :  { %v6831_v40 = vpop.f32.mrb[63].mxu0  ;;  %v8187_v41 = vpop.f32.mrb[63].mxu1 }
 0x3c4   :  { %v6938_v42 = vpop.f32.mrb[64].mxu0  ;;  %v8294_v43 = vpop.f32.mrb[64].mxu1 }
 0x3c5   :  { %v6940_v44 = vpop.f32.mrb[65].mxu0  ;;  %v8296_v45 = vpop.f32.mrb[65].mxu1 }
 0x3c6   :  { %v6942_v46 = vpop.f32.mrb[66].mxu0  ;;  %v8298_v47 = vpop.f32.mrb[66].mxu1 }
 0x3c7   :  { %v6944_v48 = vpop.f32.mrb[67].mxu0  ;;  %v8300_v49 = vpop.f32.mrb[67].mxu1 }
 0x404   :  { %v7051_v51 = vpop.f32.mrb[68].mxu0  ;;  %v8407_v52 = vpop.f32.mrb[68].mxu1 }
 0x405   :  { %v7053_v54 = vpop.f32.mrb[69].mxu0  ;;  %v8409_v56 = vpop.f32.mrb[69].mxu1 }
 0x406   :  { %v7055_v57 = vpop.f32.mrb[70].mxu0  ;;  %v8411_v58 = vpop.f32.mrb[70].mxu1 }
 0x407   :  { %v7057_v59 = vpop.f32.mrb[71].mxu0  ;;  %v8413_v60 = vpop.f32.mrb[71].mxu1 }
 0x40c   :  { %v7094_v7 = vpop.f32.mrb[0].mxu0  ;;  %v8450_v8 = vpop.f32.mrb[0].mxu1 }
 0x40d   :  { %v14545_v11 = vadd.f32 %v14518_v61, %v7094_v7  ;;  %v8677_v12 = vmul.f32 0.7357589, %v7094_v7  ;;  %v14547_v13 = vmul.f32 0.40600586, %v7094_v7  ;;  %v14549_v14 = vpop.f32.mrb[1].mxu0  ;;  %v14553_v16 = vmul.f32 0.19914827, %v7094_v7 }
 0x40e   :  { %v9199_v17 = vmul.f32 0.09157819, %v7094_v7  ;;  %v9477_v18 = vmul.f32 0.04042768, %v7094_v7  ;;  %v14556_v19 = vadd.f32 %v14518_v61, %v8450_v8  ;;  %v9807_v20 = vmul.f32 0.017351266, %v7094_v7 }
 0x40f   :  { %16191 = vst [vmem:[#allocation18_spill] sm:$0xff] %v14547_v13  ;;  %16193 = vst [vmem:[#allocation20_spill] sm:$0xff] %v14553_v16  ;;  %vm8644_vm0 = vcmp.ge.f32.partialorder %v14545_v11, 10.0  ;;  %v8679_v21 = vmul.f32 0.7357589, %v8450_v8  ;;  %v14559_v22 = vmul.f32 0.40600586, %v8450_v8  ;;  %v8713_v40 = vadd.f32 %v14520_v62, %v8677_v12 }
 0x410   :  { %v14564_v24 = vsel %vm8644_vm0, 1.0, %v16121_v23  ;;  %vm8646_vm1 = vcmp.ge.f32.partialorder %v14556_v19, 10.0  ;;  %v14567_v25 = vmul.f32 0.19914827, %v8450_v8  ;;  %v9201_v26 = vmul.f32 0.09157819, %v8450_v8 }
 0x411   :  { %16194 = vst [vmem:[#allocation21_spill] sm:$0xff] %v14559_v22  ;;  %16195 = vst [vmem:[#allocation22_spill] sm:$0xff] %v14564_v24  ;;  %v9479_v27 = vmul.f32 0.04042768, %v8450_v8  ;;  %v9809_v28 = vmul.f32 0.017351266, %v8450_v8  ;;  %v9235_v49 = vadd.f32 %v14522_v63, %v9199_v17  ;;  %v9513_v54 = vadd.f32 %v14524_v0, %v9477_v18 }
 0x412   :  { %16196 = vst [vmem:[#allocation23_spill] sm:$0xff] %v14567_v25  ;;  %v14570_v29 = vmul.f32 0.7357589, %v14549_v14  ;;  %v14575_v30 = vsel %vm8646_vm1, 1.0, %v16121_v23  ;;  %v14578_v31 = vmul.f32 0.40600586, %v14549_v14  ;;  %v8452_v36 = vpop.f32.mrb[1].mxu1  ;;  %v9843_v56 = vadd.f32 %v14526_v1, %v9807_v20 }
 0x413   :  { %16197 = vst [vmem:[#allocation24_spill] sm:$0xff] %v14575_v30  ;;  %v14581_v32 = vmul.f32 0.19914827, %v14549_v14  ;;  %v14584_v33 = vmul.f32 0.09157819, %v14549_v14  ;;  %v14592_v37 = vpop.f32.mrb[2].mxu0  ;;  %v8715_v7 = vadd.f32 %v14520_v62, %v8679_v21  ;;  %v9237_v18 = vadd.f32 %v14522_v63, %v9201_v26 }
 0x414   :  { %16198 = vst [vmem:[#allocation25_spill] sm:$0xff] %v14578_v31  ;;  %v14587_v34 = vmul.f32 0.04042768, %v14549_v14  ;;  %v14590_v35 = vmul.f32 0.017351266, %v14549_v14  ;;  %v8750_v41 = vmul.f32 -20.0, %v14564_v24  ;;  %v9515_v21 = vadd.f32 %v14524_v0, %v9479_v27 }
 0x415   :  { %16199 = vst [vmem:[#allocation26_spill] sm:$0xff] %v14581_v32  ;;  %v14594_v38 = vmul.f32 0.7357589, %v8452_v36  ;;  %v14596_v39 = vmul.f32 0.19914827, %v8452_v36  ;;  %v14600_v42 = vmul.f32 0.40600586, %v8452_v36  ;;  %v9845_v26 = vadd.f32 %v14526_v1, %v9809_v28 }
 0x416   :  { %v14602_v43 = vmul.f32 0.09157819, %v8452_v36  ;;  %v14604_v44 = vmul.f32 0.04042768, %v8452_v36  ;;  %v14607_v45 = vmul.f32 0.40600586, %v14592_v37  ;;  %v14624_v52 = vpop.f32.mrb[2].mxu1  ;;  %v8637_v27 = vadd.f32 %v14518_v61, %v14549_v14 }
 0x417   :  { %16200 = vst [vmem:[#allocation27_spill] sm:$0xff] %v14596_v39  ;;  %16201 = vst [vmem:[#allocation28_spill] sm:$0xff] %v14600_v42  ;;  %v14609_v46 = vmul.f32 0.017351266, %v8452_v36  ;;  %v14612_v47 = vmul.f32 0.7357589, %v14592_v37  ;;  %v8639_v28 = vadd.f32 %v14518_v61, %v8452_v36 }
 0x418   :  { %16202 = vst [vmem:[#allocation29_spill] sm:$0xff] %v14607_v45  ;;  %v14615_v48 = vmul.f32 0.19914827, %v14592_v37  ;;  %v14619_v50 = vmul.f32 0.09157819, %v14592_v37  ;;  %v14626_v53 = vpop.f32.mrb[3].mxu0 }
 0x419   :  { %v14622_v51 = vmul.f32 0.04042768, %v14592_v37  ;;  %16204 = vst [vmem:[#allocation31_spill] sm:$0xff] %v14626_v53  ;;  %v14631_v57 = vmul.f32 0.017351266, %v14592_v37  ;;  %v14637_v59 = vmul.f32 0.40600586, %v14624_v52  ;;  %v8641_v16 = vadd.f32 %v14528_v2, %v14626_v53 }
 0x41a   :  { %16203 = vst [vmem:[#allocation30_spill] sm:$0xff] %v14615_v48  ;;  %v14634_v58 = vmul.f32 0.7357589, %v14624_v52  ;;  %v14639_v60 = vpop.f32.mrb[3].mxu1  ;;  %v14643_v8 = vmul.f32 0.19914827, %v14624_v52  ;;  %v9239_v11 = vadd.f32 %v14532_v55, %v14619_v50 }
 0x41b   :  { %16205 = vst [vmem:[#allocation32_spill] sm:$0xff] %v14637_v59  ;;  %16206 = vst [vmem:[#allocation33_spill] sm:$0xff] %v14639_v60  ;;  %v14646_v12 = vmul.f32 0.09157819, %v14624_v52  ;;  %v14649_v17 = vmul.f32 0.04042768, %v14624_v52 }
 0x41c   :  { %16207 = vst [vmem:[#allocation34_spill] sm:$0xff] %v14643_v8  ;;  %v14653_v20 = vmul.f32 0.017351266, %v14624_v52  ;;  %v14656_v23 = vmul.f32 0.19914827, %v14626_v53  ;;  %v7104_v25 = vpop.f32.mrb[4].mxu0  ;;  %v8719_v50 = vadd.f32 %v14530_v3, %v14634_v58 }
 0x41d   :  { %v14659_v15 = vmul.f32 0.09157819, %v14626_v53  ;;  %v14663_v8 = vmul.f32 0.04042768, %v14626_v53  ;;  %v14666_v48 = vmul.f32 0.017351266, %v14626_v53  ;;  %v9519_v58 = vadd.f32 %v14534_v4, %v14649_v17 }
 0x41e   :  { %16208 = vst [vmem:[#allocation35_spill] sm:$0xff] %v14656_v23  ;;  %v14669_v39 = vmul.f32 0.19914827, %v14639_v60  ;;  %v14673_v32 = vmul.f32 0.09157819, %v14639_v60  ;;  %v8460_v10 = vpop.f32.mrb[4].mxu1 }
 0x41f   :  { %v14676_v23 = vmul.f32 0.04042768, %v14639_v60  ;;  %v14683_v59 = vmul.f32 0.017351266, %v14639_v60  ;;  %v9251_v9 = vmul.f32 0.19914827, %v7104_v25  ;;  %v8732_v22 = vadd.f32 %v8715_v7, %v8460_v10 }
 0x420   :  { %16209 = vst [vmem:[#allocation36_spill] sm:$0xff] %v14669_v39  ;;  %v8730_v39 = vadd.f32 %v8713_v40, %v7104_v25  ;;  %v14686_v45 = vpop.f32.mrb[5].mxu0  ;;  %v9529_v42 = vmul.f32 0.09157819, %v7104_v25  ;;  %v9859_v31 = vmul.f32 0.04042768, %v7104_v25  ;;  %v8643_v40 = vadd.f32 %v14528_v2, %v14639_v60 }
 0x421   :  { %16210 = vst [vmem:[#allocation37_spill] sm:$0xff] %v14676_v23  ;;  %16211 = vst [vmem:[#allocation38_spill] sm:$0xff] %v14683_v59  ;;  %v8752_v24 = vmul.f32 -20.0, %v14575_v30  ;;  %v14689_v6 = vpop.f32.mrb[5].mxu1  ;;  %v14693_v13 = vmul.f32 0.7357589, %v7104_v25  ;;  %v14695_v53 = vadd.f32 %v9251_v9, %v9235_v49  ;;  %v8714_v60 = vadd.f32 %v14520_v62, %v14570_v29 }
 0x422   :  { %v14691_v14 = vadd.f32 %v8750_v41, %v8730_v39  ;;  %v14699_v59 = vpop.f32.mrb[6].mxu0  ;;  %v14701_v61 = vpop.f32.mrb[6].mxu1  ;;  %v14703_v36 = vadd.f32 %v9529_v42, %v9513_v54  ;;  %v14705_v7 = vadd.f32 %v9859_v31, %v9843_v56  ;;  %v9253_v23 = vmul.f32 0.19914827, %v8460_v10 }
 0x423   :  { %v14707_v30 = vadd.f32 %v8752_v24, %v8732_v22  ;;  %v14709_v39 = vpop.f32.mrb[7].mxu0  ;;  %v14711_v41 = vpop.f32.mrb[7].mxu1  ;;  %v9531_v9 = vmul.f32 0.09157819, %v8460_v10  ;;  %v9861_v49 = vmul.f32 0.04042768, %v8460_v10 }
 0x424   :  { %16212 = vst [vmem:[#allocation39_spill] sm:$0xff] %v14705_v7  ;;  %vm8645_vm2 = vcmp.ge.f32.partialorder %v8637_v27, 10.0  ;;  %vm8766_vm3 = vcmp.ge.f32.partialorder %v14691_v14, 10.0  ;;  %v14717_v42 = vadd.f32 %v9253_v23, %v9237_v18  ;;  %vm8649_vm5 = vcmp.ge.f32.partialorder %v8641_v16, 10.0  ;;  %v14719_v22 = vpop.f32.mrb[8].mxu0  ;;  %v14721_v24 = vpop.f32.mrb[8].mxu1 }
 0x425   :  { %vm8768_vm4 = vcmp.ge.f32.partialorder %v14707_v30, 10.0  ;;  %16214 = vst [vmem:[#allocation41_spill] sm:$0xff] %v14721_v24  ;;  %v14723_v31 = vmul.f32 0.7357589, %v8460_v10  ;;  %v14725_v54 = vadd.f32 %v9531_v9, %v9515_v21  ;;  %v14727_v56 = vadd.f32 %v9861_v49, %v9845_v26  ;;  %vm12347_vm6 = vmpackc.low %vm8649_vm5, %vm8645_vm2  ;;  %v14733_v29 = vpop.f32.mrb[9].mxu0  ;;  %v14735_v23 = vpop.f32.mrb[9].mxu1 }
 0x426   :  { %16213 = vst [vmem:[#allocation40_spill] sm:$0xff] %v14717_v42  ;;  %v16216_v27 = vmov 0.0   ;;  %16218 = vst [vmem:[#allocation44_spill] sm:$0xff] %v14733_v29  ;;  %v14737_v18 = vmul.f32 0.40600586, %v7104_v25  ;;  %v14739_v42 = vmul.f32 0.40600586, %v8460_v10  ;;  %vm8647_vm7 = vcmp.ge.f32.partialorder %v8639_v28, 10.0 }
 0x427   :  { %16215 = vst [vmem:[#allocation42_spill] sm:$0xff] %v14727_v56  ;;  %v14730_v7 = vsel %vm8645_vm2, 1.0, %v16216_v27  ;;  %16219 = vst [vmem:[#allocation45_spill] sm:$0xff] %v14735_v23  ;;  %v16136_v24 = vmov 1.0|1.0   ;;  %vm8651_vm8 = vcmp.ge.f32.partialorder %v8643_v40, 10.0  ;;  %v8731_v28 = vadd.f32 %v8714_v60, %v14686_v45 }
 0x428   :  { %16217 = vst [vmem:[#allocation43_spill] sm:$0xff] %v14730_v7  ;;  %16220 = vst [vmem:[#allocation46_spill] sm:$0xff] %v14737_v18  ;;  %12348 = vmatprep.mubr.msk.bf16.mxu0 %vm12347_vm6, %v16136_v24  ;;  %v14742_v21 = vpop.f32.mrb[10].mxu0  ;;  %v14744_v26 = vpop.f32.mrb[10].mxu1  ;;  %v14749_v9 = vsel %vm8766_vm3, 1.0, %v16216_v27  ;;  %v14754_v25 = vsel %vm8768_vm4, 1.0, %v16216_v27 }
 0x429   :  { %16221 = vst [vmem:[#allocation47_spill] sm:$0xff] %v14739_v42  ;;  %16222 = vst [vmem:[#allocation48_spill] sm:$0xff] %v14742_v21  ;;  %v8751_v10 = vmul.f32 -20.0, %v14730_v7  ;;  %v14759_v49 = vpop.f32.mrb[11].mxu0  ;;  %v14761_v24 = vpop.f32.mrb[11].mxu1  ;;  %v14765_v42 = vsel %vm8649_vm5, 1.0, %v16216_v27  ;;  %v9236_v21 = vadd.f32 %v14522_v63, %v14584_v33 }
 0x42a   :  { %16223 = vst [vmem:[#allocation49_spill] sm:$0xff] %v14744_v26  ;;  %16224 = vst [vmem:[#allocation50_spill] sm:$0xff] %v14749_v9  ;;  %v14768_v18 = vsel %vm8647_vm7, 1.0, %v16216_v27  ;;  %v16230_v26 = vmov 1.0|1.0   ;;  %v14774_v29 = vpop.f32.mrb[12].mxu0 }
 0x42b   :  { %16225 = vst [vmem:[#allocation51_spill] sm:$0xff] %v14754_v25  ;;  %vm12375_vm9 = vmpackc.low %vm8651_vm8, %vm8647_vm7  ;;  %v9252_v23 = vmul.f32 0.19914827, %v14686_v45  ;;  %v14776_v60 = vpop.f32.mrb[12].mxu1  ;;  %v14782_v16 = vadd.f32 %v8751_v10, %v8731_v28  ;;  %v14787_v7 = vpop.f32.mrb[13].mxu0  ;;  %v8716_v10 = vadd.f32 %v14520_v62, %v14594_v38  ;;  %v9238_v38 = vadd.f32 %v14522_v63, %v14602_v43 }
 0x42c   :  { %16226 = vst [vmem:[#allocation52_spill] sm:$0xff] %v14759_v49  ;;  %16227 = vst [vmem:[#allocation53_spill] sm:$0xff] %v14761_v24  ;;  %12376 = vmatprep.mubr.msk.bf16.mxu1 %vm12375_vm9, %v16230_v26  ;;  %v14780_v24 = vsel %vm8651_vm8, 1.0, %v16216_v27  ;;  %v9514_v49 = vadd.f32 %v14524_v0, %v14587_v34  ;;  %v14789_v33 = vpop.f32.mrb[13].mxu1  ;;  %v9860_v40 = vmul.f32 0.04042768, %v14686_v45  ;;  %v8642_v63 = vadd.f32 %v14528_v2, %v14624_v52 }
 0x42d   :  { %16228 = vst [vmem:[#allocation54_spill] sm:$0xff] %v14765_v42  ;;  %16229 = vst [vmem:[#allocation55_spill] sm:$0xff] %v14768_v18  ;;  %v9530_v42 = vmul.f32 0.09157819, %v14686_v45  ;;  %v14791_v56 = vadd.f32 %v9252_v23, %v9236_v21  ;;  %v14798_v28 = vpop.f32.mrb[14].mxu0  ;;  %v8753_v34 = vmul.f32 -20.0, %v14768_v18  ;;  %v8733_v62 = vadd.f32 %v8716_v10, %v14689_v6 }
 0x42e   :  { %16231 = vst [vmem:[#allocation56_spill] sm:$0xff] %v14774_v29  ;;  %16232 = vst [vmem:[#allocation57_spill] sm:$0xff] %v14776_v60  ;;  %v9844_v60 = vadd.f32 %v14526_v1, %v14590_v35  ;;  %v14800_v29 = vpop.f32.mrb[14].mxu1  ;;  %v14807_v23 = vmul.f32 0.40600586, %v14686_v45  ;;  %v14811_v35 = vpop.f32.mrb[15].mxu0  ;;  %vm8767_vm10 = vcmp.ge.f32.partialorder %v14782_v16, 10.0 }
 0x42f   :  { %16233 = vst [vmem:[#allocation58_spill] sm:$0xff] %v14780_v24  ;;  %16234 = vst [vmem:[#allocation59_spill] sm:$0xff] %v14787_v7  ;;  %v14804_v7 = vmul.f32 0.7357589, %v14686_v45  ;;  %v14809_v21 = vadd.f32 %v9530_v42, %v9514_v49  ;;  %v9532_v45 = vmul.f32 0.09157819, %v14689_v6  ;;  %v9846_v42 = vadd.f32 %v14526_v1, %v14609_v46 }
 0x430   :  { %16235 = vst [vmem:[#allocation60_spill] sm:$0xff] %v14789_v33  ;;  %16236 = vst [vmem:[#allocation61_spill] sm:$0xff] %v14798_v28  ;;  %v14813_v33 = vpop.f32.mrb[15].mxu1  ;;  %v14815_v24 = vadd.f32 %v9860_v40, %v9844_v60  ;;  %v9516_v28 = vadd.f32 %v14524_v0, %v14604_v44  ;;  %v9862_v49 = vmul.f32 0.04042768, %v14689_v6  ;;  %v8640_v40 = vadd.f32 %v14528_v2, %v14592_v37  ;;  %v14834_v43 = vpop.f32.mrb[16].mxu0 }
 0x431   :  { %16237 = vst [vmem:[#allocation62_spill] sm:$0xff] %v14800_v29  ;;  %16238 = vst [vmem:[#allocation63_spill] sm:$0xff] %v14807_v23  ;;  %v9254_v29 = vmul.f32 0.19914827, %v14689_v6  ;;  %v14836_v0 = vpop.f32.mrb[16].mxu1  ;;  %v14847_v10 = vpop.f32.mrb[17].mxu0 }
 0x432   :  { %16239 = vst [vmem:[#allocation64_spill] sm:$0xff] %v14811_v35  ;;  %16240 = vst [vmem:[#allocation65_spill] sm:$0xff] %v14813_v33  ;;  %v14839_v44 = vmul.f32 0.7357589, %v14689_v6  ;;  %v14841_v1 = vadd.f32 %v9532_v45, %v9516_v28  ;;  %v14843_v46 = vadd.f32 %v9862_v49, %v9846_v42  ;;  %v14849_v37 = vpop.f32.mrb[17].mxu1  ;;  %v14854_v2 = vmul.f32 0.40600586, %v14689_v6 }
 0x433   :  { %v14828_v60 = vadd.f32 %v9254_v29, %v9238_v38  ;;  %16241 = vst [vmem:[#allocation66_spill] sm:$0xff] %v14834_v43  ;;  %16242 = vst [vmem:[#allocation67_spill] sm:$0xff] %v14836_v0  ;;  %v8717_v29 = vadd.f32 %v14530_v3, %v14612_v47  ;;  %v14851_v38 = vadd.f32 %v8753_v34, %v8733_v62  ;;  %vm8648_vm11 = vcmp.ge.f32.partialorder %v8640_v40, 10.0  ;;  %v14856_v52 = vpop.f32.mrb[18].mxu0  ;;  %v14872_v62 = vpop.f32.mrb[18].mxu1  ;;  %v16272_v23 = vld [vmem:[#allocation24_spill] sm:$0xff] }
 0x434   :  { %16243 = vst [vmem:[#allocation68_spill] sm:$0xff] %v14847_v10  ;;  %16244 = vst [vmem:[#allocation69_spill] sm:$0xff] %v14849_v37  ;;  %vm8650_vm12 = vcmp.ge.f32.partialorder %v8642_v63, 10.0  ;;  %v14861_v28 = vsel %vm8767_vm10, 1.0, %v16216_v27  ;;  %v14864_v47 = vsel %vm8648_vm11, 1.0, %v16216_v27  ;;  %v9517_v40 = vadd.f32 %v14534_v4, %v14622_v51 }
 0x435   :  { %16245 = vst [vmem:[#allocation70_spill] sm:$0xff] %v14854_v2  ;;  %16246 = vst [vmem:[#allocation71_spill] sm:$0xff] %v14856_v52  ;;  %v8734_v34 = vadd.f32 %v8717_v29, %v14699_v59  ;;  %v14870_v6 = vmul.f32 0.7357589, %v14699_v59  ;;  %v8754_v45 = vmul.f32 -20.0, %v14864_v47  ;;  %v14877_v42 = vsel %vm8650_vm12, 1.0, %v16216_v27 }
 0x436   :  { %vm12349_vm13 = vmpackc.low %vm8648_vm11, %vm8644_vm0  ;;  %16247 = vst [vmem:[#allocation72_spill] sm:$0xff] %v14872_v62  ;;  %v9255_v49 = vmul.f32 0.19914827, %v14699_v59  ;;  %v9533_v63 = vmul.f32 0.09157819, %v14699_v59  ;;  %v9847_v29 = vadd.f32 %v14536_v5, %v14631_v57  ;;  %vm8769_vm15 = vcmp.ge.f32.partialorder %v14851_v38, 10.0 }
 0x437   :  { %12350 = vmatmul.mubr.msk.bf16.gmra.mrb[80].mxu0 %vm12349_vm13, %v16230_v26  ;;  %vm12377_vm14 = vmpackc.low %vm8650_vm12, %vm8646_vm1  ;;  %v9863_v62 = vmul.f32 0.04042768, %v14699_v59  ;;  %v8762_v19 = vadd.f32 %v8754_v45, %v8734_v34  ;;  %v8756_v37 = vmul.f32 -20.0, %v14877_v42  ;;  %v14898_v10 = vmul.f32 0.40600586, %v14699_v59 }
 0x438   :  { %12378 = vmatmul.mubr.msk.bf16.gmra.mrb[80].mxu1 %vm12377_vm14, %v16230_v26  ;;  %v14892_v52 = vadd.f32 %v9255_v49, %v9239_v11  ;;  %v14900_v51 = vadd.f32 %v9533_v63, %v9517_v40  ;;  %v8736_v57 = vadd.f32 %v8719_v50, %v14701_v61  ;;  %v9241_v34 = vadd.f32 %v14532_v55, %v14646_v12  ;;  %v14908_v11 = vpop.f32.mrb[19].mxu0  ;;  %v14923_v12 = vpop.f32.mrb[19].mxu1 }
 0x439   :  { %16248 = vst [vmem:[#allocation73_spill] sm:$0xff] %v14898_v10  ;;  %v14902_v0 = vadd.f32 %v9863_v62, %v9847_v29  ;;  %vm8770_vm0 = vcmp.ge.f32.partialorder %v8762_v19, 10.0  ;;  %v9257_v45 = vmul.f32 0.19914827, %v14701_v61  ;;  %16249 = vst [vmem:[#allocation74_spill] sm:$0xff] %v14908_v11  ;;  %v9849_v49 = vadd.f32 %v14536_v5, %v14653_v20 }
 0x43a   :  { %v9535_v59 = vmul.f32 0.09157819, %v14701_v61  ;;  %v9865_v62 = vmul.f32 0.04042768, %v14701_v61  ;;  %vm14919_vm1 = vmpackc.low %vm8770_vm0, %vm8766_vm3  ;;  %16252 = vst [vmem:[#allocation75_spill] sm:$0xff] %v14923_v12  ;;  %v14928_v17 = vsel %vm8769_vm15, 1.0, %v16216_v27  ;;  %v8764_v63 = vadd.f32 %v8756_v37, %v8736_v57 }
 0x43b   :  { %v14931_v29 = vmul.f32 0.7357589, %v14701_v61  ;;  %v14933_v20 = vadd.f32 %v9257_v45, %v9241_v34  ;;  %v9240_v11 = vadd.f32 %v14532_v55, %v14659_v15  ;;  %v9256_v12 = vmul.f32 0.19914827, %v14709_v39 }
 0x43c   :  { %v14935_v50 = vadd.f32 %v9535_v59, %v9519_v58  ;;  %v14937_v14 = vadd.f32 %v9865_v62, %v9849_v49  ;;  %vm8772_vm2 = vcmp.ge.f32.partialorder %v8764_v63, 10.0  ;;  %v14943_v43 = vmul.f32 0.40600586, %v14701_v61  ;;  %v16260_v62 = vld [vmem:[#allocation37_spill] sm:$0xff] }
 0x43d   :  { %v9518_v37 = vadd.f32 %v14534_v4, %v14663_v8  ;;  %v9534_v57 = vmul.f32 0.09157819, %v14709_v39  ;;  %v14950_v34 = vsel %vm8770_vm0, 1.0, %v16216_v27  ;;  %v14952_v45 = vadd.f32 %v9256_v12, %v9240_v11  ;;  %vm14960_vm3 = vmpackc.low %vm8772_vm2, %vm8768_vm4 }
 0x43e   :  { %16253 = vst [vmem:[#allocation76_spill] sm:$0xff] %v14943_v43  ;;  %v9848_v15 = vadd.f32 %v14536_v5, %v14666_v48  ;;  %v9864_v58 = vmul.f32 0.04042768, %v14709_v39  ;;  %v16254_v61 = vmov 0  ;;  %v14965_v8 = vmul.f32 0.7357589, %v14709_v39 }
 0x43f   :  { %v16255_v61 = vsel %vm14960_vm3, 4294967295, %v16254_v61  ;;  %v14967_v19 = vadd.f32 %v9534_v57, %v9518_v37  ;;  %v9242_v11 = vadd.f32 %v14532_v55, %v14673_v32  ;;  %v9258_v59 = vmul.f32 0.19914827, %v14711_v41  ;;  %v14972_v48 = vpop.f32.mrb[20].mxu0  ;;  %v16261_v37 = vld [vmem:[#allocation38_spill] sm:$0xff]  ;;  %v15002_v43 = vpop.f32.mrb[20].mxu1 }
 0x440   :  { %16256 = vst [vmem:[#allocation77_spill] sm:$0xff] %v16255_v61  ;;  %16257 = vst [vmem:[#allocation78_spill] sm:$0xff] %v14965_v8  ;;  %v14975_v49 = vmul.f32 0.40600586, %v14709_v39  ;;  %v14977_v30 = vadd.f32 %v9864_v58, %v9848_v15  ;;  %v9520_v12 = vadd.f32 %v14534_v4, %v16260_v62  ;;  %v9536_v33 = vmul.f32 0.09157819, %v14711_v41  ;;  %v16262_v32 = vld [vmem:[#allocation18_spill] sm:$0xff] }
 0x441   :  { %16258 = vst [vmem:[#allocation79_spill] sm:$0xff] %v14972_v48  ;;  %v14982_v35 = vadd.f32 %v9258_v59, %v9242_v11  ;;  %v9850_v57 = vadd.f32 %v14536_v5, %v16261_v37  ;;  %v9866_v55 = vmul.f32 0.04042768, %v14711_v41  ;;  %v16263_v8 = vld [vmem:[#allocation15_spill] sm:$0xff]  ;;  %v16265_v58 = vld [vmem:[#allocation22_spill] sm:$0xff]  ;;  %v9303_v5 = vmul.f32 0.40600586, %v14719_v22 }
 0x442   :  { %16259 = vst [vmem:[#allocation80_spill] sm:$0xff] %v14975_v49  ;;  %v8835_v48 = vadd.f32 %v16263_v8, %v16262_v32  ;;  %v14991_v49 = vsel %vm8772_vm2, 1.0, %v16216_v27  ;;  %v14993_v15 = vadd.f32 %v9536_v33, %v9520_v12  ;;  %v8879_v4 = vmul.f32 -14.715178, %v16265_v58  ;;  %16267 = vst [vmem:[#allocation18_spill] sm:$0xff] %v15002_v43 }
 0x443   :  { %v9279_v62 = vmul.f32 -3.9829655, %v16265_v58  ;;  %v14997_v11 = vadd.f32 %v9866_v55, %v9850_v57  ;;  %v9557_v37 = vmul.f32 -1.8315638, %v16265_v58  ;;  %v9581_v32 = vmul.f32 0.19914827, %v14719_v22 }
 0x444   :  { %16264 = vst [vmem:[#allocation37_spill] sm:$0xff] %v14993_v15  ;;  %v8859_v59 = vadd.f32 %v14693_v13, %v8835_v48  ;;  %v9887_v33 = vmul.f32 -0.80855364, %v16265_v58  ;;  %v9911_v12 = vmul.f32 0.09157819, %v14719_v22  ;;  %v16269_v48 = vld [vmem:[#allocation21_spill] sm:$0xff] }
 0x445   :  { %16266 = vst [vmem:[#allocation38_spill] sm:$0xff] %v14997_v11  ;;  %v9287_v63 = vadd.f32 %v9279_v62, %v14695_v53  ;;  %v15009_v10 = vmul.f32 0.7357589, %v14711_v41  ;;  %v9565_v13 = vadd.f32 %v9557_v37, %v14703_v36  ;;  %v8837_v55 = vadd.f32 %v16263_v8, %v16269_v48  ;;  %v16271_v53 = vld [vmem:[#allocation39_spill] sm:$0xff]  ;;  %v15019_v58 = vpop.f32.mrb[21].mxu0  ;;  %v16274_v37 = vld [vmem:[#allocation41_spill] sm:$0xff] }
 0x446   :  { %v8887_v57 = vadd.f32 %v8879_v4, %v8859_v59  ;;  %v8924_v2 = vmul.f32 -20.0, %v14749_v9  ;;  %v9895_v62 = vadd.f32 %v9887_v33, %v16271_v53  ;;  %v8881_v61 = vmul.f32 -14.715178, %v16272_v23  ;;  %16273 = vst [vmem:[#allocation39_spill] sm:$0xff] %v15019_v58  ;;  %v15031_v33 = vpop.f32.mrb[21].mxu1 }
 0x447   :  { %16268 = vst [vmem:[#allocation15_spill] sm:$0xff] %v15009_v10  ;;  %v15015_v43 = vadd.f32 %v9303_v5, %v9287_v63  ;;  %v15022_v15 = vadd.f32 %v9581_v32, %v9565_v13  ;;  %v8861_v4 = vadd.f32 %v14723_v31, %v8837_v55  ;;  %v9281_v36 = vmul.f32 -3.9829655, %v16272_v23  ;;  %16275 = vst [vmem:[#allocation24_spill] sm:$0xff] %v15031_v33 }
 0x448   :  { %v8904_v11 = vadd.f32 %v8887_v57, %v14719_v22  ;;  %v15026_v59 = vadd.f32 %v9911_v12, %v9895_v62  ;;  %v9305_v48 = vmul.f32 0.40600586, %v16274_v37  ;;  %v9559_v5 = vmul.f32 -1.8315638, %v16272_v23  ;;  %v16276_v57 = vld [vmem:[#allocation40_spill] sm:$0xff]  ;;  %v16278_v62 = vld [vmem:[#allocation25_spill] sm:$0xff] }
 0x449   :  { %16270 = vst [vmem:[#allocation21_spill] sm:$0xff] %v15015_v43  ;;  %v9583_v63 = vmul.f32 0.19914827, %v16274_v37  ;;  %v8889_v58 = vadd.f32 %v8881_v61, %v8861_v4  ;;  %v9289_v32 = vadd.f32 %v9281_v36, %v16276_v57  ;;  %v9889_v13 = vmul.f32 -0.80855364, %v16272_v23  ;;  %v16280_v61 = vld [vmem:[#allocation42_spill] sm:$0xff] }
 0x44a   :  { %v15033_v53 = vadd.f32 %v8924_v2, %v8904_v11  ;;  %v15038_v31 = vmul.f32 0.40600586, %v14711_v41  ;;  %v9567_v12 = vadd.f32 %v9559_v5, %v14725_v54  ;;  %v9913_v55 = vmul.f32 0.09157819, %v16274_v37  ;;  %v15049_v36 = vpop.f32.mrb[22].mxu0  ;;  %v16282_v5 = vld [vmem:[#allocation43_spill] sm:$0xff] }
 0x44b   :  { %v8836_v43 = vadd.f32 %v16263_v8, %v16278_v62  ;;  %v8906_v10 = vadd.f32 %v8889_v58, %v16274_v37  ;;  %v8926_v2 = vmul.f32 -20.0, %v14754_v25  ;;  %v15046_v11 = vadd.f32 %v9305_v48, %v9289_v32  ;;  %16281 = vst [vmem:[#allocation25_spill] sm:$0xff] %v15049_v36 }
 0x44c   :  { %16277 = vst [vmem:[#allocation41_spill] sm:$0xff] %v15038_v31  ;;  %v9897_v4 = vadd.f32 %v9889_v13, %v16280_v61  ;;  %v15052_v57 = vmul.f32 0.7357589, %v14719_v22  ;;  %v15054_v33 = vadd.f32 %v9583_v63, %v9567_v12  ;;  %v8880_v31 = vmul.f32 -14.715178, %v16282_v5  ;;  %v15066_v13 = vpop.f32.mrb[22].mxu1 }
 0x44d   :  { %16279 = vst [vmem:[#allocation40_spill] sm:$0xff] %v15046_v11  ;;  %v8860_v54 = vadd.f32 %v14804_v7, %v8836_v43  ;;  %v15058_v62 = vadd.f32 %v8926_v2, %v8906_v10  ;;  %v15061_v58 = vmul.f32 0.7357589, %v16274_v37  ;;  %v9280_v32 = vmul.f32 -3.9829655, %v16282_v5  ;;  %16283 = vst [vmem:[#allocation42_spill] sm:$0xff] %v15066_v13 }
 0x44e   :  { %v15063_v48 = vadd.f32 %v9913_v55, %v9897_v4  ;;  %v16284_v22 = vld [vmem:[#allocation44_spill] sm:$0xff]  ;;  %v9558_v63 = vmul.f32 -1.8315638, %v16282_v5  ;;  %vm8940_vm4 = vcmp.ge.f32.partialorder %v15033_v53, 10.0  ;;  %v9888_v10 = vmul.f32 -0.80855364, %v16282_v5 }
 0x44f   :  { %v8888_v61 = vadd.f32 %v8880_v31, %v8860_v54  ;;  %v9304_v36 = vmul.f32 0.40600586, %v16284_v22  ;;  %v9582_v7 = vmul.f32 0.19914827, %v16284_v22  ;;  %v9288_v43 = vadd.f32 %v9280_v32, %v14791_v56  ;;  %v16285_v2 = vld [vmem:[#allocation28_spill] sm:$0xff]  ;;  %v15087_v32 = vpop.f32.mrb[23].mxu0 }
 0x450   :  { %v9912_v37 = vmul.f32 0.09157819, %v16284_v22  ;;  %v8925_v55 = vmul.f32 -20.0, %v14861_v28  ;;  %v9566_v31 = vadd.f32 %v9558_v63, %v14809_v21  ;;  %v8838_v4 = vadd.f32 %v16263_v8, %v16285_v2  ;;  %16288 = vst [vmem:[#allocation28_spill] sm:$0xff] %v15087_v32  ;;  %v16294_v32 = vld [vmem:[#allocation16_spill] sm:$0xff] }
 0x451   :  { %v8905_v12 = vadd.f32 %v8888_v61, %v16284_v22  ;;  %vm8942_vm5 = vcmp.ge.f32.partialorder %v15058_v62, 10.0  ;;  %v15082_v54 = vmul.f32 0.7357589, %v16284_v22  ;;  %v15084_v13 = vadd.f32 %v9304_v36, %v9288_v43  ;;  %v16291_v22 = vld [vmem:[#allocation45_spill] sm:$0xff] }
 0x452   :  { %v9896_v56 = vadd.f32 %v9888_v10, %v14815_v24  ;;  %v15091_v61 = vadd.f32 %v9582_v7, %v9566_v31  ;;  %v8862_v21 = vadd.f32 %v14839_v44, %v8838_v4  ;;  %v8882_v63 = vmul.f32 -14.715178, %v14768_v18  ;;  %v15107_v10 = vpop.f32.mrb[23].mxu1 }
 0x453   :  { %16286 = vst [vmem:[#allocation43_spill] sm:$0xff] %v15082_v54  ;;  %16287 = vst [vmem:[#allocation44_spill] sm:$0xff] %v15084_v13  ;;  %v15089_v11 = vadd.f32 %v8925_v55, %v8905_v12  ;;  %v9282_v2 = vmul.f32 -3.9829655, %v14768_v18  ;;  %v9306_v54 = vmul.f32 0.40600586, %v16291_v22  ;;  %v15103_v24 = vsel %vm8940_vm4, 1.0, %v16216_v27 }
 0x454   :  { %v15095_v8 = vadd.f32 %v9912_v37, %v9896_v56  ;;  %v9560_v36 = vmul.f32 -1.8315638, %v14768_v18  ;;  %v8890_v43 = vadd.f32 %v8882_v63, %v8862_v21  ;;  %v9584_v7 = vmul.f32 0.19914827, %v16291_v22  ;;  %16292 = vst [vmem:[#allocation45_spill] sm:$0xff] %v15107_v10  ;;  %v16293_v63 = vld [vmem:[#allocation29_spill] sm:$0xff] }
 0x455   :  { %16289 = vst [vmem:[#allocation81_spill] sm:$0xff] %v15089_v11  ;;  %v9890_v44 = vmul.f32 -0.80855364, %v14768_v18  ;;  %v15112_v37 = vsel %vm8942_vm5, 1.0, %v16216_v27  ;;  %v9290_v12 = vadd.f32 %v9282_v2, %v14828_v60  ;;  %v9914_v31 = vmul.f32 0.09157819, %v16291_v22 }
 0x456   :  { %16290 = vst [vmem:[#allocation82_spill] sm:$0xff] %v15095_v8  ;;  %v9568_v55 = vadd.f32 %v9560_v36, %v14841_v1  ;;  %v8907_v4 = vadd.f32 %v8890_v43, %v16291_v22  ;;  %v8927_v56 = vmul.f32 -20.0, %v14928_v17  ;;  %v8839_v10 = vadd.f32 %v16294_v32, %v16293_v63  ;;  %v15130_v1 = vpop.f32.mrb[24].mxu0 }
 0x457   :  { %v9898_v21 = vadd.f32 %v9890_v44, %v14843_v46  ;;  %v15123_v13 = vmul.f32 0.7357589, %v16291_v22  ;;  %v15125_v18 = vadd.f32 %v9306_v54, %v9290_v12  ;;  %v8883_v60 = vmul.f32 -14.715178, %v14864_v47  ;;  %16296 = vst [vmem:[#allocation83_spill] sm:$0xff] %v15130_v1  ;;  %v16298_v44 = vld [vmem:[#allocation48_spill] sm:$0xff] }
 0x458   :  { %v15127_v8 = vadd.f32 %v9584_v7, %v9568_v55  ;;  %v15132_v2 = vadd.f32 %v8927_v56, %v8907_v4  ;;  %v8863_v46 = vadd.f32 %v14870_v6, %v8839_v10  ;;  %v9283_v43 = vmul.f32 -3.9829655, %v14864_v47  ;;  %v16299_v7 = vld [vmem:[#allocation32_spill] sm:$0xff]  ;;  %v15146_v56 = vpop.f32.mrb[24].mxu1 }
 0x459   :  { %16295 = vst [vmem:[#allocation29_spill] sm:$0xff] %v15125_v18  ;;  %v15134_v36 = vadd.f32 %v9914_v31, %v9898_v21  ;;  %v9307_v63 = vmul.f32 0.40600586, %v16298_v44  ;;  %v9561_v22 = vmul.f32 -1.8315638, %v14864_v47  ;;  %v9585_v54 = vmul.f32 0.19914827, %v16298_v44 }
 0x45a   :  { %16297 = vst [vmem:[#allocation84_spill] sm:$0xff] %v15132_v2  ;;  %v8841_v12 = vadd.f32 %v16294_v32, %v16299_v7  ;;  %vm8941_vm6 = vcmp.ge.f32.partialorder %v15089_v11, 10.0  ;;  %v8891_v55 = vadd.f32 %v8883_v60, %v8863_v46  ;;  %v9291_v4 = vadd.f32 %v9283_v43, %v14892_v52  ;;  %16300 = vst [vmem:[#allocation48_spill] sm:$0xff] %v15146_v56  ;;  %v15157_v46 = vpop.f32.mrb[25].mxu0  ;;  %v15164_v56 = vpop.f32.mrb[25].mxu1 }
 0x45b   :  { %v9891_v31 = vmul.f32 -0.80855364, %v14864_v47  ;;  %v8928_v6 = vmul.f32 -20.0, %v14950_v34  ;;  %v9569_v10 = vadd.f32 %v9561_v22, %v14900_v51  ;;  %v9915_v21 = vmul.f32 0.09157819, %v16298_v44  ;;  %16302 = vst [vmem:[#allocation85_spill] sm:$0xff] %v15157_v46 }
 0x45c   :  { %v8865_v1 = vadd.f32 %v14931_v29, %v8841_v12  ;;  %v8908_v18 = vadd.f32 %v8891_v55, %v16298_v44  ;;  %v15153_v7 = vadd.f32 %v9307_v63, %v9291_v4  ;;  %v8885_v52 = vmul.f32 -14.715178, %v14877_v42  ;;  %16303 = vst [vmem:[#allocation86_spill] sm:$0xff] %v15164_v56 }
 0x45d   :  { %v9899_v60 = vadd.f32 %v9891_v31, %v14902_v0  ;;  %vm8943_vm7 = vcmp.ge.f32.partialorder %v15132_v2, 10.0  ;;  %v15160_v43 = vadd.f32 %v9585_v54, %v9569_v10  ;;  %v8930_v51 = vmul.f32 -20.0, %v14991_v49  ;;  %v16304_v0 = vld [vmem:[#allocation49_spill] sm:$0xff]  ;;  %v16317_v2 = vld [vmem:[#allocation58_spill] sm:$0xff] }
 0x45e   :  { %16301 = vst [vmem:[#allocation32_spill] sm:$0xff] %v15153_v7  ;;  %v9285_v22 = vmul.f32 -3.9829655, %v14877_v42  ;;  %v15166_v29 = vadd.f32 %v8928_v6, %v8908_v18  ;;  %v8893_v12 = vadd.f32 %v8885_v52, %v8865_v1  ;;  %v9309_v55 = vmul.f32 0.40600586, %v16304_v0  ;;  %v16305_v6 = vld [vmem:[#allocation31_spill] sm:$0xff] }
 0x45f   :  { %v15168_v63 = vadd.f32 %v9915_v21, %v9899_v60  ;;  %v9563_v31 = vmul.f32 -1.8315638, %v14877_v42  ;;  %v9587_v54 = vmul.f32 0.19914827, %v16304_v0  ;;  %v9893_v10 = vmul.f32 -0.80855364, %v14877_v42 }
 0x460   :  { %v9293_v4 = vadd.f32 %v9285_v22, %v14933_v20  ;;  %vm8944_vm8 = vcmp.ge.f32.partialorder %v15166_v29, 10.0  ;;  %v8910_v46 = vadd.f32 %v8893_v12, %v16304_v0  ;;  %v9917_v18 = vmul.f32 0.09157819, %v16304_v0  ;;  %v15179_v60 = vpop.f32.mrb[26].mxu0 }
 0x461   :  { %v8682_v21 = vmul.f32 0.7357589, %v16305_v6  ;;  %16306 = vst [vmem:[#allocation49_spill] sm:$0xff] %v15179_v60  ;;  %v15184_v20 = vsel %vm8941_vm6, 1.0, %v16216_v27  ;;  %v9571_v52 = vadd.f32 %v9563_v31, %v14935_v50  ;;  %v9901_v22 = vadd.f32 %v9893_v10, %v14937_v14  ;;  %vm15194_vm9 = vmpackc.low %vm8944_vm8, %vm8940_vm4  ;;  %v15198_v60 = vpop.f32.mrb[26].mxu1  ;;  %v15205_v31 = vpop.f32.mrb[27].mxu0 }
 0x462   :  { %v15186_v1 = vadd.f32 %v9309_v55, %v9293_v4  ;;  %v16308_v12 = vmov 0  ;;  %16311 = vst [vmem:[#allocation88_spill] sm:$0xff] %v15198_v60  ;;  %v15201_v56 = vmul.f32 0.7357589, %v16298_v44  ;;  %v8938_v7 = vadd.f32 %v8930_v51, %v8910_v46  ;;  %v16312_v4 = vld [vmem:[#allocation33_spill] sm:$0xff]  ;;  %16313 = vst [vmem:[#allocation89_spill] sm:$0xff] %v15205_v31 }
 0x463   :  { %v16309_v12 = vsel %vm15194_vm9, 4294967295, %v16308_v12  ;;  %v8718_v55 = vadd.f32 %v14530_v3, %v8682_v21  ;;  %v8684_v50 = vmul.f32 0.7357589, %v16312_v4  ;;  %v15210_v14 = vsel %vm8943_vm7, 1.0, %v16216_v27  ;;  %v16315_v60 = vld [vmem:[#allocation54_spill] sm:$0xff]  ;;  %v7164_v44 = vpop.f32.mrb[72].mxu0 }
 0x464   :  { %16307 = vst [vmem:[#allocation31_spill] sm:$0xff] %v15186_v1  ;;  %16310 = vst [vmem:[#allocation87_spill] sm:$0xff] %v16309_v12  ;;  %v15212_v53 = vadd.f32 %v9587_v54, %v9571_v52  ;;  %v15214_v10 = vadd.f32 %v9917_v18, %v9901_v22  ;;  %v8755_v1 = vmul.f32 -20.0, %v16315_v60  ;;  %vm8946_vm11 = vcmp.ge.f32.partialorder %v8938_v7, 10.0  ;;  %v15220_v31 = vpop.f32.mrb[27].mxu1  ;;  %v7166_v12 = vpop.f32.mrb[73].mxu0 }
 0x465   :  { %v8735_v46 = vadd.f32 %v8718_v55, %v14709_v39  ;;  %v8720_v51 = vadd.f32 %v14530_v3, %v8684_v50  ;;  %v9284_v21 = vmul.f32 -3.9829655, %v16315_v60  ;;  %16316 = vst [vmem:[#allocation54_spill] sm:$0xff] %v15220_v31  ;;  %v8757_v11 = vmul.f32 -20.0, %v16317_v2  ;;  %v16318_v4 = vld [vmem:[#allocation52_spill] sm:$0xff]  ;;  %vm15229_vm12 = vmpackc.low %vm8946_vm11, %vm8942_vm5  ;;  %v8520_v50 = vpop.f32.mrb[72].mxu1 }
 0x466   :  { %16314 = vst [vmem:[#allocation90_spill] sm:$0xff] %v15214_v10  ;;  %v9308_v54 = vmul.f32 0.40600586, %v16318_v4  ;;  %v9562_v18 = vmul.f32 -1.8315638, %v16315_v60  ;;  %v9586_v52 = vmul.f32 0.19914827, %v16318_v4 }
 0x467   :  { %v16319_v39 = vmov 0  ;;  %v8763_v3 = vadd.f32 %v8755_v1, %v8735_v46  ;;  %v8737_v22 = vadd.f32 %v8720_v51, %v14711_v41  ;;  %v9292_v12 = vadd.f32 %v9284_v21, %v14952_v45  ;;  %v7168_v44 = vpop.f32.mrb[74].mxu0  ;;  %v8522_v45 = vpop.f32.mrb[73].mxu1  ;;  %v16323_v21 = vld [vmem:[#allocation53_spill] sm:$0xff]  ;;  %v16335_v7 = vld [vmem:[#allocation38_spill] sm:$0xff] }
 0x468   :  { %v16320_v39 = vsel %vm15229_vm12, 4294967295, %v16319_v39  ;;  %v9892_v55 = vmul.f32 -0.80855364, %v16315_v60  ;;  %v15237_v31 = vmul.f32 0.7357589, %v16304_v0  ;;  %v9570_v32 = vadd.f32 %v9562_v18, %v14967_v19  ;;  %v7170_v46 = vpop.f32.mrb[75].mxu0 }
 0x469   :  { %16321 = vst [vmem:[#allocation58_spill] sm:$0xff] %v16320_v39  ;;  %v9916_v62 = vmul.f32 0.09157819, %v16318_v4  ;;  %v9286_v10 = vmul.f32 -3.9829655, %v16317_v2  ;;  %vm8771_vm13 = vcmp.ge.f32.partialorder %v8763_v3, 10.0  ;;  %v8765_v39 = vadd.f32 %v8757_v11, %v8737_v22 }
 0x46a   :  { %v15242_v1 = vadd.f32 %v9308_v54, %v9292_v12  ;;  %v9900_v41 = vadd.f32 %v9892_v55, %v14977_v30  ;;  %vm12351_vm14 = vmpackc.low %vm8771_vm13, %vm8767_vm10  ;;  %v15249_v0 = vmul.f32 0.7357589, %v16318_v4  ;;  %v15251_v19 = vadd.f32 %v9586_v52, %v9570_v32  ;;  %v8524_v11 = vpop.f32.mrb[74].mxu1  ;;  %v15255_v54 = vpop.f32.mrb[76].mxu0  ;;  %v16330_v50 = vld [vmem:[#allocation37_spill] sm:$0xff] }
 0x46b   :  { %v9294_v51 = vadd.f32 %v9286_v10, %v14982_v35  ;;  %v9310_v18 = vmul.f32 0.40600586, %v16323_v21  ;;  %16324 = vst [vmem:[#allocation53_spill] sm:$0xff] %v15255_v54  ;;  %12352 = vmatprep.mubr.msk.bf16.mxu0 %vm12351_vm14, %v16230_v26  ;;  %vm8773_vm0 = vcmp.ge.f32.partialorder %v8765_v39, 10.0  ;;  %v9564_v16 = vmul.f32 -1.8315638, %v16317_v2  ;;  %v8526_v12 = vpop.f32.mrb[75].mxu1 }
 0x46c   :  { %16322 = vst [vmem:[#allocation52_spill] sm:$0xff] %v15242_v1  ;;  %v15258_v30 = vadd.f32 %v9916_v62, %v9900_v41  ;;  %v9588_v22 = vmul.f32 0.19914827, %v16323_v21  ;;  %v15265_v32 = vsel %vm8944_vm8, 1.0, %v16216_v27  ;;  %vm12379_vm10 = vmpackc.low %vm8773_vm0, %vm8769_vm15  ;;  %v9894_v10 = vmul.f32 -0.80855364, %v16317_v2  ;;  %12354 = vmatmul.mubr.msk.bf16.gmra.mrb[84].mxu0 %vm14919_vm1, %v16230_v26 }
 0x46d   :  { %16325 = vst [vmem:[#allocation91_spill] sm:$0xff] %v15265_v32  ;;  %v15270_v35 = vadd.f32 %v9310_v18, %v9294_v51  ;;  %v9918_v52 = vmul.f32 0.09157819, %v16323_v21  ;;  %v15277_v55 = vpop.f32.mrb[76].mxu1  ;;  %v15281_v29 = vsel %vm8946_vm11, 1.0, %v16216_v27  ;;  %12380 = vmatprep.mubr.msk.bf16.mxu1 %vm12379_vm10, %v16230_v26  ;;  %v9572_v44 = vadd.f32 %v9564_v16, %v16330_v50  ;;  %v16331_v62 = vld [vmem:[#allocation20_spill] sm:$0xff] }
 0x46e   :  { %16327 = vst [vmem:[#allocation93_spill] sm:$0xff] %v15277_v55  ;;  %16328 = vst [vmem:[#allocation94_spill] sm:$0xff] %v15281_v29  ;;  %v15285_v38 = vmul.f32 0.7357589, %v16323_v21  ;;  %v16332_v41 = vld [vmem:[#allocation17_spill] sm:$0xff]  ;;  %v15290_v46 = vpop.f32.mrb[77].mxu0  ;;  %v9902_v18 = vadd.f32 %v9894_v10, %v16335_v7  ;;  %12382 = vmatmul.mubr.msk.bf16.gmra.mrb[84].mxu1 %vm14960_vm3, %v16230_v26 }
 0x46f   :  { %16326 = vst [vmem:[#allocation92_spill] sm:$0xff] %v15270_v35  ;;  %v9009_v45 = vadd.f32 %v16332_v41, %v16331_v62  ;;  %16333 = vst [vmem:[#allocation37_spill] sm:$0xff] %v15290_v46  ;;  %v15292_v40 = vpop.f32.mrb[77].mxu1  ;;  %v15296_v51 = vsel %vm8771_vm13, 1.0, %v16216_v27  ;;  %v16337_v12 = vld [vmem:[#allocation22_spill] sm:$0xff]  ;;  %v15304_v50 = vpop.f32.mrb[78].mxu0  ;;  %v15306_v62 = vadd.f32 %v9588_v22, %v9572_v44 }
 0x470   :  { %16329 = vst [vmem:[#allocation95_spill] sm:$0xff] %v15285_v38  ;;  %16334 = vst [vmem:[#allocation20_spill] sm:$0xff] %v15292_v40  ;;  %v9053_v55 = vmul.f32 -8.120117, %v16337_v12  ;;  %v9609_v16 = vmul.f32 -3.9829655, %v14749_v9  ;;  %v15315_v7 = vadd.f32 %v9918_v52, %v9902_v18 }
 0x471   :  { %16338 = vst [vmem:[#allocation17_spill] sm:$0xff] %v15304_v50  ;;  %v16339_v46 = vld [vmem:[#allocation46_spill] sm:$0xff]  ;;  %v16340_v54 = vld [vmem:[#allocation56_spill] sm:$0xff]  ;;  %v9939_v35 = vmul.f32 -1.8315638, %v14749_v9  ;;  %v15311_v1 = vpop.f32.mrb[78].mxu1 }
 0x472   :  { %v9033_v40 = vadd.f32 %v16339_v46, %v9009_v45  ;;  %v9633_v3 = vmul.f32 0.40600586, %v16340_v54  ;;  %16341 = vst [vmem:[#allocation38_spill] sm:$0xff] %v15311_v1  ;;  %v15313_v10 = vpop.f32.mrb[79].mxu0  ;;  %16343 = vst [vmem:[#allocation22_spill] sm:$0xff] %v15315_v7  ;;  %v9617_v11 = vadd.f32 %v9609_v16, %v15022_v15  ;;  %v9963_v12 = vmul.f32 0.19914827, %v16340_v54 }
 0x473   :  { %16342 = vst [vmem:[#allocation77_spill] sm:$0xff] %v15313_v10  ;;  %v16344_v38 = vld [vmem:[#allocation23_spill] sm:$0xff]  ;;  %v15321_v44 = vpop.f32.mrb[79].mxu1  ;;  %v15325_v45 = vsel %vm8773_vm0, 1.0, %v16216_v27  ;;  %v9105_v1 = vmul.f32 -14.715178, %v14749_v9  ;;  %v9947_v10 = vadd.f32 %v9939_v35, %v15026_v59 }
 0x474   :  { %v9011_v22 = vadd.f32 %v16332_v41, %v16344_v38  ;;  %16345 = vst [vmem:[#allocation46_spill] sm:$0xff] %v15321_v44  ;;  %v9061_v46 = vadd.f32 %v9053_v55, %v9033_v40  ;;  %v9150_v52 = vmul.f32 -20.0, %v15103_v24  ;;  %v15330_v18 = vadd.f32 %v9633_v3, %v9617_v11  ;;  %v16346_v15 = vld [vmem:[#allocation47_spill] sm:$0xff]  ;;  %v16348_v7 = vld [vmem:[#allocation57_spill] sm:$0xff]  ;;  %v16349_v35 = vld [vmem:[#allocation26_spill] sm:$0xff] }
 0x475   :  { %v9055_v50 = vmul.f32 -8.120117, %v16272_v23  ;;  %v15335_v44 = vadd.f32 %v9963_v12, %v9947_v10  ;;  %v9611_v39 = vmul.f32 -3.9829655, %v14754_v25  ;;  %v9635_v55 = vmul.f32 0.40600586, %v16348_v7 }
 0x476   :  { %v9035_v16 = vadd.f32 %v16346_v15, %v9011_v22  ;;  %v9085_v38 = vadd.f32 %v15052_v57, %v9061_v46  ;;  %v9941_v9 = vmul.f32 -1.8315638, %v14754_v25  ;;  %v9965_v59 = vmul.f32 0.19914827, %v16348_v7 }
 0x477   :  { %16347 = vst [vmem:[#allocation56_spill] sm:$0xff] %v15335_v44  ;;  %v9010_v3 = vadd.f32 %v16332_v41, %v16349_v35  ;;  %v15344_v22 = vmul.f32 0.7357589, %v16340_v54  ;;  %v9107_v23 = vmul.f32 -14.715178, %v14754_v25  ;;  %v9619_v57 = vadd.f32 %v9611_v39, %v15054_v33  ;;  %v16351_v39 = vld [vmem:[#allocation59_spill] sm:$0xff] }
 0x478   :  { %v9063_v40 = vadd.f32 %v9055_v50, %v9035_v16  ;;  %v9113_v11 = vadd.f32 %v9105_v1, %v9085_v38  ;;  %v9949_v12 = vadd.f32 %v9941_v9, %v15063_v48  ;;  %v16350_v50 = vld [vmem:[#allocation63_spill] sm:$0xff]  ;;  %v9054_v15 = vmul.f32 -8.120117, %v16282_v5 }
 0x479   :  { %v9034_v46 = vadd.f32 %v16350_v50, %v9010_v3  ;;  %v9152_v35 = vmul.f32 -20.0, %v15112_v37  ;;  %v15354_v1 = vadd.f32 %v9635_v55, %v9619_v57  ;;  %v9610_v38 = vmul.f32 -3.9829655, %v14861_v28  ;;  %v16352_v55 = vld [vmem:[#allocation43_spill] sm:$0xff] }
 0x47a   :  { %v9087_v10 = vadd.f32 %v15061_v58, %v9063_v40  ;;  %v9130_v16 = vadd.f32 %v9113_v11, %v16340_v54  ;;  %v15357_v25 = vadd.f32 %v9965_v59, %v9949_v12  ;;  %v9634_v58 = vmul.f32 0.40600586, %v16351_v39 }
 0x47b   :  { %v9062_v33 = vadd.f32 %v9054_v15, %v9034_v46  ;;  %v9618_v9 = vadd.f32 %v9610_v38, %v15091_v61  ;;  %v9940_v5 = vmul.f32 -1.8315638, %v14861_v28  ;;  %v9964_v48 = vmul.f32 0.19914827, %v16351_v39  ;;  %v16354_v61 = vld [vmem:[#allocation82_spill] sm:$0xff] }
 0x47c   :  { %v9115_v44 = vadd.f32 %v9107_v23, %v9087_v10  ;;  %v15360_v40 = vadd.f32 %v9150_v52, %v9130_v16  ;;  %v9106_v11 = vmul.f32 -14.715178, %v14861_v28  ;;  %v16353_v23 = vld [vmem:[#allocation27_spill] sm:$0xff]  ;;  %v15371_v57 = vmul.f32 0.7357589, %v16348_v7 }
 0x47d   :  { %v9086_v3 = vadd.f32 %v16352_v55, %v9062_v33  ;;  %v9012_v59 = vadd.f32 %v16332_v41, %v16353_v23  ;;  %v9151_v52 = vmul.f32 -20.0, %v15184_v20  ;;  %v15374_v10 = vadd.f32 %v9634_v58, %v9618_v9  ;;  %v16356_v16 = vld [vmem:[#allocation55_spill] sm:$0xff] }
 0x47e   :  { %v9132_v54 = vadd.f32 %v9115_v44, %v16348_v7  ;;  %v9948_v12 = vadd.f32 %v9940_v5, %v16354_v61  ;;  %v16355_v44 = vld [vmem:[#allocation70_spill] sm:$0xff]  ;;  %v9056_v38 = vmul.f32 -8.120117, %v16356_v16  ;;  %vm9166_vm15 = vcmp.ge.f32.partialorder %v15360_v40, 10.0  ;;  %v16357_v5 = vld [vmem:[#allocation60_spill] sm:$0xff]  ;;  %v16360_v61 = vld [vmem:[#allocation19_spill] sm:$0xff] }
 0x47f   :  { %v9114_v46 = vadd.f32 %v9106_v11, %v9086_v3  ;;  %v9036_v15 = vadd.f32 %v16355_v44, %v9012_v59  ;;  %v15383_v41 = vmul.f32 0.7357589, %v16351_v39  ;;  %v9612_v33 = vmul.f32 -3.9829655, %v14928_v17  ;;  %v16359_v59 = vld [vmem:[#allocation30_spill] sm:$0xff] }
 0x480   :  { %v15377_v50 = vadd.f32 %v9152_v35, %v9132_v54  ;;  %v15385_v7 = vadd.f32 %v9964_v48, %v9948_v12  ;;  %v9108_v35 = vmul.f32 -14.715178, %v14928_v17  ;;  %v9636_v54 = vmul.f32 0.40600586, %v16357_v5 }
 0x481   :  { %v9131_v58 = vadd.f32 %v9114_v46, %v16351_v39  ;;  %v9064_v9 = vadd.f32 %v9056_v38, %v9036_v15  ;;  %v9620_v55 = vadd.f32 %v9612_v33, %v15127_v8  ;;  %v9942_v3 = vmul.f32 -1.8315638, %v14928_v17  ;;  %v16363_v38 = vld [vmem:[#allocation73_spill] sm:$0xff] }
 0x482   :  { %vm9168_vm1 = vcmp.ge.f32.partialorder %v15377_v50, 10.0  ;;  %v9966_v11 = vmul.f32 0.19914827, %v16357_v5  ;;  %v15398_v48 = vsel %vm9166_vm15, 1.0, %v16216_v27  ;;  %v9013_v12 = vadd.f32 %v16360_v61, %v16359_v59 }
 0x483   :  { %v15400_v23 = vadd.f32 %v9151_v52, %v9131_v58  ;;  %v9088_v39 = vadd.f32 %v15123_v13, %v9064_v9  ;;  %v9153_v46 = vmul.f32 -20.0, %v15210_v14  ;;  %v15407_v8 = vmul.f32 0.7357589, %v16357_v5 }
 0x484   :  { %v15409_v44 = vadd.f32 %v9636_v54, %v9620_v55  ;;  %v9950_v15 = vadd.f32 %v9942_v3, %v15134_v36  ;;  %v15415_v16 = vsel %vm9168_vm1, 1.0, %v16216_v27  ;;  %v9037_v13 = vadd.f32 %v16363_v38, %v9013_v12  ;;  %v16364_v54 = vld [vmem:[#allocation61_spill] sm:$0xff] }
 0x485   :  { %16358 = vst [vmem:[#allocation23_spill] sm:$0xff] %v15400_v23  ;;  %16361 = vst [vmem:[#allocation47_spill] sm:$0xff] %v15407_v8  ;;  %v9116_v52 = vadd.f32 %v9108_v35, %v9088_v39  ;;  %v9057_v33 = vmul.f32 -8.120117, %v14864_v47  ;;  %v9109_v9 = vmul.f32 -14.715178, %v14950_v34 }
 0x486   :  { %16362 = vst [vmem:[#allocation57_spill] sm:$0xff] %v15409_v44  ;;  %v15419_v58 = vadd.f32 %v9966_v11, %v9950_v15  ;;  %v9613_v59 = vmul.f32 -3.9829655, %v14950_v34  ;;  %v9637_v55 = vmul.f32 0.40600586, %v16364_v54  ;;  %v9943_v44 = vmul.f32 -1.8315638, %v14950_v34 }
 0x487   :  { %v9133_v36 = vadd.f32 %v9116_v52, %v16357_v5  ;;  %v9065_v3 = vadd.f32 %v9057_v33, %v9037_v13  ;;  %v9967_v8 = vmul.f32 0.19914827, %v16364_v54  ;;  %vm9167_vm2 = vcmp.ge.f32.partialorder %v15400_v23, 10.0  ;;  %v16365_v11 = vld [vmem:[#allocation34_spill] sm:$0xff]  ;;  %v16366_v13 = vld [vmem:[#allocation76_spill] sm:$0xff] }
 0x488   :  { %v9154_v35 = vmul.f32 -20.0, %v15265_v32  ;;  %v9621_v47 = vadd.f32 %v9613_v59, %v15160_v43  ;;  %v9015_v39 = vadd.f32 %v16360_v61, %v16365_v11  ;;  %v15436_v5 = vmul.f32 0.7357589, %v16364_v54 }
 0x489   :  { %v15432_v12 = vadd.f32 %v9153_v46, %v9133_v36  ;;  %v9089_v15 = vadd.f32 %v15201_v56, %v9065_v3  ;;  %v9951_v52 = vadd.f32 %v9943_v44, %v15168_v63  ;;  %v9059_v32 = vmul.f32 -8.120117, %v14877_v42  ;;  %v16367_v36 = vld [vmem:[#allocation62_spill] sm:$0xff] }
 0x48a   :  { %v15439_v38 = vadd.f32 %v9637_v55, %v9621_v47  ;;  %v9039_v33 = vadd.f32 %v16366_v13, %v9015_v39  ;;  %v9615_v43 = vmul.f32 -3.9829655, %v14991_v49  ;;  %v15447_v46 = vsel %vm9167_vm2, 1.0, %v16216_v27 }
 0x48b   :  { %v9117_v59 = vadd.f32 %v9109_v9, %v9089_v15  ;;  %v15449_v56 = vadd.f32 %v9967_v8, %v9951_v52  ;;  %v9639_v3 = vmul.f32 0.40600586, %v16367_v36  ;;  %v9111_v63 = vmul.f32 -14.715178, %v14991_v49  ;;  %v16368_v15 = vld [vmem:[#allocation90_spill] sm:$0xff] }
 0x48c   :  { %v9067_v11 = vadd.f32 %v9059_v32, %v9039_v33  ;;  %v9623_v44 = vadd.f32 %v9615_v43, %v15212_v53  ;;  %v9945_v55 = vmul.f32 -1.8315638, %v14991_v49  ;;  %v9156_v47 = vmul.f32 -20.0, %v15281_v29  ;;  %v16369_v33 = vld [vmem:[#allocation16_spill] sm:$0xff]  ;;  %v16370_v43 = vld [vmem:[#allocation33_spill] sm:$0xff] }
 0x48d   :  { %v9134_v42 = vadd.f32 %v9117_v59, %v16364_v54  ;;  %v9969_v39 = vmul.f32 0.19914827, %v16367_v36  ;;  %v8804_v13 = vmul.f32 0.40600586, %v16305_v6  ;;  %v15461_v9 = vmul.f32 0.7357589, %v16367_v36 }
 0x48e   :  { %v9091_v8 = vadd.f32 %v15237_v31, %v9067_v11  ;;  %v15463_v32 = vadd.f32 %v9639_v3, %v9623_v44  ;;  %v9953_v52 = vadd.f32 %v9945_v55, %v16368_v15  ;;  %vm9169_vm3 = vcmp.ge.f32.partialorder %v15432_v12, 10.0  ;;  %v16371_v31 = vld [vmem:[#allocation35_spill] sm:$0xff]  ;;  %v16372_v3 = vld [vmem:[#allocation78_spill] sm:$0xff] }
 0x48f   :  { %v9162_v53 = vadd.f32 %v9154_v35, %v9134_v42  ;;  %v8840_v54 = vadd.f32 %v16369_v33, %v8804_v13  ;;  %v8806_v59 = vmul.f32 0.40600586, %v16370_v43  ;;  %v8884_v6 = vmul.f32 -14.715178, %v16315_v60  ;;  %v16373_v13 = vld [vmem:[#allocation80_spill] sm:$0xff] }
 0x490   :  { %v9119_v23 = vadd.f32 %v9111_v63, %v9091_v8  ;;  %v15469_v29 = vadd.f32 %v9969_v39, %v9953_v52  ;;  %v9014_v11 = vadd.f32 %v16360_v61, %v16371_v31  ;;  %v8929_v55 = vmul.f32 -20.0, %v15296_v51  ;;  %v16378_v31 = vld [vmem:[#allocation64_spill] sm:$0xff] }
 0x491   :  { %vm9170_vm4 = vcmp.ge.f32.partialorder %v9162_v53, 10.0  ;;  %v8864_v44 = vadd.f32 %v16372_v3, %v8840_v54  ;;  %v8842_v15 = vadd.f32 %v16369_v33, %v8806_v59  ;;  %v8886_v42 = vmul.f32 -14.715178, %v16317_v2  ;;  %v16377_v54 = vld [vmem:[#allocation15_spill] sm:$0xff] }
 0x492   :  { %v9136_v35 = vadd.f32 %v9119_v23, %v16367_v36  ;;  %v9038_v63 = vadd.f32 %v16373_v13, %v9014_v11  ;;  %v9058_v39 = vmul.f32 -8.120117, %v16315_v60  ;;  %vm15484_vm5 = vmpackc.low %vm9170_vm4, %vm9166_vm15  ;;  %v16374_v8 = vmov 0 }
 0x493   :  { %v16375_v8 = vsel %vm15484_vm5, 4294967295, %v16374_v8  ;;  %v8892_v52 = vadd.f32 %v8884_v6, %v8864_v44  ;;  %v8866_v43 = vadd.f32 %v16377_v54, %v8842_v15  ;;  %v9110_v33 = vmul.f32 -14.715178, %v15296_v51  ;;  %v16379_v15 = vld [vmem:[#allocation36_spill] sm:$0xff]  ;;  %v16391_v54 = vld [vmem:[#allocation21_spill] sm:$0xff] }
 0x494   :  { %16376 = vst [vmem:[#allocation26_spill] sm:$0xff] %v16375_v8  ;;  %v9614_v23 = vmul.f32 -3.9829655, %v15296_v51  ;;  %v9164_v36 = vadd.f32 %v9156_v47, %v9136_v35  ;;  %v9066_v59 = vadd.f32 %v9058_v39, %v9038_v63  ;;  %v9638_v11 = vmul.f32 0.40600586, %v16378_v31 }
 0x495   :  { %v9944_v60 = vmul.f32 -1.8315638, %v15296_v51  ;;  %v8909_v40 = vadd.f32 %v8892_v52, %v16318_v4  ;;  %v8894_v3 = vadd.f32 %v8886_v42, %v8866_v43  ;;  %v9968_v8 = vmul.f32 0.19914827, %v16378_v31  ;;  %v16382_v42 = vld [vmem:[#allocation41_spill] sm:$0xff] }
 0x496   :  { %v9622_v13 = vadd.f32 %v9614_v23, %v15251_v19  ;;  %vm9172_vm8 = vcmp.ge.f32.partialorder %v9164_v36, 10.0  ;;  %v9090_v6 = vadd.f32 %v15249_v0, %v9066_v59  ;;  %v9016_v47 = vadd.f32 %v16360_v61, %v16379_v15 }
 0x497   :  { %v9952_v44 = vadd.f32 %v9944_v60, %v15258_v30  ;;  %v15500_v35 = vadd.f32 %v8929_v55, %v8909_v40  ;;  %v8911_v63 = vadd.f32 %v8894_v3, %v16323_v21  ;;  %v8931_v39 = vmul.f32 -20.0, %v15325_v45  ;;  %vm15509_vm11 = vmpackc.low %vm9172_vm8, %vm9168_vm1 }
 0x498   :  { %v15504_v4 = vadd.f32 %v9638_v11, %v9622_v13  ;;  %v9118_v0 = vadd.f32 %v9110_v33, %v9090_v6  ;;  %v9040_v61 = vadd.f32 %v16382_v42, %v9016_v47  ;;  %v9060_v55 = vmul.f32 -8.120117, %v16317_v2  ;;  %v16384_v33 = vld [vmem:[#allocation65_spill] sm:$0xff] }
 0x499   :  { %v15513_v30 = vadd.f32 %v9968_v8, %v9952_v44  ;;  %v15520_v21 = vsel %vm9169_vm3, 1.0, %v16216_v27  ;;  %v15524_v50 = vsel %vm9170_vm4, 1.0, %v16216_v27  ;;  %vm8945_vm13 = vcmp.ge.f32.partialorder %v15500_v35, 10.0  ;;  %v16388_v44 = vld [vmem:[#allocation50_spill] sm:$0xff] }
 0x49a   :  { %v15527_v52 = vadd.f32 %v8931_v39, %v8911_v63  ;;  %vm12355_vm14 = vmpackc.low %vm8945_vm13, %vm8941_vm6  ;;  %v15534_v2 = vadd.f32 %v9118_v0, %v16378_v31  ;;  %v15537_v8 = vmul.f32 0.7357589, %v16378_v31  ;;  %v9068_v43 = vadd.f32 %v9060_v55, %v9040_v61  ;;  %v16386_v31 = vld [vmem:[#allocation95_spill] sm:$0xff]  ;;  %v16389_v39 = vld [vmem:[#allocation22_spill] sm:$0xff] }
 0x49b   :  { %v9616_v53 = vmul.f32 -3.9829655, %v15325_v45  ;;  %12356 = vmatprep.mubr.msk.bf16.mxu0 %vm12355_vm14, %v16230_v26  ;;  %v9640_v23 = vmul.f32 0.40600586, %v16384_v33  ;;  %v9946_v59 = vmul.f32 -1.8315638, %v15325_v45  ;;  %v15558_v47 = vsel %vm9172_vm8, 1.0, %v16216_v27 }
 0x49c   :  { %vm8947_vm0 = vcmp.ge.f32.partialorder %v15527_v52, 10.0  ;;  %v9970_v11 = vmul.f32 0.19914827, %v16384_v33  ;;  %v9092_v40 = vadd.f32 %v16386_v31, %v9068_v43  ;;  %v9112_v3 = vmul.f32 -14.715178, %v15325_v45  ;;  %12358 = vmatmul.mubr.msk.bf16.gmra.mrb[88].mxu0 %vm15194_vm9, %v16230_v26  ;;  %v16392_v43 = vld [vmem:[#allocation66_spill] sm:$0xff] }
 0x49d   :  { %vm12383_vm6 = vmpackc.low %vm8947_vm0, %vm8943_vm7  ;;  %v9624_v13 = vadd.f32 %v9616_v53, %v15306_v62  ;;  %v9331_v15 = vmul.f32 -8.120117, %v16388_v44  ;;  %v15562_v63 = vmul.f32 0.7357589, %v16384_v33  ;;  %v9954_v0 = vadd.f32 %v9946_v59, %v16389_v39  ;;  %v16396_v55 = vld [vmem:[#allocation40_spill] sm:$0xff]  ;;  %v16406_v52 = vld [vmem:[#allocation71_spill] sm:$0xff] }
 0x49e   :  { %12384 = vmatprep.mubr.msk.bf16.mxu1 %vm12383_vm6, %v16230_v26  ;;  %v9661_v42 = vmul.f32 -8.120117, %v15103_v24  ;;  %v9120_v62 = vadd.f32 %v9112_v3, %v9092_v40  ;;  %v9685_v53 = vmul.f32 0.7357589, %v16392_v43  ;;  %v9991_v6 = vmul.f32 -3.9829655, %v15103_v24 }
 0x49f   :  { %v15566_v61 = vadd.f32 %v9640_v23, %v9624_v13  ;;  %12386 = vmatmul.mubr.msk.bf16.gmra.mrb[88].mxu1 %vm15229_vm12, %v16230_v26  ;;  %v9339_v36 = vadd.f32 %v9331_v15, %v16391_v54  ;;  %v15573_v60 = vadd.f32 %v9970_v11, %v9954_v0  ;;  %v10015_v59 = vmul.f32 0.40600586, %v16392_v43  ;;  %v16394_v13 = vld [vmem:[#allocation51_spill] sm:$0xff]  ;;  %v16395_v11 = vld [vmem:[#allocation56_spill] sm:$0xff] }
 0x4a0   :  { %v9669_v31 = vadd.f32 %v9661_v42, %v15330_v18  ;;  %v15579_v40 = vadd.f32 %v9120_v62, %v16384_v33  ;;  %v9383_v3 = vmul.f32 -14.715178, %v15103_v24  ;;  %v9333_v44 = vmul.f32 -8.120117, %v16394_v13 }
 0x4a1   :  { %16393 = vst [vmem:[#allocation63_spill] sm:$0xff] %v15573_v60  ;;  %v9363_v23 = vadd.f32 %v15344_v22, %v9339_v36  ;;  %v9428_v15 = vmul.f32 -20.0, %v15398_v48  ;;  %v9999_v0 = vadd.f32 %v9991_v6, %v16395_v11  ;;  %v9663_v18 = vmul.f32 -8.120117, %v15112_v37  ;;  %v16397_v60 = vld [vmem:[#allocation67_spill] sm:$0xff] }
 0x4a2   :  { %v15585_v39 = vadd.f32 %v9685_v53, %v9669_v31  ;;  %v9341_v54 = vadd.f32 %v9333_v44, %v16396_v55  ;;  %v9687_v33 = vmul.f32 0.7357589, %v16397_v60  ;;  %v9993_v62 = vmul.f32 -3.9829655, %v15112_v37  ;;  %v16398_v44 = vld [vmem:[#allocation44_spill] sm:$0xff] }
 0x4a3   :  { %v9391_v42 = vadd.f32 %v9383_v3, %v9363_v23  ;;  %v15592_v22 = vadd.f32 %v10015_v59, %v9999_v0  ;;  %v9671_v24 = vadd.f32 %v9663_v18, %v15354_v1  ;;  %v10017_v36 = vmul.f32 0.40600586, %v16397_v60 }
 0x4a4   :  { %v9332_v53 = vmul.f32 -8.120117, %v14861_v28  ;;  %v9365_v6 = vadd.f32 %v15371_v57, %v9341_v54  ;;  %v9385_v23 = vmul.f32 -14.715178, %v15112_v37  ;;  %v10001_v3 = vadd.f32 %v9993_v62, %v15357_v25 }
 0x4a5   :  { %v9408_v31 = vadd.f32 %v9391_v42, %v16392_v43  ;;  %v15601_v13 = vadd.f32 %v9687_v33, %v9671_v24  ;;  %v9384_v59 = vmul.f32 -14.715178, %v15184_v20  ;;  %v9662_v1 = vmul.f32 -8.120117, %v15184_v20  ;;  %v16399_v43 = vld [vmem:[#allocation68_spill] sm:$0xff] }
 0x4a6   :  { %v9340_v11 = vadd.f32 %v9332_v53, %v16398_v44  ;;  %v9393_v18 = vadd.f32 %v9385_v23, %v9365_v6  ;;  %v15608_v28 = vadd.f32 %v10017_v36, %v10001_v3  ;;  %v9686_v42 = vmul.f32 0.7357589, %v16399_v43  ;;  %v16400_v53 = vld [vmem:[#allocation29_spill] sm:$0xff] }
 0x4a7   :  { %v15606_v0 = vadd.f32 %v9428_v15, %v9408_v31  ;;  %v9670_v37 = vadd.f32 %v9662_v1, %v15374_v10  ;;  %v9992_v25 = vmul.f32 -3.9829655, %v15184_v20  ;;  %v10016_v55 = vmul.f32 0.40600586, %v16399_v43  ;;  %v16401_v6 = vld [vmem:[#allocation69_spill] sm:$0xff] }
 0x4a8   :  { %v9364_v57 = vadd.f32 %v15383_v41, %v9340_v11  ;;  %v15618_v54 = vsel %vm8945_vm13, 1.0, %v16216_v27  ;;  %v9410_v15 = vadd.f32 %v9393_v18, %v16397_v60  ;;  %v9430_v33 = vmul.f32 -20.0, %v15415_v16  ;;  %v16402_v11 = vld [vmem:[#allocation47_spill] sm:$0xff]  ;;  %v16403_v1 = vld [vmem:[#allocation57_spill] sm:$0xff] }
 0x4a9   :  { %v9334_v62 = vmul.f32 -8.120117, %v14928_v17  ;;  %v9429_v41 = vmul.f32 -20.0, %v15447_v46  ;;  %v15624_v36 = vadd.f32 %v9686_v42, %v9670_v37  ;;  %v10000_v20 = vadd.f32 %v9992_v25, %v15385_v7 }
 0x4aa   :  { %v9392_v24 = vadd.f32 %v9384_v59, %v9364_v57  ;;  %v15627_v10 = vadd.f32 %v9430_v33, %v9410_v15  ;;  %v9664_v35 = vmul.f32 -8.120117, %v15210_v14  ;;  %v9688_v23 = vmul.f32 0.7357589, %v16401_v6  ;;  %v16404_v33 = vld [vmem:[#allocation32_spill] sm:$0xff] }
 0x4ab   :  { %v9342_v31 = vadd.f32 %v9334_v62, %v16400_v53  ;;  %v15633_v3 = vadd.f32 %v10016_v55, %v10000_v20  ;;  %v9994_v17 = vmul.f32 -3.9829655, %v15210_v14  ;;  %v10018_v44 = vmul.f32 0.40600586, %v16401_v6  ;;  %v16405_v62 = vld [vmem:[#allocation91_spill] sm:$0xff] }
 0x4ac   :  { %v9409_v60 = vadd.f32 %v9392_v24, %v16399_v43  ;;  %v9386_v7 = vmul.f32 -14.715178, %v15210_v14  ;;  %v9672_v18 = vadd.f32 %v9664_v35, %v16403_v1  ;;  %v9335_v42 = vmul.f32 -8.120117, %v14950_v34 }
 0x4ad   :  { %v9366_v59 = vadd.f32 %v16402_v11, %v9342_v31  ;;  %v15644_v57 = vsel %vm8947_vm0, 1.0, %v16216_v27  ;;  %v9431_v37 = vmul.f32 -20.0, %v15520_v21  ;;  %v10002_v25 = vadd.f32 %v9994_v17, %v15419_v58 }
 0x4ae   :  { %v15646_v43 = vadd.f32 %v9429_v41, %v9409_v60  ;;  %v15650_v15 = vadd.f32 %v9688_v23, %v9672_v18  ;;  %v9343_v14 = vadd.f32 %v9335_v42, %v16404_v33  ;;  %v9665_v24 = vmul.f32 -8.120117, %v16405_v62  ;;  %v16409_v42 = vld [vmem:[#allocation72_spill] sm:$0xff] }
 0x4af   :  { %v9394_v55 = vadd.f32 %v9386_v7, %v9366_v59  ;;  %v15654_v20 = vadd.f32 %v10018_v44, %v10002_v25  ;;  %v9387_v34 = vmul.f32 -14.715178, %v16405_v62  ;;  %v9689_v53 = vmul.f32 0.7357589, %v16406_v52 }
 0x4b0   :  { %v9995_v41 = vmul.f32 -3.9829655, %v16405_v62  ;;  %v9367_v35 = vadd.f32 %v15436_v5, %v9343_v14  ;;  %v9673_v58 = vadd.f32 %v9665_v24, %v15439_v38  ;;  %v10019_v23 = vmul.f32 0.40600586, %v16406_v52  ;;  %v16408_v38 = vld [vmem:[#allocation31_spill] sm:$0xff] }
 0x4b1   :  { %v9411_v31 = vadd.f32 %v9394_v55, %v16401_v6  ;;  %vm9444_vm7 = vcmp.ge.f32.partialorder %v15606_v0, 10.0  ;;  %v9432_v60 = vmul.f32 -20.0, %v15524_v50  ;;  %v9337_v44 = vmul.f32 -8.120117, %v14991_v49  ;;  %v16407_v6 = vld [vmem:[#allocation94_spill] sm:$0xff] }
 0x4b2   :  { %v10003_v17 = vadd.f32 %v9995_v41, %v15449_v56  ;;  %v9395_v59 = vadd.f32 %v9387_v34, %v9367_v35  ;;  %v15669_v7 = vadd.f32 %v9689_v53, %v9673_v58  ;;  %v9667_v1 = vmul.f32 -8.120117, %v16407_v6 }
 0x4b3   :  { %v15667_v11 = vadd.f32 %v9431_v37, %v9411_v31  ;;  %v9345_v18 = vadd.f32 %v9337_v44, %v16408_v38  ;;  %v9691_v25 = vmul.f32 0.7357589, %v16409_v42  ;;  %v9997_v55 = vmul.f32 -3.9829655, %v16407_v6 }
 0x4b4   :  { %v15672_v5 = vadd.f32 %v10019_v23, %v10003_v17  ;;  %v9412_v33 = vadd.f32 %v9395_v59, %v16406_v52  ;;  %v9389_v56 = vmul.f32 -14.715178, %v16407_v6  ;;  %v9675_v49 = vadd.f32 %v9667_v1, %v15463_v32  ;;  %v16411_v17 = vld [vmem:[#allocation74_spill] sm:$0xff] }
 0x4b5   :  { %v10021_v37 = vmul.f32 0.40600586, %v16409_v42  ;;  %vm9446_vm9 = vcmp.ge.f32.partialorder %v15627_v10, 10.0  ;;  %v9369_v14 = vadd.f32 %v15461_v9, %v9345_v18  ;;  %v10005_v62 = vadd.f32 %v9997_v55, %v15469_v29  ;;  %v16410_v29 = vld [vmem:[#allocation52_spill] sm:$0xff] }
 0x4b6   :  { %v9155_v24 = vmul.f32 -20.0, %v15618_v54  ;;  %v9157_v34 = vmul.f32 -20.0, %v15644_v57  ;;  %v15686_v53 = vadd.f32 %v9432_v60, %v9412_v33  ;;  %v9434_v52 = vmul.f32 -20.0, %v15558_v47  ;;  %v16423_v33 = vld [vmem:[#allocation39_spill] sm:$0xff] }
 0x4b7   :  { %v15689_v41 = vadd.f32 %v9691_v25, %v9675_v49  ;;  %v9336_v32 = vmul.f32 -8.120117, %v15296_v51  ;;  %v9397_v31 = vadd.f32 %v9389_v56, %v9369_v14  ;;  %v15692_v35 = vadd.f32 %v10021_v37, %v10005_v62  ;;  %v16417_v49 = vld [vmem:[#allocation75_spill] sm:$0xff] }
 0x4b8   :  { %v9163_v58 = vadd.f32 %v9155_v24, %v15534_v2  ;;  %v15696_v9 = vadd.f32 %v9157_v34, %v15579_v40  ;;  %vm9448_vm12 = vcmp.ge.f32.partialorder %v15686_v53, 10.0  ;;  %v9666_v60 = vmul.f32 -8.120117, %v15618_v54 }
 0x4b9   :  { %v9344_v23 = vadd.f32 %v9336_v32, %v16410_v29  ;;  %v9690_v44 = vmul.f32 0.7357589, %v16411_v17  ;;  %v9414_v59 = vadd.f32 %v9397_v31, %v16409_v42  ;;  %v9996_v51 = vmul.f32 -3.9829655, %v15618_v54  ;;  %vm15709_vm1 = vmpackc.low %vm9448_vm12, %vm9444_vm7 }
 0x4ba   :  { %vm9171_vm10 = vcmp.ge.f32.partialorder %v9163_v58, 10.0  ;;  %vm9173_vm15 = vcmp.ge.f32.partialorder %v15696_v9, 10.0  ;;  %vm9445_vm4 = vcmp.ge.f32.partialorder %v15646_v43, 10.0  ;;  %v9388_v1 = vmul.f32 -14.715178, %v15618_v54 }
 0x4bb   :  { %vm12359_vm8 = vmpackc.low %vm9171_vm10, %vm9167_vm2  ;;  %v9368_v6 = vadd.f32 %v15537_v8, %v9344_v23  ;;  %v9674_v38 = vadd.f32 %v9666_v60, %v15504_v4  ;;  %v15720_v18 = vadd.f32 %v9434_v52, %v9414_v59  ;;  %v10004_v42 = vadd.f32 %v9996_v51, %v15513_v30  ;;  %v16420_v23 = vld [vmem:[#allocation63_spill] sm:$0xff] }
 0x4bc   :  { %12360 = vmatprep.mubr.msk.bf16.mxu0 %vm12359_vm8, %v16230_v26  ;;  %vm12387_vm13 = vmpackc.low %vm9173_vm15, %vm9169_vm3  ;;  %v10020_v25 = vmul.f32 0.40600586, %v16411_v17  ;;  %v9338_v55 = vmul.f32 -8.120117, %v15325_v45  ;;  %vm9447_vm2 = vcmp.ge.f32.partialorder %v15667_v11, 10.0  ;;  %v9390_v54 = vmul.f32 -14.715178, %v15644_v57 }
 0x4bd   :  { %12388 = vmatprep.mubr.msk.bf16.mxu1 %vm12387_vm13, %v16230_v26  ;;  %v9396_v4 = vadd.f32 %v9388_v1, %v9368_v6  ;;  %v15732_v8 = vadd.f32 %v9690_v44, %v9674_v38  ;;  %v9668_v12 = vmul.f32 -8.120117, %v15644_v57  ;;  %12362 = vmatmul.mubr.msk.bf16.gmra.mrb[92].mxu0 %vm15484_vm5, %v16230_v26  ;;  %vm9450_vm3 = vcmp.ge.f32.partialorder %v15720_v18, 10.0  ;;  %v16416_v45 = vld [vmem:[#allocation92_spill] sm:$0xff]  ;;  %v16440_v11 = vld [vmem:[#allocation37_spill] sm:$0xff] }
 0x4be   :  { %v15740_v30 = vadd.f32 %v10020_v25, %v10004_v42  ;;  %v9346_v56 = vadd.f32 %v9338_v55, %v16416_v45  ;;  %v9692_v37 = vmul.f32 0.7357589, %v16417_v49  ;;  %12390 = vmatmul.mubr.msk.bf16.gmra.mrb[92].mxu1 %vm15509_vm11, %v16230_v26  ;;  %v9998_v24 = vmul.f32 -3.9829655, %v15644_v57  ;;  %vm15757_vm5 = vmpackc.low %vm9450_vm3, %vm9446_vm9  ;;  %v16422_v42 = vld [vmem:[#allocation18_spill] sm:$0xff] }
 0x4bf   :  { %v15748_v14 = vadd.f32 %v9396_v4, %v16411_v17  ;;  %v9676_v62 = vadd.f32 %v9668_v12, %v15566_v61  ;;  %v10022_v34 = vmul.f32 0.40600586, %v16417_v49  ;;  %v15765_v32 = vsel %vm9444_vm7, 1.0, %v16216_v27  ;;  %v16421_v17 = vld [vmem:[#allocation79_spill] sm:$0xff] }
 0x4c0   :  { %v9370_v19 = vadd.f32 %v15562_v63, %v9346_v56  ;;  %v9713_v61 = vmul.f32 -14.715178, %v15398_v48  ;;  %v10043_v57 = vmul.f32 -8.120117, %v15398_v48  ;;  %v15771_v31 = vsel %vm9171_vm10, 1.0, %v16216_v27 }
 0x4c1   :  { %v15773_v29 = vadd.f32 %v9692_v37, %v9676_v62  ;;  %v10006_v60 = vadd.f32 %v9998_v24, %v16420_v23  ;;  %v10067_v44 = vmul.f32 0.7357589, %v16421_v17  ;;  %v9758_v0 = vmul.f32 -20.0, %v15765_v32 }
 0x4c2   :  { %v9398_v63 = vadd.f32 %v9390_v54, %v9370_v19  ;;  %v9721_v59 = vadd.f32 %v9713_v61, %v15585_v39  ;;  %v10051_v51 = vadd.f32 %v10043_v57, %v15592_v22  ;;  %v15785_v48 = vsel %vm9446_vm9, 1.0, %v16216_v27  ;;  %v16424_v61 = vld [vmem:[#allocation24_spill] sm:$0xff] }
 0x4c3   :  { %v15780_v40 = vadd.f32 %v10022_v34, %v10006_v60  ;;  %v9715_v58 = vmul.f32 -14.715178, %v15415_v16  ;;  %v10045_v6 = vmul.f32 -8.120117, %v15415_v16  ;;  %v10069_v25 = vmul.f32 0.7357589, %v16422_v42 }
 0x4c4   :  { %v9415_v1 = vadd.f32 %v9398_v63, %v16417_v49  ;;  %v9738_v38 = vadd.f32 %v9721_v59, %v16421_v17  ;;  %v15791_v39 = vadd.f32 %v10067_v44, %v10051_v51  ;;  %v15799_v10 = vsel %vm9445_vm4, 1.0, %v16216_v27 }
 0x4c5   :  { %v9723_v22 = vadd.f32 %v9715_v58, %v15601_v13  ;;  %v10053_v55 = vadd.f32 %v10045_v6, %v15608_v28  ;;  %v9714_v4 = vmul.f32 -14.715178, %v15447_v46  ;;  %v15805_v16 = vsel %vm9173_vm15, 1.0, %v16216_v27 }
 0x4c6   :  { %v15807_v54 = vadd.f32 %v9758_v0, %v9738_v38  ;;  %v10044_v12 = vmul.f32 -8.120117, %v15447_v46  ;;  %v10068_v13 = vmul.f32 0.7357589, %v16423_v33  ;;  %v9760_v45 = vmul.f32 -20.0, %v15785_v48 }
 0x4c7   :  { %v9740_v28 = vadd.f32 %v9723_v22, %v16422_v42  ;;  %v15813_v56 = vadd.f32 %v10069_v25, %v10053_v55  ;;  %v9722_v49 = vadd.f32 %v9714_v4, %v15624_v36  ;;  %v9759_v37 = vmul.f32 -20.0, %v15799_v10  ;;  %v16426_v22 = vld [vmem:[#allocation42_spill] sm:$0xff] }
 0x4c8   :  { %v10052_v9 = vadd.f32 %v10044_v12, %v15633_v3  ;;  %v15821_v62 = vsel %vm9447_vm2, 1.0, %v16216_v27  ;;  %v9716_v46 = vmul.f32 -14.715178, %v15520_v21  ;;  %v10046_v19 = vmul.f32 -8.120117, %v15520_v21 }
 0x4c9   :  { %v15824_v24 = vadd.f32 %v9760_v45, %v9740_v28  ;;  %v9739_v34 = vadd.f32 %v9722_v49, %v16423_v33  ;;  %v10070_v57 = vmul.f32 0.7357589, %v16424_v61  ;;  %vm9774_vm11 = vcmp.ge.f32.partialorder %v15807_v54, 10.0 }
 0x4ca   :  { %v15830_v36 = vadd.f32 %v10068_v13, %v10052_v9  ;;  %v9724_v3 = vadd.f32 %v9716_v46, %v15650_v15  ;;  %v9717_v23 = vmul.f32 -14.715178, %v15524_v50  ;;  %v9761_v17 = vmul.f32 -20.0, %v15821_v62  ;;  %v16425_v15 = vld [vmem:[#allocation25_spill] sm:$0xff] }
 0x4cb   :  { %v15834_v60 = vadd.f32 %v9759_v37, %v9739_v34  ;;  %v10054_v44 = vadd.f32 %v10046_v19, %v15654_v20  ;;  %v15841_v21 = vsel %vm9448_vm12, 1.0, %v16216_v27  ;;  %v10047_v0 = vmul.f32 -8.120117, %v15524_v50  ;;  %v16427_v37 = vld [vmem:[#allocation28_spill] sm:$0xff] }
 0x4cc   :  { %v9741_v63 = vadd.f32 %v9724_v3, %v16424_v61  ;;  %v9725_v59 = vadd.f32 %v9717_v23, %v15669_v7  ;;  %v10071_v51 = vmul.f32 0.7357589, %v16425_v15  ;;  %vm9776_vm14 = vcmp.ge.f32.partialorder %v15824_v24, 10.0 }
 0x4cd   :  { %v15848_v58 = vadd.f32 %v10070_v57, %v10054_v44  ;;  %v15853_v20 = vsel %vm9450_vm3, 1.0, %v16216_v27  ;;  %v9719_v53 = vmul.f32 -14.715178, %v15558_v47  ;;  %v9762_v7 = vmul.f32 -20.0, %v15841_v21 }
 0x4ce   :  { %v15856_v6 = vadd.f32 %v9761_v17, %v9741_v63  ;;  %v9742_v38 = vadd.f32 %v9725_v59, %v16425_v15  ;;  %v10055_v50 = vadd.f32 %v10047_v0, %v15672_v5  ;;  %v10049_v25 = vmul.f32 -8.120117, %v15558_v47  ;;  %v16432_v17 = vld [vmem:[#allocation45_spill] sm:$0xff] }
 0x4cf   :  { %v9727_v42 = vadd.f32 %v9719_v53, %v15689_v41  ;;  %v10073_v55 = vmul.f32 0.7357589, %v16426_v22  ;;  %v9433_v18 = vmul.f32 -20.0, %v15771_v31  ;;  %v9764_v33 = vmul.f32 -20.0, %v15853_v20 }
 0x4d0   :  { %v15865_v4 = vadd.f32 %v9762_v7, %v9742_v38  ;;  %v15867_v12 = vadd.f32 %v10071_v51, %v10055_v50  ;;  %v9435_v13 = vmul.f32 -20.0, %v15805_v16  ;;  %v10057_v5 = vadd.f32 %v10049_v25, %v15692_v35  ;;  %v16433_v38 = vld [vmem:[#allocation83_spill] sm:$0xff]  ;;  %v16434_v25 = vld [vmem:[#allocation48_spill] sm:$0xff] }
 0x4d1   :  { %v9744_v28 = vadd.f32 %v9727_v42, %v16426_v22  ;;  %v9441_v41 = vadd.f32 %v9433_v18, %v15748_v14  ;;  %v9718_v47 = vmul.f32 -14.715178, %v15771_v31  ;;  %v10048_v49 = vmul.f32 -8.120117, %v15771_v31  ;;  %v16438_v35 = vld [vmem:[#allocation88_spill] sm:$0xff] }
 0x4d2   :  { %vm9778_vm0 = vcmp.ge.f32.partialorder %v15865_v4, 10.0  ;;  %v9443_v45 = vadd.f32 %v9435_v13, %v9415_v1  ;;  %v10072_v9 = vmul.f32 0.7357589, %v16427_v37  ;;  %v15880_v34 = vadd.f32 %v10073_v55, %v10057_v5  ;;  %v16435_v55 = vld [vmem:[#allocation85_spill] sm:$0xff] }
 0x4d3   :  { %v15878_v46 = vadd.f32 %v9764_v33, %v9744_v28  ;;  %vm9449_vm6 = vcmp.ge.f32.partialorder %v9441_v41, 10.0  ;;  %v9726_v19 = vadd.f32 %v9718_v47, %v15732_v8  ;;  %vm15887_vm7 = vmpackc.low %vm9778_vm0, %vm9774_vm11  ;;  %v10056_v31 = vadd.f32 %v10048_v49, %v15740_v30  ;;  %v16436_v28 = vld [vmem:[#allocation86_spill] sm:$0xff]  ;;  %v16437_v47 = vld [vmem:[#allocation49_spill] sm:$0xff] }
 0x4d4   :  { %v15892_v14 = vsel %vm9449_vm6, 1.0, %v16216_v27  ;;  %vm12363_vm9 = vmpackc.low %vm9449_vm6, %vm9445_vm4  ;;  %vm9451_vm12 = vcmp.ge.f32.partialorder %v9443_v45, 10.0  ;;  %v9720_v1 = vmul.f32 -14.715178, %v15805_v16  ;;  %vm9775_vm4 = vcmp.ge.f32.partialorder %v15834_v60, 10.0 }
 0x4d5   :  { %vm9780_vm10 = vcmp.ge.f32.partialorder %v15878_v46, 10.0  ;;  %12364 = vmatprep.mubr.msk.bf16.mxu0 %vm12363_vm9, %v16230_v26  ;;  %v15901_v8 = vsel %vm9451_vm12, 1.0, %v16216_v27  ;;  %vm12391_vm15 = vmpackc.low %vm9451_vm12, %vm9447_vm2  ;;  %v9743_v61 = vadd.f32 %v9726_v19, %v16427_v37  ;;  %v9763_v43 = vmul.f32 -20.0, %v15892_v14 }
 0x4d6   :  { %12392 = vmatprep.mubr.msk.bf16.mxu1 %vm12391_vm15, %v16230_v26  ;;  %v10080_v30 = vadd.f32 %v10072_v9, %v10056_v31  ;;  %v9728_v57 = vadd.f32 %v9720_v1, %v15773_v29  ;;  %v10050_v3 = vmul.f32 -8.120117, %v15805_v16  ;;  %12366 = vmatmul.mubr.msk.bf16.gmra.mrb[96].mxu0 %vm15709_vm1, %v16230_v26  ;;  %vm15918_vm8 = vmpackc.low %vm9780_vm10, %vm9776_vm14  ;;  %v10074_v44 = vmul.f32 0.7357589, %v16432_v17 }
 0x4d7   :  { %v9771_v23 = vadd.f32 %v9763_v43, %v9743_v61  ;;  %12394 = vmatmul.mubr.msk.bf16.gmra.mrb[96].mxu1 %vm15757_vm5, %v16230_v26  ;;  %v9782_v2 = vsel %vm9774_vm11, 1.0, %v16216_v27  ;;  %v10095_v29 = vmul.f32 -14.715178, %v15765_v32  ;;  %vm9777_vm1 = vcmp.ge.f32.partialorder %v15856_v6, 10.0  ;;  %v12214_v43 = vld [vmem:[#allocation11] sm:$0xff]  }
 0x4d8   :  { %v9745_v16 = vadd.f32 %v9728_v57, %v16432_v17  ;;  %v9765_v63 = vmul.f32 -20.0, %v15901_v8  ;;  %v10058_v59 = vadd.f32 %v10050_v3, %v15780_v40  ;;  %v9784_v52 = vsel %vm9776_vm14, 1.0, %v16216_v27  ;;  %v16439_v3 = vld [vmem:[#allocation53_spill] sm:$0xff] }
 0x4d9   :  { %vm9779_vm13 = vcmp.ge.f32.partialorder %v9771_v23, 10.0  ;;  %v10103_v0 = vadd.f32 %v10095_v29, %v15791_v39  ;;  %v10097_v54 = vmul.f32 -14.715178, %v15785_v48  ;;  %v10140_v32 = vmul.f32 -20.0, %v9782_v2  ;;  %v16441_v17 = vld [vmem:[#allocation93_spill] sm:$0xff] }
 0x4da   :  { %v9773_v15 = vadd.f32 %v9765_v63, %v9745_v16  ;;  %v10082_v51 = vadd.f32 %v10074_v44, %v10058_v59  ;;  %v10096_v53 = vmul.f32 -14.715178, %v15799_v10  ;;  %vm12367_vm2 = vmpackc.low %vm9779_vm13, %vm9775_vm4  ;;  %v9783_v39 = vsel %vm9775_vm4, 1.0, %v16216_v27  ;;  %v16443_v29 = vld [vmem:[#allocation89_spill] sm:$0xff] }
 0x4db   :  { %v10120_v40 = vadd.f32 %v10103_v0, %v16433_v38  ;;  %v10105_v7 = vadd.f32 %v10097_v54, %v15813_v56  ;;  %v9785_v48 = vsel %vm9777_vm1, 1.0, %v16216_v27  ;;  %12368 = vmatprep.mubr.msk.bf16.mxu0 %vm12367_vm2, %v16230_v26  ;;  %v10142_v10 = vmul.f32 -20.0, %v9784_v52  ;;  %v16446_v0 = vld [vmem:[#allocation17_spill] sm:$0xff] }
 0x4dc   :  { %vm9781_vm3 = vcmp.ge.f32.partialorder %v9773_v15, 10.0  ;;  %v10104_v24 = vadd.f32 %v10096_v53, %v15830_v36  ;;  %v10098_v50 = vmul.f32 -14.715178, %v15821_v62  ;;  %v9786_v56 = vsel %vm9778_vm0, 1.0, %v16216_v27  ;;  %v16447_v52 = vld [vmem:[#allocation77_spill] sm:$0xff]  ;;  %v16448_v15 = vld [vmem:[#allocation38_spill] sm:$0xff] }
 0x4dd   :  { %v10148_v42 = vadd.f32 %v10140_v32, %v10120_v40  ;;  %v10122_v22 = vadd.f32 %v10105_v7, %v16434_v25  ;;  %v10099_v60 = vmul.f32 -14.715178, %v15841_v21  ;;  %vm12395_vm5 = vmpackc.low %vm9781_vm3, %vm9777_vm1  ;;  %v10141_v33 = vmul.f32 -20.0, %v9783_v39  ;;  %v16449_v32 = vld [vmem:[#allocation46_spill] sm:$0xff] }
 0x4de   :  { %v10121_v18 = vadd.f32 %v10104_v24, %v16435_v55  ;;  %v10106_v36 = vadd.f32 %v10098_v50, %v15848_v58  ;;  %v10143_v13 = vmul.f32 -20.0, %v9785_v48  ;;  %12396 = vmatprep.mubr.msk.bf16.mxu1 %vm12395_vm5, %v16230_v26  ;;  %12370 = vmatmul.mubr.msk.bf16.gmra.mrb[100].mxu0 %vm15887_vm7, %v16230_v26  ;;  %v9788_v21 = vsel %vm9780_vm10, 1.0, %v16216_v27  ;;  %v16450_v40 = vld [vmem:[#allocation54_spill] sm:$0xff] }
 0x4df   :  { %v10150_v62 = vadd.f32 %v10142_v10, %v10122_v22  ;;  %v10107_v4 = vadd.f32 %v10099_v60, %v15867_v12  ;;  %v10101_v6 = vmul.f32 -14.715178, %v15853_v20  ;;  %12398 = vmatmul.mubr.msk.bf16.gmra.mrb[100].mxu1 %vm15918_vm8, %v16230_v26  ;;  %vm10156_vm11 = vcmp.ge.f32.partialorder %v10148_v42, 10.0 }
 0x4e0   :  { %v10149_v58 = vadd.f32 %v10141_v33, %v10121_v18  ;;  %v10123_v5 = vadd.f32 %v10106_v36, %v16436_v28  ;;  %v10144_v41 = vmul.f32 -20.0, %v9786_v56  ;;  %v9787_v12 = vsel %vm9779_vm13, 1.0, %v16216_v27 }
 0x4e1   :  { %v10124_v45 = vadd.f32 %v10107_v4, %v16437_v47  ;;  %v10109_v49 = vadd.f32 %v10101_v6, %v15880_v34  ;;  %v10100_v37 = vmul.f32 -14.715178, %v15892_v14  ;;  %vm10158_vm14 = vcmp.ge.f32.partialorder %v10150_v62, 10.0  ;;  %v16442_v14 = vld [vmem:[#allocation20_spill] sm:$0xff] }
 0x4e2   :  { %v10151_v20 = vadd.f32 %v10143_v13, %v10123_v5  ;;  %v10146_v9 = vmul.f32 -20.0, %v9788_v21  ;;  %v9789_v46 = vsel %vm9781_vm3, 1.0, %v16216_v27  ;;  %v10102_v61 = vmul.f32 -14.715178, %v15901_v8 }
 0x4e3   :  { %v10152_v19 = vadd.f32 %v10144_v41, %v10124_v45  ;;  %v10126_v31 = vadd.f32 %v10109_v49, %v16438_v35  ;;  %v10108_v1 = vadd.f32 %v10100_v37, %v10080_v30  ;;  %v10145_v57 = vmul.f32 -20.0, %v9787_v12 }
 0x4e4   :  { %v10147_v34 = vmul.f32 -20.0, %v9789_v46  ;;  %v12421_v23 = vadd.f32 %v16440_v11, %v16439_v3  ;;  %v12485_v44 = vadd.f32 %v16442_v14, %v16441_v17  ;;  %v10110_v63 = vadd.f32 %v10102_v61, %v10082_v51 }
 0x4e5   :  { %vm10160_vm0 = vcmp.ge.f32.partialorder %v10152_v19, 10.0  ;;  %v10154_v2 = vadd.f32 %v10146_v9, %v10126_v31  ;;  %v10125_v16 = vadd.f32 %v10108_v1, %v16443_v29  ;;  %v15998_v30 = vunpack.c.l.bf16 %v12214_v43 }
 0x4e6   :  { %vm15992_vm6 = vmpackc.low %vm10160_vm0, %vm10156_vm11  ;;  %v15996_v8 = vadd.f32 %v12485_v44, %v12421_v23  ;;  %v12424_v54 = vadd.f32 %v16447_v52, %v16446_v0  ;;  %v12488_v53 = vadd.f32 %v16449_v32, %v16448_v15  ;;  %v10127_v7 = vadd.f32 %v10110_v63, %v16450_v40 }
 0x4e7   :  { %vm10162_vm7 = vcmp.ge.f32.partialorder %v10154_v2, 10.0  ;;  %v10153_v38 = vadd.f32 %v10145_v57, %v10125_v16  ;;  %v16005_v51 = vunpack.c.h.bf16 %v12214_v43  ;;  %v10689_v48 = vmul.f32 -20.0, %v15998_v30 }
 0x4e8   :  { %vm16008_vm9 = vmpackc.low %vm10162_vm7, %vm10158_vm14  ;;  %v16013_v10 = vadd.f32 %v12488_v53, %v12424_v54  ;;  %vm10157_vm12 = vcmp.ge.f32.partialorder %v10149_v58, 10.0  ;;  %v10155_v24 = vadd.f32 %v10147_v34, %v10127_v7  ;;  %vm10159_vm15 = vcmp.ge.f32.partialorder %v10151_v20, 10.0 }
 0x4e9   :  { %vm10161_vm10 = vcmp.ge.f32.partialorder %v10153_v38, 10.0  ;;  %v10690_v50 = vmul.f32 -20.0, %v16005_v51  ;;  %v10691_v42 = vadd.f32 %v10689_v48, %v15996_v8  ;;  %v10752_v25 = vmul.f32 0.40600586, %v15996_v8 }
 0x4ea   :  { %vm12371_vm4 = vmpackc.low %vm10161_vm10, %vm10157_vm12  ;;  %vm10163_vm8 = vcmp.ge.f32.partialorder %v10155_v24, 10.0  ;;  %v10760_v56 = vmul.f32 -8.120117, %v15998_v30  ;;  %v10753_v60 = vmul.f32 0.40600586, %v16013_v10  ;;  %v10761_v55 = vmul.f32 -8.120117, %v16005_v51 }
 0x4eb   :  { %12372 = vmatprep.mubr.msk.bf16.mxu0 %vm12371_vm4, %v16230_v26  ;;  %v10692_v22 = vadd.f32 %v10690_v50, %v16013_v10  ;;  %vm12399_vm1 = vmpackc.low %vm10163_vm8, %vm10159_vm15  ;;  %vm10693_vm13 = vcmp.ge.f32.partialorder %v10691_v42, 10.0  ;;  %v10808_v4 = vmul.f32 0.19914827, %v15996_v8  ;;  %v10816_v21 = vmul.f32 -3.9829655, %v15998_v30 }
 0x4ec   :  { %12374 = vmatmul.mubr.msk.bf16.gmra.mrb[104].mxu0 %vm15992_vm6, %v16230_v26  ;;  %12400 = vmatprep.mubr.msk.bf16.mxu1 %vm12399_vm1, %v16230_v26  ;;  %v16028_v18 = vsel %vm10693_vm13, 1.0, %v16216_v27  ;;  %v10762_v33 = vadd.f32 %v10760_v56, %v10752_v25  ;;  %v16036_v13 = vadd.f32 %v10761_v55, %v10753_v60  ;;  %v11060_v58 = vmul.f32 0.017351266, %v15996_v8 }
 0x4ed   :  { %vm10694_vm2 = vcmp.ge.f32.partialorder %v10692_v22, 10.0  ;;  %12402 = vmatmul.mubr.msk.bf16.gmra.mrb[104].mxu1 %vm16008_vm9, %v16230_v26  ;;  %v10818_v6 = vadd.f32 %v10816_v21, %v10808_v4  ;;  %v11068_v28 = vmul.f32 -0.3470253, %v15998_v30  ;;  %v10809_v26 = vmul.f32 0.19914827, %v16013_v10 }
 0x4ee   :  { %v16034_v36 = vsel %vm10694_vm2, 1.0, %v16216_v27  ;;  %v10817_v5 = vmul.f32 -3.9829655, %v16005_v51  ;;  %v11061_v45 = vmul.f32 0.017351266, %v16013_v10  ;;  %v10731_v3 = vmul.f32 -20.0, %v16028_v18 }
 0x4ef   :  { %v12218_v62 = vpack.c.bf16 %v16034_v36, %v16028_v18  ;;  %v11070_v41 = vadd.f32 %v11068_v28, %v11060_v58  ;;  %v11069_v49 = vmul.f32 -0.3470253, %v16005_v51  ;;  %v10710_v37 = vmul.f32 0.7357589, %v15996_v8 }
 0x4f0   :  { %v16046_v47 = vadd.f32 %v10817_v5, %v10809_v26  ;;  %v10718_v20 = vmul.f32 -14.715178, %v15998_v30  ;;  %v10711_v61 = vmul.f32 0.7357589, %v16013_v10  ;;  %v10719_v43 = vmul.f32 -14.715178, %v16005_v51 }
 0x4f1   :  { %12219 = vst [vmem:[#allocation11 + $0x8] sm:$0xff] %v12218_v62   ;;  %v11071_v12 = vadd.f32 %v11069_v49, %v11061_v45  ;;  %v10774_v17 = vmul.f32 -14.715178, %v16028_v18  ;;  %v10732_v2 = vmul.f32 -20.0, %v16034_v36  ;;  %v10775_v29 = vmul.f32 -14.715178, %v16034_v36 }
 0x4f2   :  { %v10720_v34 = vadd.f32 %v10718_v20, %v10710_v37  ;;  %v10830_v16 = vmul.f32 -8.120117, %v16028_v18  ;;  %v10878_v0 = vmul.f32 0.09157819, %v15996_v8  ;;  %v10886_v52 = vmul.f32 -1.8315638, %v15998_v30 }
 0x4f3   :  { %v10721_v54 = vadd.f32 %v10719_v43, %v10711_v61  ;;  %v11082_v15 = vmul.f32 -0.80855364, %v16028_v18  ;;  %v10879_v32 = vmul.f32 0.09157819, %v16013_v10  ;;  %v10887_v53 = vmul.f32 -1.8315638, %v16005_v51 }
 0x4f4   :  { %v10831_v7 = vmul.f32 -8.120117, %v16034_v36  ;;  %v11083_v39 = vmul.f32 -0.80855364, %v16034_v36  ;;  %v10888_v42 = vadd.f32 %v10886_v52, %v10878_v0  ;;  %v10900_v4 = vmul.f32 -3.9829655, %v16028_v18 }
 0x4f5   :  { %v10889_v60 = vadd.f32 %v10887_v53, %v10879_v32  ;;  %v10962_v21 = vmul.f32 0.04042768, %v15996_v8  ;;  %v10970_v43 = vmul.f32 -0.80855364, %v15998_v30 }
 0x50a   :  { %v12425_v9 = vpop.f32.mrb[80].mxu0 }
 0x50b   :  { %v12489_v46 = vpop.f32.mrb[80].mxu1  ;;  %v12426_v19 = vpop.f32.mrb[81].mxu0 }
 0x50c   :  { %v12427_v35 = vadd.f32 %v12426_v19, %v12425_v9  ;;  %v12490_v31 = vpop.f32.mrb[81].mxu1  ;;  %v12428_v1 = vpop.f32.mrb[82].mxu0 }
 0x50d   :  { %v12491_v57 = vadd.f32 %v12490_v31, %v12489_v46  ;;  %v12492_v11 = vpop.f32.mrb[82].mxu1  ;;  %v12429_v23 = vpop.f32.mrb[83].mxu0 }
 0x50e   :  { %v12430_v14 = vadd.f32 %v12429_v23, %v12428_v1  ;;  %v12493_v44 = vpop.f32.mrb[83].mxu1 }
 0x50f   :  { %v10609_v63 = vadd.f32 %v12491_v57, %v12427_v35  ;;  %v12494_v59 = vadd.f32 %v12493_v44, %v12492_v11  ;;  %v10971_v11 = vmul.f32 -0.80855364, %v16005_v51 }
 0x511   :  { %v10725_v38 = vadd.f32 %v10720_v34, %v10609_v63  ;;  %v10766_v40 = vmul.f32 0.7357589, %v10609_v63  ;;  %v11074_v48 = vmul.f32 0.04042768, %v10609_v63  ;;  %v10612_v24 = vadd.f32 %v12494_v59, %v12430_v14 }
 0x512   :  { %v10822_v50 = vmul.f32 0.40600586, %v10609_v63  ;;  %v10892_v22 = vmul.f32 0.19914827, %v10609_v63  ;;  %v10976_v57 = vmul.f32 0.09157819, %v10609_v63 }
 0x513   :  { %v10733_v25 = vadd.f32 %v10731_v3, %v10725_v38  ;;  %v10768_v56 = vadd.f32 %v10766_v40, %v10762_v33  ;;  %v10726_v55 = vadd.f32 %v10721_v54, %v10612_v24  ;;  %v10767_v62 = vmul.f32 0.7357589, %v10612_v24 }
 0x514   :  { %v11075_v58 = vmul.f32 0.04042768, %v10612_v24  ;;  %v10824_v26 = vadd.f32 %v10822_v50, %v10818_v6  ;;  %v10893_v45 = vmul.f32 0.19914827, %v10612_v24  ;;  %v11076_v37 = vadd.f32 %v11074_v48, %v11070_v41 }
 0x515   :  { %vm10735_vm3 = vcmp.ge.f32.partialorder %v10733_v25, 10.0  ;;  %v10776_v28 = vadd.f32 %v10774_v17, %v10768_v56  ;;  %v10734_v5 = vadd.f32 %v10732_v2, %v10726_v55  ;;  %v10769_v49 = vadd.f32 %v10767_v62, %v16036_v13 }
 0x516   :  { %v10832_v20 = vadd.f32 %v10830_v16, %v10824_v26  ;;  %v10823_v9 = vmul.f32 0.40600586, %v10612_v24  ;;  %v11077_v46 = vadd.f32 %v11075_v58, %v11071_v12  ;;  %v10894_v33 = vadd.f32 %v10892_v22, %v10888_v42 }
 0x517   :  { %v10737_v19 = vsel %vm10735_vm3, 1.0, %v16216_v27  ;;  %vm10736_vm5 = vcmp.ge.f32.partialorder %v10734_v5, 10.0  ;;  %v10777_v35 = vadd.f32 %v10775_v29, %v10769_v49  ;;  %v16070_v31 = vadd.f32 %v11082_v15, %v11076_v37 }
 0x518   :  { %v16073_v8 = vsel %vm10736_vm5, 1.0, %v16216_v27  ;;  %v10825_v6 = vadd.f32 %v10823_v9, %v16046_v47  ;;  %v16076_v1 = vadd.f32 %v11083_v39, %v11077_v46  ;;  %v10902_v61 = vadd.f32 %v10900_v4, %v10894_v33 }
 0x519   :  { %v12229_v13 = vpack.c.bf16 %v16073_v8, %v10737_v19  ;;  %v10895_v41 = vadd.f32 %v10893_v45, %v10889_v60  ;;  %v10901_v12 = vmul.f32 -3.9829655, %v16034_v36  ;;  %v10963_v3 = vmul.f32 0.04042768, %v16013_v10 }
 0x51a   :  { %v10833_v34 = vadd.f32 %v10831_v7, %v10825_v6  ;;  %v10977_v23 = vmul.f32 0.09157819, %v10612_v24  ;;  %v10972_v47 = vadd.f32 %v10970_v43, %v10962_v21  ;;  %v10984_v2 = vmul.f32 -1.8315638, %v16028_v18 }
 0x51b   :  { %12230 = vst [vmem:[#allocation11 + $0x10] sm:$0xff] %v12229_v13   ;;  %v10903_v17 = vadd.f32 %v10901_v12, %v10895_v41  ;;  %v10973_v14 = vadd.f32 %v10971_v11, %v10963_v3  ;;  %v10985_v16 = vmul.f32 -1.8315638, %v16034_v36  ;;  %v10787_v40 = vmul.f32 -20.0, %v10737_v19 }
 0x51c   :  { %v10978_v44 = vadd.f32 %v10976_v57, %v10972_v47  ;;  %v10788_v39 = vmul.f32 -20.0, %v16073_v8  ;;  %v10844_v24 = vmul.f32 -14.715178, %v10737_v19  ;;  %v11096_v36 = vmul.f32 -1.8315638, %v10737_v19 }
 0x51d   :  { %v10979_v29 = vadd.f32 %v10977_v23, %v10973_v14  ;;  %v10845_v50 = vmul.f32 -14.715178, %v16073_v8  ;;  %v11097_v42 = vmul.f32 -1.8315638, %v16073_v8  ;;  %v10914_v25 = vmul.f32 -8.120117, %v10737_v19 }
 0x51e   :  { %v10986_v59 = vadd.f32 %v10984_v2, %v10978_v44  ;;  %v10915_v21 = vmul.f32 -8.120117, %v16073_v8  ;;  %v10998_v58 = vmul.f32 -3.9829655, %v10737_v19  ;;  %v10999_v23 = vmul.f32 -3.9829655, %v16073_v8 }
 0x51f   :  { %v10987_v0 = vadd.f32 %v10985_v16, %v10979_v29 }
 0x53f   :  { %v12431_v30 = vpop.f32.mrb[84].mxu0 }
 0x540   :  { %v12432_v63 = vpop.f32.mrb[85].mxu0 }
 0x541   :  { %v12495_v52 = vpop.f32.mrb[84].mxu1  ;;  %v12433_v54 = vadd.f32 %v12432_v63, %v12431_v30  ;;  %v12434_v10 = vpop.f32.mrb[86].mxu0 }
 0x542   :  { %v12496_v15 = vpop.f32.mrb[85].mxu1  ;;  %v12435_v51 = vpop.f32.mrb[87].mxu0 }
 0x543   :  { %v12497_v32 = vadd.f32 %v12496_v15, %v12495_v52  ;;  %v12498_v53 = vpop.f32.mrb[86].mxu1  ;;  %v12436_v38 = vadd.f32 %v12435_v51, %v12434_v10 }
 0x544   :  { %v12499_v7 = vpop.f32.mrb[87].mxu1 }
 0x545   :  { %v10617_v18 = vadd.f32 %v12497_v32, %v12433_v54  ;;  %v12500_v48 = vadd.f32 %v12499_v7, %v12498_v53 }
 0x547   :  { %v10781_v22 = vadd.f32 %v10776_v28, %v10617_v18  ;;  %v10836_v56 = vmul.f32 0.7357589, %v10617_v18  ;;  %v10906_v60 = vmul.f32 0.40600586, %v10617_v18  ;;  %v10990_v55 = vmul.f32 0.19914827, %v10617_v18 }
 0x548   :  { %v11088_v62 = vmul.f32 0.09157819, %v10617_v18  ;;  %v10620_v4 = vadd.f32 %v12500_v48, %v12436_v38 }
 0x549   :  { %v10789_v26 = vadd.f32 %v10787_v40, %v10781_v22  ;;  %v10838_v5 = vadd.f32 %v10836_v56, %v10832_v20  ;;  %v10908_v45 = vadd.f32 %v10906_v60, %v10902_v61  ;;  %v10992_v49 = vadd.f32 %v10990_v55, %v10986_v59 }
 0x54a   :  { %v10782_v37 = vadd.f32 %v10777_v35, %v10620_v4  ;;  %v10837_v9 = vmul.f32 0.7357589, %v10620_v4  ;;  %v10907_v46 = vmul.f32 0.40600586, %v10620_v4  ;;  %v10991_v33 = vmul.f32 0.19914827, %v10620_v4 }
 0x54b   :  { %vm10791_vm11 = vcmp.ge.f32.partialorder %v10789_v26, 10.0  ;;  %v11089_v6 = vmul.f32 0.09157819, %v10620_v4  ;;  %v10846_v13 = vadd.f32 %v10844_v24, %v10838_v5  ;;  %v11090_v28 = vadd.f32 %v11088_v62, %v16070_v31 }
 0x54c   :  { %v10793_v41 = vsel %vm10791_vm11, 1.0, %v16216_v27  ;;  %v10790_v12 = vadd.f32 %v10788_v39, %v10782_v37  ;;  %v10839_v43 = vadd.f32 %v10837_v9, %v10833_v34  ;;  %v10916_v57 = vadd.f32 %v10914_v25, %v10908_v45 }
 0x54d   :  { %v11098_v3 = vadd.f32 %v11096_v36, %v11090_v28  ;;  %v11091_v19 = vadd.f32 %v11089_v6, %v16076_v1  ;;  %v10909_v20 = vadd.f32 %v10907_v46, %v10903_v17  ;;  %v11000_v61 = vadd.f32 %v10998_v58, %v10992_v49 }
 0x54e   :  { %vm10792_vm14 = vcmp.ge.f32.partialorder %v10790_v12, 10.0  ;;  %v10847_v35 = vadd.f32 %v10845_v50, %v10839_v43  ;;  %v10993_v11 = vadd.f32 %v10991_v33, %v10987_v0  ;;  %v10857_v8 = vmul.f32 -20.0, %v10793_v41 }
 0x54f   :  { %v10794_v47 = vsel %vm10792_vm14, 1.0, %v16216_v27  ;;  %v11099_v14 = vadd.f32 %v11097_v42, %v11091_v19  ;;  %v10917_v44 = vadd.f32 %v10915_v21, %v10909_v20  ;;  %v10928_v32 = vmul.f32 -14.715178, %v10793_v41 }
 0x550   :  { %v12244_v31 = vpack.c.bf16 %v10794_v47, %v10793_v41  ;;  %v11001_v2 = vadd.f32 %v10999_v23, %v10993_v11  ;;  %v10858_v51 = vmul.f32 -20.0, %v10794_v47  ;;  %v11110_v53 = vmul.f32 -3.9829655, %v10793_v41 }
 0x551   :  { %v11012_v38 = vmul.f32 -8.120117, %v10793_v41  ;;  %v10929_v24 = vmul.f32 -14.715178, %v10794_v47  ;;  %v11111_v36 = vmul.f32 -3.9829655, %v10794_v47 }
 0x552   :  { %12245 = vst [vmem:[#allocation11 + $0x18] sm:$0xff] %v12244_v31   ;;  %v11013_v50 = vmul.f32 -8.120117, %v10794_v47 }
 0x56f   :  { %v12437_v29 = vpop.f32.mrb[88].mxu0 }
 0x570   :  { %v12438_v34 = vpop.f32.mrb[89].mxu0 }
 0x571   :  { %v12439_v59 = vadd.f32 %v12438_v34, %v12437_v29  ;;  %v12440_v30 = vpop.f32.mrb[90].mxu0 }
 0x572   :  { %v12501_v16 = vpop.f32.mrb[88].mxu1  ;;  %v12441_v17 = vpop.f32.mrb[91].mxu0 }
 0x573   :  { %v12502_v1 = vpop.f32.mrb[89].mxu1  ;;  %v12442_v54 = vadd.f32 %v12441_v17, %v12440_v30 }
 0x574   :  { %v12503_v63 = vadd.f32 %v12502_v1, %v12501_v16  ;;  %v12504_v52 = vpop.f32.mrb[90].mxu1 }
 0x575   :  { %v12505_v0 = vpop.f32.mrb[91].mxu1 }
 0x576   :  { %v10625_v10 = vadd.f32 %v12503_v63, %v12439_v59  ;;  %v12506_v15 = vadd.f32 %v12505_v0, %v12504_v52 }
 0x578   :  { %v10851_v40 = vadd.f32 %v10846_v13, %v10625_v10  ;;  %v10920_v7 = vmul.f32 0.7357589, %v10625_v10  ;;  %v11004_v39 = vmul.f32 0.40600586, %v10625_v10  ;;  %v11102_v18 = vmul.f32 0.19914827, %v10625_v10 }
 0x579   :  { %v10628_v48 = vadd.f32 %v12506_v15, %v12442_v54 }
 0x57a   :  { %v10859_v42 = vadd.f32 %v10857_v8, %v10851_v40  ;;  %v11104_v25 = vadd.f32 %v11102_v18, %v11098_v3  ;;  %v10922_v22 = vadd.f32 %v10920_v7, %v10916_v57  ;;  %v11006_v56 = vadd.f32 %v11004_v39, %v11000_v61 }
 0x57b   :  { %v10852_v60 = vadd.f32 %v10847_v35, %v10628_v48  ;;  %v10921_v55 = vmul.f32 0.7357589, %v10628_v48  ;;  %v11005_v62 = vmul.f32 0.40600586, %v10628_v48  ;;  %v11103_v4 = vmul.f32 0.19914827, %v10628_v48 }
 0x57c   :  { %vm10861_vm0 = vcmp.ge.f32.partialorder %v10859_v42, 10.0  ;;  %v10930_v21 = vadd.f32 %v10928_v32, %v10922_v22  ;;  %v11112_v58 = vadd.f32 %v11110_v53, %v11104_v25  ;;  %v11014_v26 = vadd.f32 %v11012_v38, %v11006_v56 }
 0x57d   :  { %v10860_v5 = vadd.f32 %v10858_v51, %v10852_v60  ;;  %v11105_v45 = vadd.f32 %v11103_v4, %v11099_v14  ;;  %v10923_v49 = vadd.f32 %v10921_v55, %v10917_v44  ;;  %v10863_v37 = vsel %vm10861_vm0, 1.0, %v16216_v27 }
 0x57e   :  { %v11007_v9 = vadd.f32 %v11005_v62, %v11001_v2  ;;  %v10941_v14 = vmul.f32 -20.0, %v10863_v37  ;;  %v11124_v2 = vmul.f32 -8.120117, %v10863_v37  ;;  %v11026_v30 = vmul.f32 -14.715178, %v10863_v37 }
 0x57f   :  { %vm10862_vm6 = vcmp.ge.f32.partialorder %v10860_v5, 10.0  ;;  %v10931_v46 = vadd.f32 %v10929_v24, %v10923_v49  ;;  %v11113_v33 = vadd.f32 %v11111_v36, %v11105_v45 }
 0x580   :  { %v10864_v6 = vsel %vm10862_vm6, 1.0, %v16216_v27  ;;  %v11015_v13 = vadd.f32 %v11013_v50, %v11007_v9 }
 0x581   :  { %v12263_v28 = vpack.c.bf16 %v10864_v6, %v10863_v37  ;;  %v10942_v31 = vmul.f32 -20.0, %v10864_v6  ;;  %v11027_v1 = vmul.f32 -14.715178, %v10864_v6  ;;  %v11125_v8 = vmul.f32 -8.120117, %v10864_v6 }
 0x583   :  { %12264 = vst [vmem:[#allocation11 + $0x20] sm:$0xff] %v12263_v28  }
 0x590   :  { %v12443_v41 = vpop.f32.mrb[92].mxu0 }
 0x591   :  { %v12507_v12 = vpop.f32.mrb[92].mxu1  ;;  %v12444_v43 = vpop.f32.mrb[93].mxu0 }
 0x592   :  { %v12445_v57 = vadd.f32 %v12444_v43, %v12443_v41  ;;  %v12508_v3 = vpop.f32.mrb[93].mxu1  ;;  %v12446_v19 = vpop.f32.mrb[94].mxu0 }
 0x593   :  { %v12509_v20 = vadd.f32 %v12508_v3, %v12507_v12  ;;  %v12510_v61 = vpop.f32.mrb[94].mxu1  ;;  %v12447_v35 = vpop.f32.mrb[95].mxu0 }
 0x594   :  { %v12448_v11 = vadd.f32 %v12447_v35, %v12446_v19  ;;  %v12511_v23 = vpop.f32.mrb[95].mxu1 }
 0x595   :  { %v10633_v47 = vadd.f32 %v12509_v20, %v12445_v57  ;;  %v12512_v44 = vadd.f32 %v12511_v23, %v12510_v61 }
 0x597   :  { %v10935_v29 = vadd.f32 %v10930_v21, %v10633_v47  ;;  %v11018_v34 = vmul.f32 0.7357589, %v10633_v47  ;;  %v11116_v16 = vmul.f32 0.40600586, %v10633_v47  ;;  %v10636_v59 = vadd.f32 %v12512_v44, %v12448_v11 }
 0x599   :  { %v10943_v17 = vadd.f32 %v10941_v14, %v10935_v29  ;;  %v11118_v63 = vadd.f32 %v11116_v16, %v11112_v58  ;;  %v10936_v52 = vadd.f32 %v10931_v46, %v10636_v59  ;;  %v11019_v54 = vmul.f32 0.7357589, %v10636_v59 }
 0x59a   :  { %v11117_v0 = vmul.f32 0.40600586, %v10636_v59  ;;  %v11020_v10 = vadd.f32 %v11018_v34, %v11014_v26 }
 0x59b   :  { %vm10945_vm7 = vcmp.ge.f32.partialorder %v10943_v17, 10.0  ;;  %v10944_v15 = vadd.f32 %v10942_v31, %v10936_v52  ;;  %v11126_v51 = vadd.f32 %v11124_v2, %v11118_v63  ;;  %v11021_v32 = vadd.f32 %v11019_v54, %v11015_v13 }
 0x59c   :  { %v10947_v53 = vsel %vm10945_vm7, 1.0, %v16216_v27  ;;  %v11119_v38 = vadd.f32 %v11117_v0, %v11113_v33  ;;  %v11028_v40 = vadd.f32 %v11026_v30, %v11020_v10 }
 0x59d   :  { %vm10946_vm9 = vcmp.ge.f32.partialorder %v10944_v15, 10.0  ;;  %v11029_v7 = vadd.f32 %v11027_v1, %v11021_v32  ;;  %v11039_v58 = vmul.f32 -20.0, %v10947_v53  ;;  %v11138_v46 = vmul.f32 -14.715178, %v10947_v53 }
 0x59e   :  { %v10948_v39 = vsel %vm10946_vm9, 1.0, %v16216_v27  ;;  %v11127_v18 = vadd.f32 %v11125_v8, %v11119_v38 }
 0x59f   :  { %v12286_v48 = vpack.c.bf16 %v10948_v39, %v10947_v53  ;;  %v11040_v37 = vmul.f32 -20.0, %v10948_v39  ;;  %v11139_v33 = vmul.f32 -14.715178, %v10948_v39 }
 0x5a1   :  { %12287 = vst [vmem:[#allocation11 + $0x28] sm:$0xff] %v12286_v48  }
 0x5a9   :  { %v12449_v24 = vpop.f32.mrb[96].mxu0 }
 0x5aa   :  { %v12513_v36 = vpop.f32.mrb[96].mxu1  ;;  %v12450_v50 = vpop.f32.mrb[97].mxu0 }
 0x5ab   :  { %v12451_v42 = vadd.f32 %v12450_v50, %v12449_v24  ;;  %v12514_v25 = vpop.f32.mrb[97].mxu1  ;;  %v12452_v22 = vpop.f32.mrb[98].mxu0 }
 0x5ac   :  { %v12515_v56 = vadd.f32 %v12514_v25, %v12513_v36  ;;  %v12516_v60 = vpop.f32.mrb[98].mxu1  ;;  %v12453_v55 = vpop.f32.mrb[99].mxu0 }
 0x5ad   :  { %v12454_v62 = vadd.f32 %v12453_v55, %v12452_v22  ;;  %v12517_v4 = vpop.f32.mrb[99].mxu1 }
 0x5ae   :  { %v10641_v21 = vadd.f32 %v12515_v56, %v12451_v42  ;;  %v12518_v26 = vadd.f32 %v12517_v4, %v12516_v60 }
 0x5b0   :  { %v11033_v5 = vadd.f32 %v11028_v40, %v10641_v21  ;;  %v11130_v45 = vmul.f32 0.7357589, %v10641_v21  ;;  %v10644_v49 = vadd.f32 %v12518_v26, %v12454_v62 }
 0x5b1   :  { %v12455_v9 = vpop.f32.mrb[100].mxu0 }
 0x5b2   :  { %v11041_v6 = vadd.f32 %v11039_v58, %v11033_v5  ;;  %v11132_v13 = vadd.f32 %v11130_v45, %v11126_v51  ;;  %v11034_v28 = vadd.f32 %v11029_v7, %v10644_v49  ;;  %v11131_v41 = vmul.f32 0.7357589, %v10644_v49  ;;  %v12519_v12 = vpop.f32.mrb[100].mxu1  ;;  %v12456_v43 = vpop.f32.mrb[101].mxu0 }
 0x5b3   :  { %v12457_v57 = vadd.f32 %v12456_v43, %v12455_v9  ;;  %v12520_v3 = vpop.f32.mrb[101].mxu1  ;;  %v12458_v19 = vpop.f32.mrb[102].mxu0 }
 0x5b4   :  { %vm11043_vm12 = vcmp.ge.f32.partialorder %v11041_v6, 10.0  ;;  %v11042_v20 = vadd.f32 %v11040_v37, %v11034_v28  ;;  %v11133_v61 = vadd.f32 %v11131_v41, %v11127_v18  ;;  %v12521_v35 = vadd.f32 %v12520_v3, %v12519_v12  ;;  %v12522_v11 = vpop.f32.mrb[102].mxu1  ;;  %v12459_v23 = vpop.f32.mrb[103].mxu0 }
 0x5b5   :  { %v11045_v47 = vsel %vm11043_vm12, 1.0, %v16216_v27  ;;  %v11140_v14 = vadd.f32 %v11138_v46, %v11132_v13  ;;  %v12460_v44 = vadd.f32 %v12459_v23, %v12458_v19  ;;  %v12523_v31 = vpop.f32.mrb[103].mxu1 }
 0x5b6   :  { %vm11044_vm10 = vcmp.ge.f32.partialorder %v11042_v20, 10.0  ;;  %v10649_v2 = vadd.f32 %v12521_v35, %v12457_v57  ;;  %v12524_v29 = vadd.f32 %v12523_v31, %v12522_v11  ;;  %v11141_v34 = vadd.f32 %v11139_v33, %v11133_v61 }
 0x5b7   :  { %v11046_v16 = vsel %vm11044_vm10, 1.0, %v16216_v27  ;;  %v11151_v63 = vmul.f32 -20.0, %v11045_v47 }
 0x5b8   :  { %v12313_v59 = vpack.c.bf16 %v11046_v16, %v11045_v47  ;;  %v11145_v30 = vadd.f32 %v11140_v14, %v10649_v2  ;;  %v10652_v1 = vadd.f32 %v12524_v29, %v12460_v44  ;;  %v11152_v52 = vmul.f32 -20.0, %v11046_v16 }
 0x5ba   :  { %12314 = vst [vmem:[#allocation11 + $0x30] sm:$0xff] %v12313_v59   ;;  %v11146_v17 = vadd.f32 %v11141_v34, %v10652_v1  ;;  %v11153_v54 = vadd.f32 %v11151_v63, %v11145_v30 }
 0x5bc   :  { %v11154_v0 = vadd.f32 %v11152_v52, %v11146_v17  ;;  %vm11155_vm15 = vcmp.ge.f32.partialorder %v11153_v54, 10.0 }
 0x5bd   :  { %v11157_v15 = vsel %vm11155_vm15, 1.0, %v16216_v27 }
 0x5be   :  { %vm11156_vm4 = vcmp.ge.f32.partialorder %v11154_v0, 10.0 }
 0x5bf   :  { %v12461_v10 = vpop.f32.mrb[104].mxu0  ;;  %v11158_v51 = vsel %vm11156_vm4, 1.0, %v16216_v27 }
 0x5c0   :  { %v12462_v8 = vpop.f32.mrb[105].mxu0  ;;  %v12525_v32 = vpop.f32.mrb[104].mxu1  ;;  %v12344_v38 = vpack.c.bf16 %v11158_v51, %v11157_v15 }
 0x5c1   :  { %v12464_v53 = vpop.f32.mrb[106].mxu0  ;;  %v12526_v40 = vpop.f32.mrb[105].mxu1 }
 0x5c2   :  { %v12465_v7 = vpop.f32.mrb[107].mxu0  ;;  %v12528_v39 = vpop.f32.mrb[106].mxu1  ;;  %12345 = vst [vmem:[#allocation11 + $0x38] sm:$0xff] %v12344_v38  }
 0x5c3   :  { %v12529_v18 = vpop.f32.mrb[107].mxu1 }
 0x5c4   :  { %14421 = shalt.err (!%p14418_p0)
}
 0x5c5   :  { %s14422_s29 = scalar_lea.hbm %s16120_s3, 1024 }
 0x5c6   :  { %p14423_p1 = scmp.ne.s32.totalorder %s16120_s3, %s14422_s29  ;;  %p14426_p2 = scmp.lt.u32.totalorder %s14422_s29, %s16120_s3 }
 0x5c8   :  { %p14428_p3 = pnand %p14426_p2, %p14423_p1 }
 0x5ca   :  { %14431 = shalt.err (!%p14428_p3)
}
 0x5cb   :  { %11181 = dma.vmem_to_hbm [thread:$0]  %s11176_s25, 1024, %s16120_s3, [#allocation7], %s14445_s0, %s14445_s0, %s14446_s22  }
 0x5cc   :  { %14436 = dma.done.wait [#allocation7], 1024  }
 0x5cd   :  { %14437 = vsyncadd [#allocation7], 4294966272 }
 0x5ce   :  { %11185 = vsyncpa [#allocation6], 1 }
 0x5cf   :  { %11186 = vsyncpa [#allocation9], 1 }
 0x5d0   :  { %11187 = vsyncpa [#allocation7], 1 }

</bundles_post_ra>
